<compile_context>
chip_gen: v5e
topology: v5e:2x2
jax: 0.10.0
libtpu: 0.0.40
codegen_flags: <defaults>
</compile_context>

<pallas_src>
import functools

import numpy as np

import jax
import jax.numpy as jnp
from jax.experimental import pallas as pl
from jax.experimental.pallas import tpu as pltpu


def _round_up(x, m):
    return (x + m - 1) // m * m


# ---------------------------------------------------------------------------
# Kernel 1: fused  out = act(X @ W + b), tiled over rows (M), bf16 operands.
# ---------------------------------------------------------------------------
def _matmul_bias_act_kernel(x_ref, w_ref, b_ref, o_ref, *, activation, n_valid):
    acc = jnp.dot(x_ref[...], w_ref[...], preferred_element_type=jnp.float32)
    acc = acc + b_ref[...]                       # (1, N) f32, broadcast over rows
    if activation == "relu":
        acc = jnp.maximum(acc, 0.0)
    elif activation == "log_softmax":
        # Mask zero-padded logit columns so they do not corrupt the normalizer.
        col = jax.lax.broadcasted_iota(jnp.int32, acc.shape, 1)
        acc = jnp.where(col < n_valid, acc, -jnp.inf)
        m = jnp.max(acc, axis=-1, keepdims=True)
        s = acc - m
        lse = jnp.log(jnp.sum(jnp.exp(s), axis=-1, keepdims=True))
        acc = s - lse
    o_ref[...] = acc.astype(o_ref.dtype)


def matmul_bias_act(x, w, b, activation="none", n_valid=None,
                    out_dtype=jnp.float32, tm=256):
    """x:(M,K)  w:(K,N) bf16 packed  b:(1,N) f32.  N, K multiples of 128."""
    M, K = x.shape
    K2, N = w.shape
    assert K == K2 and N % 128 == 0 and K % 128 == 0
    if n_valid is None:
        n_valid = N

    TM = min(tm, _round_up(M, 8))
    Mp = _round_up(M, TM)
    x = x.astype(jnp.bfloat16)
    if Mp != M:
        x = jnp.pad(x, ((0, Mp - M), (0, 0)))

    kernel = functools.partial(_matmul_bias_act_kernel,
                               activation=activation, n_valid=n_valid)
    out = pl.pallas_call(
        kernel,
        out_shape=jax.ShapeDtypeStruct((Mp, N), out_dtype),
        grid=(Mp // TM,),
        in_specs=[
            pl.BlockSpec((TM, K), lambda i: (i, 0)),   # row tile of X
            pl.BlockSpec((K, N), lambda i: (0, 0)),    # full (resident) weights
            pl.BlockSpec((1, N), lambda i: (0, 0)),    # bias
        ],
        out_specs=pl.BlockSpec((TM, N), lambda i: (i, 0)),
        compiler_params=pltpu.CompilerParams(
            dimension_semantics=("parallel",),
            vmem_limit_bytes=32 * 1024 * 1024,
        ),
    )(x, w, b)
    return out[:M] if Mp != M else out


# ---------------------------------------------------------------------------
# Kernel 2: "halve-max" — max of the left/right lane halves of each row.
# Two applications on contiguous reshapes implement a 2x2/stride-2 max pool
# in NHWC with channels kept on the lane axis (no strided gathers).
# ---------------------------------------------------------------------------
def _halve_max_kernel(x_ref, o_ref):
    n = o_ref.shape[-1]
    o_ref[...] = jnp.maximum(x_ref[:, :n], x_ref[:, n:])


def _halve_max(x, tm=256):
    M, two_n = x.shape
    n = two_n // 2
    assert n % 128 == 0
    TM = min(tm, _round_up(M, 8))
    Mp = _round_up(M, TM)
    if Mp != M:
        x = jnp.pad(x, ((0, Mp - M), (0, 0)))
    out = pl.pallas_call(
        _halve_max_kernel,
        out_shape=jax.ShapeDtypeStruct((Mp, n), x.dtype),
        grid=(Mp // TM,),
        in_specs=[pl.BlockSpec((TM, two_n), lambda i: (i, 0))],
        out_specs=pl.BlockSpec((TM, n), lambda i: (i, 0)),
        compiler_params=pltpu.CompilerParams(
            dimension_semantics=("parallel",)),
    )(x)
    return out[:M] if Mp != M else out


def max_pool_2x2_nhwc(x):
    """x: (B, H, W, C) channels-last, C multiple of 128."""
    B, H, W, C = x.shape
    # vertical: rows (b, 2i) vs (b, 2i+1), content (w, c) stays lane-dense
    y = _halve_max(x.reshape(B * (H // 2), 2 * W * C))        # (B*H/2, W*C)
    # horizontal: adjacent w pairs, content c stays lane-dense
    z = _halve_max(y.reshape(B * (H // 2) * (W // 2), 2 * C))  # (.., C)
    return z.reshape(B, H // 2, W // 2, C)


# ---------------------------------------------------------------------------
# Conv2d (stride 1, no padding) = single-gather im2col (glue) + fused matmul.
# ---------------------------------------------------------------------------
def _im2col_gather_indices(H, W, KH, KW):
    OH, OW = H - KH + 1, W - KW + 1
    oh = np.arange(OH).reshape(OH, 1, 1, 1)
    ow = np.arange(OW).reshape(1, OW, 1, 1)
    kh = np.arange(KH).reshape(1, 1, KH, 1)
    kw = np.arange(KW).reshape(1, 1, 1, KW)
    idx = (oh + kh) * W + (ow + kw)              # (OH, OW, KH, KW)
    return idx.reshape(-1).astype(np.int32)


def conv2d_relu_nhwc(x_nhwc, w_packed, b_packed, KH=5, KW=5):
    """x_nhwc: (B,H,W,C).  w_packed: (Kpad, OCpad) bf16 rows ordered (kh,kw,c)."""
    B, H, W, C = x_nhwc.shape
    OH, OW = H - KH + 1, W - KW + 1
    Kpad, OCp = w_packed.shape
    idx = _im2col_gather_indices(H, W, KH, KW)
    xs = x_nhwc.reshape(B, H * W, C)
    cols = jnp.take(xs, idx, axis=1)                       # (B, OH*OW*KH*KW, C)
    cols = cols.reshape(B * OH * OW, KH * KW * C)          # cols ordered (kh,kw,c)
    if cols.shape[1] != Kpad:                              # conv1: K 25 -> 128
        cols = jnp.pad(cols, ((0, 0), (0, Kpad - cols.shape[1])))
    y = matmul_bias_act(cols, w_packed, b_packed,
                        activation="relu", out_dtype=jnp.bfloat16)
    return y.reshape(B, OH, OW, OCp)                       # stays NHWC (C padded)


# ---------------------------------------------------------------------------
# Parameters: PyTorch shapes -> packed/padded bf16 matmul operands (one time).
# ---------------------------------------------------------------------------
def init_params(key):
    ks = jax.random.split(key, 8)

    def u(k, shape, fan_in):
        bound = 1.0 / jnp.sqrt(jnp.float32(fan_in))
        return jax.random.uniform(k, shape, jnp.float32, -bound, bound)

    return {
        "conv1_w": u(ks[0], (20, 1, 5, 5), 1 * 5 * 5),
        "conv1_b": u(ks[1], (20,), 1 * 5 * 5),
        "conv2_w": u(ks[2], (50, 20, 5, 5), 20 * 5 * 5),
        "conv2_b": u(ks[3], (50,), 20 * 5 * 5),
        "fc1_w": u(ks[4], (500, 800), 800),
        "fc1_b": u(ks[5], (500,), 800),
        "fc2_w": u(ks[6], (10, 500), 500),
        "fc2_b": u(ks[7], (10,), 500),
    }


def prepare_params(p):
    def pad_to(a, shape):
        return jnp.pad(a, [(0, t - s) for s, t in zip(a.shape, shape)])

    # conv1: (OC,IC,KH,KW) -> (KH,KW,IC,OC) -> (25,20) -> pad (128,128)
    w1 = p["conv1_w"].transpose(2, 3, 1, 0).reshape(25, 20)
    w1 = pad_to(w1, (128, 128)).astype(jnp.bfloat16)
    b1 = pad_to(p["conv1_b"].reshape(1, 20), (1, 128)).astype(jnp.float32)

    # conv2: pad IC 20->128, OC 50->128, rows ordered (kh,kw,ic) -> (3200,128)
    w2 = pad_to(p["conv2_w"].transpose(2, 3, 1, 0), (5, 5, 128, 128))
    w2 = w2.reshape(5 * 5 * 128, 128).astype(jnp.bfloat16)
    b2 = pad_to(p["conv2_b"].reshape(1, 50), (1, 128)).astype(jnp.float32)

    # fc1: fold PyTorch's (c,h,w) flatten into the weight so the NHWC (h,w,c)
    # flatten of the padded activation matches; pad K 800->2048, N 500->512.
    wf1 = p["fc1_w"].reshape(500, 50, 4, 4).transpose(2, 3, 1, 0)   # (4,4,50,500)
    wf1 = pad_to(wf1, (4, 4, 128, 512)).reshape(4 * 4 * 128, 512).astype(jnp.bfloat16)
    bf1 = pad_to(p["fc1_b"].reshape(1, 500), (1, 512)).astype(jnp.float32)

    # fc2: pad K 500->512, N 10->128
    wf2 = pad_to(p["fc2_w"].T, (512, 128)).astype(jnp.bfloat16)
    bf2 = pad_to(p["fc2_b"].reshape(1, 10), (1, 128)).astype(jnp.float32)

    return {"w1": w1, "b1": b1, "w2": w2, "b2": b2,
            "wf1": wf1, "bf1": bf1, "wf2": wf2, "bf2": bf2}


# ---------------------------------------------------------------------------
# Forward pass (matches PyTorch MnistNet semantics; NHWC internally)
# ---------------------------------------------------------------------------
def mnist_net_forward(packed, x_nchw):
    B = x_nchw.shape[0]
    x = jnp.transpose(x_nchw, (0, 2, 3, 1))                       # (B,28,28,1)
    x = conv2d_relu_nhwc(x, packed["w1"], packed["b1"])           # (B,24,24,128) bf16
    x = max_pool_2x2_nhwc(x)                                      # (B,12,12,128)
    x = conv2d_relu_nhwc(x, packed["w2"], packed["b2"])           # (B,8,8,128)
    x = max_pool_2x2_nhwc(x)                                      # (B,4,4,128)
    x = x.reshape(B, 4 * 4 * 128)                                 # (h,w,c) flatten
    x = matmul_bias_act(x, packed["wf1"], packed["bf1"],
                        activation="relu", out_dtype=jnp.bfloat16)      # (B,512)
    x = matmul_bias_act(x, packed["wf2"], packed["bf2"],
                        activation="log_softmax", n_valid=10,
                        out_dtype=jnp.float32)                           # (B,128)
    return x[:, :10]


if __name__ == "__main__":
    key = jax.random.PRNGKey(0)
    pkey, xkey = jax.random.split(key)
    params = init_params(pkey)
    packed = prepare_params(params)
    # MNIST-shaped input (28x28 required by the 4*4*50 flatten); batch = 2.
    x = jax.random.normal(xkey, (2, 1, 28, 28), jnp.float32)
    out = jax.jit(mnist_net_forward)(packed, x)
    out = jax.block_until_ready(out)
    assert out.shape == (2, 10), out.shape
    # log_softmax sanity: rows must exponentiate-sum to 1
    assert jnp.allclose(jnp.sum(jnp.exp(out), axis=1), 1.0, atol=1e-3)
    print("KERNEL_OK")
</pallas_src>

<mosaic_0001>
module attributes {stable_mosaic.version = 11 : i64} {
  func.func @_matmul_bias_act_kernel(%arg0: i32, %arg1: memref<256x128xbf16, #tpu.memory_space<vmem>>, %arg2: memref<128x128xbf16, #tpu.memory_space<vmem>>, %arg3: memref<1x128xf32, #tpu.memory_space<vmem>>, %arg4: memref<256x128xbf16, #tpu.memory_space<vmem>>) attributes {dimension_semantics = [#tpu.dimension_semantics<parallel>], iteration_bounds = array<i64: 5>, scalar_prefetch = 0 : i64, scratch_operands = 0 : i64, tpu.core_type = #tpu.core_type<tc>, window_params = [{transform_indices = @transform_0, window_bounds = array<i64: 256, 128>}, {pipeline_mode = #tpu.pipeline_mode<synchronous>, transform_indices = @transform_1, window_bounds = array<i64: 128, 128>}, {pipeline_mode = #tpu.pipeline_mode<synchronous>, transform_indices = @transform_2, window_bounds = array<i64: 1, 128>}, {transform_indices = @transform_3, window_bounds = array<i64: 256, 128>}]} {
    %c0 = arith.constant 0 : index
    %c0_0 = arith.constant 0 : index
    %0 = vector.load %arg1[%c0, %c0_0] : memref<256x128xbf16, #tpu.memory_space<vmem>>, vector<256x128xbf16>
    %c0_1 = arith.constant 0 : index
    %c0_2 = arith.constant 0 : index
    %1 = vector.load %arg2[%c0_1, %c0_2] : memref<128x128xbf16, #tpu.memory_space<vmem>>, vector<128x128xbf16>
    %cst = arith.constant dense<0.000000e+00> : vector<256x128xf32>
    %2 = tpu.matmul %0, %1, %cst {dimension_numbers = #tpu.dot_dimension_numbers<[1], [0], [0], [1], [0, 0, 1, 1], [], []>} : vector<256x128xbf16>, vector<128x128xbf16>, vector<256x128xf32> -> vector<256x128xf32>
    %c0_3 = arith.constant 0 : index
    %c0_4 = arith.constant 0 : index
    %3 = vector.load %arg3[%c0_3, %c0_4] : memref<1x128xf32, #tpu.memory_space<vmem>>, vector<1x128xf32>
    %4 = vector.broadcast %3 : vector<1x128xf32> to vector<256x128xf32>
    %5 = arith.addf %2, %4 : vector<256x128xf32>
    %cst_5 = arith.constant 0.000000e+00 : f32
    %6 = vector.broadcast %cst_5 : f32 to vector<256x128xf32>
    %7 = arith.maximumf %5, %6 : vector<256x128xf32>
    %8 = arith.truncf %7 : vector<256x128xf32> to vector<256x128xbf16>
    %c0_6 = arith.constant 0 : index
    %c0_7 = arith.constant 0 : index
    %9 = vector.load %arg4[%c0_6, %c0_7] : memref<256x128xbf16, #tpu.memory_space<vmem>>, vector<256x128xbf16>
    tpu.vector_store %arg4[%c0_6, %c0_7], %8 {strides = array<i32>} : memref<256x128xbf16, #tpu.memory_space<vmem>>, vector<256x128xbf16>,
    return
  }
  func.func @transform_0(%arg0: i32) -> (i32, i32) {
    %c0_i32 = arith.constant 0 : i32
    %c0_i32_0 = arith.constant 0 : i32
    return %arg0, %c0_i32 : i32, i32
  }
  func.func @transform_1(%arg0: i32) -> (i32, i32) {
    %c0_i32 = arith.constant 0 : i32
    %c0_i32_0 = arith.constant 0 : i32
    %c0_i32_1 = arith.constant 0 : i32
    return %c0_i32, %c0_i32_0 : i32, i32
  }
  func.func @transform_2(%arg0: i32) -> (i32, i32) {
    %c0_i32 = arith.constant 0 : i32
    %c0_i32_0 = arith.constant 0 : i32
    %c0_i32_1 = arith.constant 0 : i32
    return %c0_i32, %c0_i32_0 : i32, i32
  }
  func.func @transform_3(%arg0: i32) -> (i32, i32) {
    %c0_i32 = arith.constant 0 : i32
    %c0_i32_0 = arith.constant 0 : i32
    return %arg0, %c0_i32 : i32, i32
  }
}

module attributes {stable_mosaic.version = 11 : i64} {
  func.func @_halve_max_kernel(%arg0: i32, %arg1: memref<24x6144xbf16, #tpu.memory_space<vmem>>, %arg2: memref<24x3072xbf16, #tpu.memory_space<vmem>>) attributes {dimension_semantics = [#tpu.dimension_semantics<parallel>], iteration_bounds = array<i64: 1>, scalar_prefetch = 0 : i64, scratch_operands = 0 : i64, tpu.core_type = #tpu.core_type<tc>, window_params = [{transform_indices = @transform_0, window_bounds = array<i64: 24, 6144>}, {transform_indices = @transform_1, window_bounds = array<i64: 24, 3072>}]} {
    %c0 = arith.constant 0 : index
    %c0_0 = arith.constant 0 : index
    %0 = vector.load %arg1[%c0, %c0_0] : memref<24x6144xbf16, #tpu.memory_space<vmem>>, vector<24x3072xbf16>
    %c0_1 = arith.constant 0 : index
    %c3072 = arith.constant 3072 : index
    %1 = vector.load %arg1[%c0_1, %c3072] : memref<24x6144xbf16, #tpu.memory_space<vmem>>, vector<24x3072xbf16>
    %2 = arith.maximumf %0, %1 : vector<24x3072xbf16>
    %c0_2 = arith.constant 0 : index
    %c0_3 = arith.constant 0 : index
    %3 = vector.load %arg2[%c0_2, %c0_3] : memref<24x3072xbf16, #tpu.memory_space<vmem>>, vector<24x3072xbf16>
    tpu.vector_store %arg2[%c0_2, %c0_3], %2 {strides = array<i32>} : memref<24x3072xbf16, #tpu.memory_space<vmem>>, vector<24x3072xbf16>,
    return
  }
  func.func @transform_0(%arg0: i32) -> (i32, i32) {
    %c0_i32 = arith.constant 0 : i32
    %c0_i32_0 = arith.constant 0 : i32
    return %arg0, %c0_i32 : i32, i32
  }
  func.func @transform_1(%arg0: i32) -> (i32, i32) {
    %c0_i32 = arith.constant 0 : i32
    %c0_i32_0 = arith.constant 0 : i32
    return %arg0, %c0_i32 : i32, i32
  }
}

module attributes {stable_mosaic.version = 11 : i64} {
  func.func @_halve_max_kernel(%arg0: i32, %arg1: memref<256x256xbf16, #tpu.memory_space<vmem>>, %arg2: memref<256x128xbf16, #tpu.memory_space<vmem>>) attributes {dimension_semantics = [#tpu.dimension_semantics<parallel>], iteration_bounds = array<i64: 2>, scalar_prefetch = 0 : i64, scratch_operands = 0 : i64, tpu.core_type = #tpu.core_type<tc>, window_params = [{transform_indices = @transform_0, window_bounds = array<i64: 256, 256>}, {transform_indices = @transform_1, window_bounds = array<i64: 256, 128>}]} {
    %c0 = arith.constant 0 : index
    %c0_0 = arith.constant 0 : index
    %0 = vector.load %arg1[%c0, %c0_0] : memref<256x256xbf16, #tpu.memory_space<vmem>>, vector<256x128xbf16>
    %c0_1 = arith.constant 0 : index
    %c128 = arith.constant 128 : index
    %1 = vector.load %arg1[%c0_1, %c128] : memref<256x256xbf16, #tpu.memory_space<vmem>>, vector<256x128xbf16>
    %2 = arith.maximumf %0, %1 : vector<256x128xbf16>
    %c0_2 = arith.constant 0 : index
    %c0_3 = arith.constant 0 : index
    %3 = vector.load %arg2[%c0_2, %c0_3] : memref<256x128xbf16, #tpu.memory_space<vmem>>, vector<256x128xbf16>
    tpu.vector_store %arg2[%c0_2, %c0_3], %2 {strides = array<i32>} : memref<256x128xbf16, #tpu.memory_space<vmem>>, vector<256x128xbf16>,
    return
  }
  func.func @transform_0(%arg0: i32) -> (i32, i32) {
    %c0_i32 = arith.constant 0 : i32
    %c0_i32_0 = arith.constant 0 : i32
    return %arg0, %c0_i32 : i32, i32
  }
  func.func @transform_1(%arg0: i32) -> (i32, i32) {
    %c0_i32 = arith.constant 0 : i32
    %c0_i32_0 = arith.constant 0 : i32
    return %arg0, %c0_i32 : i32, i32
  }
}

module attributes {stable_mosaic.version = 11 : i64} {
  func.func @_matmul_bias_act_kernel(%arg0: i32, %arg1: memref<128x3200xbf16, #tpu.memory_space<vmem>>, %arg2: memref<3200x128xbf16, #tpu.memory_space<vmem>>, %arg3: memref<1x128xf32, #tpu.memory_space<vmem>>, %arg4: memref<128x128xbf16, #tpu.memory_space<vmem>>) attributes {dimension_semantics = [#tpu.dimension_semantics<parallel>], iteration_bounds = array<i64: 1>, scalar_prefetch = 0 : i64, scratch_operands = 0 : i64, tpu.core_type = #tpu.core_type<tc>, window_params = [{transform_indices = @transform_0, window_bounds = array<i64: 128, 3200>}, {pipeline_mode = #tpu.pipeline_mode<synchronous>, transform_indices = @transform_1, window_bounds = array<i64: 3200, 128>}, {pipeline_mode = #tpu.pipeline_mode<synchronous>, transform_indices = @transform_2, window_bounds = array<i64: 1, 128>}, {transform_indices = @transform_3, window_bounds = array<i64: 128, 128>}]} {
    %c0 = arith.constant 0 : index
    %c0_0 = arith.constant 0 : index
    %0 = vector.load %arg1[%c0, %c0_0] : memref<128x3200xbf16, #tpu.memory_space<vmem>>, vector<128x3200xbf16>
    %c0_1 = arith.constant 0 : index
    %c0_2 = arith.constant 0 : index
    %1 = vector.load %arg2[%c0_1, %c0_2] : memref<3200x128xbf16, #tpu.memory_space<vmem>>, vector<3200x128xbf16>
    %cst = arith.constant dense<0.000000e+00> : vector<128x128xf32>
    %2 = tpu.matmul %0, %1, %cst {dimension_numbers = #tpu.dot_dimension_numbers<[1], [0], [0], [1], [0, 0, 1, 1], [], []>} : vector<128x3200xbf16>, vector<3200x128xbf16>, vector<128x128xf32> -> vector<128x128xf32>
    %c0_3 = arith.constant 0 : index
    %c0_4 = arith.constant 0 : index
    %3 = vector.load %arg3[%c0_3, %c0_4] : memref<1x128xf32, #tpu.memory_space<vmem>>, vector<1x128xf32>
    %4 = vector.broadcast %3 : vector<1x128xf32> to vector<128x128xf32>
    %5 = arith.addf %2, %4 : vector<128x128xf32>
    %cst_5 = arith.constant 0.000000e+00 : f32
    %6 = vector.broadcast %cst_5 : f32 to vector<128x128xf32>
    %7 = arith.maximumf %5, %6 : vector<128x128xf32>
    %8 = arith.truncf %7 : vector<128x128xf32> to vector<128x128xbf16>
    %c0_6 = arith.constant 0 : index
    %c0_7 = arith.constant 0 : index
    %9 = vector.load %arg4[%c0_6, %c0_7] : memref<128x128xbf16, #tpu.memory_space<vmem>>, vector<128x128xbf16>
    tpu.vector_store %arg4[%c0_6, %c0_7], %8 {strides = array<i32>} : memref<128x128xbf16, #tpu.memory_space<vmem>>, vector<128x128xbf16>,
    return
  }
  func.func @transform_0(%arg0: i32) -> (i32, i32) {
    %c0_i32 = arith.constant 0 : i32
    %c0_i32_0 = arith.constant 0 : i32
    return %arg0, %c0_i32 : i32, i32
  }
  func.func @transform_1(%arg0: i32) -> (i32, i32) {
    %c0_i32 = arith.constant 0 : i32
    %c0_i32_0 = arith.constant 0 : i32
    %c0_i32_1 = arith.constant 0 : i32
    return %c0_i32, %c0_i32_0 : i32, i32
  }
  func.func @transform_2(%arg0: i32) -> (i32, i32) {
    %c0_i32 = arith.constant 0 : i32
    %c0_i32_0 = arith.constant 0 : i32
    %c0_i32_1 = arith.constant 0 : i32
    return %c0_i32, %c0_i32_0 : i32, i32
  }
  func.func @transform_3(%arg0: i32) -> (i32, i32) {
    %c0_i32 = arith.constant 0 : i32
    %c0_i32_0 = arith.constant 0 : i32
    return %arg0, %c0_i32 : i32, i32
  }
}

module attributes {stable_mosaic.version = 11 : i64} {
  func.func @_halve_max_kernel(%arg0: i32, %arg1: memref<8x2048xbf16, #tpu.memory_space<vmem>>, %arg2: memref<8x1024xbf16, #tpu.memory_space<vmem>>) attributes {dimension_semantics = [#tpu.dimension_semantics<parallel>], iteration_bounds = array<i64: 1>, scalar_prefetch = 0 : i64, scratch_operands = 0 : i64, tpu.core_type = #tpu.core_type<tc>, window_params = [{transform_indices = @transform_0, window_bounds = array<i64: 8, 2048>}, {transform_indices = @transform_1, window_bounds = array<i64: 8, 1024>}]} {
    %c0 = arith.constant 0 : index
    %c0_0 = arith.constant 0 : index
    %0 = vector.load %arg1[%c0, %c0_0] : memref<8x2048xbf16, #tpu.memory_space<vmem>>, vector<8x1024xbf16>
    %c0_1 = arith.constant 0 : index
    %c1024 = arith.constant 1024 : index
    %1 = vector.load %arg1[%c0_1, %c1024] : memref<8x2048xbf16, #tpu.memory_space<vmem>>, vector<8x1024xbf16>
    %2 = arith.maximumf %0, %1 : vector<8x1024xbf16>
    %c0_2 = arith.constant 0 : index
    %c0_3 = arith.constant 0 : index
    %3 = vector.load %arg2[%c0_2, %c0_3] : memref<8x1024xbf16, #tpu.memory_space<vmem>>, vector<8x1024xbf16>
    tpu.vector_store %arg2[%c0_2, %c0_3], %2 {strides = array<i32>} : memref<8x1024xbf16, #tpu.memory_space<vmem>>, vector<8x1024xbf16>,
    return
  }
  func.func @transform_0(%arg0: i32) -> (i32, i32) {
    %c0_i32 = arith.constant 0 : i32
    %c0_i32_0 = arith.constant 0 : i32
    return %arg0, %c0_i32 : i32, i32
  }
  func.func @transform_1(%arg0: i32) -> (i32, i32) {
    %c0_i32 = arith.constant 0 : i32
    %c0_i32_0 = arith.constant 0 : i32
    return %arg0, %c0_i32 : i32, i32
  }
}

module attributes {stable_mosaic.version = 11 : i64} {
  func.func @_halve_max_kernel(%arg0: i32, %arg1: memref<32x256xbf16, #tpu.memory_space<vmem>>, %arg2: memref<32x128xbf16, #tpu.memory_space<vmem>>) attributes {dimension_semantics = [#tpu.dimension_semantics<parallel>], iteration_bounds = array<i64: 1>, scalar_prefetch = 0 : i64, scratch_operands = 0 : i64, tpu.core_type = #tpu.core_type<tc>, window_params = [{transform_indices = @transform_0, window_bounds = array<i64: 32, 256>}, {transform_indices = @transform_1, window_bounds = array<i64: 32, 128>}]} {
    %c0 = arith.constant 0 : index
    %c0_0 = arith.constant 0 : index
    %0 = vector.load %arg1[%c0, %c0_0] : memref<32x256xbf16, #tpu.memory_space<vmem>>, vector<32x128xbf16>
    %c0_1 = arith.constant 0 : index
    %c128 = arith.constant 128 : index
    %1 = vector.load %arg1[%c0_1, %c128] : memref<32x256xbf16, #tpu.memory_space<vmem>>, vector<32x128xbf16>
    %2 = arith.maximumf %0, %1 : vector<32x128xbf16>
    %c0_2 = arith.constant 0 : index
    %c0_3 = arith.constant 0 : index
    %3 = vector.load %arg2[%c0_2, %c0_3] : memref<32x128xbf16, #tpu.memory_space<vmem>>, vector<32x128xbf16>
    tpu.vector_store %arg2[%c0_2, %c0_3], %2 {strides = array<i32>} : memref<32x128xbf16, #tpu.memory_space<vmem>>, vector<32x128xbf16>,
    return
  }
  func.func @transform_0(%arg0: i32) -> (i32, i32) {
    %c0_i32 = arith.constant 0 : i32
    %c0_i32_0 = arith.constant 0 : i32
    return %arg0, %c0_i32 : i32, i32
  }
  func.func @transform_1(%arg0: i32) -> (i32, i32) {
    %c0_i32 = arith.constant 0 : i32
    %c0_i32_0 = arith.constant 0 : i32
    return %arg0, %c0_i32 : i32, i32
  }
}

module attributes {stable_mosaic.version = 11 : i64} {
  func.func @_matmul_bias_act_kernel(%arg0: i32, %arg1: memref<8x2048xbf16, #tpu.memory_space<vmem>>, %arg2: memref<2048x512xbf16, #tpu.memory_space<vmem>>, %arg3: memref<1x512xf32, #tpu.memory_space<vmem>>, %arg4: memref<8x512xbf16, #tpu.memory_space<vmem>>) attributes {dimension_semantics = [#tpu.dimension_semantics<parallel>], iteration_bounds = array<i64: 1>, scalar_prefetch = 0 : i64, scratch_operands = 0 : i64, tpu.core_type = #tpu.core_type<tc>, window_params = [{transform_indices = @transform_0, window_bounds = array<i64: 8, 2048>}, {pipeline_mode = #tpu.pipeline_mode<synchronous>, transform_indices = @transform_1, window_bounds = array<i64: 2048, 512>}, {pipeline_mode = #tpu.pipeline_mode<synchronous>, transform_indices = @transform_2, window_bounds = array<i64: 1, 512>}, {transform_indices = @transform_3, window_bounds = array<i64: 8, 512>}]} {
    %c0 = arith.constant 0 : index
    %c0_0 = arith.constant 0 : index
    %0 = vector.load %arg1[%c0, %c0_0] : memref<8x2048xbf16, #tpu.memory_space<vmem>>, vector<8x2048xbf16>
    %c0_1 = arith.constant 0 : index
    %c0_2 = arith.constant 0 : index
    %1 = vector.load %arg2[%c0_1, %c0_2] : memref<2048x512xbf16, #tpu.memory_space<vmem>>, vector<2048x512xbf16>
    %cst = arith.constant dense<0.000000e+00> : vector<8x512xf32>
    %2 = tpu.matmul %0, %1, %cst {dimension_numbers = #tpu.dot_dimension_numbers<[1], [0], [0], [1], [0, 0, 1, 1], [], []>} : vector<8x2048xbf16>, vector<2048x512xbf16>, vector<8x512xf32> -> vector<8x512xf32>
    %c0_3 = arith.constant 0 : index
    %c0_4 = arith.constant 0 : index
    %3 = vector.load %arg3[%c0_3, %c0_4] : memref<1x512xf32, #tpu.memory_space<vmem>>, vector<1x512xf32>
    %4 = vector.broadcast %3 : vector<1x512xf32> to vector<8x512xf32>
    %5 = arith.addf %2, %4 : vector<8x512xf32>
    %cst_5 = arith.constant 0.000000e+00 : f32
    %6 = vector.broadcast %cst_5 : f32 to vector<8x512xf32>
    %7 = arith.maximumf %5, %6 : vector<8x512xf32>
    %8 = arith.truncf %7 : vector<8x512xf32> to vector<8x512xbf16>
    %c0_6 = arith.constant 0 : index
    %c0_7 = arith.constant 0 : index
    %9 = vector.load %arg4[%c0_6, %c0_7] : memref<8x512xbf16, #tpu.memory_space<vmem>>, vector<8x512xbf16>
    tpu.vector_store %arg4[%c0_6, %c0_7], %8 {strides = array<i32>} : memref<8x512xbf16, #tpu.memory_space<vmem>>, vector<8x512xbf16>,
    return
  }
  func.func @transform_0(%arg0: i32) -> (i32, i32) {
    %c0_i32 = arith.constant 0 : i32
    %c0_i32_0 = arith.constant 0 : i32
    return %arg0, %c0_i32 : i32, i32
  }
  func.func @transform_1(%arg0: i32) -> (i32, i32) {
    %c0_i32 = arith.constant 0 : i32
    %c0_i32_0 = arith.constant 0 : i32
    %c0_i32_1 = arith.constant 0 : i32
    return %c0_i32, %c0_i32_0 : i32, i32
  }
  func.func @transform_2(%arg0: i32) -> (i32, i32) {
    %c0_i32 = arith.constant 0 : i32
    %c0_i32_0 = arith.constant 0 : i32
    %c0_i32_1 = arith.constant 0 : i32
    return %c0_i32, %c0_i32_0 : i32, i32
  }
  func.func @transform_3(%arg0: i32) -> (i32, i32) {
    %c0_i32 = arith.constant 0 : i32
    %c0_i32_0 = arith.constant 0 : i32
    return %arg0, %c0_i32 : i32, i32
  }
}

module attributes {stable_mosaic.version = 11 : i64} {
  func.func @_matmul_bias_act_kernel(%arg0: i32, %arg1: memref<8x512xbf16, #tpu.memory_space<vmem>>, %arg2: memref<512x128xbf16, #tpu.memory_space<vmem>>, %arg3: memref<1x128xf32, #tpu.memory_space<vmem>>, %arg4: memref<8x128xf32, #tpu.memory_space<vmem>>) attributes {dimension_semantics = [#tpu.dimension_semantics<parallel>], iteration_bounds = array<i64: 1>, scalar_prefetch = 0 : i64, scratch_operands = 0 : i64, tpu.core_type = #tpu.core_type<tc>, window_params = [{transform_indices = @transform_0, window_bounds = array<i64: 8, 512>}, {pipeline_mode = #tpu.pipeline_mode<synchronous>, transform_indices = @transform_1, window_bounds = array<i64: 512, 128>}, {pipeline_mode = #tpu.pipeline_mode<synchronous>, transform_indices = @transform_2, window_bounds = array<i64: 1, 128>}, {transform_indices = @transform_3, window_bounds = array<i64: 8, 128>}]} {
    %c0 = arith.constant 0 : index
    %c0_0 = arith.constant 0 : index
    %0 = vector.load %arg1[%c0, %c0_0] : memref<8x512xbf16, #tpu.memory_space<vmem>>, vector<8x512xbf16>
    %c0_1 = arith.constant 0 : index
    %c0_2 = arith.constant 0 : index
    %1 = vector.load %arg2[%c0_1, %c0_2] : memref<512x128xbf16, #tpu.memory_space<vmem>>, vector<512x128xbf16>
    %cst = arith.constant dense<0.000000e+00> : vector<8x128xf32>
    %2 = tpu.matmul %0, %1, %cst {dimension_numbers = #tpu.dot_dimension_numbers<[1], [0], [0], [1], [0, 0, 1, 1], [], []>} : vector<8x512xbf16>, vector<512x128xbf16>, vector<8x128xf32> -> vector<8x128xf32>
    %c0_3 = arith.constant 0 : index
    %c0_4 = arith.constant 0 : index
    %3 = vector.load %arg3[%c0_3, %c0_4] : memref<1x128xf32, #tpu.memory_space<vmem>>, vector<1x128xf32>
    %4 = vector.broadcast %3 : vector<1x128xf32> to vector<8x128xf32>
    %5 = arith.addf %2, %4 : vector<8x128xf32>
    %6 = tpu.iota {dimensions = array<i32: 1>} : vector<8x128xi32>
    %c10_i32 = arith.constant 10 : i32
    %7 = vector.broadcast %c10_i32 : i32 to vector<8x128xi32>
    %8 = arith.cmpi slt, %6, %7 : vector<8x128xi32>
    %cst_5 = arith.constant 0xFF800000 : f32
    %9 = vector.broadcast %cst_5 : f32 to vector<8x128xf32>
    %10 = arith.select %8, %5, %9 : vector<8x128xi1>, vector<8x128xf32>
    %cst_6 = arith.constant dense<0xFF800000> : vector<8xf32>
    %11 = vector.multi_reduction <maximumf>, %10, %cst_6 [1] : vector<8x128xf32> to vector<8xf32>
    %12 = vector.shape_cast %11 : vector<8xf32> to vector<8x1xf32>
    %13 = vector.broadcast %12 : vector<8x1xf32> to vector<8x128xf32>
    %14 = arith.subf %10, %13 : vector<8x128xf32>
    %15 = math.exp %14 : vector<8x128xf32>
    %cst_7 = arith.constant dense<0.000000e+00> : vector<8xf32>
    %16 = vector.multi_reduction <add>, %15, %cst_7 [1] : vector<8x128xf32> to vector<8xf32>
    %17 = vector.shape_cast %16 : vector<8xf32> to vector<8x1xf32>
    %18 = math.log %17 : vector<8x1xf32>
    %19 = vector.broadcast %18 : vector<8x1xf32> to vector<8x128xf32>
    %20 = arith.subf %14, %19 : vector<8x128xf32>
    %c0_8 = arith.constant 0 : index
    %c0_9 = arith.constant 0 : index
    %21 = vector.load %arg4[%c0_8, %c0_9] : memref<8x128xf32, #tpu.memory_space<vmem>>, vector<8x128xf32>
    tpu.vector_store %arg4[%c0_8, %c0_9], %20 {strides = array<i32>} : memref<8x128xf32, #tpu.memory_space<vmem>>, vector<8x128xf32>,
    return
  }
  func.func @transform_0(%arg0: i32) -> (i32, i32) {
    %c0_i32 = arith.constant 0 : i32
    %c0_i32_0 = arith.constant 0 : i32
    return %arg0, %c0_i32 : i32, i32
  }
  func.func @transform_1(%arg0: i32) -> (i32, i32) {
    %c0_i32 = arith.constant 0 : i32
    %c0_i32_0 = arith.constant 0 : i32
    %c0_i32_1 = arith.constant 0 : i32
    return %c0_i32, %c0_i32_0 : i32, i32
  }
  func.func @transform_2(%arg0: i32) -> (i32, i32) {
    %c0_i32 = arith.constant 0 : i32
    %c0_i32_0 = arith.constant 0 : i32
    %c0_i32_1 = arith.constant 0 : i32
    return %c0_i32, %c0_i32_0 : i32, i32
  }
  func.func @transform_3(%arg0: i32) -> (i32, i32) {
    %c0_i32 = arith.constant 0 : i32
    %c0_i32_0 = arith.constant 0 : i32
    return %arg0, %c0_i32 : i32, i32
  }
}

</mosaic_0001>

<bundles_post_ra>
// kernel: mnist_net_forward.8
= control target key start
LH: loop header
LB: loop body
LE: loop exit
PB: predicated region body
PF: predicated region fallthrough
CT: control target
= control target key end

     0   :  { %s898_s12 = smov 0   ;;  %s1019_s0 = inlined_call_operand.vmem [shape: bf16[1280,128], index: 0, kind: input, shape index: {}]   ;;  %s1020_s1 = inlined_call_operand.vmem [shape: bf16[128,128], index: 1, kind: input, shape index: {}]   ;;  %s1021_s2 = inlined_call_operand.vmem [shape: f32[1,128], index: 2, kind: input, shape index: {}]   ;;  %s1022_s3 = inlined_call_operand.vmem [shape: bf16[1280,128], index: 3, kind: output, shape index: {}]  }
   0x1 LB: > { %s611_s13 = sadd.s32 4294967295, %s876_s12   ;;  %p615_p0 = scmp.ge.s32.totalorder %s876_s12, 1  ;;  %s876_s12 = sphi %s898_s12, %s13_s12  }
   0x2   : > { %p138_p1 = scmp.lt.s32.totalorder %s876_s12, 6 }
   0x4   : > { %p139_p2 = pnand %p615_p0, %p138_p1 }
   0x5   : > { %s616_s22 = sshll.u32 (!%p139_p2), %s611_s13, 5 }
   0x6   : > { %142 = sbr.rel (%p139_p2) target bundleno = 240 (0xf0), region = 32  ;;  %p163_p3 = scmp.lt.s32.totalorder (!%p139_p2), %s616_s22, 159 }
   0xb   : > { %v741_v0 = vld [vmem:[%s1020_s1 + $0x38] sm:$0xff]  ;;  %v740_v1 = vld [vmem:[%s1020_s1 + $0x30] sm:$0xff]  ;;  %v739_v2 = vld [vmem:[%s1020_s1 + $0x28] sm:$0xff]  ;;  %s1024_s22 = smov (!%p163_p3, %s616_s22), 159 }
   0xc   : > { %370 = vmatpush.bf16.msra.mxu0 %v741_v0  ;;  %837 = vmatpush.bf16.msra.mxu1 %v741_v0  ;;  %v738_v3 = vld [vmem:[%s1020_s1 + $0x20] sm:$0xff]  ;;  %v737_v4 = vld [vmem:[%s1020_s1 + $0x18] sm:$0xff]  ;;  %v736_v5 = vld [vmem:[%s1020_s1 + $0x10] sm:$0xff]  ;;  %s617_s29 = sshll.u32 %s1024_s22, 2 }
   0xd   : > { %838 = vmatpush.bf16.msra.mxu2 %v741_v0  ;;  %839 = vmatpush.bf16.msra.mxu3 %v741_v0  ;;  %v735_v6 = vld [vmem:[%s1020_s1 + $0x8] sm:$0xff]  ;;  %v734_v7 = vld [vmem:[%s1020_s1] sm:$0xff]  ;;  %s938_s7 = scalar_lea.vmem %s1019_s0, %s617_s29  ;;  %s970_s13 = scalar_lea.vmem %s1022_s3, %s617_s29 }
   0xe   : > { %v718_v8 = vld [vmem:[%s938_s7] sm:$0xff]  ;;  %v719_v12 = vld [vmem:[%s938_s7 + $0x8] sm:$0xff]  ;;  %v720_v16 = vld [vmem:[%s938_s7 + $0x10] sm:$0xff] }
   0xf   : > { %v722_v9 = vld [vmem:[%s938_s7 + $0x20] sm:$0xff]  ;;  %v723_v13 = vld [vmem:[%s938_s7 + $0x28] sm:$0xff]  ;;  %v724_v17 = vld [vmem:[%s938_s7 + $0x30] sm:$0xff] }
  0x10   : > { %371 = vmatpush.bf16.msra.mxu0 %v740_v1  ;;  %840 = vmatpush.bf16.msra.mxu1 %v740_v1  ;;  %v726_v10 = vld [vmem:[%s938_s7 + $0x40] sm:$0xff]  ;;  %v727_v14 = vld [vmem:[%s938_s7 + $0x48] sm:$0xff]  ;;  %v728_v18 = vld [vmem:[%s938_s7 + $0x50] sm:$0xff] }
  0x11   : > { %841 = vmatpush.bf16.msra.mxu2 %v740_v1  ;;  %842 = vmatpush.bf16.msra.mxu3 %v740_v1  ;;  %v730_v11 = vld [vmem:[%s938_s7 + $0x60] sm:$0xff]  ;;  %v731_v15 = vld [vmem:[%s938_s7 + $0x68] sm:$0xff]  ;;  %v732_v19 = vld [vmem:[%s938_s7 + $0x70] sm:$0xff] }
  0x12   : > { %v721_v20 = vld [vmem:[%s938_s7 + $0x18] sm:$0xff]  ;;  %v959_v26 = vld [vmem:[%s1021_s2] ss:$0 sm:$0xff] }
  0x13   : > { %v725_v21 = vld [vmem:[%s938_s7 + $0x38] sm:$0xff] }
  0x14   : > { %372 = vmatpush.bf16.msra.mxu0 %v739_v2  ;;  %843 = vmatpush.bf16.msra.mxu1 %v739_v2  ;;  %v729_v22 = vld [vmem:[%s938_s7 + $0x58] sm:$0xff] }
  0x15   : > { %844 = vmatpush.bf16.msra.mxu2 %v739_v2  ;;  %845 = vmatpush.bf16.msra.mxu3 %v739_v2  ;;  %v733_v23 = vld [vmem:[%s938_s7 + $0x78] sm:$0xff] }
  0x18   : > { %373 = vmatpush.bf16.msra.mxu0 %v738_v3  ;;  %846 = vmatpush.bf16.msra.mxu1 %v738_v3 }
  0x19   : > { %847 = vmatpush.bf16.msra.mxu2 %v738_v3  ;;  %848 = vmatpush.bf16.msra.mxu3 %v738_v3 }
  0x1c   : > { %374 = vmatpush.bf16.msra.mxu0 %v737_v4  ;;  %849 = vmatpush.bf16.msra.mxu1 %v737_v4 }
  0x1d   : > { %850 = vmatpush.bf16.msra.mxu2 %v737_v4  ;;  %851 = vmatpush.bf16.msra.mxu3 %v737_v4 }
  0x20   : > { %375 = vmatpush.bf16.msra.mxu0 %v736_v5  ;;  %852 = vmatpush.bf16.msra.mxu1 %v736_v5 }
  0x21   : > { %853 = vmatpush.bf16.msra.mxu2 %v736_v5  ;;  %854 = vmatpush.bf16.msra.mxu3 %v736_v5 }
  0x24   : > { %376 = vmatpush.bf16.msra.mxu0 %v735_v6  ;;  %855 = vmatpush.bf16.msra.mxu1 %v735_v6 }
  0x25   : > { %856 = vmatpush.bf16.msra.mxu2 %v735_v6  ;;  %857 = vmatpush.bf16.msra.mxu3 %v735_v6 }
  0x28   : > { %377 = vmatpush.bf16.msra.mxu0 %v734_v7  ;;  %858 = vmatpush.bf16.msra.mxu1 %v734_v7 }
  0x29   : > { %859 = vmatpush.bf16.msra.mxu2 %v734_v7  ;;  %860 = vmatpush.bf16.msra.mxu3 %v734_v7 }
  0x2b   : > { %378 = vmatmul.bf16.vlgmr.msra.gmra.mxu0 %v718_v8  ;;  %398 = vmatmul.bf16.vlgmr.msra.gmra.mxu1 %v722_v9 }
  0x2c   : > { %418 = vmatmul.bf16.vlgmr.msra.gmra.mxu2 %v726_v10  ;;  %438 = vmatmul.bf16.vlgmr.msra.gmra.mxu3 %v730_v11 }
  0x3b   : > { %383 = vmatmul.bf16.gmra.mxu0 %v719_v12  ;;  %403 = vmatmul.bf16.gmra.mxu1 %v723_v13 }
  0x3c   : > { %423 = vmatmul.bf16.gmra.mxu2 %v727_v14  ;;  %443 = vmatmul.bf16.gmra.mxu3 %v731_v15 }
  0x4b   : > { %388 = vmatmul.bf16.gmra.mxu0 %v720_v16  ;;  %408 = vmatmul.bf16.gmra.mxu1 %v724_v17 }
  0x4c   : > { %428 = vmatmul.bf16.gmra.mxu2 %v728_v18  ;;  %448 = vmatmul.bf16.gmra.mxu3 %v732_v19 }
  0x5b   : > { %393 = vmatmul.bf16.gmra.mxu0 %v721_v20  ;;  %413 = vmatmul.bf16.gmra.mxu1 %v725_v21 }
  0x5c   : > { %433 = vmatmul.bf16.gmra.mxu2 %v729_v22  ;;  %453 = vmatmul.bf16.gmra.mxu3 %v733_v23 }
  0xa8   : > { %v379_v24 = vpop.f32.mrf.mxu0  ;;  %v399_v25 = vpop.f32.mrf.mxu1 }
  0xa9   : > { %v380_v27 = vadd.f32 %v959_v26, %v379_v24  ;;  %v400_v28 = vadd.f32 %v959_v26, %v399_v25 }
  0xab   : > { %v459_v35 = vmax.f32 %v380_v27, 0.0  ;;  %v467_v36 = vmax.f32 %v400_v28, 0.0 }
  0xaf   : > { %v419_v29 = vpop.f32.mrf.mxu2  ;;  %v439_v30 = vpop.f32.mrf.mxu3 }
  0xb0   : > { %v381_v31 = vpop.f32.mrf.mxu0  ;;  %v401_v32 = vpop.f32.mrf.mxu1  ;;  %v420_v41 = vadd.f32 %v959_v26, %v419_v29  ;;  %v440_v42 = vadd.f32 %v959_v26, %v439_v30 }
  0xb1   : > { %v382_v33 = vadd.f32 %v959_v26, %v381_v31  ;;  %v402_v34 = vadd.f32 %v959_v26, %v401_v32 }
  0xb2   : > { %v475_v49 = vmax.f32 %v420_v41, 0.0  ;;  %v483_v50 = vmax.f32 %v440_v42, 0.0 }
  0xb3   : > { %v460_v37 = vmax.f32 %v382_v33, 0.0  ;;  %v468_v38 = vmax.f32 %v402_v34, 0.0 }
  0xb5   : > { %v745_v39 = vpack.c.bf16 %v460_v37, %v459_v35  ;;  %v765_v40 = vpack.c.bf16 %v468_v38, %v467_v36 }
  0xb7   : > { %746 = vst [vmem:[%s970_s13] sm:$0xff] %v745_v39   ;;  %v421_v43 = vpop.f32.mrf.mxu2  ;;  %v441_v44 = vpop.f32.mrf.mxu3 }
  0xb8   : > { %825 = vst [vmem:[%s970_s13 + $0x20] sm:$0xff] %v765_v40   ;;  %v422_v45 = vadd.f32 %v959_v26, %v421_v43  ;;  %v442_v46 = vadd.f32 %v959_v26, %v441_v44  ;;  %v384_v47 = vpop.f32.mrf.mxu0  ;;  %v404_v48 = vpop.f32.mrf.mxu1 }
  0xb9   : > { %v385_v55 = vadd.f32 %v959_v26, %v384_v47  ;;  %v405_v56 = vadd.f32 %v959_v26, %v404_v48 }
  0xba   : > { %v476_v51 = vmax.f32 %v422_v45, 0.0  ;;  %v484_v52 = vmax.f32 %v442_v46, 0.0 }
  0xbb   : > { %v461_v63 = vmax.f32 %v385_v55, 0.0  ;;  %v469_v0 = vmax.f32 %v405_v56, 0.0 }
  0xbc   : > { %v785_v53 = vpack.c.bf16 %v476_v51, %v475_v49  ;;  %v805_v54 = vpack.c.bf16 %v484_v52, %v483_v50 }
  0xbe   : > { %829 = vst [vmem:[%s970_s13 + $0x40] sm:$0xff] %v785_v53  }
  0xbf   : > { %833 = vst [vmem:[%s970_s13 + $0x60] sm:$0xff] %v805_v54   ;;  %v424_v57 = vpop.f32.mrf.mxu2  ;;  %v444_v58 = vpop.f32.mrf.mxu3 }
  0xc0   : > { %v386_v59 = vpop.f32.mrf.mxu0  ;;  %v406_v60 = vpop.f32.mrf.mxu1  ;;  %v425_v5 = vadd.f32 %v959_v26, %v424_v57  ;;  %v445_v6 = vadd.f32 %v959_v26, %v444_v58 }
  0xc1   : > { %v387_v61 = vadd.f32 %v959_v26, %v386_v59  ;;  %v407_v62 = vadd.f32 %v959_v26, %v406_v60 }
  0xc2   : > { %v477_v13 = vmax.f32 %v425_v5, 0.0  ;;  %v485_v14 = vmax.f32 %v445_v6, 0.0 }
  0xc3   : > { %v462_v1 = vmax.f32 %v387_v61, 0.0  ;;  %v470_v2 = vmax.f32 %v407_v62, 0.0 }
  0xc5   : > { %v750_v3 = vpack.c.bf16 %v462_v1, %v461_v63  ;;  %v770_v4 = vpack.c.bf16 %v470_v2, %v469_v0 }
  0xc7   : > { %822 = vst [vmem:[%s970_s13 + $0x8] sm:$0xff] %v750_v3   ;;  %v426_v7 = vpop.f32.mrf.mxu2  ;;  %v446_v8 = vpop.f32.mrf.mxu3 }
  0xc8   : > { %826 = vst [vmem:[%s970_s13 + $0x28] sm:$0xff] %v770_v4   ;;  %v427_v9 = vadd.f32 %v959_v26, %v426_v7  ;;  %v447_v10 = vadd.f32 %v959_v26, %v446_v8  ;;  %v389_v11 = vpop.f32.mrf.mxu0  ;;  %v409_v12 = vpop.f32.mrf.mxu1 }
  0xc9   : > { %v390_v19 = vadd.f32 %v959_v26, %v389_v11  ;;  %v410_v20 = vadd.f32 %v959_v26, %v409_v12 }
  0xca   : > { %v478_v15 = vmax.f32 %v427_v9, 0.0  ;;  %v486_v16 = vmax.f32 %v447_v10, 0.0 }
  0xcb   : > { %v463_v28 = vmax.f32 %v390_v19, 0.0  ;;  %v471_v29 = vmax.f32 %v410_v20, 0.0 }
  0xcc   : > { %v790_v17 = vpack.c.bf16 %v478_v15, %v477_v13  ;;  %v810_v18 = vpack.c.bf16 %v486_v16, %v485_v14 }
  0xce   : > { %830 = vst [vmem:[%s970_s13 + $0x48] sm:$0xff] %v790_v17  }
  0xcf   : > { %834 = vst [vmem:[%s970_s13 + $0x68] sm:$0xff] %v810_v18   ;;  %v429_v21 = vpop.f32.mrf.mxu2  ;;  %v449_v22 = vpop.f32.mrf.mxu3 }
  0xd0   : > { %v391_v23 = vpop.f32.mrf.mxu0  ;;  %v411_v24 = vpop.f32.mrf.mxu1  ;;  %v430_v34 = vadd.f32 %v959_v26, %v429_v21  ;;  %v450_v35 = vadd.f32 %v959_v26, %v449_v22 }
  0xd1   : > { %v392_v25 = vadd.f32 %v959_v26, %v391_v23  ;;  %v412_v27 = vadd.f32 %v959_v26, %v411_v24 }
  0xd2   : > { %v479_v42 = vmax.f32 %v430_v34, 0.0  ;;  %v487_v43 = vmax.f32 %v450_v35, 0.0 }
  0xd3   : > { %v464_v30 = vmax.f32 %v392_v25, 0.0  ;;  %v472_v31 = vmax.f32 %v412_v27, 0.0 }
  0xd5   : > { %v755_v32 = vpack.c.bf16 %v464_v30, %v463_v28  ;;  %v775_v33 = vpack.c.bf16 %v472_v31, %v471_v29 }
  0xd7   : > { %823 = vst [vmem:[%s970_s13 + $0x10] sm:$0xff] %v755_v32   ;;  %v431_v36 = vpop.f32.mrf.mxu2  ;;  %v451_v37 = vpop.f32.mrf.mxu3 }
  0xd8   : > { %827 = vst [vmem:[%s970_s13 + $0x30] sm:$0xff] %v775_v33   ;;  %v432_v38 = vadd.f32 %v959_v26, %v431_v36  ;;  %v452_v39 = vadd.f32 %v959_v26, %v451_v37  ;;  %v394_v40 = vpop.f32.mrf.mxu0  ;;  %v414_v41 = vpop.f32.mrf.mxu1 }
  0xd9   : > { %v395_v48 = vadd.f32 %v959_v26, %v394_v40  ;;  %v415_v49 = vadd.f32 %v959_v26, %v414_v41 }
  0xda   : > { %v480_v44 = vmax.f32 %v432_v38, 0.0  ;;  %v488_v45 = vmax.f32 %v452_v39, 0.0 }
  0xdb   : > { %v465_v56 = vmax.f32 %v395_v48, 0.0  ;;  %v473_v57 = vmax.f32 %v415_v49, 0.0 }
  0xdc   : > { %v795_v46 = vpack.c.bf16 %v480_v44, %v479_v42  ;;  %v815_v47 = vpack.c.bf16 %v488_v45, %v487_v43 }
  0xde   : > { %831 = vst [vmem:[%s970_s13 + $0x50] sm:$0xff] %v795_v46  }
  0xdf   : > { %835 = vst [vmem:[%s970_s13 + $0x70] sm:$0xff] %v815_v47   ;;  %v434_v50 = vpop.f32.mrf.mxu2  ;;  %v454_v51 = vpop.f32.mrf.mxu3 }
  0xe0   : > { %v396_v52 = vpop.f32.mrf.mxu0  ;;  %v416_v53 = vpop.f32.mrf.mxu1  ;;  %v435_v62 = vadd.f32 %v959_v26, %v434_v50  ;;  %v455_v63 = vadd.f32 %v959_v26, %v454_v51 }
  0xe1   : > { %v397_v54 = vadd.f32 %v959_v26, %v396_v52  ;;  %v417_v55 = vadd.f32 %v959_v26, %v416_v53 }
  0xe2   : > { %v481_v4 = vmax.f32 %v435_v62, 0.0  ;;  %v489_v5 = vmax.f32 %v455_v63, 0.0 }
  0xe3   : > { %v466_v58 = vmax.f32 %v397_v54, 0.0  ;;  %v474_v59 = vmax.f32 %v417_v55, 0.0 }
  0xe5   : > { %v760_v60 = vpack.c.bf16 %v466_v58, %v465_v56  ;;  %v780_v61 = vpack.c.bf16 %v474_v59, %v473_v57 }
  0xe7   : > { %824 = vst [vmem:[%s970_s13 + $0x18] sm:$0xff] %v760_v60   ;;  %v436_v0 = vpop.f32.mrf.mxu2  ;;  %v456_v1 = vpop.f32.mrf.mxu3 }
  0xe8   : > { %828 = vst [vmem:[%s970_s13 + $0x38] sm:$0xff] %v780_v61   ;;  %v437_v2 = vadd.f32 %v959_v26, %v436_v0  ;;  %v457_v3 = vadd.f32 %v959_v26, %v456_v1 }
  0xea   : > { %v482_v6 = vmax.f32 %v437_v2, 0.0  ;;  %v490_v7 = vmax.f32 %v457_v3, 0.0 }
  0xec   : > { %v800_v8 = vpack.c.bf16 %v482_v6, %v481_v4  ;;  %v820_v9 = vpack.c.bf16 %v490_v7, %v489_v5 }
  0xee   : > { %832 = vst [vmem:[%s970_s13 + $0x58] sm:$0xff] %v800_v8  }
  0xef   : > { %836 = vst [vmem:[%s970_s13 + $0x78] sm:$0xff] %v820_v9  }
  0xf0 PF: > { %s13_s12 = sadd.s32 1, %s876_s12  }
  0xf1   : > { %p10_p4 = scmp.ge.s32.totalorder %s13_s12, 7  }
  0xf3   :  { %12 = sbr.rel (!%p10_p4) target bundleno = 1 (0x1), region = 62 }

// kernel: mnist_net_forward.9
= control target key start
LH: loop header
LB: loop body
LE: loop exit
PB: predicated region body
PF: predicated region fallthrough
CT: control target
= control target key end

     0   :  { %s706_s0 = inlined_call_operand.vmem [shape: bf16[24,6144], index: 0, kind: input, shape index: {}]   ;;  %s707_s1 = inlined_call_operand.vmem [shape: bf16[24,3072], index: 1, kind: output, shape index: {}]  }
   0x1   :  { %v8_v0 = vld [vmem:[%s706_s0] sm:$0xff]  ;;  %v9_v2 = vld [vmem:[%s706_s0 + $0x8] sm:$0xff]  ;;  %v10_v8 = vld [vmem:[%s706_s0 + $0x10] sm:$0xff] }
   0x2   :  { %v44_v1 = vld [vmem:[%s706_s0 + $0x60] sm:$0xff]  ;;  %v80_v3 = vunpack.c.l.bf16 %v8_v0  ;;  %v81_v4 = vunpack.c.h.bf16 %v8_v0  ;;  %v45_v7 = vld [vmem:[%s706_s0 + $0x68] sm:$0xff]  ;;  %v46_v9 = vld [vmem:[%s706_s0 + $0x70] sm:$0xff]  ;;  %v82_v10 = vunpack.c.l.bf16 %v9_v2  ;;  %v83_v11 = vunpack.c.h.bf16 %v9_v2 }
   0x3   :  { %v152_v5 = vunpack.c.l.bf16 %v44_v1  ;;  %v153_v6 = vunpack.c.h.bf16 %v44_v1  ;;  %v154_v12 = vunpack.c.l.bf16 %v45_v7  ;;  %v155_v13 = vunpack.c.h.bf16 %v45_v7  ;;  %v11_v14 = vld [vmem:[%s706_s0 + $0x18] sm:$0xff]  ;;  %v12_v24 = vld [vmem:[%s706_s0 + $0x20] sm:$0xff]  ;;  %v13_v30 = vld [vmem:[%s706_s0 + $0x28] sm:$0xff] }
   0x4   :  { %v47_v15 = vld [vmem:[%s706_s0 + $0x78] sm:$0xff]  ;;  %v84_v18 = vunpack.c.l.bf16 %v10_v8  ;;  %v85_v19 = vunpack.c.h.bf16 %v10_v8  ;;  %v156_v22 = vunpack.c.l.bf16 %v46_v9  ;;  %v157_v23 = vunpack.c.h.bf16 %v46_v9  ;;  %v48_v25 = vld [vmem:[%s706_s0 + $0x80] sm:$0xff]  ;;  %v49_v35 = vld [vmem:[%s706_s0 + $0x88] sm:$0xff] }
   0x5   :  { %v224_v16 = vmax.f32 %v80_v3, %v152_v5  ;;  %v225_v17 = vmax.f32 %v81_v4, %v153_v6  ;;  %v226_v20 = vmax.f32 %v82_v10, %v154_v12  ;;  %v227_v21 = vmax.f32 %v83_v11, %v155_v13  ;;  %v14_v40 = vld [vmem:[%s706_s0 + $0x30] sm:$0xff]  ;;  %v15_v50 = vld [vmem:[%s706_s0 + $0x38] sm:$0xff]  ;;  %v16_v60 = vld [vmem:[%s706_s0 + $0x40] sm:$0xff] }
   0x6   :  { %v86_v27 = vunpack.c.l.bf16 %v11_v14  ;;  %v87_v28 = vunpack.c.h.bf16 %v11_v14  ;;  %v158_v29 = vunpack.c.l.bf16 %v47_v15  ;;  %v228_v32 = vmax.f32 %v84_v18, %v156_v22  ;;  %v50_v45 = vld [vmem:[%s706_s0 + $0x90] sm:$0xff]  ;;  %v51_v51 = vld [vmem:[%s706_s0 + $0x98] sm:$0xff]  ;;  %v52_v61 = vld [vmem:[%s706_s0 + $0xa0] sm:$0xff] }
   0x7   :  { %v296_v26 = vpack.c.bf16 %v225_v17, %v224_v16  ;;  %v297_v31 = vpack.c.bf16 %v227_v21, %v226_v20  ;;  %v229_v33 = vmax.f32 %v85_v19, %v157_v23  ;;  %v159_v34 = vunpack.c.h.bf16 %v47_v15  ;;  %v17_v2 = vld [vmem:[%s706_s0 + $0x48] sm:$0xff]  ;;  %v18_v12 = vld [vmem:[%s706_s0 + $0x50] sm:$0xff]  ;;  %v19_v22 = vld [vmem:[%s706_s0 + $0x58] sm:$0xff] }
   0x8   :  { %v230_v36 = vmax.f32 %v86_v27, %v158_v29  ;;  %v88_v37 = vunpack.c.l.bf16 %v12_v24  ;;  %v89_v38 = vunpack.c.h.bf16 %v12_v24  ;;  %v160_v39 = vunpack.c.l.bf16 %v48_v25  ;;  %v53_v7 = vld [vmem:[%s706_s0 + $0xa8] sm:$0xff]  ;;  %v54_v17 = vld [vmem:[%s706_s0 + $0xb0] sm:$0xff]  ;;  %v55_v23 = vld [vmem:[%s706_s0 + $0xb8] sm:$0xff] }
   0x9   :  { %332 = vst [vmem:[%s707_s1] sm:$0xff] %v296_v26  ;;  %v298_v41 = vpack.c.bf16 %v229_v33, %v228_v32  ;;  %v231_v42 = vmax.f32 %v87_v28, %v159_v34  ;;  %v161_v43 = vunpack.c.h.bf16 %v48_v25  ;;  %v90_v44 = vunpack.c.l.bf16 %v13_v30  ;;  %v20_v32 = vld [vmem:[%s706_s0 + $0xc0] sm:$0xff] }
   0xa   :  { %333 = vst [vmem:[%s707_s1 + $0x8] sm:$0xff] %v297_v31  ;;  %v232_v46 = vmax.f32 %v88_v37, %v160_v39  ;;  %v91_v47 = vunpack.c.h.bf16 %v13_v30  ;;  %v162_v48 = vunpack.c.l.bf16 %v49_v35  ;;  %v163_v49 = vunpack.c.h.bf16 %v49_v35  ;;  %v56_v33 = vld [vmem:[%s706_s0 + $0x120] sm:$0xff] }
   0xb   :  { %334 = vst [vmem:[%s707_s1 + $0x10] sm:$0xff] %v298_v41  ;;  %v299_v52 = vpack.c.bf16 %v231_v42, %v230_v36  ;;  %v233_v53 = vmax.f32 %v89_v38, %v161_v43  ;;  %v92_v54 = vunpack.c.l.bf16 %v14_v40  ;;  %v93_v55 = vunpack.c.h.bf16 %v14_v40  ;;  %v21_v38 = vld [vmem:[%s706_s0 + $0xc8] sm:$0xff] }
   0xc   :  { %v234_v56 = vmax.f32 %v90_v44, %v162_v48  ;;  %v235_v57 = vmax.f32 %v91_v47, %v163_v49  ;;  %v164_v58 = vunpack.c.l.bf16 %v50_v45  ;;  %v165_v59 = vunpack.c.h.bf16 %v50_v45  ;;  %v57_v43 = vld [vmem:[%s706_s0 + $0x128] sm:$0xff]  ;;  %v22_v48 = vld [vmem:[%s706_s0 + $0xd0] sm:$0xff] }
   0xd   :  { %335 = vst [vmem:[%s707_s1 + $0x18] sm:$0xff] %v299_v52  ;;  %v300_v62 = vpack.c.bf16 %v233_v53, %v232_v46  ;;  %v94_v63 = vunpack.c.l.bf16 %v15_v50  ;;  %v95_v0 = vunpack.c.h.bf16 %v15_v50  ;;  %v166_v1 = vunpack.c.l.bf16 %v51_v51  ;;  %v58_v53 = vld [vmem:[%s706_s0 + $0x130] sm:$0xff] }
   0xe   :  { %v301_v3 = vpack.c.bf16 %v235_v57, %v234_v56  ;;  %v236_v4 = vmax.f32 %v92_v54, %v164_v58  ;;  %v237_v5 = vmax.f32 %v93_v55, %v165_v59  ;;  %v167_v6 = vunpack.c.h.bf16 %v51_v51  ;;  %v23_v58 = vld [vmem:[%s706_s0 + $0xd8] sm:$0xff] }
   0xf   :  { %336 = vst [vmem:[%s707_s1 + $0x20] sm:$0xff] %v300_v62  ;;  %v238_v8 = vmax.f32 %v94_v63, %v166_v1  ;;  %v96_v9 = vunpack.c.l.bf16 %v16_v60  ;;  %v97_v10 = vunpack.c.h.bf16 %v16_v60  ;;  %v168_v11 = vunpack.c.l.bf16 %v52_v61  ;;  %v59_v59 = vld [vmem:[%s706_s0 + $0x138] sm:$0xff] }
  0x10   :  { %337 = vst [vmem:[%s707_s1 + $0x28] sm:$0xff] %v301_v3  ;;  %v302_v13 = vpack.c.bf16 %v237_v5, %v236_v4  ;;  %v239_v14 = vmax.f32 %v95_v0, %v167_v6  ;;  %v169_v15 = vunpack.c.h.bf16 %v52_v61  ;;  %v98_v16 = vunpack.c.l.bf16 %v17_v2  ;;  %v24_v4 = vld [vmem:[%s706_s0 + $0xe0] sm:$0xff] }
  0x11   :  { %v240_v18 = vmax.f32 %v96_v9, %v168_v11  ;;  %v99_v19 = vunpack.c.h.bf16 %v17_v2  ;;  %v170_v20 = vunpack.c.l.bf16 %v53_v7  ;;  %v171_v21 = vunpack.c.h.bf16 %v53_v7  ;;  %v60_v5 = vld [vmem:[%s706_s0 + $0x140] sm:$0xff] }
  0x12   :  { %338 = vst [vmem:[%s707_s1 + $0x30] sm:$0xff] %v302_v13  ;;  %v303_v24 = vpack.c.bf16 %v239_v14, %v238_v8  ;;  %v241_v25 = vmax.f32 %v97_v10, %v169_v15  ;;  %v100_v26 = vunpack.c.l.bf16 %v18_v12  ;;  %v101_v27 = vunpack.c.h.bf16 %v18_v12  ;;  %v25_v10 = vld [vmem:[%s706_s0 + $0xe8] sm:$0xff] }
  0x13   :  { %v242_v28 = vmax.f32 %v98_v16, %v170_v20  ;;  %v243_v29 = vmax.f32 %v99_v19, %v171_v21  ;;  %v172_v30 = vunpack.c.l.bf16 %v54_v17  ;;  %v173_v31 = vunpack.c.h.bf16 %v54_v17  ;;  %v61_v15 = vld [vmem:[%s706_s0 + $0x148] sm:$0xff]  ;;  %v26_v20 = vld [vmem:[%s706_s0 + $0xf0] sm:$0xff] }
  0x14   :  { %339 = vst [vmem:[%s707_s1 + $0x38] sm:$0xff] %v303_v24  ;;  %v304_v34 = vpack.c.bf16 %v241_v25, %v240_v18  ;;  %v102_v35 = vunpack.c.l.bf16 %v19_v22  ;;  %v103_v36 = vunpack.c.h.bf16 %v19_v22  ;;  %v174_v37 = vunpack.c.l.bf16 %v55_v23  ;;  %v62_v25 = vld [vmem:[%s706_s0 + $0x150] sm:$0xff] }
  0x15   :  { %v305_v39 = vpack.c.bf16 %v243_v29, %v242_v28  ;;  %v244_v40 = vmax.f32 %v100_v26, %v172_v30  ;;  %v245_v41 = vmax.f32 %v101_v27, %v173_v31  ;;  %v175_v42 = vunpack.c.h.bf16 %v55_v23  ;;  %v27_v30 = vld [vmem:[%s706_s0 + $0xf8] sm:$0xff] }
  0x16   :  { %340 = vst [vmem:[%s707_s1 + $0x40] sm:$0xff] %v304_v34  ;;  %v246_v44 = vmax.f32 %v102_v35, %v174_v37  ;;  %v104_v45 = vunpack.c.l.bf16 %v20_v32  ;;  %v105_v46 = vunpack.c.h.bf16 %v20_v32  ;;  %v176_v47 = vunpack.c.l.bf16 %v56_v33  ;;  %v63_v31 = vld [vmem:[%s706_s0 + $0x158] sm:$0xff] }
  0x17   :  { %341 = vst [vmem:[%s707_s1 + $0x48] sm:$0xff] %v305_v39  ;;  %v306_v49 = vpack.c.bf16 %v245_v41, %v244_v40  ;;  %v247_v50 = vmax.f32 %v103_v36, %v175_v42  ;;  %v177_v51 = vunpack.c.h.bf16 %v56_v33  ;;  %v106_v52 = vunpack.c.l.bf16 %v21_v38  ;;  %v28_v40 = vld [vmem:[%s706_s0 + $0x100] sm:$0xff] }
  0x18   :  { %v248_v54 = vmax.f32 %v104_v45, %v176_v47  ;;  %v107_v55 = vunpack.c.h.bf16 %v21_v38  ;;  %v178_v56 = vunpack.c.l.bf16 %v57_v43  ;;  %v179_v57 = vunpack.c.h.bf16 %v57_v43  ;;  %v64_v41 = vld [vmem:[%s706_s0 + $0x160] sm:$0xff] }
  0x19   :  { %342 = vst [vmem:[%s707_s1 + $0x50] sm:$0xff] %v306_v49  ;;  %v307_v60 = vpack.c.bf16 %v247_v50, %v246_v44  ;;  %v249_v61 = vmax.f32 %v105_v46, %v177_v51  ;;  %v108_v62 = vunpack.c.l.bf16 %v22_v48  ;;  %v109_v63 = vunpack.c.h.bf16 %v22_v48  ;;  %v29_v46 = vld [vmem:[%s706_s0 + $0x108] sm:$0xff] }
  0x1a   :  { %v250_v0 = vmax.f32 %v106_v52, %v178_v56  ;;  %v251_v1 = vmax.f32 %v107_v55, %v179_v57  ;;  %v180_v2 = vunpack.c.l.bf16 %v58_v53  ;;  %v181_v3 = vunpack.c.h.bf16 %v58_v53  ;;  %v65_v51 = vld [vmem:[%s706_s0 + $0x168] sm:$0xff]  ;;  %v30_v56 = vld [vmem:[%s706_s0 + $0x110] sm:$0xff] }
  0x1b   :  { %343 = vst [vmem:[%s707_s1 + $0x58] sm:$0xff] %v307_v60  ;;  %v308_v6 = vpack.c.bf16 %v249_v61, %v248_v54  ;;  %v110_v7 = vunpack.c.l.bf16 %v23_v58  ;;  %v111_v8 = vunpack.c.h.bf16 %v23_v58  ;;  %v182_v9 = vunpack.c.l.bf16 %v59_v59  ;;  %v66_v61 = vld [vmem:[%s706_s0 + $0x170] sm:$0xff] }
  0x1c   :  { %v309_v11 = vpack.c.bf16 %v251_v1, %v250_v0  ;;  %v252_v12 = vmax.f32 %v108_v62, %v180_v2  ;;  %v253_v13 = vmax.f32 %v109_v63, %v181_v3  ;;  %v183_v14 = vunpack.c.h.bf16 %v59_v59  ;;  %v31_v2 = vld [vmem:[%s706_s0 + $0x118] sm:$0xff] }
  0x1d   :  { %344 = vst [vmem:[%s707_s1 + $0x60] sm:$0xff] %v308_v6  ;;  %v254_v16 = vmax.f32 %v110_v7, %v182_v9  ;;  %v112_v17 = vunpack.c.l.bf16 %v24_v4  ;;  %v113_v18 = vunpack.c.h.bf16 %v24_v4  ;;  %v184_v19 = vunpack.c.l.bf16 %v60_v5  ;;  %v67_v3 = vld [vmem:[%s706_s0 + $0x178] sm:$0xff] }
  0x1e   :  { %345 = vst [vmem:[%s707_s1 + $0x68] sm:$0xff] %v309_v11  ;;  %v310_v21 = vpack.c.bf16 %v253_v13, %v252_v12  ;;  %v255_v22 = vmax.f32 %v111_v8, %v183_v14  ;;  %v185_v23 = vunpack.c.h.bf16 %v60_v5  ;;  %v114_v24 = vunpack.c.l.bf16 %v25_v10  ;;  %v32_v12 = vld [vmem:[%s706_s0 + $0x180] sm:$0xff] }
  0x1f   :  { %v256_v26 = vmax.f32 %v112_v17, %v184_v19  ;;  %v115_v27 = vunpack.c.h.bf16 %v25_v10  ;;  %v186_v28 = vunpack.c.l.bf16 %v61_v15  ;;  %v187_v29 = vunpack.c.h.bf16 %v61_v15  ;;  %v68_v13 = vld [vmem:[%s706_s0 + $0x1e0] sm:$0xff] }
  0x20   :  { %346 = vst [vmem:[%s707_s1 + $0x70] sm:$0xff] %v310_v21  ;;  %v311_v32 = vpack.c.bf16 %v255_v22, %v254_v16  ;;  %v257_v33 = vmax.f32 %v113_v18, %v185_v23  ;;  %v116_v34 = vunpack.c.l.bf16 %v26_v20  ;;  %v117_v35 = vunpack.c.h.bf16 %v26_v20  ;;  %v33_v18 = vld [vmem:[%s706_s0 + $0x188] sm:$0xff] }
  0x21   :  { %v258_v36 = vmax.f32 %v114_v24, %v186_v28  ;;  %v259_v37 = vmax.f32 %v115_v27, %v187_v29  ;;  %v188_v38 = vunpack.c.l.bf16 %v62_v25  ;;  %v189_v39 = vunpack.c.h.bf16 %v62_v25  ;;  %v69_v23 = vld [vmem:[%s706_s0 + $0x1e8] sm:$0xff]  ;;  %v34_v28 = vld [vmem:[%s706_s0 + $0x190] sm:$0xff] }
  0x22   :  { %347 = vst [vmem:[%s707_s1 + $0x78] sm:$0xff] %v311_v32  ;;  %v312_v42 = vpack.c.bf16 %v257_v33, %v256_v26  ;;  %v118_v43 = vunpack.c.l.bf16 %v27_v30  ;;  %v119_v44 = vunpack.c.h.bf16 %v27_v30  ;;  %v190_v45 = vunpack.c.l.bf16 %v63_v31  ;;  %v70_v33 = vld [vmem:[%s706_s0 + $0x1f0] sm:$0xff] }
  0x23   :  { %v313_v47 = vpack.c.bf16 %v259_v37, %v258_v36  ;;  %v260_v48 = vmax.f32 %v116_v34, %v188_v38  ;;  %v261_v49 = vmax.f32 %v117_v35, %v189_v39  ;;  %v191_v50 = vunpack.c.h.bf16 %v63_v31  ;;  %v35_v38 = vld [vmem:[%s706_s0 + $0x198] sm:$0xff] }
  0x24   :  { %348 = vst [vmem:[%s707_s1 + $0x80] sm:$0xff] %v312_v42  ;;  %v262_v52 = vmax.f32 %v118_v43, %v190_v45  ;;  %v120_v53 = vunpack.c.l.bf16 %v28_v40  ;;  %v121_v54 = vunpack.c.h.bf16 %v28_v40  ;;  %v192_v55 = vunpack.c.l.bf16 %v64_v41  ;;  %v71_v39 = vld [vmem:[%s706_s0 + $0x1f8] sm:$0xff] }
  0x25   :  { %349 = vst [vmem:[%s707_s1 + $0x88] sm:$0xff] %v313_v47  ;;  %v314_v57 = vpack.c.bf16 %v261_v49, %v260_v48  ;;  %v263_v58 = vmax.f32 %v119_v44, %v191_v50  ;;  %v193_v59 = vunpack.c.h.bf16 %v64_v41  ;;  %v122_v60 = vunpack.c.l.bf16 %v29_v46  ;;  %v36_v48 = vld [vmem:[%s706_s0 + $0x1a0] sm:$0xff] }
  0x26   :  { %v264_v62 = vmax.f32 %v120_v53, %v192_v55  ;;  %v123_v63 = vunpack.c.h.bf16 %v29_v46  ;;  %v194_v0 = vunpack.c.l.bf16 %v65_v51  ;;  %v195_v1 = vunpack.c.h.bf16 %v65_v51  ;;  %v72_v49 = vld [vmem:[%s706_s0 + $0x200] sm:$0xff] }
  0x27   :  { %350 = vst [vmem:[%s707_s1 + $0x90] sm:$0xff] %v314_v57  ;;  %v315_v4 = vpack.c.bf16 %v263_v58, %v262_v52  ;;  %v265_v5 = vmax.f32 %v121_v54, %v193_v59  ;;  %v124_v6 = vunpack.c.l.bf16 %v30_v56  ;;  %v125_v7 = vunpack.c.h.bf16 %v30_v56  ;;  %v37_v54 = vld [vmem:[%s706_s0 + $0x1a8] sm:$0xff] }
  0x28   :  { %v266_v8 = vmax.f32 %v122_v60, %v194_v0  ;;  %v267_v9 = vmax.f32 %v123_v63, %v195_v1  ;;  %v196_v10 = vunpack.c.l.bf16 %v66_v61  ;;  %v197_v11 = vunpack.c.h.bf16 %v66_v61  ;;  %v73_v59 = vld [vmem:[%s706_s0 + $0x208] sm:$0xff]  ;;  %v38_v0 = vld [vmem:[%s706_s0 + $0x1b0] sm:$0xff] }
  0x29   :  { %351 = vst [vmem:[%s707_s1 + $0x98] sm:$0xff] %v315_v4  ;;  %v316_v14 = vpack.c.bf16 %v265_v5, %v264_v62  ;;  %v126_v15 = vunpack.c.l.bf16 %v31_v2  ;;  %v127_v16 = vunpack.c.h.bf16 %v31_v2  ;;  %v198_v17 = vunpack.c.l.bf16 %v67_v3  ;;  %v74_v5 = vld [vmem:[%s706_s0 + $0x210] sm:$0xff] }
  0x2a   :  { %v317_v19 = vpack.c.bf16 %v267_v9, %v266_v8  ;;  %v268_v20 = vmax.f32 %v124_v6, %v196_v10  ;;  %v269_v21 = vmax.f32 %v125_v7, %v197_v11  ;;  %v199_v22 = vunpack.c.h.bf16 %v67_v3  ;;  %v39_v10 = vld [vmem:[%s706_s0 + $0x1b8] sm:$0xff] }
  0x2b   :  { %352 = vst [vmem:[%s707_s1 + $0xa0] sm:$0xff] %v316_v14  ;;  %v270_v24 = vmax.f32 %v126_v15, %v198_v17  ;;  %v128_v25 = vunpack.c.l.bf16 %v32_v12  ;;  %v129_v26 = vunpack.c.h.bf16 %v32_v12  ;;  %v200_v27 = vunpack.c.l.bf16 %v68_v13  ;;  %v75_v11 = vld [vmem:[%s706_s0 + $0x218] sm:$0xff] }
  0x2c   :  { %353 = vst [vmem:[%s707_s1 + $0xa8] sm:$0xff] %v317_v19  ;;  %v318_v29 = vpack.c.bf16 %v269_v21, %v268_v20  ;;  %v271_v30 = vmax.f32 %v127_v16, %v199_v22  ;;  %v201_v31 = vunpack.c.h.bf16 %v68_v13  ;;  %v130_v32 = vunpack.c.l.bf16 %v33_v18  ;;  %v40_v20 = vld [vmem:[%s706_s0 + $0x1c0] sm:$0xff] }
  0x2d   :  { %v272_v34 = vmax.f32 %v128_v25, %v200_v27  ;;  %v131_v35 = vunpack.c.h.bf16 %v33_v18  ;;  %v202_v36 = vunpack.c.l.bf16 %v69_v23  ;;  %v203_v37 = vunpack.c.h.bf16 %v69_v23  ;;  %v76_v21 = vld [vmem:[%s706_s0 + $0x220] sm:$0xff] }
  0x2e   :  { %354 = vst [vmem:[%s707_s1 + $0xb0] sm:$0xff] %v318_v29  ;;  %v319_v40 = vpack.c.bf16 %v271_v30, %v270_v24  ;;  %v273_v41 = vmax.f32 %v129_v26, %v201_v31  ;;  %v132_v42 = vunpack.c.l.bf16 %v34_v28  ;;  %v133_v43 = vunpack.c.h.bf16 %v34_v28  ;;  %v41_v26 = vld [vmem:[%s706_s0 + $0x1c8] sm:$0xff] }
  0x2f   :  { %v274_v44 = vmax.f32 %v130_v32, %v202_v36  ;;  %v275_v45 = vmax.f32 %v131_v35, %v203_v37  ;;  %v204_v46 = vunpack.c.l.bf16 %v70_v33  ;;  %v205_v47 = vunpack.c.h.bf16 %v70_v33  ;;  %v77_v31 = vld [vmem:[%s706_s0 + $0x228] sm:$0xff]  ;;  %v42_v36 = vld [vmem:[%s706_s0 + $0x1d0] sm:$0xff] }
  0x30   :  { %355 = vst [vmem:[%s707_s1 + $0xb8] sm:$0xff] %v319_v40  ;;  %v320_v50 = vpack.c.bf16 %v273_v41, %v272_v34  ;;  %v134_v51 = vunpack.c.l.bf16 %v35_v38  ;;  %v135_v52 = vunpack.c.h.bf16 %v35_v38  ;;  %v206_v53 = vunpack.c.l.bf16 %v71_v39  ;;  %v78_v41 = vld [vmem:[%s706_s0 + $0x230] sm:$0xff] }
  0x31   :  { %v321_v55 = vpack.c.bf16 %v275_v45, %v274_v44  ;;  %v276_v56 = vmax.f32 %v132_v42, %v204_v46  ;;  %v277_v57 = vmax.f32 %v133_v43, %v205_v47  ;;  %v207_v58 = vunpack.c.h.bf16 %v71_v39  ;;  %v43_v46 = vld [vmem:[%s706_s0 + $0x1d8] sm:$0xff] }
  0x32   :  { %356 = vst [vmem:[%s707_s1 + $0xc0] sm:$0xff] %v320_v50  ;;  %v278_v60 = vmax.f32 %v134_v51, %v206_v53  ;;  %v136_v61 = vunpack.c.l.bf16 %v36_v48  ;;  %v137_v62 = vunpack.c.h.bf16 %v36_v48  ;;  %v208_v63 = vunpack.c.l.bf16 %v72_v49  ;;  %v79_v47 = vld [vmem:[%s706_s0 + $0x238] sm:$0xff] }
  0x33   :  { %357 = vst [vmem:[%s707_s1 + $0xc8] sm:$0xff] %v321_v55  ;;  %v322_v1 = vpack.c.bf16 %v277_v57, %v276_v56  ;;  %v279_v2 = vmax.f32 %v135_v52, %v207_v58  ;;  %v209_v3 = vunpack.c.h.bf16 %v72_v49  ;;  %v138_v4 = vunpack.c.l.bf16 %v37_v54 }
  0x34   :  { %v280_v6 = vmax.f32 %v136_v61, %v208_v63  ;;  %v139_v7 = vunpack.c.h.bf16 %v37_v54  ;;  %v210_v8 = vunpack.c.l.bf16 %v73_v59  ;;  %v211_v9 = vunpack.c.h.bf16 %v73_v59 }
  0x35   :  { %358 = vst [vmem:[%s707_s1 + $0xd0] sm:$0xff] %v322_v1  ;;  %v323_v12 = vpack.c.bf16 %v279_v2, %v278_v60  ;;  %v281_v13 = vmax.f32 %v137_v62, %v209_v3  ;;  %v140_v14 = vunpack.c.l.bf16 %v38_v0  ;;  %v141_v15 = vunpack.c.h.bf16 %v38_v0 }
  0x36   :  { %v282_v16 = vmax.f32 %v138_v4, %v210_v8  ;;  %v283_v17 = vmax.f32 %v139_v7, %v211_v9  ;;  %v212_v18 = vunpack.c.l.bf16 %v74_v5  ;;  %v213_v19 = vunpack.c.h.bf16 %v74_v5 }
  0x37   :  { %359 = vst [vmem:[%s707_s1 + $0xd8] sm:$0xff] %v323_v12  ;;  %v324_v22 = vpack.c.bf16 %v281_v13, %v280_v6  ;;  %v142_v23 = vunpack.c.l.bf16 %v39_v10  ;;  %v143_v24 = vunpack.c.h.bf16 %v39_v10  ;;  %v214_v25 = vunpack.c.l.bf16 %v75_v11 }
  0x38   :  { %v325_v27 = vpack.c.bf16 %v283_v17, %v282_v16  ;;  %v284_v28 = vmax.f32 %v140_v14, %v212_v18  ;;  %v285_v29 = vmax.f32 %v141_v15, %v213_v19  ;;  %v215_v30 = vunpack.c.h.bf16 %v75_v11 }
  0x39   :  { %360 = vst [vmem:[%s707_s1 + $0xe0] sm:$0xff] %v324_v22  ;;  %v286_v32 = vmax.f32 %v142_v23, %v214_v25  ;;  %v144_v33 = vunpack.c.l.bf16 %v40_v20  ;;  %v145_v34 = vunpack.c.h.bf16 %v40_v20  ;;  %v216_v35 = vunpack.c.l.bf16 %v76_v21 }
  0x3a   :  { %361 = vst [vmem:[%s707_s1 + $0xe8] sm:$0xff] %v325_v27  ;;  %v326_v37 = vpack.c.bf16 %v285_v29, %v284_v28  ;;  %v287_v38 = vmax.f32 %v143_v24, %v215_v30  ;;  %v217_v39 = vunpack.c.h.bf16 %v76_v21  ;;  %v146_v40 = vunpack.c.l.bf16 %v41_v26 }
  0x3b   :  { %v288_v42 = vmax.f32 %v144_v33, %v216_v35  ;;  %v147_v43 = vunpack.c.h.bf16 %v41_v26  ;;  %v218_v44 = vunpack.c.l.bf16 %v77_v31  ;;  %v219_v45 = vunpack.c.h.bf16 %v77_v31 }
  0x3c   :  { %362 = vst [vmem:[%s707_s1 + $0xf0] sm:$0xff] %v326_v37  ;;  %v327_v48 = vpack.c.bf16 %v287_v38, %v286_v32  ;;  %v289_v49 = vmax.f32 %v145_v34, %v217_v39  ;;  %v148_v50 = vunpack.c.l.bf16 %v42_v36  ;;  %v149_v51 = vunpack.c.h.bf16 %v42_v36 }
  0x3d   :  { %v290_v52 = vmax.f32 %v146_v40, %v218_v44  ;;  %v291_v53 = vmax.f32 %v147_v43, %v219_v45  ;;  %v220_v54 = vunpack.c.l.bf16 %v78_v41  ;;  %v221_v55 = vunpack.c.h.bf16 %v78_v41 }
  0x3e   :  { %363 = vst [vmem:[%s707_s1 + $0xf8] sm:$0xff] %v327_v48  ;;  %v328_v56 = vpack.c.bf16 %v289_v49, %v288_v42  ;;  %v150_v57 = vunpack.c.l.bf16 %v43_v46  ;;  %v151_v58 = vunpack.c.h.bf16 %v43_v46  ;;  %v222_v59 = vunpack.c.l.bf16 %v79_v47 }
  0x3f   :  { %v329_v60 = vpack.c.bf16 %v291_v53, %v290_v52  ;;  %v292_v61 = vmax.f32 %v148_v50, %v220_v54  ;;  %v293_v62 = vmax.f32 %v149_v51, %v221_v55  ;;  %v223_v63 = vunpack.c.h.bf16 %v79_v47 }
  0x40   :  { %364 = vst [vmem:[%s707_s1 + $0x100] sm:$0xff] %v328_v56  ;;  %v294_v0 = vmax.f32 %v150_v57, %v222_v59 }
  0x41   :  { %365 = vst [vmem:[%s707_s1 + $0x108] sm:$0xff] %v329_v60  ;;  %v330_v1 = vpack.c.bf16 %v293_v62, %v292_v61  ;;  %v295_v2 = vmax.f32 %v151_v58, %v223_v63 }
  0x43   :  { %366 = vst [vmem:[%s707_s1 + $0x110] sm:$0xff] %v330_v1  ;;  %v331_v3 = vpack.c.bf16 %v295_v2, %v294_v0 }
  0x45   :  { %367 = vst [vmem:[%s707_s1 + $0x118] sm:$0xff] %v331_v3 }

// kernel: mnist_net_forward.10
= control target key start
LH: loop header
LB: loop body
LE: loop exit
PB: predicated region body
PF: predicated region fallthrough
CT: control target
= control target key end

     0   :  { %s537_s6 = smov 0   ;;  %s606_s0 = inlined_call_operand.vmem [shape: bf16[512,256], index: 0, kind: input, shape index: {}]   ;;  %s607_s1 = inlined_call_operand.vmem [shape: bf16[512,128], index: 1, kind: output, shape index: {}]  }
   0x1 LB: > { %s403_s7 = sadd.s32 4294967295, %s525_s6   ;;  %p407_p0 = scmp.ge.s32.totalorder %s525_s6, 1  ;;  %s525_s6 = sphi %s537_s6, %s11_s6  }
   0x2   : > { %p89_p1 = scmp.lt.s32.totalorder %s525_s6, 3 }
   0x4   : > { %p90_p2 = pnand %p407_p0, %p89_p1 }
   0x5   : > { %s408_s8 = sshll.u32 (!%p90_p2), %s403_s7, 5 }
   0x6   : > { %93 = sbr.rel (%p90_p2) target bundleno = 48 (0x30), region = 24  ;;  %p111_p3 = scmp.lt.s32.totalorder (!%p90_p2), %s408_s8, 63 }
   0xb   : > { %s609_s8 = smov (!%p111_p3, %s408_s8), 63 }
   0xc   : > { %s415_s9 = sshll.u32 %s609_s8, 3  ;;  %s412_s13 = sshll.u32 %s609_s8, 2 }
   0xd   : > { %s548_s12 = scalar_lea.vmem %s606_s0, %s415_s9  ;;  %s561_s16 = scalar_lea.vmem %s607_s1, %s412_s13 }
   0xe   : > { %v123_v0 = vld [vmem:[%s548_s12] sm:$0xff]   ;;  %v124_v1 = vld [vmem:[%s548_s12 + $0x8] sm:$0xff]   ;;  %v125_v2 = vld [vmem:[%s548_s12 + $0x10] sm:$0xff]  }
   0xf   : > { %v187_v3 = vunpack.c.l.bf16 %v123_v0  ;;  %v188_v4 = vunpack.c.l.bf16 %v124_v1  ;;  %v219_v5 = vunpack.c.h.bf16 %v123_v0  ;;  %v220_v6 = vunpack.c.h.bf16 %v124_v1  ;;  %v126_v7 = vld [vmem:[%s548_s12 + $0x18] sm:$0xff]   ;;  %v127_v8 = vld [vmem:[%s548_s12 + $0x20] sm:$0xff]   ;;  %v128_v9 = vld [vmem:[%s548_s12 + $0x28] sm:$0xff]  }
  0x10   : > { %v189_v10 = vunpack.c.l.bf16 %v125_v2  ;;  %v190_v11 = vunpack.c.l.bf16 %v126_v7  ;;  %v221_v12 = vunpack.c.h.bf16 %v125_v2  ;;  %v222_v13 = vunpack.c.h.bf16 %v126_v7  ;;  %v129_v14 = vld [vmem:[%s548_s12 + $0x30] sm:$0xff]   ;;  %v130_v15 = vld [vmem:[%s548_s12 + $0x38] sm:$0xff]   ;;  %v131_v24 = vld [vmem:[%s548_s12 + $0x40] sm:$0xff]  }
  0x11   : > { %v251_v16 = vmax.f32 %v187_v3, %v219_v5  ;;  %v252_v17 = vmax.f32 %v188_v4, %v220_v6  ;;  %v191_v18 = vunpack.c.l.bf16 %v127_v8  ;;  %v192_v19 = vunpack.c.l.bf16 %v128_v9  ;;  %v132_v25 = vld [vmem:[%s548_s12 + $0x48] sm:$0xff]   ;;  %v133_v30 = vld [vmem:[%s548_s12 + $0x50] sm:$0xff]   ;;  %v134_v35 = vld [vmem:[%s548_s12 + $0x58] sm:$0xff]  }
  0x12   : > { %v253_v20 = vmax.f32 %v189_v10, %v221_v12  ;;  %v254_v21 = vmax.f32 %v190_v11, %v222_v13  ;;  %v223_v22 = vunpack.c.h.bf16 %v127_v8  ;;  %v224_v23 = vunpack.c.h.bf16 %v128_v9  ;;  %v135_v40 = vld [vmem:[%s548_s12 + $0x60] sm:$0xff]   ;;  %v136_v41 = vld [vmem:[%s548_s12 + $0x68] sm:$0xff]   ;;  %v137_v50 = vld [vmem:[%s548_s12 + $0x70] sm:$0xff]  }
  0x13   : > { %v419_v26 = vpack.c.bf16 %v252_v17, %v251_v16  ;;  %v193_v27 = vunpack.c.l.bf16 %v129_v14  ;;  %v194_v28 = vunpack.c.l.bf16 %v130_v15  ;;  %v225_v29 = vunpack.c.h.bf16 %v129_v14  ;;  %v138_v51 = vld [vmem:[%s548_s12 + $0x78] sm:$0xff]   ;;  %v139_v60 = vld [vmem:[%s548_s12 + $0x80] sm:$0xff]   ;;  %v140_v61 = vld [vmem:[%s548_s12 + $0x88] sm:$0xff]  }
  0x14   : > { %v424_v31 = vpack.c.bf16 %v254_v21, %v253_v20  ;;  %v255_v32 = vmax.f32 %v191_v18, %v223_v22  ;;  %v256_v33 = vmax.f32 %v192_v19, %v224_v23  ;;  %v226_v34 = vunpack.c.h.bf16 %v130_v15  ;;  %v141_v2 = vld [vmem:[%s548_s12 + $0x90] sm:$0xff]   ;;  %v142_v7 = vld [vmem:[%s548_s12 + $0x98] sm:$0xff]   ;;  %v143_v12 = vld [vmem:[%s548_s12 + $0xa0] sm:$0xff]  }
  0x15   : > { %420 = vst [vmem:[%s561_s16] sm:$0xff] %v419_v26   ;;  %v257_v36 = vmax.f32 %v193_v27, %v225_v29  ;;  %v195_v37 = vunpack.c.l.bf16 %v131_v24  ;;  %v196_v38 = vunpack.c.l.bf16 %v132_v25  ;;  %v227_v39 = vunpack.c.h.bf16 %v131_v24  ;;  %v144_v13 = vld [vmem:[%s548_s12 + $0xa8] sm:$0xff]   ;;  %v145_v22 = vld [vmem:[%s548_s12 + $0xb0] sm:$0xff]   ;;  %v146_v23 = vld [vmem:[%s548_s12 + $0xb8] sm:$0xff]  }
  0x16   : > { %496 = vst [vmem:[%s561_s16 + $0x8] sm:$0xff] %v424_v31   ;;  %v429_v42 = vpack.c.bf16 %v256_v33, %v255_v32  ;;  %v258_v43 = vmax.f32 %v194_v28, %v226_v34  ;;  %v228_v44 = vunpack.c.h.bf16 %v132_v25  ;;  %v197_v45 = vunpack.c.l.bf16 %v133_v30  ;;  %v147_v32 = vld [vmem:[%s548_s12 + $0xc0] sm:$0xff]   ;;  %v148_v33 = vld [vmem:[%s548_s12 + $0xc8] sm:$0xff]  }
  0x17   : > { %v259_v46 = vmax.f32 %v195_v37, %v227_v39  ;;  %v198_v47 = vunpack.c.l.bf16 %v134_v35  ;;  %v229_v48 = vunpack.c.h.bf16 %v133_v30  ;;  %v230_v49 = vunpack.c.h.bf16 %v134_v35 }
  0x18   : > { %497 = vst [vmem:[%s561_s16 + $0x10] sm:$0xff] %v429_v42   ;;  %v434_v52 = vpack.c.bf16 %v258_v43, %v257_v36  ;;  %v260_v53 = vmax.f32 %v196_v38, %v228_v44  ;;  %v199_v54 = vunpack.c.l.bf16 %v135_v40  ;;  %v200_v55 = vunpack.c.l.bf16 %v136_v41  ;;  %v149_v38 = vld [vmem:[%s548_s12 + $0xd0] sm:$0xff]   ;;  %v150_v43 = vld [vmem:[%s548_s12 + $0xd8] sm:$0xff]  }
  0x19   : > { %v261_v56 = vmax.f32 %v197_v45, %v229_v48  ;;  %v262_v57 = vmax.f32 %v198_v47, %v230_v49  ;;  %v231_v58 = vunpack.c.h.bf16 %v135_v40  ;;  %v232_v59 = vunpack.c.h.bf16 %v136_v41  ;;  %v151_v48 = vld [vmem:[%s548_s12 + $0xe0] sm:$0xff]   ;;  %v152_v49 = vld [vmem:[%s548_s12 + $0xe8] sm:$0xff]  }
  0x1a   : > { %498 = vst [vmem:[%s561_s16 + $0x18] sm:$0xff] %v434_v52   ;;  %v439_v62 = vpack.c.bf16 %v260_v53, %v259_v46  ;;  %v201_v63 = vunpack.c.l.bf16 %v137_v50  ;;  %v202_v0 = vunpack.c.l.bf16 %v138_v51  ;;  %v233_v1 = vunpack.c.h.bf16 %v137_v50 }
  0x1b   : > { %v444_v3 = vpack.c.bf16 %v262_v57, %v261_v56  ;;  %v263_v4 = vmax.f32 %v199_v54, %v231_v58  ;;  %v264_v5 = vmax.f32 %v200_v55, %v232_v59  ;;  %v234_v6 = vunpack.c.h.bf16 %v138_v51  ;;  %v153_v58 = vld [vmem:[%s548_s12 + $0xf0] sm:$0xff]   ;;  %v154_v59 = vld [vmem:[%s548_s12 + $0xf8] sm:$0xff]  }
  0x1c   : > { %499 = vst [vmem:[%s561_s16 + $0x20] sm:$0xff] %v439_v62   ;;  %v265_v8 = vmax.f32 %v201_v63, %v233_v1  ;;  %v203_v9 = vunpack.c.l.bf16 %v139_v60  ;;  %v204_v10 = vunpack.c.l.bf16 %v140_v61  ;;  %v235_v11 = vunpack.c.h.bf16 %v139_v60 }
  0x1d   : > { %500 = vst [vmem:[%s561_s16 + $0x28] sm:$0xff] %v444_v3   ;;  %v449_v14 = vpack.c.bf16 %v264_v5, %v263_v4  ;;  %v266_v15 = vmax.f32 %v202_v0, %v234_v6  ;;  %v236_v16 = vunpack.c.h.bf16 %v140_v61  ;;  %v205_v17 = vunpack.c.l.bf16 %v141_v2 }
  0x1e   : > { %v267_v18 = vmax.f32 %v203_v9, %v235_v11  ;;  %v206_v19 = vunpack.c.l.bf16 %v142_v7  ;;  %v237_v20 = vunpack.c.h.bf16 %v141_v2  ;;  %v238_v21 = vunpack.c.h.bf16 %v142_v7 }
  0x1f   : > { %501 = vst [vmem:[%s561_s16 + $0x30] sm:$0xff] %v449_v14   ;;  %v454_v24 = vpack.c.bf16 %v266_v15, %v265_v8  ;;  %v268_v25 = vmax.f32 %v204_v10, %v236_v16  ;;  %v207_v26 = vunpack.c.l.bf16 %v143_v12  ;;  %v208_v27 = vunpack.c.l.bf16 %v144_v13 }
  0x20   : > { %v269_v28 = vmax.f32 %v205_v17, %v237_v20  ;;  %v270_v29 = vmax.f32 %v206_v19, %v238_v21  ;;  %v239_v30 = vunpack.c.h.bf16 %v143_v12  ;;  %v240_v31 = vunpack.c.h.bf16 %v144_v13 }
  0x21   : > { %502 = vst [vmem:[%s561_s16 + $0x38] sm:$0xff] %v454_v24   ;;  %v459_v34 = vpack.c.bf16 %v268_v25, %v267_v18  ;;  %v209_v35 = vunpack.c.l.bf16 %v145_v22  ;;  %v210_v36 = vunpack.c.l.bf16 %v146_v23  ;;  %v241_v37 = vunpack.c.h.bf16 %v145_v22 }
  0x22   : > { %v464_v39 = vpack.c.bf16 %v270_v29, %v269_v28  ;;  %v271_v40 = vmax.f32 %v207_v26, %v239_v30  ;;  %v272_v41 = vmax.f32 %v208_v27, %v240_v31  ;;  %v242_v42 = vunpack.c.h.bf16 %v146_v23 }
  0x23   : > { %503 = vst [vmem:[%s561_s16 + $0x40] sm:$0xff] %v459_v34   ;;  %v273_v44 = vmax.f32 %v209_v35, %v241_v37  ;;  %v211_v45 = vunpack.c.l.bf16 %v147_v32  ;;  %v212_v46 = vunpack.c.l.bf16 %v148_v33  ;;  %v243_v47 = vunpack.c.h.bf16 %v147_v32 }
  0x24   : > { %504 = vst [vmem:[%s561_s16 + $0x48] sm:$0xff] %v464_v39   ;;  %v469_v50 = vpack.c.bf16 %v272_v41, %v271_v40  ;;  %v274_v51 = vmax.f32 %v210_v36, %v242_v42  ;;  %v244_v52 = vunpack.c.h.bf16 %v148_v33  ;;  %v213_v53 = vunpack.c.l.bf16 %v149_v38 }
  0x25   : > { %v275_v54 = vmax.f32 %v211_v45, %v243_v47  ;;  %v214_v55 = vunpack.c.l.bf16 %v150_v43  ;;  %v245_v56 = vunpack.c.h.bf16 %v149_v38  ;;  %v246_v57 = vunpack.c.h.bf16 %v150_v43 }
  0x26   : > { %505 = vst [vmem:[%s561_s16 + $0x50] sm:$0xff] %v469_v50   ;;  %v474_v60 = vpack.c.bf16 %v274_v51, %v273_v44  ;;  %v276_v61 = vmax.f32 %v212_v46, %v244_v52  ;;  %v215_v62 = vunpack.c.l.bf16 %v151_v48  ;;  %v216_v63 = vunpack.c.l.bf16 %v152_v49 }
  0x27   : > { %v277_v0 = vmax.f32 %v213_v53, %v245_v56  ;;  %v278_v1 = vmax.f32 %v214_v55, %v246_v57  ;;  %v247_v2 = vunpack.c.h.bf16 %v151_v48  ;;  %v248_v3 = vunpack.c.h.bf16 %v152_v49 }
  0x28   : > { %506 = vst [vmem:[%s561_s16 + $0x58] sm:$0xff] %v474_v60   ;;  %v479_v4 = vpack.c.bf16 %v276_v61, %v275_v54  ;;  %v217_v5 = vunpack.c.l.bf16 %v153_v58  ;;  %v218_v6 = vunpack.c.l.bf16 %v154_v59  ;;  %v249_v7 = vunpack.c.h.bf16 %v153_v58 }
  0x29   : > { %v484_v8 = vpack.c.bf16 %v278_v1, %v277_v0  ;;  %v279_v9 = vmax.f32 %v215_v62, %v247_v2  ;;  %v280_v10 = vmax.f32 %v216_v63, %v248_v3  ;;  %v250_v11 = vunpack.c.h.bf16 %v154_v59 }
  0x2a   : > { %507 = vst [vmem:[%s561_s16 + $0x60] sm:$0xff] %v479_v4   ;;  %v281_v12 = vmax.f32 %v217_v5, %v249_v7 }
  0x2b   : > { %508 = vst [vmem:[%s561_s16 + $0x68] sm:$0xff] %v484_v8   ;;  %v489_v13 = vpack.c.bf16 %v280_v10, %v279_v9  ;;  %v282_v14 = vmax.f32 %v218_v6, %v250_v11 }
  0x2d   : > { %509 = vst [vmem:[%s561_s16 + $0x70] sm:$0xff] %v489_v13   ;;  %v494_v15 = vpack.c.bf16 %v282_v14, %v281_v12 }
  0x2f   : > { %510 = vst [vmem:[%s561_s16 + $0x78] sm:$0xff] %v494_v15  }
  0x30 PF: > { %s11_s6 = sadd.s32 1, %s525_s6  }
  0x31   : > { %p8_p4 = scmp.ge.s32.totalorder %s11_s6, 4  }
  0x33   :  { %10 = sbr.rel (!%p8_p4) target bundleno = 1 (0x1), region = 54 }

// kernel: mnist_net_forward.12
= control target key start
LH: loop header
LB: loop body
LE: loop exit
PB: predicated region body
PF: predicated region fallthrough
CT: control target
= control target key end

     0   :  { %s98_s0 = inlined_call_operand.vmem [shape: bf16[8,2048], index: 0, kind: input, shape index: {}]   ;;  %s99_s1 = inlined_call_operand.vmem [shape: bf16[8,1024], index: 1, kind: output, shape index: {}]  }
   0x1   :  { %v8_v0 = vld [vmem:[%s98_s0] sm:$0xff]  ;;  %v9_v2 = vld [vmem:[%s98_s0 + $0x8] sm:$0xff]  ;;  %v10_v8 = vld [vmem:[%s98_s0 + $0x10] sm:$0xff] }
   0x2   :  { %v12_v1 = vld [vmem:[%s98_s0 + $0x20] sm:$0xff]  ;;  %v16_v3 = vunpack.c.l.bf16 %v8_v0  ;;  %v17_v4 = vunpack.c.h.bf16 %v8_v0  ;;  %v13_v7 = vld [vmem:[%s98_s0 + $0x28] sm:$0xff]  ;;  %v14_v9 = vld [vmem:[%s98_s0 + $0x30] sm:$0xff]  ;;  %v18_v10 = vunpack.c.l.bf16 %v9_v2  ;;  %v19_v11 = vunpack.c.h.bf16 %v9_v2 }
   0x3   :  { %v24_v5 = vunpack.c.l.bf16 %v12_v1  ;;  %v25_v6 = vunpack.c.h.bf16 %v12_v1  ;;  %v26_v12 = vunpack.c.l.bf16 %v13_v7  ;;  %v27_v13 = vunpack.c.h.bf16 %v13_v7  ;;  %v11_v14 = vld [vmem:[%s98_s0 + $0x18] sm:$0xff] }
   0x4   :  { %v15_v15 = vld [vmem:[%s98_s0 + $0x38] sm:$0xff]  ;;  %v20_v18 = vunpack.c.l.bf16 %v10_v8  ;;  %v21_v19 = vunpack.c.h.bf16 %v10_v8  ;;  %v28_v22 = vunpack.c.l.bf16 %v14_v9  ;;  %v29_v23 = vunpack.c.h.bf16 %v14_v9 }
   0x5   :  { %v32_v16 = vmax.f32 %v16_v3, %v24_v5  ;;  %v33_v17 = vmax.f32 %v17_v4, %v25_v6  ;;  %v34_v20 = vmax.f32 %v18_v10, %v26_v12  ;;  %v35_v21 = vmax.f32 %v19_v11, %v27_v13 }
   0x6   :  { %v22_v25 = vunpack.c.l.bf16 %v11_v14  ;;  %v23_v26 = vunpack.c.h.bf16 %v11_v14  ;;  %v30_v27 = vunpack.c.l.bf16 %v15_v15  ;;  %v36_v29 = vmax.f32 %v20_v18, %v28_v22 }
   0x7   :  { %v40_v24 = vpack.c.bf16 %v33_v17, %v32_v16  ;;  %v41_v28 = vpack.c.bf16 %v35_v21, %v34_v20  ;;  %v37_v30 = vmax.f32 %v21_v19, %v29_v23  ;;  %v31_v31 = vunpack.c.h.bf16 %v15_v15 }
   0x8   :  { %v38_v32 = vmax.f32 %v22_v25, %v30_v27 }
   0x9   :  { %44 = vst [vmem:[%s99_s1] sm:$0xff] %v40_v24  ;;  %v42_v33 = vpack.c.bf16 %v37_v30, %v36_v29  ;;  %v39_v34 = vmax.f32 %v23_v26, %v31_v31 }
   0xa   :  { %45 = vst [vmem:[%s99_s1 + $0x8] sm:$0xff] %v41_v28 }
   0xb   :  { %46 = vst [vmem:[%s99_s1 + $0x10] sm:$0xff] %v42_v33  ;;  %v43_v35 = vpack.c.bf16 %v39_v34, %v38_v32 }
   0xd   :  { %47 = vst [vmem:[%s99_s1 + $0x18] sm:$0xff] %v43_v35 }

// kernel: mnist_net_forward.13
= control target key start
LH: loop header
LB: loop body
LE: loop exit
PB: predicated region body
PF: predicated region fallthrough
CT: control target
= control target key end

     0   :  { %s98_s0 = inlined_call_operand.vmem [shape: bf16[32,256], index: 0, kind: input, shape index: {}]   ;;  %s99_s1 = inlined_call_operand.vmem [shape: bf16[32,128], index: 1, kind: output, shape index: {}]  }
   0x1   :  { %v41_v0 = vld [vmem:[%s98_s0] sm:$0xff]   ;;  %v66_v1 = vld [vmem:[%s98_s0 + $0x8] sm:$0xff]   ;;  %v67_v2 = vld [vmem:[%s98_s0 + $0x10] sm:$0xff]  }
   0x2   :  { %v42_v3 = vunpack.c.l.bf16 %v41_v0  ;;  %v43_v4 = vunpack.c.h.bf16 %v41_v0  ;;  %v46_v5 = vunpack.c.l.bf16 %v66_v1  ;;  %v47_v6 = vunpack.c.h.bf16 %v66_v1  ;;  %v68_v7 = vld [vmem:[%s98_s0 + $0x18] sm:$0xff]  }
   0x3   :  { %v50_v8 = vunpack.c.l.bf16 %v67_v2  ;;  %v51_v9 = vunpack.c.h.bf16 %v67_v2  ;;  %v54_v10 = vunpack.c.l.bf16 %v68_v7  ;;  %v55_v11 = vunpack.c.h.bf16 %v68_v7 }
   0x4   :  { %v24_v12 = vmax.f32 %v42_v3, %v43_v4  ;;  %v25_v13 = vmax.f32 %v46_v5, %v47_v6 }
   0x5   :  { %v26_v14 = vmax.f32 %v50_v8, %v51_v9  ;;  %v27_v15 = vmax.f32 %v54_v10, %v55_v11 }
   0x6   :  { %v59_v16 = vpack.c.bf16 %v25_v13, %v24_v12 }
   0x7   :  { %v64_v17 = vpack.c.bf16 %v27_v15, %v26_v14 }
   0x8   :  { %60 = vst [vmem:[%s99_s1] sm:$0xff] %v59_v16  }
   0x9   :  { %69 = vst [vmem:[%s99_s1 + $0x8] sm:$0xff] %v64_v17  }

// kernel: mnist_net_forward.11
= control target key start
LH: loop header
LB: loop body
LE: loop exit
PB: predicated region body
PF: predicated region fallthrough
CT: control target
= control target key end

     0   :  { %s8336_s1 = inlined_call_operand.vmem [shape: bf16[3200,128], index: 1, kind: input, shape index: {}]   ;;  %s8337_s2 = inlined_call_operand.vmem [shape: f32[1,128], index: 2, kind: input, shape index: {}]   ;;  %s8338_s0 = inlined_call_operand.vmem [shape: bf16[128,3200], index: 0, kind: input, shape index: {}]   ;;  %s8339_s3 = inlined_call_operand.vmem [shape: bf16[128,128], index: 3, kind: output, shape index: {}]  }
   0x1   :  { %v5918_v0 = vld [vmem:[%s8336_s1 + $0x38] sm:$0xff]  ;;  %v5917_v1 = vld [vmem:[%s8336_s1 + $0x30] sm:$0xff]  ;;  %v5916_v2 = vld [vmem:[%s8336_s1 + $0x28] sm:$0xff] }
   0x2   :  { %6158 = vmatpush.bf16.msra.mxu1 %v5918_v0  ;;  %6159 = vmatpush.bf16.msra.mxu2 %v5918_v0  ;;  %v5915_v3 = vld [vmem:[%s8336_s1 + $0x20] sm:$0xff]  ;;  %v5914_v4 = vld [vmem:[%s8336_s1 + $0x18] sm:$0xff]  ;;  %v5913_v5 = vld [vmem:[%s8336_s1 + $0x10] sm:$0xff] }
   0x3   :  { %6160 = vmatpush.bf16.msra.mxu3 %v5918_v0  ;;  %2834 = vmatpush.bf16.msra.mxu0 %v5918_v0  ;;  %v5912_v6 = vld [vmem:[%s8336_s1 + $0x8] sm:$0xff]  ;;  %v5911_v7 = vld [vmem:[%s8336_s1] sm:$0xff]  ;;  %v4313_v8 = vld [vmem:[%s8338_s0 + $0x190] sm:$0xf] }
   0x4   :  { %v5773_v9 = vld [vmem:[%s8338_s0 + $0x1f0] sm:$0xf0]  ;;  %v4513_v10 = vld [vmem:[%s8338_s0 + $0x320] sm:$0xf]  ;;  %v5823_v11 = vld [vmem:[%s8338_s0 + $0x380] sm:$0xf0] }
   0x5   :  { %v4713_v12 = vld [vmem:[%s8338_s0 + $0x4b0] sm:$0xf]  ;;  %v5873_v13 = vld [vmem:[%s8338_s0 + $0x510] sm:$0xf0]  ;;  %v4113_v14 = vld [vmem:[%s8338_s0] sm:$0xf]  ;;  %v4314_v18 = vor.u32 %v5773_v9, %v4313_v8  ;;  %v4514_v19 = vor.u32 %v5823_v11, %v4513_v10 }
   0x6   :  { %6161 = vmatpush.bf16.msra.mxu1 %v5917_v1  ;;  %6162 = vmatpush.bf16.msra.mxu2 %v5917_v1  ;;  %v5723_v15 = vld [vmem:[%s8338_s0 + $0x60] sm:$0xf0]  ;;  %v5934_v16 = vld [vmem:[%s8336_s1 + $0xb8] sm:$0xff]  ;;  %v4714_v20 = vor.u32 %v5873_v13, %v4713_v12  ;;  %v5933_v24 = vld [vmem:[%s8336_s1 + $0xb0] sm:$0xff] }
   0x7   :  { %6163 = vmatpush.bf16.msra.mxu3 %v5917_v1  ;;  %2835 = vmatpush.bf16.msra.mxu0 %v5917_v1  ;;  %v5926_v17 = vld [vmem:[%s8336_s1 + $0x78] sm:$0xff]  ;;  %v4114_v21 = vor.u32 %v5723_v15, %v4113_v14  ;;  %v5925_v25 = vld [vmem:[%s8336_s1 + $0x70] sm:$0xff]  ;;  %v5932_v28 = vld [vmem:[%s8336_s1 + $0xa8] sm:$0xff] }
   0x8   :  { %v5942_v22 = vld [vmem:[%s8336_s1 + $0xf8] sm:$0xff]  ;;  %v5941_v26 = vld [vmem:[%s8336_s1 + $0xf0] sm:$0xff]  ;;  %v5924_v29 = vld [vmem:[%s8336_s1 + $0x68] sm:$0xff] }
   0x9   :  { %v5950_v23 = vld [vmem:[%s8336_s1 + $0x138] sm:$0xff]  ;;  %v5949_v27 = vld [vmem:[%s8336_s1 + $0x130] sm:$0xff]  ;;  %v5940_v30 = vld [vmem:[%s8336_s1 + $0xe8] sm:$0xff] }
   0xa   :  { %6164 = vmatpush.bf16.msra.mxu1 %v5916_v2  ;;  %6165 = vmatpush.bf16.msra.mxu2 %v5916_v2  ;;  %v5948_v31 = vld [vmem:[%s8336_s1 + $0x128] sm:$0xff]  ;;  %v5931_v32 = vld [vmem:[%s8336_s1 + $0xa0] sm:$0xff]  ;;  %v4413_v36 = vld [vmem:[%s8338_s0 + $0x258] sm:$0xf] }
   0xb   :  { %6166 = vmatpush.bf16.msra.mxu3 %v5916_v2  ;;  %2836 = vmatpush.bf16.msra.mxu0 %v5916_v2  ;;  %v5923_v33 = vld [vmem:[%s8336_s1 + $0x60] sm:$0xff]  ;;  %v5798_v37 = vld [vmem:[%s8338_s0 + $0x2b8] sm:$0xf0]  ;;  %v4613_v38 = vld [vmem:[%s8338_s0 + $0x3e8] sm:$0xf] }
   0xc   :  { %v5939_v34 = vld [vmem:[%s8336_s1 + $0xe0] sm:$0xff]  ;;  %v5848_v39 = vld [vmem:[%s8338_s0 + $0x448] sm:$0xf0]  ;;  %v4813_v40 = vld [vmem:[%s8338_s0 + $0x578] sm:$0xf]  ;;  %v4414_v46 = vor.u32 %v5798_v37, %v4413_v36 }
   0xd   :  { %v5947_v35 = vld [vmem:[%s8336_s1 + $0x120] sm:$0xff]  ;;  %v5898_v41 = vld [vmem:[%s8338_s0 + $0x5d8] sm:$0xf0]  ;;  %v4213_v42 = vld [vmem:[%s8338_s0 + $0xc8] sm:$0xf]  ;;  %v4614_v47 = vor.u32 %v5848_v39, %v4613_v38 }
   0xe   :  { %6167 = vmatpush.bf16.msra.mxu1 %v5915_v3  ;;  %6168 = vmatpush.bf16.msra.mxu2 %v5915_v3  ;;  %v5748_v43 = vld [vmem:[%s8338_s0 + $0x128] sm:$0xf0]  ;;  %v5930_v44 = vld [vmem:[%s8336_s1 + $0x98] sm:$0xff]  ;;  %v4814_v48 = vor.u32 %v5898_v41, %v4813_v40  ;;  %v5929_v52 = vld [vmem:[%s8336_s1 + $0x90] sm:$0xff] }
   0xf   :  { %6169 = vmatpush.bf16.msra.mxu3 %v5915_v3  ;;  %2837 = vmatpush.bf16.msra.mxu0 %v5915_v3  ;;  %v5922_v45 = vld [vmem:[%s8336_s1 + $0x58] sm:$0xff]  ;;  %v4214_v49 = vor.u32 %v5748_v43, %v4213_v42  ;;  %v5921_v53 = vld [vmem:[%s8336_s1 + $0x50] sm:$0xff]  ;;  %v5928_v56 = vld [vmem:[%s8336_s1 + $0x88] sm:$0xff] }
  0x10   :  { %v5938_v50 = vld [vmem:[%s8336_s1 + $0xd8] sm:$0xff]  ;;  %v5937_v54 = vld [vmem:[%s8336_s1 + $0xd0] sm:$0xff]  ;;  %v5920_v57 = vld [vmem:[%s8336_s1 + $0x48] sm:$0xff] }
  0x11   :  { %v5946_v51 = vld [vmem:[%s8336_s1 + $0x118] sm:$0xff]  ;;  %v5945_v55 = vld [vmem:[%s8336_s1 + $0x110] sm:$0xff]  ;;  %v5936_v58 = vld [vmem:[%s8336_s1 + $0xc8] sm:$0xff] }
  0x12   :  { %6170 = vmatpush.bf16.msra.mxu1 %v5914_v4  ;;  %6171 = vmatpush.bf16.msra.mxu2 %v5914_v4  ;;  %v5944_v59 = vld [vmem:[%s8336_s1 + $0x108] sm:$0xff]  ;;  %v5927_v60 = vld [vmem:[%s8336_s1 + $0x80] sm:$0xff]  ;;  %v5966_v2 = vld [vmem:[%s8336_s1 + $0x1b8] sm:$0xff] }
  0x13   :  { %6172 = vmatpush.bf16.msra.mxu3 %v5914_v4  ;;  %2838 = vmatpush.bf16.msra.mxu0 %v5914_v4  ;;  %v5919_v61 = vld [vmem:[%s8336_s1 + $0x40] sm:$0xff]  ;;  %v4115_v1 = vld [vmem:[%s8338_s0 + $0x64] sm:$0xf0]  ;;  %v5958_v3 = vld [vmem:[%s8336_s1 + $0x178] sm:$0xff] }
  0x14   :  { %v5711_v62 = vld [vmem:[%s8338_s0 + $0x4] sm:$0xf]  ;;  %v4121_v4 = vld [vmem:[%s8338_s0 + $0x8] sm:$0xf]  ;;  %v4129_v8 = vld [vmem:[%s8338_s0 + $0x10] sm:$0xf] }
  0x15   :  { %v5935_v63 = vld [vmem:[%s8336_s1 + $0xc0] sm:$0xff]  ;;  %v5725_v9 = vld [vmem:[%s8338_s0 + $0x70] sm:$0xf0]  ;;  %v5974_v10 = vld [vmem:[%s8336_s1 + $0x1f8] sm:$0xff]  ;;  %v4118_v12 = vor.u32 %v5711_v62, %v4115_v1 }
  0x16   :  { %6173 = vmatpush.bf16.msra.mxu1 %v5913_v5  ;;  %6174 = vmatpush.bf16.msra.mxu2 %v5913_v5  ;;  %v5943_v0 = vld [vmem:[%s8336_s1 + $0x100] sm:$0xff]  ;;  %v5982_v11 = vld [vmem:[%s8336_s1 + $0x238] sm:$0xff]  ;;  %v4130_v15 = vor.u32 %v5725_v9, %v4129_v8  ;;  %v5761_v40 = vld [vmem:[%s8338_s0 + $0x194] sm:$0xf] }
  0x17   :  { %6175 = vmatpush.bf16.msra.mxu3 %v5913_v5  ;;  %2839 = vmatpush.bf16.msra.mxu0 %v5913_v5  ;;  %v5724_v5 = vld [vmem:[%s8338_s0 + $0x68] sm:$0xf0]  ;;  %v5963_v36 = vld [vmem:[%s8336_s1 + $0x1a0] sm:$0xff]  ;;  %v4315_v41 = vld [vmem:[%s8338_s0 + $0x1f4] sm:$0xf0] }
  0x18   :  { %v4122_v13 = vor.u32 %v5724_v5, %v4121_v4  ;;  %v5971_v37 = vld [vmem:[%s8336_s1 + $0x1e0] sm:$0xff]  ;;  %v4321_v42 = vld [vmem:[%s8338_s0 + $0x198] sm:$0xf]  ;;  %v5774_v43 = vld [vmem:[%s8338_s0 + $0x1f8] sm:$0xf0] }
  0x19   :  { %v5955_v38 = vld [vmem:[%s8336_s1 + $0x160] sm:$0xff]  ;;  %v4429_v62 = vld [vmem:[%s8338_s0 + $0x268] sm:$0xf]  ;;  %v5961_v4 = vld [vmem:[%s8336_s1 + $0x190] sm:$0xff] }
  0x1a   :  { %6176 = vmatpush.bf16.msra.mxu1 %v5912_v6  ;;  %6177 = vmatpush.bf16.msra.mxu2 %v5912_v6  ;;  %v5979_v39 = vld [vmem:[%s8336_s1 + $0x220] sm:$0xff]  ;;  %v5969_v5 = vld [vmem:[%s8336_s1 + $0x1d0] sm:$0xff]  ;;  %v4515_v9 = vld [vmem:[%s8338_s0 + $0x384] sm:$0xf0] }
  0x1b   :  { %6178 = vmatpush.bf16.msra.mxu3 %v5912_v6  ;;  %2840 = vmatpush.bf16.msra.mxu0 %v5912_v6  ;;  %v5712_v6 = vld [vmem:[%s8338_s0 + $0xc] sm:$0xf]  ;;  %v5811_v8 = vld [vmem:[%s8338_s0 + $0x324] sm:$0xf] }
  0x1e   :  { %6179 = vmatpush.bf16.msra.mxu1 %v5911_v7  ;;  %6180 = vmatpush.bf16.msra.mxu2 %v5911_v7 }
  0x1f   :  { %6181 = vmatpush.bf16.msra.mxu3 %v5911_v7  ;;  %2841 = vmatpush.bf16.msra.mxu0 %v5911_v7  ;;  %v4123_v7 = vld [vmem:[%s8338_s0 + $0x6c] sm:$0xf0] }
  0x20   :  { %v4126_v14 = vor.u32 %v5712_v6, %v4123_v7  ;;  %v5953_v6 = vld [vmem:[%s8336_s1 + $0x150] sm:$0xff] }
  0x21   :  { %2852 = vmatmul.bf16.vlgmr.msra.gmra.mxu1 %v4314_v18  ;;  %2862 = vmatmul.bf16.vlgmr.msra.gmra.mxu2 %v4514_v19  ;;  %v5973_v18 = vld [vmem:[%s8336_s1 + $0x1f0] sm:$0xff] }
  0x22   :  { %2932 = vmatpush.bf16.msrb.mxu2 %v5934_v16  ;;  %2883 = vmatpush.bf16.msrb.mxu1 %v5926_v17  ;;  %v5965_v16 = vld [vmem:[%s8336_s1 + $0x1b0] sm:$0xff] }
  0x23   :  { %2872 = vmatmul.bf16.vlgmr.msra.gmra.mxu3 %v4714_v20  ;;  %2842 = vmatmul.bf16.vlgmr.msra.gmra.mxu0 %v4114_v21  ;;  %v5957_v17 = vld [vmem:[%s8336_s1 + $0x170] sm:$0xff]  ;;  %v5964_v20 = vld [vmem:[%s8336_s1 + $0x1a8] sm:$0xff] }
  0x24   :  { %2981 = vmatpush.bf16.msrb.mxu3 %v5942_v22  ;;  %3030 = vmatpush.bf16.msrb.mxu0 %v5950_v23  ;;  %v5981_v19 = vld [vmem:[%s8336_s1 + $0x230] sm:$0xff]  ;;  %v5956_v21 = vld [vmem:[%s8336_s1 + $0x168] sm:$0xff] }
  0x25   :  { %v5972_v22 = vld [vmem:[%s8336_s1 + $0x1e8] sm:$0xff]  ;;  %v5977_v7 = vld [vmem:[%s8336_s1 + $0x210] sm:$0xff] }
  0x26   :  { %2933 = vmatpush.bf16.msrb.mxu2 %v5933_v24  ;;  %2884 = vmatpush.bf16.msrb.mxu1 %v5925_v25  ;;  %v5980_v23 = vld [vmem:[%s8336_s1 + $0x228] sm:$0xff]  ;;  %v4215_v25 = vld [vmem:[%s8338_s0 + $0x12c] sm:$0xf0] }
  0x27   :  { %v5736_v24 = vld [vmem:[%s8338_s0 + $0xcc] sm:$0xf] }
  0x28   :  { %2982 = vmatpush.bf16.msrb.mxu3 %v5941_v26  ;;  %3031 = vmatpush.bf16.msrb.mxu0 %v5949_v27  ;;  %v4221_v26 = vld [vmem:[%s8338_s0 + $0xd0] sm:$0xf]  ;;  %v5749_v27 = vld [vmem:[%s8338_s0 + $0x130] sm:$0xf0] }
  0x2a   :  { %2934 = vmatpush.bf16.msrb.mxu2 %v5932_v28  ;;  %2885 = vmatpush.bf16.msrb.mxu1 %v5924_v29  ;;  %v5737_v28 = vld [vmem:[%s8338_s0 + $0xd4] sm:$0xf]  ;;  %v4223_v29 = vld [vmem:[%s8338_s0 + $0x134] sm:$0xf0] }
  0x2c   :  { %2983 = vmatpush.bf16.msrb.mxu3 %v5940_v30  ;;  %3032 = vmatpush.bf16.msrb.mxu0 %v5948_v31  ;;  %v4229_v30 = vld [vmem:[%s8338_s0 + $0xd8] sm:$0xf]  ;;  %v5750_v31 = vld [vmem:[%s8338_s0 + $0x138] sm:$0xf0] }
  0x2e   :  { %2935 = vmatpush.bf16.msrb.mxu2 %v5931_v32  ;;  %2886 = vmatpush.bf16.msrb.mxu1 %v5923_v33  ;;  %v4218_v32 = vor.u32 %v5736_v24, %v4215_v25  ;;  %v4222_v33 = vor.u32 %v5749_v27, %v4221_v26  ;;  %v5836_v24 = vld [vmem:[%s8338_s0 + $0x3ec] sm:$0xf]  ;;  %v4615_v25 = vld [vmem:[%s8338_s0 + $0x44c] sm:$0xf0]  ;;  %v5849_v27 = vld [vmem:[%s8338_s0 + $0x450] sm:$0xf0] }
  0x2f   :  { %v4621_v26 = vld [vmem:[%s8338_s0 + $0x3f0] sm:$0xf] }
  0x30   :  { %2984 = vmatpush.bf16.msrb.mxu3 %v5939_v34  ;;  %3033 = vmatpush.bf16.msrb.mxu0 %v5947_v35  ;;  %v4226_v34 = vor.u32 %v5737_v28, %v4223_v29  ;;  %v4230_v35 = vor.u32 %v5750_v31, %v4229_v30  ;;  %v5837_v28 = vld [vmem:[%s8338_s0 + $0x3f4] sm:$0xf]  ;;  %v4623_v29 = vld [vmem:[%s8338_s0 + $0x454] sm:$0xf0]  ;;  %v5850_v31 = vld [vmem:[%s8338_s0 + $0x458] sm:$0xf0] }
  0x31   :  { %2857 = vmatmul.bf16.gmra.mxu1 %v4414_v46  ;;  %2867 = vmatmul.bf16.gmra.mxu2 %v4614_v47  ;;  %v4329_v46 = vld [vmem:[%s8338_s0 + $0x1a0] sm:$0xf]  ;;  %v5775_v47 = vld [vmem:[%s8338_s0 + $0x200] sm:$0xf0]  ;;  %v4629_v30 = vld [vmem:[%s8338_s0 + $0x3f8] sm:$0xf] }
  0x32   :  { %2936 = vmatpush.bf16.msrb.mxu2 %v5930_v44  ;;  %2887 = vmatpush.bf16.msrb.mxu1 %v5922_v45  ;;  %v5762_v44 = vld [vmem:[%s8338_s0 + $0x19c] sm:$0xf]  ;;  %v4323_v45 = vld [vmem:[%s8338_s0 + $0x1fc] sm:$0xf0] }
  0x33   :  { %2877 = vmatmul.bf16.gmra.mxu3 %v4814_v48  ;;  %2847 = vmatmul.bf16.gmra.mxu0 %v4214_v49  ;;  %v4318_v48 = vor.u32 %v5761_v40, %v4315_v41  ;;  %v4322_v49 = vor.u32 %v5774_v43, %v4321_v42  ;;  %v5861_v40 = vld [vmem:[%s8338_s0 + $0x4b4] sm:$0xf]  ;;  %v4715_v41 = vld [vmem:[%s8338_s0 + $0x514] sm:$0xf0]  ;;  %v5874_v43 = vld [vmem:[%s8338_s0 + $0x518] sm:$0xf0] }
  0x34   :  { %2985 = vmatpush.bf16.msrb.mxu3 %v5938_v50  ;;  %3034 = vmatpush.bf16.msrb.mxu0 %v5946_v51  ;;  %v4326_v50 = vor.u32 %v5762_v44, %v4323_v45  ;;  %v4330_v51 = vor.u32 %v5775_v47, %v4329_v46  ;;  %v4721_v42 = vld [vmem:[%s8338_s0 + $0x4b8] sm:$0xf]  ;;  %v5862_v44 = vld [vmem:[%s8338_s0 + $0x4bc] sm:$0xf]  ;;  %v4723_v45 = vld [vmem:[%s8338_s0 + $0x51c] sm:$0xf0] }
  0x35   :  { %v4729_v46 = vld [vmem:[%s8338_s0 + $0x4c0] sm:$0xf]  ;;  %v5875_v47 = vld [vmem:[%s8338_s0 + $0x520] sm:$0xf0] }
  0x36   :  { %2937 = vmatpush.bf16.msrb.mxu2 %v5929_v52  ;;  %2888 = vmatpush.bf16.msrb.mxu1 %v5921_v53  ;;  %v5962_v52 = vld [vmem:[%s8336_s1 + $0x198] sm:$0xff] }
  0x37   :  { %v5970_v53 = vld [vmem:[%s8336_s1 + $0x1d8] sm:$0xff] }
  0x38   :  { %2986 = vmatpush.bf16.msrb.mxu3 %v5937_v54  ;;  %3035 = vmatpush.bf16.msrb.mxu0 %v5945_v55  ;;  %v5954_v54 = vld [vmem:[%s8336_s1 + $0x158] sm:$0xff] }
  0x39   :  { %v5978_v55 = vld [vmem:[%s8336_s1 + $0x218] sm:$0xff] }
  0x3a   :  { %2938 = vmatpush.bf16.msrb.mxu2 %v5928_v56  ;;  %2889 = vmatpush.bf16.msrb.mxu1 %v5920_v57  ;;  %v5786_v56 = vld [vmem:[%s8338_s0 + $0x25c] sm:$0xf]  ;;  %v4415_v57 = vld [vmem:[%s8338_s0 + $0x2bc] sm:$0xf0] }
  0x3c   :  { %2987 = vmatpush.bf16.msrb.mxu3 %v5936_v58  ;;  %3036 = vmatpush.bf16.msrb.mxu0 %v5944_v59  ;;  %v4421_v58 = vld [vmem:[%s8338_s0 + $0x260] sm:$0xf]  ;;  %v5799_v59 = vld [vmem:[%s8338_s0 + $0x2c0] sm:$0xf0] }
  0x3d   :  { %v4422_v1 = vor.u32 %v5799_v59, %v4421_v58 }
  0x3e   :  { %2939 = vmatpush.bf16.msrb.mxu2 %v5927_v60  ;;  %2890 = vmatpush.bf16.msrb.mxu1 %v5919_v61  ;;  %v5787_v60 = vld [vmem:[%s8338_s0 + $0x264] sm:$0xf]  ;;  %v4423_v61 = vld [vmem:[%s8338_s0 + $0x2c4] sm:$0xf0] }
  0x40   :  { %2988 = vmatpush.bf16.msrb.mxu3 %v5935_v63  ;;  %3037 = vmatpush.bf16.msrb.mxu0 %v5943_v0  ;;  %v5800_v63 = vld [vmem:[%s8338_s0 + $0x2c8] sm:$0xf0]  ;;  %v4418_v0 = vor.u32 %v5786_v56, %v4415_v57  ;;  %v6648_v56 = vld [vmem:[%s8337_s2] ss:$0 sm:$0xff] }
  0x41   :  { %2891 = vmatmul.bf16.vlgmr.msrb.gmra.mxu1 %v4118_v12  ;;  %2940 = vmatmul.bf16.vlgmr.msrb.gmra.mxu2 %v4122_v13  ;;  %v5812_v12 = vld [vmem:[%s8338_s0 + $0x32c] sm:$0xf]  ;;  %v4523_v13 = vld [vmem:[%s8338_s0 + $0x38c] sm:$0xf0] }
  0x42   :  { %3128 = vmatpush.bf16.msra.mxu2 %v5966_v2  ;;  %3079 = vmatpush.bf16.msra.mxu1 %v5958_v3  ;;  %v4426_v2 = vor.u32 %v5787_v60, %v4423_v61  ;;  %v4430_v3 = vor.u32 %v5800_v63, %v4429_v62  ;;  %v5990_v63 = vld [vmem:[%s8336_s1 + $0x278] sm:$0xff] }
  0x43   :  { %2989 = vmatmul.bf16.vlgmr.msrb.gmra.mxu3 %v4126_v14  ;;  %3038 = vmatmul.bf16.vlgmr.msrb.gmra.mxu0 %v4130_v15  ;;  %v4529_v14 = vld [vmem:[%s8338_s0 + $0x330] sm:$0xf]  ;;  %v5825_v15 = vld [vmem:[%s8338_s0 + $0x390] sm:$0xf0] }
  0x44   :  { %3177 = vmatpush.bf16.msra.mxu3 %v5974_v10  ;;  %3226 = vmatpush.bf16.msra.mxu0 %v5982_v11  ;;  %v4521_v10 = vld [vmem:[%s8338_s0 + $0x328] sm:$0xf]  ;;  %v5824_v11 = vld [vmem:[%s8338_s0 + $0x388] sm:$0xf0] }
  0x46   :  { %3129 = vmatpush.bf16.msra.mxu2 %v5965_v16  ;;  %3080 = vmatpush.bf16.msra.mxu1 %v5957_v17  ;;  %v4518_v16 = vor.u32 %v5811_v8, %v4515_v9  ;;  %v4522_v17 = vor.u32 %v5824_v11, %v4521_v10  ;;  %v5900_v8 = vld [vmem:[%s8338_s0 + $0x5e8] sm:$0xf0] }
  0x48   :  { %3178 = vmatpush.bf16.msra.mxu3 %v5973_v18  ;;  %3227 = vmatpush.bf16.msra.mxu0 %v5981_v19  ;;  %v4526_v18 = vor.u32 %v5812_v12, %v4523_v13  ;;  %v4530_v19 = vor.u32 %v5825_v15, %v4529_v14 }
  0x4a   :  { %3130 = vmatpush.bf16.msra.mxu2 %v5964_v20  ;;  %3081 = vmatpush.bf16.msra.mxu1 %v5956_v21  ;;  %v5960_v20 = vld [vmem:[%s8336_s1 + $0x188] sm:$0xff] }
  0x4b   :  { %v5968_v21 = vld [vmem:[%s8336_s1 + $0x1c8] sm:$0xff] }
  0x4c   :  { %3179 = vmatpush.bf16.msra.mxu3 %v5972_v22  ;;  %3228 = vmatpush.bf16.msra.mxu0 %v5980_v23  ;;  %v5952_v22 = vld [vmem:[%s8336_s1 + $0x148] sm:$0xff] }
  0x4d   :  { %v5976_v23 = vld [vmem:[%s8336_s1 + $0x208] sm:$0xff] }
  0x4e   :  { %3131 = vmatpush.bf16.msra.mxu2 %v5963_v36  ;;  %3082 = vmatpush.bf16.msra.mxu1 %v5955_v38  ;;  %v5959_v36 = vld [vmem:[%s8336_s1 + $0x180] sm:$0xff] }
  0x4f   :  { %v5951_v38 = vld [vmem:[%s8336_s1 + $0x140] sm:$0xff] }
  0x50   :  { %3180 = vmatpush.bf16.msra.mxu3 %v5971_v37  ;;  %3229 = vmatpush.bf16.msra.mxu0 %v5979_v39  ;;  %v5967_v37 = vld [vmem:[%s8336_s1 + $0x1c0] sm:$0xff] }
  0x51   :  { %2896 = vmatmul.bf16.gmra.mxu1 %v4218_v32  ;;  %2945 = vmatmul.bf16.gmra.mxu2 %v4222_v33  ;;  %v4618_v32 = vor.u32 %v5836_v24, %v4615_v25  ;;  %v4622_v33 = vor.u32 %v5849_v27, %v4621_v26  ;;  %v5975_v39 = vld [vmem:[%s8336_s1 + $0x200] sm:$0xff]  ;;  %v5989_v27 = vld [vmem:[%s8336_s1 + $0x270] sm:$0xff] }
  0x52   :  { %3132 = vmatpush.bf16.msra.mxu2 %v5962_v52  ;;  %3083 = vmatpush.bf16.msra.mxu1 %v5954_v54  ;;  %v4730_v52 = vor.u32 %v5875_v47, %v4729_v46  ;;  %v5998_v54 = vld [vmem:[%s8336_s1 + $0x2b8] sm:$0xff] }
  0x53   :  { %2994 = vmatmul.bf16.gmra.mxu3 %v4226_v34  ;;  %3043 = vmatmul.bf16.gmra.mxu0 %v4230_v35  ;;  %v4626_v34 = vor.u32 %v5837_v28, %v4623_v29  ;;  %v4630_v35 = vor.u32 %v5850_v31, %v4629_v30  ;;  %v6013_v28 = vld [vmem:[%s8336_s1 + $0x330] sm:$0xff]  ;;  %v4131_v30 = vld [vmem:[%s8338_s0 + $0x74] sm:$0xf0] }
  0x54   :  { %3181 = vmatpush.bf16.msra.mxu3 %v5970_v53  ;;  %3230 = vmatpush.bf16.msra.mxu0 %v5978_v55  ;;  %v6006_v55 = vld [vmem:[%s8336_s1 + $0x2f8] sm:$0xff]  ;;  %v5713_v29 = vld [vmem:[%s8338_s0 + $0x14] sm:$0xf] }
  0x55   :  { %v4137_v31 = vld [vmem:[%s8338_s0 + $0x18] sm:$0xf] }
  0x56   :  { %3133 = vmatpush.bf16.msra.mxu2 %v5961_v4  ;;  %3084 = vmatpush.bf16.msra.mxu1 %v5953_v6  ;;  %v5899_v4 = vld [vmem:[%s8338_s0 + $0x5e0] sm:$0xf0]  ;;  %v4823_v6 = vld [vmem:[%s8338_s0 + $0x5e4] sm:$0xf0] }
  0x58   :  { %3182 = vmatpush.bf16.msra.mxu3 %v5969_v5  ;;  %3231 = vmatpush.bf16.msra.mxu0 %v5977_v7  ;;  %v5887_v5 = vld [vmem:[%s8338_s0 + $0x584] sm:$0xf]  ;;  %v4829_v7 = vld [vmem:[%s8338_s0 + $0x588] sm:$0xf] }
  0x5a   :  { %3134 = vmatpush.bf16.msra.mxu2 %v5960_v20  ;;  %3085 = vmatpush.bf16.msra.mxu1 %v5952_v22  ;;  %v6005_v20 = vld [vmem:[%s8336_s1 + $0x2f0] sm:$0xff] }
  0x5c   :  { %3183 = vmatpush.bf16.msra.mxu3 %v5968_v21  ;;  %3232 = vmatpush.bf16.msra.mxu0 %v5976_v23 }
  0x5e   :  { %3135 = vmatpush.bf16.msra.mxu2 %v5959_v36  ;;  %3086 = vmatpush.bf16.msra.mxu1 %v5951_v38  ;;  %v5727_v36 = vld [vmem:[%s8338_s0 + $0x80] sm:$0xf0] }
  0x60   :  { %3184 = vmatpush.bf16.msra.mxu3 %v5967_v37  ;;  %3233 = vmatpush.bf16.msra.mxu0 %v5975_v39 }
  0x61   :  { %2901 = vmatmul.bf16.gmra.mxu1 %v4318_v48  ;;  %2950 = vmatmul.bf16.gmra.mxu2 %v4322_v49  ;;  %v4718_v48 = vor.u32 %v5861_v40, %v4715_v41  ;;  %v4722_v49 = vor.u32 %v5874_v43, %v4721_v42  ;;  %v4134_v41 = vor.u32 %v5713_v29, %v4131_v30 }
  0x62   :  { %3324 = vmatpush.bf16.msrb.mxu2 %v5998_v54  ;;  %3275 = vmatpush.bf16.msrb.mxu1 %v5990_v63 }
  0x63   :  { %2999 = vmatmul.bf16.gmra.mxu3 %v4326_v50  ;;  %3048 = vmatmul.bf16.gmra.mxu0 %v4330_v51  ;;  %v4726_v51 = vor.u32 %v5862_v44, %v4723_v45 }
  0x64   :  { %3373 = vmatpush.bf16.msrb.mxu3 %v6006_v55 }
  0x66   :  { %3276 = vmatpush.bf16.msrb.mxu1 %v5989_v27 }
  0x68   :  { %3374 = vmatpush.bf16.msrb.mxu3 %v6005_v20 }
  0x71   :  { %2906 = vmatmul.bf16.gmra.mxu1 %v4418_v0  ;;  %2955 = vmatmul.bf16.gmra.mxu2 %v4422_v1  ;;  %v6014_v0 = vld [vmem:[%s8336_s1 + $0x338] sm:$0xff] }
  0x72   :  { %v5886_v1 = vld [vmem:[%s8338_s0 + $0x57c] sm:$0xf]  ;;  %3422 = vmatpush.bf16.msrb.mxu0 %v6014_v0 }
  0x73   :  { %3004 = vmatmul.bf16.gmra.mxu3 %v4426_v2  ;;  %3053 = vmatmul.bf16.gmra.mxu0 %v4430_v3  ;;  %v4815_v2 = vld [vmem:[%s8338_s0 + $0x5dc] sm:$0xf0] }
  0x74   :  { %v4821_v3 = vld [vmem:[%s8338_s0 + $0x580] sm:$0xf]  ;;  %v4818_v12 = vor.u32 %v5886_v1, %v4815_v2  ;;  %v5988_v1 = vld [vmem:[%s8336_s1 + $0x268] sm:$0xff] }
  0x75   :  { %v4822_v13 = vor.u32 %v5899_v4, %v4821_v3  ;;  %v6012_v2 = vld [vmem:[%s8336_s1 + $0x328] sm:$0xff]  ;;  %v5738_v3 = vld [vmem:[%s8338_s0 + $0xdc] sm:$0xf]  ;;  %3277 = vmatpush.bf16.msrb.mxu1 %v5988_v1 }
  0x76   :  { %3423 = vmatpush.bf16.msrb.mxu0 %v6013_v28 }
  0x7a   :  { %3424 = vmatpush.bf16.msrb.mxu0 %v6012_v2 }
  0x81   :  { %2911 = vmatmul.bf16.gmra.mxu1 %v4518_v16  ;;  %2960 = vmatmul.bf16.gmra.mxu2 %v4522_v17  ;;  %v4826_v16 = vor.u32 %v5887_v5, %v4823_v6  ;;  %v4830_v17 = vor.u32 %v5900_v8, %v4829_v7  ;;  %v4237_v5 = vld [vmem:[%s8338_s0 + $0xe0] sm:$0xf]  ;;  %v5751_v6 = vld [vmem:[%s8338_s0 + $0x140] sm:$0xf0]  ;;  %v4239_v8 = vld [vmem:[%s8338_s0 + $0x144] sm:$0xf0] }
  0x82   :  { %v5739_v7 = vld [vmem:[%s8338_s0 + $0xe4] sm:$0xf]  ;;  %v4238_v20 = vor.u32 %v5751_v6, %v4237_v5 }
  0x83   :  { %3009 = vmatmul.bf16.gmra.mxu3 %v4526_v18  ;;  %3058 = vmatmul.bf16.gmra.mxu0 %v4530_v19  ;;  %v5997_v19 = vld [vmem:[%s8336_s1 + $0x2b0] sm:$0xff] }
  0x84   :  { %3325 = vmatpush.bf16.msrb.mxu2 %v5997_v19 }
  0x91   :  { %2916 = vmatmul.bf16.gmra.mxu1 %v4618_v32  ;;  %2965 = vmatmul.bf16.gmra.mxu2 %v4622_v33  ;;  %v5726_v32 = vld [vmem:[%s8338_s0 + $0x78] sm:$0xf0] }
  0x92   :  { %v5714_v33 = vld [vmem:[%s8338_s0 + $0x1c] sm:$0xf]  ;;  %v4138_v42 = vor.u32 %v5726_v32, %v4137_v31  ;;  %v6003_v32 = vld [vmem:[%s8336_s1 + $0x2e0] sm:$0xff] }
  0x93   :  { %3014 = vmatmul.bf16.gmra.mxu3 %v4626_v34  ;;  %3063 = vmatmul.bf16.gmra.mxu0 %v4630_v35  ;;  %v4139_v34 = vld [vmem:[%s8338_s0 + $0x7c] sm:$0xf0] }
  0x94   :  { %v4145_v35 = vld [vmem:[%s8338_s0 + $0x20] sm:$0xf]  ;;  %v4142_v45 = vor.u32 %v5714_v33, %v4139_v34 }
  0x95   :  { %v4146_v46 = vor.u32 %v5727_v36, %v4145_v35 }
  0x9e   :  { %v6635_v50 = vpop.f32.mrf.mxu1 }
  0xa0   :  { %v6637_v53 = vpop.f32.mrf.mxu0 }
  0xa1   :  { %2921 = vmatmul.bf16.gmra.mxu1 %v4718_v48  ;;  %2970 = vmatmul.bf16.gmra.mxu2 %v4722_v49  ;;  %v2844_v38 = vadd.f32 %v6648_v56, %v6637_v53  ;;  %v5996_v49 = vld [vmem:[%s8336_s1 + $0x2a8] sm:$0xff] }
  0xa2   :  { %3326 = vmatpush.bf16.msrb.mxu2 %v5996_v49  ;;  %v5764_v49 = vld [vmem:[%s8338_s0 + $0x1ac] sm:$0xf] }
  0xa3   :  { %3019 = vmatmul.bf16.gmra.mxu3 %v4726_v51  ;;  %3068 = vmatmul.bf16.gmra.mxu0 %v4730_v52  ;;  %v6004_v51 = vld [vmem:[%s8336_s1 + $0x2e8] sm:$0xff] }
  0xa4   :  { %v2863_v57 = vpop.f32.mrf.mxu2  ;;  %3375 = vmatpush.bf16.msrb.mxu3 %v6004_v51  ;;  %v4339_v51 = vld [vmem:[%s8338_s0 + $0x20c] sm:$0xf0] }
  0xa5   :  { %v6651_v58 = vadd.f32 %v6648_v56, %v2863_v57  ;;  %v4342_v2 = vor.u32 %v5764_v49, %v4339_v51  ;;  %v6001_v51 = vld [vmem:[%s8336_s1 + $0x2d0] sm:$0xff] }
  0xa6   :  { %v2873_v59 = vpop.f32.mrf.mxu3  ;;  %v6656_v61 = vpop.f32.mrf.mxu1 }
  0xa7   :  { %v6654_v60 = vadd.f32 %v6648_v56, %v2873_v59 }
  0xa8   :  { %v6658_v62 = vpop.f32.mrf.mxu0  ;;  %3376 = vmatpush.bf16.msrb.mxu3 %v6003_v32  ;;  %v4439_v32 = vld [vmem:[%s8338_s0 + $0x2d4] sm:$0xf0] }
  0xa9   :  { %v2846_v53 = vadd.f32 %v6648_v56, %v6658_v62  ;;  %v4231_v62 = vld [vmem:[%s8338_s0 + $0x13c] sm:$0xf0] }
  0xaa   :  { %v4234_v19 = vor.u32 %v5738_v3, %v4231_v62 }
  0xac   :  { %v2865_v9 = vpop.f32.mrf.mxu2 }
  0xad   :  { %v6691_v10 = vadd.f32 %v6648_v56, %v2865_v9  ;;  %v4245_v9 = vld [vmem:[%s8338_s0 + $0xe8] sm:$0xf] }
  0xae   :  { %v2875_v11 = vpop.f32.mrf.mxu3  ;;  %v6696_v15 = vpop.f32.mrf.mxu1 }
  0xaf   :  { %v6694_v14 = vadd.f32 %v6648_v56, %v2875_v11  ;;  %v5752_v11 = vld [vmem:[%s8338_s0 + $0x148] sm:$0xf0] }
  0xb0   :  { %v6698_v18 = vpop.f32.mrf.mxu0  ;;  %v4246_v27 = vor.u32 %v5752_v11, %v4245_v9  ;;  %v2856_v11 = vadd.f32 %v6648_v56, %v6656_v61  ;;  %v4431_v61 = vld [vmem:[%s8338_s0 + $0x2cc] sm:$0xf0] }
  0xb1   :  { %2926 = vmatmul.bf16.gmra.mxu1 %v4818_v12  ;;  %2975 = vmatmul.bf16.gmra.mxu2 %v4822_v13  ;;  %v2849_v13 = vadd.f32 %v6648_v56, %v6698_v18  ;;  %v5995_v18 = vld [vmem:[%s8336_s1 + $0x2a0] sm:$0xff] }
  0xb2   :  { %3327 = vmatpush.bf16.msrb.mxu2 %v5995_v18  ;;  %v5789_v18 = vld [vmem:[%s8338_s0 + $0x274] sm:$0xf] }
  0xb3   :  { %3024 = vmatmul.bf16.gmra.mxu3 %v4826_v16  ;;  %3073 = vmatmul.bf16.gmra.mxu0 %v4830_v17 }
  0xb4   :  { %v2868_v21 = vpop.f32.mrf.mxu2 }
  0xb5   :  { %v6707_v22 = vadd.f32 %v6648_v56, %v2868_v21 }
  0xb6   :  { %v2878_v23 = vpop.f32.mrf.mxu3  ;;  %v6712_v25 = vpop.f32.mrf.mxu1 }
  0xb7   :  { %v6710_v24 = vadd.f32 %v6648_v56, %v2878_v23  ;;  %v4242_v23 = vor.u32 %v5739_v7, %v4239_v8  ;;  %v6002_v8 = vld [vmem:[%s8336_s1 + $0x2d8] sm:$0xff] }
  0xb8   :  { %v6714_v26 = vpop.f32.mrf.mxu0  ;;  %3377 = vmatpush.bf16.msrb.mxu3 %v6002_v8  ;;  %v4545_v8 = vld [vmem:[%s8338_s0 + $0x340] sm:$0xf] }
  0xb9   :  { %v2851_v34 = vadd.f32 %v6648_v56, %v6714_v26  ;;  %v4331_v26 = vld [vmem:[%s8338_s0 + $0x204] sm:$0xf0] }
  0xbc   :  { %v2870_v37 = vpop.f32.mrf.mxu2  ;;  %3378 = vmatpush.bf16.msrb.mxu3 %v6001_v51 }
  0xbd   :  { %v6749_v39 = vadd.f32 %v6648_v56, %v2870_v37 }
  0xbe   :  { %v2880_v40 = vpop.f32.mrf.mxu3  ;;  %v2892_v44 = vpop.f32.mrf.mxu1 }
  0xbf   :  { %v6752_v43 = vadd.f32 %v6648_v56, %v2880_v40  ;;  %v2893_v47 = vadd.f32 %v2892_v44, %v2844_v38  ;;  %v6011_v44 = vld [vmem:[%s8336_s1 + $0x320] sm:$0xff] }
  0xc0   :  { %v3039_v48 = vpop.f32.mrf.mxu0  ;;  %3425 = vmatpush.bf16.msrb.mxu0 %v6011_v44  ;;  %v4442_v44 = vor.u32 %v5789_v18, %v4439_v32  ;;  %v6000_v18 = vld [vmem:[%s8336_s1 + $0x2c8] sm:$0xff] }
  0xc1   :  { %3087 = vmatmul.bf16.vlgmr.msra.gmra.mxu1 %v4134_v41  ;;  %3136 = vmatmul.bf16.vlgmr.msra.gmra.mxu2 %v4138_v42  ;;  %v5987_v42 = vld [vmem:[%s8336_s1 + $0x260] sm:$0xff] }
  0xc2   :  { %3278 = vmatpush.bf16.msrb.mxu1 %v5987_v42  ;;  %3379 = vmatpush.bf16.msrb.mxu3 %v6000_v18 }
  0xc3   :  { %3185 = vmatmul.bf16.vlgmr.msra.gmra.mxu3 %v4142_v45  ;;  %3234 = vmatmul.bf16.vlgmr.msra.gmra.mxu0 %v4146_v46  ;;  %v5763_v45 = vld [vmem:[%s8338_s0 + $0x1a4] sm:$0xf] }
  0xc4   :  { %v2941_v52 = vpop.f32.mrf.mxu2 }
  0xc5   :  { %v2942_v54 = vadd.f32 %v2941_v52, %v2893_v47  ;;  %v4337_v47 = vld [vmem:[%s8338_s0 + $0x1a8] sm:$0xf]  ;;  %v4345_v52 = vld [vmem:[%s8338_s0 + $0x1b0] sm:$0xf] }
  0xc6   :  { %v2990_v55 = vpop.f32.mrf.mxu3  ;;  %v2894_v57 = vpop.f32.mrf.mxu1 }
  0xc7   :  { %v2991_v59 = vadd.f32 %v2990_v55, %v2942_v54  ;;  %v2895_v63 = vadd.f32 %v2894_v57, %v2846_v53  ;;  %v5777_v53 = vld [vmem:[%s8338_s0 + $0x210] sm:$0xf0]  ;;  %v2854_v55 = vadd.f32 %v6648_v56, %v6635_v50  ;;  %v5994_v50 = vld [vmem:[%s8336_s1 + $0x298] sm:$0xff] }
  0xc8   :  { %v3041_v0 = vpop.f32.mrf.mxu0  ;;  %v4346_v3 = vor.u32 %v5777_v53, %v4345_v52  ;;  %3328 = vmatpush.bf16.msrb.mxu2 %v5994_v50  ;;  %v2861_v53 = vadd.f32 %v6648_v56, %v6712_v25  ;;  %v4539_v50 = vld [vmem:[%s8338_s0 + $0x39c] sm:$0xf0] }
  0xc9   :  { %v6774_v4 = vadd.f32 %v3039_v48, %v2991_v59  ;;  %v5776_v48 = vld [vmem:[%s8338_s0 + $0x208] sm:$0xf0] }
  0xcc   :  { %v2943_v12 = vpop.f32.mrf.mxu2 }
  0xcd   :  { %v2944_v16 = vadd.f32 %v2943_v12, %v2895_v63  ;;  %v4334_v63 = vor.u32 %v5763_v45, %v4331_v26 }
  0xce   :  { %v2992_v17 = vpop.f32.mrf.mxu3  ;;  %v2897_v21 = vpop.f32.mrf.mxu1 }
  0xcf   :  { %v2993_v28 = vadd.f32 %v2992_v17, %v2944_v16  ;;  %v2898_v29 = vadd.f32 %v2897_v21, %v2849_v13  ;;  %v5986_v21 = vld [vmem:[%s8336_s1 + $0x258] sm:$0xff] }
  0xd0   :  { %v3044_v30 = vpop.f32.mrf.mxu0  ;;  %3279 = vmatpush.bf16.msrb.mxu1 %v5986_v21 }
  0xd1   :  { %3092 = vmatmul.bf16.gmra.mxu1 %v4234_v19  ;;  %3141 = vmatmul.bf16.gmra.mxu2 %v4238_v20  ;;  %v6796_v31 = vadd.f32 %v3041_v0, %v2993_v28  ;;  %v4338_v0 = vor.u32 %v5776_v48, %v4337_v47 }
  0xd3   :  { %3190 = vmatmul.bf16.gmra.mxu3 %v4242_v23  ;;  %3239 = vmatmul.bf16.gmra.mxu0 %v4246_v27  ;;  %v6010_v23 = vld [vmem:[%s8336_s1 + $0x318] sm:$0xff]  ;;  %v5788_v27 = vld [vmem:[%s8338_s0 + $0x26c] sm:$0xf] }
  0xd4   :  { %v2946_v33 = vpop.f32.mrf.mxu2  ;;  %3426 = vmatpush.bf16.msrb.mxu0 %v6010_v23 }
  0xd5   :  { %v2947_v35 = vadd.f32 %v2946_v33, %v2898_v29  ;;  %v4437_v29 = vld [vmem:[%s8338_s0 + $0x270] sm:$0xf]  ;;  %v4445_v33 = vld [vmem:[%s8338_s0 + $0x278] sm:$0xf] }
  0xd6   :  { %v2995_v36 = vpop.f32.mrf.mxu3  ;;  %v2899_v37 = vpop.f32.mrf.mxu1 }
  0xd7   :  { %v2996_v38 = vadd.f32 %v2995_v36, %v2947_v35  ;;  %v2900_v40 = vadd.f32 %v2899_v37, %v2851_v34  ;;  %v5802_v34 = vld [vmem:[%s8338_s0 + $0x2d8] sm:$0xf0]  ;;  %v2859_v36 = vadd.f32 %v6648_v56, %v6696_v15  ;;  %v5993_v15 = vld [vmem:[%s8336_s1 + $0x290] sm:$0xff]  ;;  %v4531_v56 = vld [vmem:[%s8338_s0 + $0x394] sm:$0xf0] }
  0xd8   :  { %v3046_v41 = vpop.f32.mrf.mxu0  ;;  %v4446_v45 = vor.u32 %v5802_v34, %v4445_v33  ;;  %3329 = vmatpush.bf16.msrb.mxu2 %v5993_v15  ;;  %v5852_v15 = vld [vmem:[%s8338_s0 + $0x468] sm:$0xf0] }
  0xd9   :  { %v6818_v46 = vadd.f32 %v3044_v30, %v2996_v38  ;;  %v5801_v30 = vld [vmem:[%s8338_s0 + $0x2d0] sm:$0xf0] }
  0xdc   :  { %v2948_v54 = vpop.f32.mrf.mxu2 }
  0xdd   :  { %v2949_v57 = vadd.f32 %v2948_v54, %v2900_v40  ;;  %v4434_v40 = vor.u32 %v5788_v27, %v4431_v61 }
  0xde   :  { %v2997_v59 = vpop.f32.mrf.mxu3  ;;  %v2902_v1 = vpop.f32.mrf.mxu1 }
  0xdf   :  { %v2998_v62 = vadd.f32 %v2997_v59, %v2949_v57  ;;  %v2903_v5 = vadd.f32 %v2902_v1, %v2854_v55  ;;  %v5985_v1 = vld [vmem:[%s8336_s1 + $0x250] sm:$0xff] }
  0xe0   :  { %v3049_v6 = vpop.f32.mrf.mxu0  ;;  %3280 = vmatpush.bf16.msrb.mxu1 %v5985_v1 }
  0xe1   :  { %3097 = vmatmul.bf16.gmra.mxu1 %v4334_v63  ;;  %3146 = vmatmul.bf16.gmra.mxu2 %v4338_v0  ;;  %v6840_v7 = vadd.f32 %v3046_v41, %v2998_v62  ;;  %v4438_v41 = vor.u32 %v5801_v30, %v4437_v29  ;;  %v4537_v62 = vld [vmem:[%s8338_s0 + $0x338] sm:$0xf]  ;;  %v5992_v30 = vld [vmem:[%s8336_s1 + $0x288] sm:$0xff] }
  0xe2   :  { %3330 = vmatpush.bf16.msrb.mxu2 %v5992_v30 }
  0xe3   :  { %3195 = vmatmul.bf16.gmra.mxu3 %v4342_v2  ;;  %3244 = vmatmul.bf16.gmra.mxu0 %v4346_v3  ;;  %v6009_v2 = vld [vmem:[%s8336_s1 + $0x310] sm:$0xff] }
  0xe4   :  { %v2951_v9 = vpop.f32.mrf.mxu2  ;;  %v5813_v3 = vld [vmem:[%s8338_s0 + $0x334] sm:$0xf]  ;;  %3427 = vmatpush.bf16.msrb.mxu0 %v6009_v2 }
  0xe5   :  { %v2952_v12 = vadd.f32 %v2951_v9, %v2903_v5  ;;  %v5826_v5 = vld [vmem:[%s8338_s0 + $0x398] sm:$0xf0]  ;;  %v5827_v9 = vld [vmem:[%s8338_s0 + $0x3a0] sm:$0xf0] }
  0xe6   :  { %v3000_v13 = vpop.f32.mrf.mxu3  ;;  %v2904_v16 = vpop.f32.mrf.mxu1  ;;  %v4546_v21 = vor.u32 %v5827_v9, %v4545_v8 }
  0xe7   :  { %v3001_v17 = vadd.f32 %v3000_v13, %v2952_v12  ;;  %v2905_v19 = vadd.f32 %v2904_v16, %v2856_v11  ;;  %v4534_v16 = vor.u32 %v5813_v3, %v4531_v56  ;;  %v5991_v56 = vld [vmem:[%s8336_s1 + $0x280] sm:$0xff] }
  0xe8   :  { %v3051_v20 = vpop.f32.mrf.mxu0  ;;  %3331 = vmatpush.bf16.msrb.mxu2 %v5991_v56 }
  0xe9   :  { %v6862_v28 = vadd.f32 %v3049_v6, %v3001_v17  ;;  %v5814_v6 = vld [vmem:[%s8338_s0 + $0x33c] sm:$0xf]  ;;  %v4538_v17 = vor.u32 %v5826_v5, %v4537_v62  ;;  %v5999_v62 = vld [vmem:[%s8336_s1 + $0x2c0] sm:$0xff] }
  0xea   :  { %3380 = vmatpush.bf16.msrb.mxu3 %v5999_v62 }
  0xec   :  { %v2953_v35 = vpop.f32.mrf.mxu2 }
  0xed   :  { %v2954_v37 = vadd.f32 %v2953_v35, %v2905_v19 }
  0xee   :  { %v3002_v38 = vpop.f32.mrf.mxu3  ;;  %v2907_v42 = vpop.f32.mrf.mxu1 }
  0xef   :  { %v3003_v26 = vadd.f32 %v3002_v38, %v2954_v37  ;;  %v2908_v47 = vadd.f32 %v2907_v42, %v2859_v36  ;;  %v5984_v38 = vld [vmem:[%s8336_s1 + $0x248] sm:$0xff]  ;;  %v4631_v42 = vld [vmem:[%s8338_s0 + $0x45c] sm:$0xf0] }
  0xf0   :  { %v3054_v48 = vpop.f32.mrf.mxu0  ;;  %3281 = vmatpush.bf16.msrb.mxu1 %v5984_v38 }
  0xf1   :  { %3102 = vmatmul.bf16.gmra.mxu1 %v4434_v40  ;;  %3151 = vmatmul.bf16.gmra.mxu2 %v4438_v41  ;;  %v6884_v49 = vadd.f32 %v3051_v20, %v3003_v26  ;;  %v4542_v20 = vor.u32 %v5814_v6, %v4539_v50  ;;  %v6008_v40 = vld [vmem:[%s8336_s1 + $0x308] sm:$0xff]  ;;  %v5838_v41 = vld [vmem:[%s8338_s0 + $0x3fc] sm:$0xf]  ;;  %v5839_v26 = vld [vmem:[%s8338_s0 + $0x404] sm:$0xf] }
  0xf2   :  { %3428 = vmatpush.bf16.msrb.mxu0 %v6008_v40 }
  0xf3   :  { %3200 = vmatmul.bf16.gmra.mxu3 %v4442_v44  ;;  %3249 = vmatmul.bf16.gmra.mxu0 %v4446_v45  ;;  %v4637_v44 = vld [vmem:[%s8338_s0 + $0x400] sm:$0xf]  ;;  %v5851_v45 = vld [vmem:[%s8338_s0 + $0x460] sm:$0xf0] }
  0xf4   :  { %v2956_v52 = vpop.f32.mrf.mxu2 }
  0xf5   :  { %v2957_v54 = vadd.f32 %v2956_v52, %v2908_v47  ;;  %v4639_v47 = vld [vmem:[%s8338_s0 + $0x464] sm:$0xf0] }
  0xf6   :  { %v3005_v55 = vpop.f32.mrf.mxu3  ;;  %v2909_v57 = vpop.f32.mrf.mxu1 }
  0xf7   :  { %v3006_v59 = vadd.f32 %v3005_v55, %v2957_v54  ;;  %v2910_v63 = vadd.f32 %v2909_v57, %v2861_v53  ;;  %v4634_v54 = vor.u32 %v5838_v41, %v4631_v42  ;;  %v4638_v55 = vor.u32 %v5851_v45, %v4637_v44  ;;  %v6030_v42 = vld [vmem:[%s8336_s1 + $0x3b8] sm:$0xff] }
  0xf8   :  { %v3056_v0 = vpop.f32.mrf.mxu0  ;;  %v6038_v44 = vld [vmem:[%s8336_s1 + $0x3f8] sm:$0xff]  ;;  %3520 = vmatpush.bf16.msra.mxu2 %v6030_v42 }
  0xf9   :  { %v6906_v25 = vadd.f32 %v3054_v48, %v3006_v59  ;;  %v4645_v48 = vld [vmem:[%s8338_s0 + $0x408] sm:$0xf]  ;;  %v4642_v59 = vor.u32 %v5839_v26, %v4639_v47  ;;  %3569 = vmatpush.bf16.msra.mxu3 %v6038_v44 }
  0xfc   :  { %v2958_v11 = vpop.f32.mrf.mxu2 }
  0xfd   :  { %v2959_v12 = vadd.f32 %v2958_v11, %v2910_v63  ;;  %v4646_v63 = vor.u32 %v5852_v15, %v4645_v48 }
  0xfe   :  { %v3007_v13 = vpop.f32.mrf.mxu3  ;;  %v2912_v19 = vpop.f32.mrf.mxu1 }
  0xff   :  { %v3008_v23 = vadd.f32 %v3007_v13, %v2959_v12  ;;  %v2913_v27 = vadd.f32 %v2912_v19, %v6651_v58  ;;  %v5983_v12 = vld [vmem:[%s8336_s1 + $0x240] sm:$0xff]  ;;  %v4737_v19 = vld [vmem:[%s8338_s0 + $0x4c8] sm:$0xf] }
 0x100   :  { %v3059_v61 = vpop.f32.mrf.mxu0  ;;  %v6007_v13 = vld [vmem:[%s8336_s1 + $0x300] sm:$0xff]  ;;  %3282 = vmatpush.bf16.msrb.mxu1 %v5983_v12 }
 0x101   :  { %3107 = vmatmul.bf16.gmra.mxu1 %v4534_v16  ;;  %3156 = vmatmul.bf16.gmra.mxu2 %v4538_v17  ;;  %v6927_v29 = vadd.f32 %v3056_v0, %v3008_v23  ;;  %v5863_v16 = vld [vmem:[%s8338_s0 + $0x4c4] sm:$0xf]  ;;  %v4731_v17 = vld [vmem:[%s8338_s0 + $0x524] sm:$0xf0]  ;;  %v4739_v23 = vld [vmem:[%s8338_s0 + $0x52c] sm:$0xf0] }
 0x102   :  { %3429 = vmatpush.bf16.msrb.mxu0 %v6007_v13 }
 0x103   :  { %3205 = vmatmul.bf16.gmra.mxu3 %v4542_v20  ;;  %3254 = vmatmul.bf16.gmra.mxu0 %v4546_v21  ;;  %v5876_v20 = vld [vmem:[%s8338_s0 + $0x528] sm:$0xf0] }
 0x104   :  { %v2961_v32 = vpop.f32.mrf.mxu2  ;;  %v5864_v21 = vld [vmem:[%s8338_s0 + $0x4cc] sm:$0xf] }
 0x105   :  { %v2962_v33 = vadd.f32 %v2961_v32, %v2913_v27  ;;  %v4745_v27 = vld [vmem:[%s8338_s0 + $0x4d0] sm:$0xf] }
 0x106   :  { %v3010_v58 = vpop.f32.mrf.mxu3  ;;  %v2914_v34 = vpop.f32.mrf.mxu1 }
 0x107   :  { %v3011_v35 = vadd.f32 %v3010_v58, %v2962_v33  ;;  %v2915_v36 = vadd.f32 %v2914_v34, %v6691_v10  ;;  %v4734_v33 = vor.u32 %v5863_v16, %v4731_v17  ;;  %v4738_v58 = vor.u32 %v5876_v20, %v4737_v19  ;;  %v6029_v17 = vld [vmem:[%s8336_s1 + $0x3b0] sm:$0xff] }
 0x108   :  { %v3061_v37 = vpop.f32.mrf.mxu0  ;;  %v6037_v19 = vld [vmem:[%s8336_s1 + $0x3f0] sm:$0xff]  ;;  %3521 = vmatpush.bf16.msra.mxu2 %v6029_v17 }
 0x109   :  { %v6948_v10 = vadd.f32 %v3059_v61, %v3011_v35  ;;  %v5877_v61 = vld [vmem:[%s8338_s0 + $0x530] sm:$0xf0]  ;;  %v4742_v35 = vor.u32 %v5864_v21, %v4739_v23  ;;  %3570 = vmatpush.bf16.msra.mxu3 %v6037_v19 }
 0x10c   :  { %v2963_v51 = vpop.f32.mrf.mxu2 }
 0x10d   :  { %v2964_v52 = vadd.f32 %v2963_v51, %v2915_v36  ;;  %v4746_v36 = vor.u32 %v5877_v61, %v4745_v27 }
 0x10e   :  { %v3012_v53 = vpop.f32.mrf.mxu3  ;;  %v2917_v57 = vpop.f32.mrf.mxu1 }
 0x10f   :  { %v3013_v0 = vadd.f32 %v3012_v53, %v2964_v52  ;;  %v2918_v1 = vadd.f32 %v2917_v57, %v6707_v22  ;;  %v6022_v52 = vld [vmem:[%s8336_s1 + $0x378] sm:$0xff]  ;;  %v4837_v57 = vld [vmem:[%s8338_s0 + $0x590] sm:$0xf] }
 0x110   :  { %v3064_v2 = vpop.f32.mrf.mxu0  ;;  %v6046_v53 = vld [vmem:[%s8336_s1 + $0x438] sm:$0xff]  ;;  %3471 = vmatpush.bf16.msra.mxu1 %v6022_v52 }
 0x111   :  { %3112 = vmatmul.bf16.gmra.mxu1 %v4634_v54  ;;  %3161 = vmatmul.bf16.gmra.mxu2 %v4638_v55  ;;  %v6969_v3 = vadd.f32 %v3061_v37, %v3013_v0  ;;  %v5888_v54 = vld [vmem:[%s8338_s0 + $0x58c] sm:$0xf]  ;;  %v4831_v55 = vld [vmem:[%s8338_s0 + $0x5ec] sm:$0xf0]  ;;  %v4839_v0 = vld [vmem:[%s8338_s0 + $0x5f4] sm:$0xf0] }
 0x112   :  { %3618 = vmatpush.bf16.msra.mxu0 %v6046_v53 }
 0x113   :  { %3210 = vmatmul.bf16.gmra.mxu3 %v4642_v59  ;;  %3259 = vmatmul.bf16.gmra.mxu0 %v4646_v63  ;;  %v5901_v59 = vld [vmem:[%s8338_s0 + $0x5f0] sm:$0xf0] }
 0x114   :  { %v2966_v5 = vpop.f32.mrf.mxu2  ;;  %v5889_v63 = vld [vmem:[%s8338_s0 + $0x594] sm:$0xf] }
 0x115   :  { %v2967_v6 = vadd.f32 %v2966_v5, %v2918_v1  ;;  %v4845_v1 = vld [vmem:[%s8338_s0 + $0x598] sm:$0xf] }
 0x116   :  { %v3015_v22 = vpop.f32.mrf.mxu3  ;;  %v2919_v50 = vpop.f32.mrf.mxu1 }
 0x117   :  { %v3016_v8 = vadd.f32 %v3015_v22, %v2967_v6  ;;  %v2920_v9 = vadd.f32 %v2919_v50, %v6749_v39  ;;  %v4834_v6 = vor.u32 %v5888_v54, %v4831_v55  ;;  %v4838_v22 = vor.u32 %v5901_v59, %v4837_v57  ;;  %v6028_v55 = vld [vmem:[%s8336_s1 + $0x3a8] sm:$0xff] }
 0x118   :  { %v3066_v11 = vpop.f32.mrf.mxu0  ;;  %v6036_v57 = vld [vmem:[%s8336_s1 + $0x3e8] sm:$0xff]  ;;  %3522 = vmatpush.bf16.msra.mxu2 %v6028_v55 }
 0x119   :  { %v6990_v39 = vadd.f32 %v3064_v2, %v3016_v8  ;;  %v5902_v2 = vld [vmem:[%s8338_s0 + $0x5f8] sm:$0xf0]  ;;  %v4842_v8 = vor.u32 %v5889_v63, %v4839_v0  ;;  %3571 = vmatpush.bf16.msra.mxu3 %v6036_v57 }
 0x11c   :  { %v2968_v30 = vpop.f32.mrf.mxu2 }
 0x11d   :  { %v2969_v18 = vadd.f32 %v2968_v30, %v2920_v9  ;;  %v4846_v9 = vor.u32 %v5902_v2, %v4845_v1 }
 0x11e   :  { %v3017_v32 = vpop.f32.mrf.mxu3  ;;  %v2922_v34 = vpop.f32.mrf.mxu1 }
 0x11f   :  { %v3018_v37 = vadd.f32 %v3017_v32, %v2969_v18  ;;  %v2923_v38 = vadd.f32 %v2922_v34, %v6654_v60  ;;  %v6021_v18 = vld [vmem:[%s8336_s1 + $0x370] sm:$0xff]  ;;  %v4153_v34 = vld [vmem:[%s8338_s0 + $0x28] sm:$0xf] }
 0x120   :  { %v3069_v40 = vpop.f32.mrf.mxu0  ;;  %v6045_v32 = vld [vmem:[%s8336_s1 + $0x430] sm:$0xff]  ;;  %3472 = vmatpush.bf16.msra.mxu1 %v6021_v18 }
 0x121   :  { %3117 = vmatmul.bf16.gmra.mxu1 %v4734_v33  ;;  %3166 = vmatmul.bf16.gmra.mxu2 %v4738_v58  ;;  %v7011_v41 = vadd.f32 %v3066_v11, %v3018_v37  ;;  %v5715_v33 = vld [vmem:[%s8338_s0 + $0x24] sm:$0xf]  ;;  %v4147_v58 = vld [vmem:[%s8338_s0 + $0x84] sm:$0xf0]  ;;  %v4155_v37 = vld [vmem:[%s8338_s0 + $0x8c] sm:$0xf0] }
 0x122   :  { %3619 = vmatpush.bf16.msra.mxu0 %v6045_v32 }
 0x123   :  { %3215 = vmatmul.bf16.gmra.mxu3 %v4742_v35  ;;  %3264 = vmatmul.bf16.gmra.mxu0 %v4746_v36  ;;  %v5728_v35 = vld [vmem:[%s8338_s0 + $0x88] sm:$0xf0] }
 0x124   :  { %v2971_v45 = vpop.f32.mrf.mxu2  ;;  %v5716_v36 = vld [vmem:[%s8338_s0 + $0x2c] sm:$0xf] }
 0x125   :  { %v2972_v26 = vadd.f32 %v2971_v45, %v2923_v38  ;;  %v4161_v38 = vld [vmem:[%s8338_s0 + $0x30] sm:$0xf] }
 0x126   :  { %v3020_v60 = vpop.f32.mrf.mxu3  ;;  %v2924_v47 = vpop.f32.mrf.mxu1 }
 0x127   :  { %v3021_v48 = vadd.f32 %v3020_v60, %v2972_v26  ;;  %v2925_v15 = vadd.f32 %v2924_v47, %v6694_v14  ;;  %v4150_v26 = vor.u32 %v5715_v33, %v4147_v58  ;;  %v4154_v60 = vor.u32 %v5728_v35, %v4153_v34  ;;  %v6027_v58 = vld [vmem:[%s8336_s1 + $0x3a0] sm:$0xff] }
 0x128   :  { %v3071_v51 = vpop.f32.mrf.mxu0  ;;  %v6035_v34 = vld [vmem:[%s8336_s1 + $0x3e0] sm:$0xff]  ;;  %3523 = vmatpush.bf16.msra.mxu2 %v6027_v58 }
 0x129   :  { %v7032_v14 = vadd.f32 %v3069_v40, %v3021_v48  ;;  %v5729_v40 = vld [vmem:[%s8338_s0 + $0x90] sm:$0xf0]  ;;  %v4158_v48 = vor.u32 %v5716_v36, %v4155_v37  ;;  %3572 = vmatpush.bf16.msra.mxu3 %v6035_v34 }
 0x12c   :  { %v2973_v56 = vpop.f32.mrf.mxu2 }
 0x12d   :  { %v2974_v62 = vadd.f32 %v2973_v56, %v2925_v15  ;;  %v4162_v15 = vor.u32 %v5729_v40, %v4161_v38 }
 0x12e   :  { %v3022_v5 = vpop.f32.mrf.mxu3  ;;  %v2927_v50 = vpop.f32.mrf.mxu1 }
 0x12f   :  { %v3023_v11 = vadd.f32 %v3022_v5, %v2974_v62  ;;  %v2928_v12 = vadd.f32 %v2927_v50, %v6710_v24  ;;  %v6020_v62 = vld [vmem:[%s8336_s1 + $0x368] sm:$0xff]  ;;  %v4253_v50 = vld [vmem:[%s8338_s0 + $0xf0] sm:$0xf] }
 0x130   :  { %v3074_v13 = vpop.f32.mrf.mxu0  ;;  %v6044_v5 = vld [vmem:[%s8336_s1 + $0x428] sm:$0xff]  ;;  %3473 = vmatpush.bf16.msra.mxu1 %v6020_v62 }
 0x131   :  { %3122 = vmatmul.bf16.gmra.mxu1 %v4834_v6  ;;  %3171 = vmatmul.bf16.gmra.mxu2 %v4838_v22  ;;  %v7053_v16 = vadd.f32 %v3071_v51, %v3023_v11  ;;  %v5740_v6 = vld [vmem:[%s8338_s0 + $0xec] sm:$0xf]  ;;  %v4247_v22 = vld [vmem:[%s8338_s0 + $0x14c] sm:$0xf0]  ;;  %v4255_v11 = vld [vmem:[%s8338_s0 + $0x154] sm:$0xf0] }
 0x132   :  { %3620 = vmatpush.bf16.msra.mxu0 %v6044_v5 }
 0x133   :  { %3220 = vmatmul.bf16.gmra.mxu3 %v4842_v8  ;;  %3269 = vmatmul.bf16.gmra.mxu0 %v4846_v9  ;;  %v5753_v8 = vld [vmem:[%s8338_s0 + $0x150] sm:$0xf0] }
 0x134   :  { %v2976_v20 = vpop.f32.mrf.mxu2  ;;  %v5741_v9 = vld [vmem:[%s8338_s0 + $0xf4] sm:$0xf] }
 0x135   :  { %v2977_v21 = vadd.f32 %v2976_v20, %v2928_v12  ;;  %v4261_v12 = vld [vmem:[%s8338_s0 + $0xf8] sm:$0xf] }
 0x136   :  { %v3025_v24 = vpop.f32.mrf.mxu3  ;;  %v2929_v23 = vpop.f32.mrf.mxu1 }
 0x137   :  { %v3026_v27 = vadd.f32 %v3025_v24, %v2977_v21  ;;  %v2930_v61 = vadd.f32 %v2929_v23, %v6752_v43  ;;  %v4250_v21 = vor.u32 %v5740_v6, %v4247_v22  ;;  %v4254_v24 = vor.u32 %v5753_v8, %v4253_v50  ;;  %v6026_v22 = vld [vmem:[%s8336_s1 + $0x398] sm:$0xff] }
 0x138   :  { %v3076_v30 = vpop.f32.mrf.mxu0  ;;  %v6034_v50 = vld [vmem:[%s8336_s1 + $0x3d8] sm:$0xff]  ;;  %3524 = vmatpush.bf16.msra.mxu2 %v6026_v22 }
 0x139   :  { %v7074_v43 = vadd.f32 %v3074_v13, %v3026_v27  ;;  %v5754_v13 = vld [vmem:[%s8338_s0 + $0x158] sm:$0xf0]  ;;  %v4258_v27 = vor.u32 %v5741_v9, %v4255_v11  ;;  %3573 = vmatpush.bf16.msra.mxu3 %v6034_v50 }
 0x13c   :  { %v2978_v42 = vpop.f32.mrf.mxu2 }
 0x13d   :  { %v2979_v44 = vadd.f32 %v2978_v42, %v2930_v61  ;;  %v4262_v61 = vor.u32 %v5754_v13, %v4261_v12 }
 0x13e   :  { %v3027_v45 = vpop.f32.mrf.mxu3  ;;  %v3088_v47 = vpop.f32.mrf.mxu1 }
 0x13f   :  { %v3028_v51 = vadd.f32 %v3027_v45, %v2979_v44  ;;  %v3089_v52 = vadd.f32 %v3088_v47, %v6774_v4  ;;  %v6019_v44 = vld [vmem:[%s8336_s1 + $0x360] sm:$0xff]  ;;  %v4353_v47 = vld [vmem:[%s8338_s0 + $0x1b8] sm:$0xf] }
 0x140   :  { %v3235_v53 = vpop.f32.mrf.mxu0  ;;  %v6043_v45 = vld [vmem:[%s8336_s1 + $0x420] sm:$0xff]  ;;  %3474 = vmatpush.bf16.msra.mxu1 %v6019_v44 }
 0x141   :  { %3283 = vmatmul.bf16.vlgmr.msrb.gmra.mxu1 %v4150_v26  ;;  %3332 = vmatmul.bf16.vlgmr.msrb.gmra.mxu2 %v4154_v60  ;;  %v7095_v54 = vadd.f32 %v3076_v30, %v3028_v51  ;;  %v5765_v26 = vld [vmem:[%s8338_s0 + $0x1b4] sm:$0xf]  ;;  %v4347_v60 = vld [vmem:[%s8338_s0 + $0x214] sm:$0xf0]  ;;  %v4355_v51 = vld [vmem:[%s8338_s0 + $0x21c] sm:$0xf0] }
 0x142   :  { %3621 = vmatpush.bf16.msra.mxu0 %v6043_v45 }
 0x143   :  { %3381 = vmatmul.bf16.vlgmr.msrb.gmra.mxu3 %v4158_v48  ;;  %3430 = vmatmul.bf16.vlgmr.msrb.gmra.mxu0 %v4162_v15  ;;  %v5778_v48 = vld [vmem:[%s8338_s0 + $0x218] sm:$0xf0] }
 0x144   :  { %v3137_v59 = vpop.f32.mrf.mxu2  ;;  %v5766_v15 = vld [vmem:[%s8338_s0 + $0x1bc] sm:$0xf] }
 0x145   :  { %v3138_v63 = vadd.f32 %v3137_v59, %v3089_v52  ;;  %v4361_v52 = vld [vmem:[%s8338_s0 + $0x1c0] sm:$0xf] }
 0x146   :  { %v3186_v4 = vpop.f32.mrf.mxu3  ;;  %v3090_v0 = vpop.f32.mrf.mxu1 }
 0x147   :  { %v3187_v1 = vadd.f32 %v3186_v4, %v3138_v63  ;;  %v3091_v2 = vadd.f32 %v3090_v0, %v6796_v31  ;;  %v4350_v63 = vor.u32 %v5765_v26, %v4347_v60  ;;  %v4354_v4 = vor.u32 %v5778_v48, %v4353_v47  ;;  %v6025_v60 = vld [vmem:[%s8336_s1 + $0x390] sm:$0xff] }
 0x148   :  { %v3237_v56 = vpop.f32.mrf.mxu0  ;;  %v6033_v47 = vld [vmem:[%s8336_s1 + $0x3d0] sm:$0xff]  ;;  %3525 = vmatpush.bf16.msra.mxu2 %v6025_v60 }
 0x149   :  { %v7116_v31 = vadd.f32 %v3235_v53, %v3187_v1  ;;  %v5779_v53 = vld [vmem:[%s8338_s0 + $0x220] sm:$0xf0]  ;;  %v4358_v1 = vor.u32 %v5766_v15, %v4355_v51  ;;  %3574 = vmatpush.bf16.msra.mxu3 %v6033_v47 }
 0x14c   :  { %v3139_v17 = vpop.f32.mrf.mxu2 }
 0x14d   :  { %v3140_v19 = vadd.f32 %v3139_v17, %v3091_v2  ;;  %v4362_v2 = vor.u32 %v5779_v53, %v4361_v52 }
 0x14e   :  { %v3188_v20 = vpop.f32.mrf.mxu3  ;;  %v3093_v23 = vpop.f32.mrf.mxu1 }
 0x14f   :  { %v3189_v30 = vadd.f32 %v3188_v20, %v3140_v19  ;;  %v3094_v18 = vadd.f32 %v3093_v23, %v6818_v46  ;;  %v6018_v19 = vld [vmem:[%s8336_s1 + $0x358] sm:$0xff]  ;;  %v4453_v23 = vld [vmem:[%s8338_s0 + $0x280] sm:$0xf] }
 0x150   :  { %v3240_v32 = vpop.f32.mrf.mxu0  ;;  %v6042_v20 = vld [vmem:[%s8336_s1 + $0x418] sm:$0xff]  ;;  %3475 = vmatpush.bf16.msra.mxu1 %v6018_v19 }
 0x151   :  { %3288 = vmatmul.bf16.gmra.mxu1 %v4250_v21  ;;  %3337 = vmatmul.bf16.gmra.mxu2 %v4254_v24  ;;  %v7137_v33 = vadd.f32 %v3237_v56, %v3189_v30  ;;  %v5790_v21 = vld [vmem:[%s8338_s0 + $0x27c] sm:$0xf]  ;;  %v4447_v24 = vld [vmem:[%s8338_s0 + $0x2dc] sm:$0xf0]  ;;  %v4455_v30 = vld [vmem:[%s8338_s0 + $0x2e4] sm:$0xf0] }
 0x152   :  { %3622 = vmatpush.bf16.msra.mxu0 %v6042_v20 }
 0x153   :  { %3386 = vmatmul.bf16.gmra.mxu3 %v4258_v27  ;;  %3435 = vmatmul.bf16.gmra.mxu0 %v4262_v61  ;;  %v5803_v27 = vld [vmem:[%s8338_s0 + $0x2e0] sm:$0xf0] }
 0x154   :  { %v3142_v35 = vpop.f32.mrf.mxu2  ;;  %v5791_v61 = vld [vmem:[%s8338_s0 + $0x284] sm:$0xf] }
 0x155   :  { %v3143_v36 = vadd.f32 %v3142_v35, %v3094_v18  ;;  %v4461_v18 = vld [vmem:[%s8338_s0 + $0x288] sm:$0xf] }
 0x156   :  { %v3191_v46 = vpop.f32.mrf.mxu3  ;;  %v3095_v37 = vpop.f32.mrf.mxu1 }
 0x157   :  { %v3192_v38 = vadd.f32 %v3191_v46, %v3143_v36  ;;  %v3096_v40 = vadd.f32 %v3095_v37, %v6840_v7  ;;  %v4450_v36 = vor.u32 %v5790_v21, %v4447_v24  ;;  %v4454_v46 = vor.u32 %v5803_v27, %v4453_v23  ;;  %v6024_v24 = vld [vmem:[%s8336_s1 + $0x388] sm:$0xff] }
 0x158   :  { %v3242_v42 = vpop.f32.mrf.mxu0  ;;  %v6032_v23 = vld [vmem:[%s8336_s1 + $0x3c8] sm:$0xff]  ;;  %3526 = vmatpush.bf16.msra.mxu2 %v6024_v24 }
 0x159   :  { %v7158_v7 = vadd.f32 %v3240_v32, %v3192_v38  ;;  %v5804_v32 = vld [vmem:[%s8338_s0 + $0x2e8] sm:$0xf0]  ;;  %v4458_v38 = vor.u32 %v5791_v61, %v4455_v30  ;;  %3575 = vmatpush.bf16.msra.mxu3 %v6032_v23 }
 0x15c   :  { %v3144_v55 = vpop.f32.mrf.mxu2 }
 0x15d   :  { %v3145_v57 = vadd.f32 %v3144_v55, %v3096_v40  ;;  %v4462_v40 = vor.u32 %v5804_v32, %v4461_v18 }
 0x15e   :  { %v3193_v59 = vpop.f32.mrf.mxu3  ;;  %v3098_v0 = vpop.f32.mrf.mxu1 }
 0x15f   :  { %v3194_v56 = vadd.f32 %v3193_v59, %v3145_v57  ;;  %v3099_v62 = vadd.f32 %v3098_v0, %v6862_v28  ;;  %v6017_v57 = vld [vmem:[%s8336_s1 + $0x350] sm:$0xff]  ;;  %v4553_v0 = vld [vmem:[%s8338_s0 + $0x348] sm:$0xf] }
 0x160   :  { %v3245_v5 = vpop.f32.mrf.mxu0  ;;  %v6041_v59 = vld [vmem:[%s8336_s1 + $0x410] sm:$0xff]  ;;  %3476 = vmatpush.bf16.msra.mxu1 %v6017_v57 }
 0x161   :  { %3293 = vmatmul.bf16.gmra.mxu1 %v4350_v63  ;;  %3342 = vmatmul.bf16.gmra.mxu2 %v4354_v4  ;;  %v7179_v6 = vadd.f32 %v3242_v42, %v3194_v56  ;;  %v5815_v63 = vld [vmem:[%s8338_s0 + $0x344] sm:$0xf]  ;;  %v4547_v4 = vld [vmem:[%s8338_s0 + $0x3a4] sm:$0xf0]  ;;  %v4555_v56 = vld [vmem:[%s8338_s0 + $0x3ac] sm:$0xf0] }
 0x162   :  { %3623 = vmatpush.bf16.msra.mxu0 %v6041_v59 }
 0x163   :  { %3391 = vmatmul.bf16.gmra.mxu3 %v4358_v1  ;;  %3440 = vmatmul.bf16.gmra.mxu0 %v4362_v2  ;;  %v5828_v1 = vld [vmem:[%s8338_s0 + $0x3a8] sm:$0xf0] }
 0x164   :  { %v3147_v8 = vpop.f32.mrf.mxu2  ;;  %v5816_v2 = vld [vmem:[%s8338_s0 + $0x34c] sm:$0xf] }
 0x165   :  { %v3148_v9 = vadd.f32 %v3147_v8, %v3099_v62  ;;  %v4561_v62 = vld [vmem:[%s8338_s0 + $0x350] sm:$0xf] }
 0x166   :  { %v3196_v28 = vpop.f32.mrf.mxu3  ;;  %v3100_v11 = vpop.f32.mrf.mxu1 }
 0x167   :  { %v3197_v12 = vadd.f32 %v3196_v28, %v3148_v9  ;;  %v3101_v13 = vadd.f32 %v3100_v11, %v6884_v49  ;;  %v4550_v9 = vor.u32 %v5815_v63, %v4547_v4  ;;  %v4554_v28 = vor.u32 %v5828_v1, %v4553_v0  ;;  %v6023_v4 = vld [vmem:[%s8336_s1 + $0x380] sm:$0xff] }
 0x168   :  { %v3247_v17 = vpop.f32.mrf.mxu0  ;;  %v6031_v0 = vld [vmem:[%s8336_s1 + $0x3c0] sm:$0xff]  ;;  %3527 = vmatpush.bf16.msra.mxu2 %v6023_v4 }
 0x169   :  { %v7200_v49 = vadd.f32 %v3245_v5, %v3197_v12  ;;  %v5829_v5 = vld [vmem:[%s8338_s0 + $0x3b0] sm:$0xf0]  ;;  %v4558_v12 = vor.u32 %v5816_v2, %v4555_v56  ;;  %3576 = vmatpush.bf16.msra.mxu3 %v6031_v0 }
 0x16c   :  { %v3149_v58 = vpop.f32.mrf.mxu2 }
 0x16d   :  { %v3150_v34 = vadd.f32 %v3149_v58, %v3101_v13  ;;  %v4562_v13 = vor.u32 %v5829_v5, %v4561_v62 }
 0x16e   :  { %v3198_v35 = vpop.f32.mrf.mxu3  ;;  %v3103_v37 = vpop.f32.mrf.mxu1 }
 0x16f   :  { %v3199_v42 = vadd.f32 %v3198_v35, %v3150_v34  ;;  %v3104_v44 = vadd.f32 %v3103_v37, %v6906_v25  ;;  %v6016_v34 = vld [vmem:[%s8336_s1 + $0x348] sm:$0xff]  ;;  %v4653_v37 = vld [vmem:[%s8338_s0 + $0x410] sm:$0xf] }
 0x170   :  { %v3250_v45 = vpop.f32.mrf.mxu0  ;;  %v6040_v35 = vld [vmem:[%s8336_s1 + $0x408] sm:$0xff]  ;;  %3477 = vmatpush.bf16.msra.mxu1 %v6016_v34 }
 0x171   :  { %3298 = vmatmul.bf16.gmra.mxu1 %v4450_v36  ;;  %3347 = vmatmul.bf16.gmra.mxu2 %v4454_v46  ;;  %v7221_v26 = vadd.f32 %v3247_v17, %v3199_v42  ;;  %v5840_v36 = vld [vmem:[%s8338_s0 + $0x40c] sm:$0xf]  ;;  %v4647_v46 = vld [vmem:[%s8338_s0 + $0x46c] sm:$0xf0]  ;;  %v4655_v42 = vld [vmem:[%s8338_s0 + $0x474] sm:$0xf0] }
 0x172   :  { %3624 = vmatpush.bf16.msra.mxu0 %v6040_v35 }
 0x173   :  { %3396 = vmatmul.bf16.gmra.mxu3 %v4458_v38  ;;  %3445 = vmatmul.bf16.gmra.mxu0 %v4462_v40  ;;  %v5853_v38 = vld [vmem:[%s8338_s0 + $0x470] sm:$0xf0] }
 0x174   :  { %v3152_v48 = vpop.f32.mrf.mxu2  ;;  %v5841_v40 = vld [vmem:[%s8338_s0 + $0x414] sm:$0xf] }
 0x175   :  { %v3153_v15 = vadd.f32 %v3152_v48, %v3104_v44  ;;  %v4661_v44 = vld [vmem:[%s8338_s0 + $0x418] sm:$0xf] }
 0x176   :  { %v3201_v25 = vpop.f32.mrf.mxu3  ;;  %v3105_v51 = vpop.f32.mrf.mxu1 }
 0x177   :  { %v3202_v52 = vadd.f32 %v3201_v25, %v3153_v15  ;;  %v3106_v53 = vadd.f32 %v3105_v51, %v6927_v29  ;;  %v4650_v15 = vor.u32 %v5840_v36, %v4647_v46  ;;  %v4654_v25 = vor.u32 %v5853_v38, %v4653_v37  ;;  %v6062_v46 = vld [vmem:[%s8336_s1 + $0x4b8] sm:$0xff] }
 0x178   :  { %v3252_v55 = vpop.f32.mrf.mxu0  ;;  %v6070_v37 = vld [vmem:[%s8336_s1 + $0x4f8] sm:$0xff]  ;;  %3716 = vmatpush.bf16.msrb.mxu2 %v6062_v46 }
 0x179   :  { %v7242_v29 = vadd.f32 %v3250_v45, %v3202_v52  ;;  %v5854_v45 = vld [vmem:[%s8338_s0 + $0x478] sm:$0xf0]  ;;  %v4658_v52 = vor.u32 %v5841_v40, %v4655_v42  ;;  %3765 = vmatpush.bf16.msrb.mxu3 %v6070_v37 }
 0x17c   :  { %v3154_v22 = vpop.f32.mrf.mxu2 }
 0x17d   :  { %v3155_v50 = vadd.f32 %v3154_v22, %v3106_v53  ;;  %v4662_v53 = vor.u32 %v5854_v45, %v4661_v44 }
 0x17e   :  { %v3203_v8 = vpop.f32.mrf.mxu3  ;;  %v3108_v11 = vpop.f32.mrf.mxu1 }
 0x17f   :  { %v3204_v17 = vadd.f32 %v3203_v8, %v3155_v50  ;;  %v3109_v19 = vadd.f32 %v3108_v11, %v6948_v10  ;;  %v6015_v50 = vld [vmem:[%s8336_s1 + $0x340] sm:$0xff]  ;;  %v4753_v11 = vld [vmem:[%s8338_s0 + $0x4d8] sm:$0xf] }
 0x180   :  { %v3255_v20 = vpop.f32.mrf.mxu0  ;;  %v6039_v8 = vld [vmem:[%s8336_s1 + $0x400] sm:$0xff]  ;;  %3478 = vmatpush.bf16.msra.mxu1 %v6015_v50 }
 0x181   :  { %3303 = vmatmul.bf16.gmra.mxu1 %v4550_v9  ;;  %3352 = vmatmul.bf16.gmra.mxu2 %v4554_v28  ;;  %v7263_v21 = vadd.f32 %v3252_v55, %v3204_v17  ;;  %v5865_v9 = vld [vmem:[%s8338_s0 + $0x4d4] sm:$0xf]  ;;  %v4747_v28 = vld [vmem:[%s8338_s0 + $0x534] sm:$0xf0]  ;;  %v4755_v17 = vld [vmem:[%s8338_s0 + $0x53c] sm:$0xf0] }
 0x182   :  { %3625 = vmatpush.bf16.msra.mxu0 %v6039_v8 }
 0x183   :  { %3401 = vmatmul.bf16.gmra.mxu3 %v4558_v12  ;;  %3450 = vmatmul.bf16.gmra.mxu0 %v4562_v13  ;;  %v5878_v12 = vld [vmem:[%s8338_s0 + $0x538] sm:$0xf0] }
 0x184   :  { %v3157_v27 = vpop.f32.mrf.mxu2  ;;  %v5866_v13 = vld [vmem:[%s8338_s0 + $0x4dc] sm:$0xf] }
 0x185   :  { %v3158_v61 = vadd.f32 %v3157_v27, %v3109_v19  ;;  %v4761_v19 = vld [vmem:[%s8338_s0 + $0x4e0] sm:$0xf] }
 0x186   :  { %v3206_v10 = vpop.f32.mrf.mxu3  ;;  %v3110_v30 = vpop.f32.mrf.mxu1 }
 0x187   :  { %v3207_v18 = vadd.f32 %v3206_v10, %v3158_v61  ;;  %v3111_v32 = vadd.f32 %v3110_v30, %v6969_v3  ;;  %v4750_v61 = vor.u32 %v5865_v9, %v4747_v28  ;;  %v4754_v10 = vor.u32 %v5878_v12, %v4753_v11  ;;  %v6061_v28 = vld [vmem:[%s8336_s1 + $0x4b0] sm:$0xff] }
 0x188   :  { %v3257_v58 = vpop.f32.mrf.mxu0  ;;  %v6069_v11 = vld [vmem:[%s8336_s1 + $0x4f0] sm:$0xff]  ;;  %3717 = vmatpush.bf16.msrb.mxu2 %v6061_v28 }
 0x189   :  { %v7284_v3 = vadd.f32 %v3255_v20, %v3207_v18  ;;  %v5879_v20 = vld [vmem:[%s8338_s0 + $0x540] sm:$0xf0]  ;;  %v4758_v18 = vor.u32 %v5866_v13, %v4755_v17  ;;  %3766 = vmatpush.bf16.msrb.mxu3 %v6069_v11 }
 0x18c   :  { %v3159_v60 = vpop.f32.mrf.mxu2 }
 0x18d   :  { %v3160_v47 = vadd.f32 %v3159_v60, %v3111_v32  ;;  %v4762_v32 = vor.u32 %v5879_v20, %v4761_v19 }
 0x18e   :  { %v3208_v48 = vpop.f32.mrf.mxu3  ;;  %v3113_v51 = vpop.f32.mrf.mxu1 }
 0x18f   :  { %v3209_v55 = vadd.f32 %v3208_v48, %v3160_v47  ;;  %v3114_v57 = vadd.f32 %v3113_v51, %v6990_v39  ;;  %v6054_v47 = vld [vmem:[%s8336_s1 + $0x478] sm:$0xff]  ;;  %v4853_v51 = vld [vmem:[%s8338_s0 + $0x5a0] sm:$0xf] }
 0x190   :  { %v3260_v59 = vpop.f32.mrf.mxu0  ;;  %v6078_v48 = vld [vmem:[%s8336_s1 + $0x538] sm:$0xff]  ;;  %3667 = vmatpush.bf16.msrb.mxu1 %v6054_v47 }
 0x191   :  { %3308 = vmatmul.bf16.gmra.mxu1 %v4650_v15  ;;  %3357 = vmatmul.bf16.gmra.mxu2 %v4654_v25  ;;  %v7305_v63 = vadd.f32 %v3257_v58, %v3209_v55  ;;  %v5890_v15 = vld [vmem:[%s8338_s0 + $0x59c] sm:$0xf]  ;;  %v4847_v25 = vld [vmem:[%s8338_s0 + $0x5fc] sm:$0xf0]  ;;  %v4855_v55 = vld [vmem:[%s8338_s0 + $0x604] sm:$0xf0] }
 0x192   :  { %3814 = vmatpush.bf16.msrb.mxu0 %v6078_v48 }
 0x193   :  { %3406 = vmatmul.bf16.gmra.mxu3 %v4658_v52  ;;  %3455 = vmatmul.bf16.gmra.mxu0 %v4662_v53  ;;  %v5903_v52 = vld [vmem:[%s8338_s0 + $0x600] sm:$0xf0] }
 0x194   :  { %v3162_v1 = vpop.f32.mrf.mxu2  ;;  %v5891_v53 = vld [vmem:[%s8338_s0 + $0x5a4] sm:$0xf] }
 0x195   :  { %v3163_v2 = vadd.f32 %v3162_v1, %v3114_v57  ;;  %v4861_v57 = vld [vmem:[%s8338_s0 + $0x5a8] sm:$0xf] }
 0x196   :  { %v3211_v39 = vpop.f32.mrf.mxu3  ;;  %v3115_v56 = vpop.f32.mrf.mxu1 }
 0x197   :  { %v3212_v62 = vadd.f32 %v3211_v39, %v3163_v2  ;;  %v3116_v5 = vadd.f32 %v3115_v56, %v7011_v41  ;;  %v4850_v2 = vor.u32 %v5890_v15, %v4847_v25  ;;  %v4854_v39 = vor.u32 %v5903_v52, %v4853_v51  ;;  %v6060_v25 = vld [vmem:[%s8336_s1 + $0x4a8] sm:$0xff] }
 0x198   :  { %v3262_v22 = vpop.f32.mrf.mxu0  ;;  %v6068_v51 = vld [vmem:[%s8336_s1 + $0x4e8] sm:$0xff]  ;;  %3718 = vmatpush.bf16.msrb.mxu2 %v6060_v25 }
 0x199   :  { %v7326_v41 = vadd.f32 %v3260_v59, %v3212_v62  ;;  %v5904_v59 = vld [vmem:[%s8338_s0 + $0x608] sm:$0xf0]  ;;  %v4858_v62 = vor.u32 %v5891_v53, %v4855_v55  ;;  %3767 = vmatpush.bf16.msrb.mxu3 %v6068_v51 }
 0x19c   :  { %v3164_v24 = vpop.f32.mrf.mxu2 }
 0x19d   :  { %v3165_v23 = vadd.f32 %v3164_v24, %v3116_v5  ;;  %v4862_v5 = vor.u32 %v5904_v59, %v4861_v57 }
 0x19e   :  { %v3213_v27 = vpop.f32.mrf.mxu3  ;;  %v3118_v30 = vpop.f32.mrf.mxu1 }
 0x19f   :  { %v3214_v58 = vadd.f32 %v3213_v27, %v3165_v23  ;;  %v3119_v34 = vadd.f32 %v3118_v30, %v7032_v14  ;;  %v6053_v23 = vld [vmem:[%s8336_s1 + $0x470] sm:$0xff]  ;;  %v4169_v30 = vld [vmem:[%s8338_s0 + $0x38] sm:$0xf] }
 0x1a0   :  { %v3265_v35 = vpop.f32.mrf.mxu0  ;;  %v6077_v27 = vld [vmem:[%s8336_s1 + $0x530] sm:$0xff]  ;;  %3668 = vmatpush.bf16.msrb.mxu1 %v6053_v23 }
 0x1a1   :  { %3313 = vmatmul.bf16.gmra.mxu1 %v4750_v61  ;;  %3362 = vmatmul.bf16.gmra.mxu2 %v4754_v10  ;;  %v7347_v36 = vadd.f32 %v3262_v22, %v3214_v58  ;;  %v5717_v61 = vld [vmem:[%s8338_s0 + $0x34] sm:$0xf]  ;;  %v4163_v10 = vld [vmem:[%s8338_s0 + $0x94] sm:$0xf0]  ;;  %v4171_v58 = vld [vmem:[%s8338_s0 + $0x9c] sm:$0xf0] }
 0x1a2   :  { %3815 = vmatpush.bf16.msrb.mxu0 %v6077_v27 }
 0x1a3   :  { %3411 = vmatmul.bf16.gmra.mxu3 %v4758_v18  ;;  %3460 = vmatmul.bf16.gmra.mxu0 %v4762_v32  ;;  %v5730_v18 = vld [vmem:[%s8338_s0 + $0x98] sm:$0xf0] }
 0x1a4   :  { %v3167_v38 = vpop.f32.mrf.mxu2  ;;  %v5718_v32 = vld [vmem:[%s8338_s0 + $0x3c] sm:$0xf] }
 0x1a5   :  { %v3168_v40 = vadd.f32 %v3167_v38, %v3119_v34  ;;  %v4177_v34 = vld [vmem:[%s8338_s0 + $0x40] sm:$0xf] }
 0x1a6   :  { %v3216_v14 = vpop.f32.mrf.mxu3  ;;  %v3120_v42 = vpop.f32.mrf.mxu1 }
 0x1a7   :  { %v3217_v44 = vadd.f32 %v3216_v14, %v3168_v40  ;;  %v3121_v45 = vadd.f32 %v3120_v42, %v7053_v16  ;;  %v4166_v40 = vor.u32 %v5717_v61, %v4163_v10  ;;  %v4170_v14 = vor.u32 %v5730_v18, %v4169_v30  ;;  %v6059_v10 = vld [vmem:[%s8336_s1 + $0x4a0] sm:$0xff] }
 0x1a8   :  { %v3267_v60 = vpop.f32.mrf.mxu0  ;;  %v6067_v30 = vld [vmem:[%s8336_s1 + $0x4e0] sm:$0xff]  ;;  %3719 = vmatpush.bf16.msrb.mxu2 %v6059_v10 }
 0x1a9   :  { %v7368_v16 = vadd.f32 %v3265_v35, %v3217_v44  ;;  %v5731_v35 = vld [vmem:[%s8338_s0 + $0xa0] sm:$0xf0]  ;;  %v4174_v44 = vor.u32 %v5718_v32, %v4171_v58  ;;  %3768 = vmatpush.bf16.msrb.mxu3 %v6067_v30 }
 0x1ac   :  { %v3169_v4 = vpop.f32.mrf.mxu2 }
 0x1ad   :  { %v3170_v0 = vadd.f32 %v3169_v4, %v3121_v45  ;;  %v4178_v45 = vor.u32 %v5731_v35, %v4177_v34 }
 0x1ae   :  { %v3218_v1 = vpop.f32.mrf.mxu3  ;;  %v3123_v56 = vpop.f32.mrf.mxu1 }
 0x1af   :  { %v3219_v22 = vadd.f32 %v3218_v1, %v3170_v0  ;;  %v3124_v50 = vadd.f32 %v3123_v56, %v7074_v43  ;;  %v6052_v0 = vld [vmem:[%s8336_s1 + $0x468] sm:$0xff]  ;;  %v4269_v56 = vld [vmem:[%s8338_s0 + $0x100] sm:$0xf] }
 0x1b0   :  { %v3270_v8 = vpop.f32.mrf.mxu0  ;;  %v6076_v1 = vld [vmem:[%s8336_s1 + $0x528] sm:$0xff]  ;;  %3669 = vmatpush.bf16.msrb.mxu1 %v6052_v0 }
 0x1b1   :  { %3318 = vmatmul.bf16.gmra.mxu1 %v4850_v2  ;;  %3367 = vmatmul.bf16.gmra.mxu2 %v4854_v39  ;;  %v7389_v9 = vadd.f32 %v3267_v60, %v3219_v22  ;;  %v5742_v2 = vld [vmem:[%s8338_s0 + $0xfc] sm:$0xf]  ;;  %v4263_v39 = vld [vmem:[%s8338_s0 + $0x15c] sm:$0xf0]  ;;  %v4271_v22 = vld [vmem:[%s8338_s0 + $0x164] sm:$0xf0] }
 0x1b2   :  { %3816 = vmatpush.bf16.msrb.mxu0 %v6076_v1 }
 0x1b3   :  { %3416 = vmatmul.bf16.gmra.mxu3 %v4858_v62  ;;  %3465 = vmatmul.bf16.gmra.mxu0 %v4862_v5  ;;  %v5755_v62 = vld [vmem:[%s8338_s0 + $0x160] sm:$0xf0] }
 0x1b4   :  { %v3172_v12 = vpop.f32.mrf.mxu2  ;;  %v5743_v5 = vld [vmem:[%s8338_s0 + $0x104] sm:$0xf] }
 0x1b5   :  { %v3173_v13 = vadd.f32 %v3172_v12, %v3124_v50  ;;  %v4277_v50 = vld [vmem:[%s8338_s0 + $0x108] sm:$0xf] }
 0x1b6   :  { %v3221_v43 = vpop.f32.mrf.mxu3  ;;  %v3125_v17 = vpop.f32.mrf.mxu1 }
 0x1b7   :  { %v3222_v19 = vadd.f32 %v3221_v43, %v3173_v13  ;;  %v3126_v20 = vadd.f32 %v3125_v17, %v7095_v54  ;;  %v4266_v13 = vor.u32 %v5742_v2, %v4263_v39  ;;  %v4270_v43 = vor.u32 %v5755_v62, %v4269_v56  ;;  %v6058_v39 = vld [vmem:[%s8336_s1 + $0x498] sm:$0xff] }
 0x1b8   :  { %v3272_v24 = vpop.f32.mrf.mxu0  ;;  %v6066_v56 = vld [vmem:[%s8336_s1 + $0x4d8] sm:$0xff]  ;;  %3720 = vmatpush.bf16.msrb.mxu2 %v6058_v39 }
 0x1b9   :  { %v7410_v54 = vadd.f32 %v3270_v8, %v3222_v19  ;;  %v5756_v8 = vld [vmem:[%s8338_s0 + $0x168] sm:$0xf0]  ;;  %v4274_v19 = vor.u32 %v5743_v5, %v4271_v22  ;;  %3769 = vmatpush.bf16.msrb.mxu3 %v6066_v56 }
 0x1bc   :  { %v3174_v46 = vpop.f32.mrf.mxu2 }
 0x1bd   :  { %v3175_v37 = vadd.f32 %v3174_v46, %v3126_v20  ;;  %v4278_v20 = vor.u32 %v5756_v8, %v4277_v50 }
 0x1be   :  { %v3223_v38 = vpop.f32.mrf.mxu3  ;;  %v3284_v42 = vpop.f32.mrf.mxu1 }
 0x1bf   :  { %v3224_v60 = vadd.f32 %v3223_v38, %v3175_v37  ;;  %v3285_v47 = vadd.f32 %v3284_v42, %v7116_v31  ;;  %v6051_v37 = vld [vmem:[%s8336_s1 + $0x460] sm:$0xff]  ;;  %v4369_v42 = vld [vmem:[%s8338_s0 + $0x1c8] sm:$0xf] }
 0x1c0   :  { %v3431_v48 = vpop.f32.mrf.mxu0  ;;  %v6075_v38 = vld [vmem:[%s8336_s1 + $0x520] sm:$0xff]  ;;  %3670 = vmatpush.bf16.msrb.mxu1 %v6051_v37 }
 0x1c1   :  { %3479 = vmatmul.bf16.vlgmr.msra.gmra.mxu1 %v4166_v40  ;;  %3528 = vmatmul.bf16.vlgmr.msra.gmra.mxu2 %v4170_v14  ;;  %v7431_v15 = vadd.f32 %v3272_v24, %v3224_v60  ;;  %v5767_v40 = vld [vmem:[%s8338_s0 + $0x1c4] sm:$0xf]  ;;  %v4363_v14 = vld [vmem:[%s8338_s0 + $0x224] sm:$0xf0]  ;;  %v4371_v60 = vld [vmem:[%s8338_s0 + $0x22c] sm:$0xf0] }
 0x1c2   :  { %3817 = vmatpush.bf16.msrb.mxu0 %v6075_v38 }
 0x1c3   :  { %3577 = vmatmul.bf16.vlgmr.msra.gmra.mxu3 %v4174_v44  ;;  %3626 = vmatmul.bf16.vlgmr.msra.gmra.mxu0 %v4178_v45  ;;  %v5780_v44 = vld [vmem:[%s8338_s0 + $0x228] sm:$0xf0] }
 0x1c4   :  { %v3333_v52 = vpop.f32.mrf.mxu2  ;;  %v5768_v45 = vld [vmem:[%s8338_s0 + $0x1cc] sm:$0xf] }
 0x1c5   :  { %v3334_v53 = vadd.f32 %v3333_v52, %v3285_v47  ;;  %v4377_v47 = vld [vmem:[%s8338_s0 + $0x1d0] sm:$0xf] }
 0x1c6   :  { %v3382_v31 = vpop.f32.mrf.mxu3  ;;  %v3286_v55 = vpop.f32.mrf.mxu1 }
 0x1c7   :  { %v3383_v57 = vadd.f32 %v3382_v31, %v3334_v53  ;;  %v3287_v59 = vadd.f32 %v3286_v55, %v7137_v33  ;;  %v4366_v53 = vor.u32 %v5767_v40, %v4363_v14  ;;  %v4370_v31 = vor.u32 %v5780_v44, %v4369_v42  ;;  %v6057_v14 = vld [vmem:[%s8336_s1 + $0x490] sm:$0xff] }
 0x1c8   :  { %v3433_v4 = vpop.f32.mrf.mxu0  ;;  %v6065_v42 = vld [vmem:[%s8336_s1 + $0x4d0] sm:$0xff]  ;;  %3721 = vmatpush.bf16.msrb.mxu2 %v6057_v14 }
 0x1c9   :  { %v7452_v33 = vadd.f32 %v3431_v48, %v3383_v57  ;;  %v5781_v48 = vld [vmem:[%s8338_s0 + $0x230] sm:$0xf0]  ;;  %v4374_v57 = vor.u32 %v5768_v45, %v4371_v60  ;;  %3770 = vmatpush.bf16.msrb.mxu3 %v6065_v42 }
 0x1cc   :  { %v3335_v28 = vpop.f32.mrf.mxu2 }
 0x1cd   :  { %v3336_v11 = vadd.f32 %v3335_v28, %v3287_v59  ;;  %v4378_v59 = vor.u32 %v5781_v48, %v4377_v47 }
 0x1ce   :  { %v3384_v12 = vpop.f32.mrf.mxu3  ;;  %v3289_v17 = vpop.f32.mrf.mxu1 }
 0x1cf   :  { %v3385_v24 = vadd.f32 %v3384_v12, %v3336_v11  ;;  %v3290_v23 = vadd.f32 %v3289_v17, %v7158_v7  ;;  %v6050_v11 = vld [vmem:[%s8336_s1 + $0x458] sm:$0xff]  ;;  %v4469_v17 = vld [vmem:[%s8338_s0 + $0x290] sm:$0xf] }
 0x1d0   :  { %v3436_v27 = vpop.f32.mrf.mxu0  ;;  %v6074_v12 = vld [vmem:[%s8336_s1 + $0x518] sm:$0xff]  ;;  %3671 = vmatpush.bf16.msrb.mxu1 %v6050_v11 }
 0x1d1   :  { %3484 = vmatmul.bf16.gmra.mxu1 %v4266_v13  ;;  %3533 = vmatmul.bf16.gmra.mxu2 %v4270_v43  ;;  %v7473_v61 = vadd.f32 %v3433_v4, %v3385_v24  ;;  %v5792_v13 = vld [vmem:[%s8338_s0 + $0x28c] sm:$0xf]  ;;  %v4463_v43 = vld [vmem:[%s8338_s0 + $0x2ec] sm:$0xf0]  ;;  %v4471_v24 = vld [vmem:[%s8338_s0 + $0x2f4] sm:$0xf0] }
 0x1d2   :  { %3818 = vmatpush.bf16.msrb.mxu0 %v6074_v12 }
 0x1d3   :  { %3582 = vmatmul.bf16.gmra.mxu3 %v4274_v19  ;;  %3631 = vmatmul.bf16.gmra.mxu0 %v4278_v20  ;;  %v5805_v19 = vld [vmem:[%s8338_s0 + $0x2f0] sm:$0xf0] }
 0x1d4   :  { %v3338_v18 = vpop.f32.mrf.mxu2  ;;  %v5793_v20 = vld [vmem:[%s8338_s0 + $0x294] sm:$0xf] }
 0x1d5   :  { %v3339_v32 = vadd.f32 %v3338_v18, %v3290_v23  ;;  %v4477_v23 = vld [vmem:[%s8338_s0 + $0x298] sm:$0xf] }
 0x1d6   :  { %v3387_v7 = vpop.f32.mrf.mxu3  ;;  %v3291_v58 = vpop.f32.mrf.mxu1 }
 0x1d7   :  { %v3388_v34 = vadd.f32 %v3387_v7, %v3339_v32  ;;  %v3292_v35 = vadd.f32 %v3291_v58, %v7179_v6  ;;  %v4466_v32 = vor.u32 %v5792_v13, %v4463_v43  ;;  %v4470_v7 = vor.u32 %v5805_v19, %v4469_v17  ;;  %v6056_v43 = vld [vmem:[%s8336_s1 + $0x488] sm:$0xff] }
 0x1d8   :  { %v3438_v46 = vpop.f32.mrf.mxu0  ;;  %v6064_v17 = vld [vmem:[%s8336_s1 + $0x4c8] sm:$0xff]  ;;  %3722 = vmatpush.bf16.msrb.mxu2 %v6056_v43 }
 0x1d9   :  { %v7494_v6 = vadd.f32 %v3436_v27, %v3388_v34  ;;  %v5806_v27 = vld [vmem:[%s8338_s0 + $0x2f8] sm:$0xf0]  ;;  %v4474_v34 = vor.u32 %v5793_v20, %v4471_v24  ;;  %3771 = vmatpush.bf16.msrb.mxu3 %v6064_v17 }
 0x1dc   :  { %v3340_v25 = vpop.f32.mrf.mxu2 }
 0x1dd   :  { %v3341_v51 = vadd.f32 %v3340_v25, %v3292_v35  ;;  %v4478_v35 = vor.u32 %v5806_v27, %v4477_v23 }
 0x1de   :  { %v3389_v52 = vpop.f32.mrf.mxu3  ;;  %v3294_v55 = vpop.f32.mrf.mxu1 }
 0x1df   :  { %v3390_v4 = vadd.f32 %v3389_v52, %v3341_v51  ;;  %v3295_v0 = vadd.f32 %v3294_v55, %v7200_v49  ;;  %v6049_v51 = vld [vmem:[%s8336_s1 + $0x450] sm:$0xff]  ;;  %v4569_v55 = vld [vmem:[%s8338_s0 + $0x358] sm:$0xf] }
 0x1e0   :  { %v3441_v1 = vpop.f32.mrf.mxu0  ;;  %v6073_v52 = vld [vmem:[%s8336_s1 + $0x510] sm:$0xff]  ;;  %3672 = vmatpush.bf16.msrb.mxu1 %v6049_v51 }
 0x1e1   :  { %3489 = vmatmul.bf16.gmra.mxu1 %v4366_v53  ;;  %3538 = vmatmul.bf16.gmra.mxu2 %v4370_v31  ;;  %v7515_v2 = vadd.f32 %v3438_v46, %v3390_v4  ;;  %v5817_v53 = vld [vmem:[%s8338_s0 + $0x354] sm:$0xf]  ;;  %v4563_v31 = vld [vmem:[%s8338_s0 + $0x3b4] sm:$0xf0]  ;;  %v4571_v4 = vld [vmem:[%s8338_s0 + $0x3bc] sm:$0xf0] }
 0x1e2   :  { %3819 = vmatpush.bf16.msrb.mxu0 %v6073_v52 }
 0x1e3   :  { %3587 = vmatmul.bf16.gmra.mxu3 %v4374_v57  ;;  %3636 = vmatmul.bf16.gmra.mxu0 %v4378_v59  ;;  %v5830_v57 = vld [vmem:[%s8338_s0 + $0x3b8] sm:$0xf0] }
 0x1e4   :  { %v3343_v62 = vpop.f32.mrf.mxu2  ;;  %v5818_v59 = vld [vmem:[%s8338_s0 + $0x35c] sm:$0xf] }
 0x1e5   :  { %v3344_v5 = vadd.f32 %v3343_v62, %v3295_v0  ;;  %v4577_v0 = vld [vmem:[%s8338_s0 + $0x360] sm:$0xf] }
 0x1e6   :  { %v3392_v49 = vpop.f32.mrf.mxu3  ;;  %v3296_v22 = vpop.f32.mrf.mxu1 }
 0x1e7   :  { %v3393_v50 = vadd.f32 %v3392_v49, %v3344_v5  ;;  %v3297_v8 = vadd.f32 %v3296_v22, %v7221_v26  ;;  %v4566_v5 = vor.u32 %v5817_v53, %v4563_v31  ;;  %v4570_v49 = vor.u32 %v5830_v57, %v4569_v55  ;;  %v6055_v31 = vld [vmem:[%s8336_s1 + $0x480] sm:$0xff] }
 0x1e8   :  { %v3443_v28 = vpop.f32.mrf.mxu0  ;;  %v6063_v55 = vld [vmem:[%s8336_s1 + $0x4c0] sm:$0xff]  ;;  %3723 = vmatpush.bf16.msrb.mxu2 %v6055_v31 }
 0x1e9   :  { %v7536_v26 = vadd.f32 %v3441_v1, %v3393_v50  ;;  %v5831_v1 = vld [vmem:[%s8338_s0 + $0x3c0] sm:$0xf0]  ;;  %v4574_v50 = vor.u32 %v5818_v59, %v4571_v4  ;;  %3772 = vmatpush.bf16.msrb.mxu3 %v6063_v55 }
 0x1ec   :  { %v3345_v10 = vpop.f32.mrf.mxu2 }
 0x1ed   :  { %v3346_v30 = vadd.f32 %v3345_v10, %v3297_v8  ;;  %v4578_v8 = vor.u32 %v5831_v1, %v4577_v0 }
 0x1ee   :  { %v3394_v18 = vpop.f32.mrf.mxu3  ;;  %v3299_v58 = vpop.f32.mrf.mxu1 }
 0x1ef   :  { %v3395_v46 = vadd.f32 %v3394_v18, %v3346_v30  ;;  %v3300_v37 = vadd.f32 %v3299_v58, %v7242_v29  ;;  %v6048_v30 = vld [vmem:[%s8336_s1 + $0x448] sm:$0xff]  ;;  %v4669_v58 = vld [vmem:[%s8338_s0 + $0x420] sm:$0xf] }
 0x1f0   :  { %v3446_v38 = vpop.f32.mrf.mxu0  ;;  %v6072_v18 = vld [vmem:[%s8336_s1 + $0x508] sm:$0xff]  ;;  %3673 = vmatpush.bf16.msrb.mxu1 %v6048_v30 }
 0x1f1   :  { %3494 = vmatmul.bf16.gmra.mxu1 %v4466_v32  ;;  %3543 = vmatmul.bf16.gmra.mxu2 %v4470_v7  ;;  %v7557_v40 = vadd.f32 %v3443_v28, %v3395_v46  ;;  %v5842_v32 = vld [vmem:[%s8338_s0 + $0x41c] sm:$0xf]  ;;  %v4663_v7 = vld [vmem:[%s8338_s0 + $0x47c] sm:$0xf0]  ;;  %v4671_v46 = vld [vmem:[%s8338_s0 + $0x484] sm:$0xf0] }
 0x1f2   :  { %3820 = vmatpush.bf16.msrb.mxu0 %v6072_v18 }
 0x1f3   :  { %3592 = vmatmul.bf16.gmra.mxu3 %v4474_v34  ;;  %3641 = vmatmul.bf16.gmra.mxu0 %v4478_v35  ;;  %v5855_v34 = vld [vmem:[%s8338_s0 + $0x480] sm:$0xf0] }
 0x1f4   :  { %v3348_v44 = vpop.f32.mrf.mxu2  ;;  %v5843_v35 = vld [vmem:[%s8338_s0 + $0x424] sm:$0xf] }
 0x1f5   :  { %v3349_v45 = vadd.f32 %v3348_v44, %v3300_v37  ;;  %v4677_v37 = vld [vmem:[%s8338_s0 + $0x428] sm:$0xf] }
 0x1f6   :  { %v3397_v29 = vpop.f32.mrf.mxu3  ;;  %v3301_v60 = vpop.f32.mrf.mxu1 }
 0x1f7   :  { %v3398_v47 = vadd.f32 %v3397_v29, %v3349_v45  ;;  %v3302_v48 = vadd.f32 %v3301_v60, %v7263_v21  ;;  %v4666_v45 = vor.u32 %v5842_v32, %v4663_v7  ;;  %v4670_v29 = vor.u32 %v5855_v34, %v4669_v58  ;;  %v6094_v7 = vld [vmem:[%s8336_s1 + $0x5b8] sm:$0xff] }
 0x1f8   :  { %v3448_v25 = vpop.f32.mrf.mxu0  ;;  %v6102_v58 = vld [vmem:[%s8336_s1 + $0x5f8] sm:$0xff]  ;;  %3912 = vmatpush.bf16.msra.mxu2 %v6094_v7 }
 0x1f9   :  { %v7578_v21 = vadd.f32 %v3446_v38, %v3398_v47  ;;  %v5856_v38 = vld [vmem:[%s8338_s0 + $0x488] sm:$0xf0]  ;;  %v4674_v47 = vor.u32 %v5843_v35, %v4671_v46  ;;  %3961 = vmatpush.bf16.msra.mxu3 %v6102_v58 }
 0x1fc   :  { %v3350_v39 = vpop.f32.mrf.mxu2 }
 0x1fd   :  { %v3351_v56 = vadd.f32 %v3350_v39, %v3302_v48  ;;  %v4678_v48 = vor.u32 %v5856_v38, %v4677_v37 }
 0x1fe   :  { %v3399_v62 = vpop.f32.mrf.mxu3  ;;  %v3304_v22 = vpop.f32.mrf.mxu1 }
 0x1ff   :  { %v3400_v28 = vadd.f32 %v3399_v62, %v3351_v56  ;;  %v3305_v11 = vadd.f32 %v3304_v22, %v7284_v3  ;;  %v6047_v56 = vld [vmem:[%s8336_s1 + $0x440] sm:$0xff]  ;;  %v4769_v22 = vld [vmem:[%s8338_s0 + $0x4e8] sm:$0xf] }
 0x200   :  { %v3451_v12 = vpop.f32.mrf.mxu0  ;;  %v6071_v62 = vld [vmem:[%s8336_s1 + $0x500] sm:$0xff]  ;;  %3674 = vmatpush.bf16.msrb.mxu1 %v6047_v56 }
 0x201   :  { %3499 = vmatmul.bf16.gmra.mxu1 %v4566_v5  ;;  %3548 = vmatmul.bf16.gmra.mxu2 %v4570_v49  ;;  %v7599_v13 = vadd.f32 %v3448_v25, %v3400_v28  ;;  %v5867_v5 = vld [vmem:[%s8338_s0 + $0x4e4] sm:$0xf]  ;;  %v4763_v49 = vld [vmem:[%s8338_s0 + $0x544] sm:$0xf0]  ;;  %v4771_v28 = vld [vmem:[%s8338_s0 + $0x54c] sm:$0xf0] }
 0x202   :  { %3821 = vmatpush.bf16.msrb.mxu0 %v6071_v62 }
 0x203   :  { %3597 = vmatmul.bf16.gmra.mxu3 %v4574_v50  ;;  %3646 = vmatmul.bf16.gmra.mxu0 %v4578_v8  ;;  %v5880_v50 = vld [vmem:[%s8338_s0 + $0x548] sm:$0xf0] }
 0x204   :  { %v3353_v19 = vpop.f32.mrf.mxu2  ;;  %v5868_v8 = vld [vmem:[%s8338_s0 + $0x4ec] sm:$0xf] }
 0x205   :  { %v3354_v20 = vadd.f32 %v3353_v19, %v3305_v11  ;;  %v4777_v11 = vld [vmem:[%s8338_s0 + $0x4f0] sm:$0xf] }
 0x206   :  { %v3402_v3 = vpop.f32.mrf.mxu3  ;;  %v3306_v24 = vpop.f32.mrf.mxu1 }
 0x207   :  { %v3403_v23 = vadd.f32 %v3402_v3, %v3354_v20  ;;  %v3307_v27 = vadd.f32 %v3306_v24, %v7305_v63  ;;  %v4766_v20 = vor.u32 %v5867_v5, %v4763_v49  ;;  %v4770_v3 = vor.u32 %v5880_v50, %v4769_v22  ;;  %v6093_v49 = vld [vmem:[%s8336_s1 + $0x5b0] sm:$0xff] }
 0x208   :  { %v3453_v10 = vpop.f32.mrf.mxu0  ;;  %v6101_v22 = vld [vmem:[%s8336_s1 + $0x5f0] sm:$0xff]  ;;  %3913 = vmatpush.bf16.msra.mxu2 %v6093_v49 }
 0x209   :  { %v7620_v63 = vadd.f32 %v3451_v12, %v3403_v23  ;;  %v5881_v12 = vld [vmem:[%s8338_s0 + $0x550] sm:$0xf0]  ;;  %v4774_v23 = vor.u32 %v5868_v8, %v4771_v28  ;;  %3962 = vmatpush.bf16.msra.mxu3 %v6101_v22 }
 0x20c   :  { %v3355_v14 = vpop.f32.mrf.mxu2 }
 0x20d   :  { %v3356_v42 = vadd.f32 %v3355_v14, %v3307_v27  ;;  %v4778_v27 = vor.u32 %v5881_v12, %v4777_v11 }
 0x20e   :  { %v3404_v44 = vpop.f32.mrf.mxu3  ;;  %v3309_v60 = vpop.f32.mrf.mxu1 }
 0x20f   :  { %v3405_v25 = vadd.f32 %v3404_v44, %v3356_v42  ;;  %v3310_v51 = vadd.f32 %v3309_v60, %v7326_v41  ;;  %v6086_v42 = vld [vmem:[%s8336_s1 + $0x578] sm:$0xff]  ;;  %v4869_v60 = vld [vmem:[%s8338_s0 + $0x5b0] sm:$0xf] }
 0x210   :  { %v3456_v52 = vpop.f32.mrf.mxu0  ;;  %v6110_v44 = vld [vmem:[%s8336_s1 + $0x638] sm:$0xff]  ;;  %3863 = vmatpush.bf16.msra.mxu1 %v6086_v42 }
 0x211   :  { %3504 = vmatmul.bf16.gmra.mxu1 %v4666_v45  ;;  %3553 = vmatmul.bf16.gmra.mxu2 %v4670_v29  ;;  %v7641_v53 = vadd.f32 %v3453_v10, %v3405_v25  ;;  %v5892_v45 = vld [vmem:[%s8338_s0 + $0x5ac] sm:$0xf]  ;;  %v4863_v29 = vld [vmem:[%s8338_s0 + $0x60c] sm:$0xf0]  ;;  %v4871_v25 = vld [vmem:[%s8338_s0 + $0x614] sm:$0xf0] }
 0x212   :  { %4010 = vmatpush.bf16.msra.mxu0 %v6110_v44 }
 0x213   :  { %3602 = vmatmul.bf16.gmra.mxu3 %v4674_v47  ;;  %3651 = vmatmul.bf16.gmra.mxu0 %v4678_v48  ;;  %v5905_v47 = vld [vmem:[%s8338_s0 + $0x610] sm:$0xf0] }
 0x214   :  { %v3358_v57 = vpop.f32.mrf.mxu2  ;;  %v5893_v48 = vld [vmem:[%s8338_s0 + $0x5b4] sm:$0xf] }
 0x215   :  { %v3359_v59 = vadd.f32 %v3358_v57, %v3310_v51  ;;  %v4877_v51 = vld [vmem:[%s8338_s0 + $0x5b8] sm:$0xf] }
 0x216   :  { %v3407_v41 = vpop.f32.mrf.mxu3  ;;  %v3311_v4 = vpop.f32.mrf.mxu1 }
 0x217   :  { %v3408_v0 = vadd.f32 %v3407_v41, %v3359_v59  ;;  %v3312_v1 = vadd.f32 %v3311_v4, %v7347_v36  ;;  %v4866_v59 = vor.u32 %v5892_v45, %v4863_v29  ;;  %v4870_v41 = vor.u32 %v5905_v47, %v4869_v60  ;;  %v6092_v29 = vld [vmem:[%s8336_s1 + $0x5a8] sm:$0xff] }
 0x218   :  { %v3458_v39 = vpop.f32.mrf.mxu0  ;;  %v6100_v60 = vld [vmem:[%s8336_s1 + $0x5e8] sm:$0xff]  ;;  %3914 = vmatpush.bf16.msra.mxu2 %v6092_v29 }
 0x219   :  { %v7662_v36 = vadd.f32 %v3456_v52, %v3408_v0  ;;  %v5906_v52 = vld [vmem:[%s8338_s0 + $0x618] sm:$0xf0]  ;;  %v4874_v0 = vor.u32 %v5893_v48, %v4871_v25  ;;  %3963 = vmatpush.bf16.msra.mxu3 %v6100_v60 }
 0x21c   :  { %v3360_v43 = vpop.f32.mrf.mxu2 }
 0x21d   :  { %v3361_v17 = vadd.f32 %v3360_v43, %v3312_v1  ;;  %v4878_v1 = vor.u32 %v5906_v52, %v4877_v51 }
 0x21e   :  { %v3409_v19 = vpop.f32.mrf.mxu3  ;;  %v3314_v24 = vpop.f32.mrf.mxu1 }
 0x21f   :  { %v3410_v10 = vadd.f32 %v3409_v19, %v3361_v17  ;;  %v3315_v30 = vadd.f32 %v3314_v24, %v7368_v16  ;;  %v6085_v17 = vld [vmem:[%s8336_s1 + $0x570] sm:$0xff]  ;;  %v4185_v24 = vld [vmem:[%s8338_s0 + $0x48] sm:$0xf] }
 0x220   :  { %v3461_v18 = vpop.f32.mrf.mxu0  ;;  %v6109_v19 = vld [vmem:[%s8336_s1 + $0x630] sm:$0xff]  ;;  %3864 = vmatpush.bf16.msra.mxu1 %v6085_v17 }
 0x221   :  { %3509 = vmatmul.bf16.gmra.mxu1 %v4766_v20  ;;  %3558 = vmatmul.bf16.gmra.mxu2 %v4770_v3  ;;  %v7683_v32 = vadd.f32 %v3458_v39, %v3410_v10  ;;  %v5719_v20 = vld [vmem:[%s8338_s0 + $0x44] sm:$0xf]  ;;  %v4179_v3 = vld [vmem:[%s8338_s0 + $0xa4] sm:$0xf0]  ;;  %v4187_v10 = vld [vmem:[%s8338_s0 + $0xac] sm:$0xf0] }
 0x222   :  { %4011 = vmatpush.bf16.msra.mxu0 %v6109_v19 }
 0x223   :  { %3607 = vmatmul.bf16.gmra.mxu3 %v4774_v23  ;;  %3656 = vmatmul.bf16.gmra.mxu0 %v4778_v27  ;;  %v5732_v23 = vld [vmem:[%s8338_s0 + $0xa8] sm:$0xf0] }
 0x224   :  { %v3363_v34 = vpop.f32.mrf.mxu2  ;;  %v5720_v27 = vld [vmem:[%s8338_s0 + $0x4c] sm:$0xf] }
 0x225   :  { %v3364_v35 = vadd.f32 %v3363_v34, %v3315_v30  ;;  %v4193_v30 = vld [vmem:[%s8338_s0 + $0x50] sm:$0xf] }
 0x226   :  { %v3412_v16 = vpop.f32.mrf.mxu3  ;;  %v3316_v46 = vpop.f32.mrf.mxu1 }
 0x227   :  { %v3413_v37 = vadd.f32 %v3412_v16, %v3364_v35  ;;  %v3317_v38 = vadd.f32 %v3316_v46, %v7389_v9  ;;  %v4182_v35 = vor.u32 %v5719_v20, %v4179_v3  ;;  %v4186_v16 = vor.u32 %v5732_v23, %v4185_v24  ;;  %v6091_v3 = vld [vmem:[%s8336_s1 + $0x5a0] sm:$0xff] }
 0x228   :  { %v3463_v14 = vpop.f32.mrf.mxu0  ;;  %v6099_v24 = vld [vmem:[%s8336_s1 + $0x5e0] sm:$0xff]  ;;  %3915 = vmatpush.bf16.msra.mxu2 %v6091_v3 }
 0x229   :  { %v7704_v9 = vadd.f32 %v3461_v18, %v3413_v37  ;;  %v5733_v18 = vld [vmem:[%s8338_s0 + $0xb0] sm:$0xf0]  ;;  %v4190_v37 = vor.u32 %v5720_v27, %v4187_v10  ;;  %3964 = vmatpush.bf16.msra.mxu3 %v6099_v24 }
 0x22c   :  { %v3365_v31 = vpop.f32.mrf.mxu2 }
 0x22d   :  { %v3366_v55 = vadd.f32 %v3365_v31, %v3317_v38  ;;  %v4194_v38 = vor.u32 %v5733_v18, %v4193_v30 }
 0x22e   :  { %v3414_v57 = vpop.f32.mrf.mxu3  ;;  %v3319_v4 = vpop.f32.mrf.mxu1 }
 0x22f   :  { %v3415_v39 = vadd.f32 %v3414_v57, %v3366_v55  ;;  %v3320_v56 = vadd.f32 %v3319_v4, %v7410_v54  ;;  %v6084_v55 = vld [vmem:[%s8336_s1 + $0x568] sm:$0xff]  ;;  %v4285_v4 = vld [vmem:[%s8338_s0 + $0x110] sm:$0xf] }
 0x230   :  { %v3466_v62 = vpop.f32.mrf.mxu0  ;;  %v6108_v57 = vld [vmem:[%s8336_s1 + $0x628] sm:$0xff]  ;;  %3865 = vmatpush.bf16.msra.mxu1 %v6084_v55 }
 0x231   :  { %3514 = vmatmul.bf16.gmra.mxu1 %v4866_v59  ;;  %3563 = vmatmul.bf16.gmra.mxu2 %v4870_v41  ;;  %v7725_v5 = vadd.f32 %v3463_v14, %v3415_v39  ;;  %v5744_v59 = vld [vmem:[%s8338_s0 + $0x10c] sm:$0xf]  ;;  %v4279_v41 = vld [vmem:[%s8338_s0 + $0x16c] sm:$0xf0]  ;;  %v4287_v39 = vld [vmem:[%s8338_s0 + $0x174] sm:$0xf0] }
 0x232   :  { %4012 = vmatpush.bf16.msra.mxu0 %v6108_v57 }
 0x233   :  { %3612 = vmatmul.bf16.gmra.mxu3 %v4874_v0  ;;  %3661 = vmatmul.bf16.gmra.mxu0 %v4878_v1  ;;  %v5757_v0 = vld [vmem:[%s8338_s0 + $0x170] sm:$0xf0] }
 0x234   :  { %v3368_v50 = vpop.f32.mrf.mxu2  ;;  %v5745_v1 = vld [vmem:[%s8338_s0 + $0x114] sm:$0xf] }
 0x235   :  { %v3369_v8 = vadd.f32 %v3368_v50, %v3320_v56  ;;  %v4293_v56 = vld [vmem:[%s8338_s0 + $0x118] sm:$0xf] }
 0x236   :  { %v3417_v54 = vpop.f32.mrf.mxu3  ;;  %v3321_v28 = vpop.f32.mrf.mxu1 }
 0x237   :  { %v3418_v11 = vadd.f32 %v3417_v54, %v3369_v8  ;;  %v3322_v12 = vadd.f32 %v3321_v28, %v7431_v15  ;;  %v4282_v8 = vor.u32 %v5744_v59, %v4279_v41  ;;  %v4286_v54 = vor.u32 %v5757_v0, %v4285_v4  ;;  %v6090_v41 = vld [vmem:[%s8336_s1 + $0x598] sm:$0xff] }
 0x238   :  { %v3468_v43 = vpop.f32.mrf.mxu0  ;;  %v6098_v4 = vld [vmem:[%s8336_s1 + $0x5d8] sm:$0xff]  ;;  %3916 = vmatpush.bf16.msra.mxu2 %v6090_v41 }
 0x239   :  { %v7746_v15 = vadd.f32 %v3466_v62, %v3418_v11  ;;  %v5758_v62 = vld [vmem:[%s8338_s0 + $0x178] sm:$0xf0]  ;;  %v4290_v11 = vor.u32 %v5745_v1, %v4287_v39  ;;  %3965 = vmatpush.bf16.msra.mxu3 %v6098_v4 }
 0x23c   :  { %v3370_v7 = vpop.f32.mrf.mxu2 }
 0x23d   :  { %v3371_v58 = vadd.f32 %v3370_v7, %v3322_v12  ;;  %v4294_v12 = vor.u32 %v5758_v62, %v4293_v56 }
 0x23e   :  { %v3419_v34 = vpop.f32.mrf.mxu3  ;;  %v3480_v46 = vpop.f32.mrf.mxu1 }
 0x23f   :  { %v3420_v14 = vadd.f32 %v3419_v34, %v3371_v58  ;;  %v3481_v42 = vadd.f32 %v3480_v46, %v7452_v33  ;;  %v6083_v58 = vld [vmem:[%s8336_s1 + $0x560] sm:$0xff]  ;;  %v4385_v46 = vld [vmem:[%s8338_s0 + $0x1d8] sm:$0xf] }
 0x240   :  { %v3627_v44 = vpop.f32.mrf.mxu0  ;;  %v6107_v34 = vld [vmem:[%s8336_s1 + $0x620] sm:$0xff]  ;;  %3866 = vmatpush.bf16.msra.mxu1 %v6083_v58 }
 0x241   :  { %3675 = vmatmul.bf16.vlgmr.msrb.gmra.mxu1 %v4182_v35  ;;  %3724 = vmatmul.bf16.vlgmr.msrb.gmra.mxu2 %v4186_v16  ;;  %v7767_v45 = vadd.f32 %v3468_v43, %v3420_v14  ;;  %v5769_v35 = vld [vmem:[%s8338_s0 + $0x1d4] sm:$0xf]  ;;  %v4379_v16 = vld [vmem:[%s8338_s0 + $0x234] sm:$0xf0]  ;;  %v4387_v14 = vld [vmem:[%s8338_s0 + $0x23c] sm:$0xf0] }
 0x242   :  { %4013 = vmatpush.bf16.msra.mxu0 %v6107_v34 }
 0x243   :  { %3773 = vmatmul.bf16.vlgmr.msrb.gmra.mxu3 %v4190_v37  ;;  %3822 = vmatmul.bf16.vlgmr.msrb.gmra.mxu0 %v4194_v38  ;;  %v5782_v37 = vld [vmem:[%s8338_s0 + $0x238] sm:$0xf0] }
 0x244   :  { %v3529_v47 = vpop.f32.mrf.mxu2  ;;  %v5770_v38 = vld [vmem:[%s8338_s0 + $0x1dc] sm:$0xf] }
 0x245   :  { %v3530_v48 = vadd.f32 %v3529_v47, %v3481_v42  ;;  %v4393_v42 = vld [vmem:[%s8338_s0 + $0x1e0] sm:$0xf] }
 0x246   :  { %v3578_v33 = vpop.f32.mrf.mxu3  ;;  %v3482_v25 = vpop.f32.mrf.mxu1 }
 0x247   :  { %v3579_v51 = vadd.f32 %v3578_v33, %v3530_v48  ;;  %v3483_v52 = vadd.f32 %v3482_v25, %v7473_v61  ;;  %v4382_v48 = vor.u32 %v5769_v35, %v4379_v16  ;;  %v4386_v33 = vor.u32 %v5782_v37, %v4385_v46  ;;  %v6089_v16 = vld [vmem:[%s8336_s1 + $0x590] sm:$0xff] }
 0x248   :  { %v3629_v31 = vpop.f32.mrf.mxu0  ;;  %v6097_v46 = vld [vmem:[%s8336_s1 + $0x5d0] sm:$0xff]  ;;  %3917 = vmatpush.bf16.msra.mxu2 %v6089_v16 }
 0x249   :  { %v7788_v61 = vadd.f32 %v3627_v44, %v3579_v51  ;;  %v5783_v44 = vld [vmem:[%s8338_s0 + $0x240] sm:$0xf0]  ;;  %v4390_v51 = vor.u32 %v5770_v38, %v4387_v14  ;;  %3966 = vmatpush.bf16.msra.mxu3 %v6097_v46 }
 0x24c   :  { %v3531_v49 = vpop.f32.mrf.mxu2 }
 0x24d   :  { %v3532_v22 = vadd.f32 %v3531_v49, %v3483_v52  ;;  %v4394_v52 = vor.u32 %v5783_v44, %v4393_v42 }
 0x24e   :  { %v3580_v50 = vpop.f32.mrf.mxu3  ;;  %v3485_v28 = vpop.f32.mrf.mxu1 }
 0x24f   :  { %v3581_v43 = vadd.f32 %v3580_v50, %v3532_v22  ;;  %v3486_v17 = vadd.f32 %v3485_v28, %v7494_v6  ;;  %v6082_v22 = vld [vmem:[%s8336_s1 + $0x558] sm:$0xff]  ;;  %v4485_v28 = vld [vmem:[%s8338_s0 + $0x2a0] sm:$0xf] }
 0x250   :  { %v3632_v19 = vpop.f32.mrf.mxu0  ;;  %v6106_v50 = vld [vmem:[%s8336_s1 + $0x618] sm:$0xff]  ;;  %3867 = vmatpush.bf16.msra.mxu1 %v6082_v22 }
 0x251   :  { %3680 = vmatmul.bf16.gmra.mxu1 %v4282_v8  ;;  %3729 = vmatmul.bf16.gmra.mxu2 %v4286_v54  ;;  %v7809_v20 = vadd.f32 %v3629_v31, %v3581_v43  ;;  %v5794_v8 = vld [vmem:[%s8338_s0 + $0x29c] sm:$0xf]  ;;  %v4479_v54 = vld [vmem:[%s8338_s0 + $0x2fc] sm:$0xf0]  ;;  %v4487_v43 = vld [vmem:[%s8338_s0 + $0x304] sm:$0xf0] }
 0x252   :  { %4014 = vmatpush.bf16.msra.mxu0 %v6106_v50 }
 0x253   :  { %3778 = vmatmul.bf16.gmra.mxu3 %v4290_v11  ;;  %3827 = vmatmul.bf16.gmra.mxu0 %v4294_v12  ;;  %v5807_v11 = vld [vmem:[%s8338_s0 + $0x300] sm:$0xf0] }
 0x254   :  { %v3534_v23 = vpop.f32.mrf.mxu2  ;;  %v5795_v12 = vld [vmem:[%s8338_s0 + $0x2a4] sm:$0xf] }
 0x255   :  { %v3535_v27 = vadd.f32 %v3534_v23, %v3486_v17  ;;  %v4493_v17 = vld [vmem:[%s8338_s0 + $0x2a8] sm:$0xf] }
 0x256   :  { %v3583_v6 = vpop.f32.mrf.mxu3  ;;  %v3487_v10 = vpop.f32.mrf.mxu1 }
 0x257   :  { %v3584_v30 = vadd.f32 %v3583_v6, %v3535_v27  ;;  %v3488_v18 = vadd.f32 %v3487_v10, %v7515_v2  ;;  %v4482_v27 = vor.u32 %v5794_v8, %v4479_v54  ;;  %v4486_v6 = vor.u32 %v5807_v11, %v4485_v28  ;;  %v6088_v54 = vld [vmem:[%s8336_s1 + $0x588] sm:$0xff] }
 0x258   :  { %v3634_v7 = vpop.f32.mrf.mxu0  ;;  %v6096_v28 = vld [vmem:[%s8336_s1 + $0x5c8] sm:$0xff]  ;;  %3918 = vmatpush.bf16.msra.mxu2 %v6088_v54 }
 0x259   :  { %v7830_v2 = vadd.f32 %v3632_v19, %v3584_v30  ;;  %v5808_v19 = vld [vmem:[%s8338_s0 + $0x308] sm:$0xf0]  ;;  %v4490_v30 = vor.u32 %v5795_v12, %v4487_v43  ;;  %3967 = vmatpush.bf16.msra.mxu3 %v6096_v28 }
 0x25c   :  { %v3536_v29 = vpop.f32.mrf.mxu2 }
 0x25d   :  { %v3537_v60 = vadd.f32 %v3536_v29, %v3488_v18  ;;  %v4494_v18 = vor.u32 %v5808_v19, %v4493_v17 }
 0x25e   :  { %v3585_v47 = vpop.f32.mrf.mxu3  ;;  %v3490_v25 = vpop.f32.mrf.mxu1 }
 0x25f   :  { %v3586_v31 = vadd.f32 %v3585_v47, %v3537_v60  ;;  %v3491_v55 = vadd.f32 %v3490_v25, %v7536_v26  ;;  %v6081_v60 = vld [vmem:[%s8336_s1 + $0x550] sm:$0xff]  ;;  %v4585_v25 = vld [vmem:[%s8338_s0 + $0x368] sm:$0xf] }
 0x260   :  { %v3637_v57 = vpop.f32.mrf.mxu0  ;;  %v6105_v47 = vld [vmem:[%s8336_s1 + $0x610] sm:$0xff]  ;;  %3868 = vmatpush.bf16.msra.mxu1 %v6081_v60 }
 0x261   :  { %3685 = vmatmul.bf16.gmra.mxu1 %v4382_v48  ;;  %3734 = vmatmul.bf16.gmra.mxu2 %v4386_v33  ;;  %v7851_v59 = vadd.f32 %v3634_v7, %v3586_v31  ;;  %v5819_v48 = vld [vmem:[%s8338_s0 + $0x364] sm:$0xf]  ;;  %v4579_v33 = vld [vmem:[%s8338_s0 + $0x3c4] sm:$0xf0]  ;;  %v4587_v31 = vld [vmem:[%s8338_s0 + $0x3cc] sm:$0xf0] }
 0x262   :  { %4015 = vmatpush.bf16.msra.mxu0 %v6105_v47 }
 0x263   :  { %3783 = vmatmul.bf16.gmra.mxu3 %v4390_v51  ;;  %3832 = vmatmul.bf16.gmra.mxu0 %v4394_v52  ;;  %v5832_v51 = vld [vmem:[%s8338_s0 + $0x3c8] sm:$0xf0] }
 0x264   :  { %v3539_v0 = vpop.f32.mrf.mxu2  ;;  %v5820_v52 = vld [vmem:[%s8338_s0 + $0x36c] sm:$0xf] }
 0x265   :  { %v3540_v1 = vadd.f32 %v3539_v0, %v3491_v55  ;;  %v4593_v55 = vld [vmem:[%s8338_s0 + $0x370] sm:$0xf] }
 0x266   :  { %v3588_v26 = vpop.f32.mrf.mxu3  ;;  %v3492_v39 = vpop.f32.mrf.mxu1 }
 0x267   :  { %v3589_v56 = vadd.f32 %v3588_v26, %v3540_v1  ;;  %v3493_v62 = vadd.f32 %v3492_v39, %v7557_v40  ;;  %v4582_v1 = vor.u32 %v5819_v48, %v4579_v33  ;;  %v4586_v26 = vor.u32 %v5832_v51, %v4585_v25  ;;  %v6087_v33 = vld [vmem:[%s8336_s1 + $0x580] sm:$0xff] }
 0x268   :  { %v3639_v49 = vpop.f32.mrf.mxu0  ;;  %v6095_v25 = vld [vmem:[%s8336_s1 + $0x5c0] sm:$0xff]  ;;  %3919 = vmatpush.bf16.msra.mxu2 %v6087_v33 }
 0x269   :  { %v7872_v40 = vadd.f32 %v3637_v57, %v3589_v56  ;;  %v5833_v57 = vld [vmem:[%s8338_s0 + $0x3d0] sm:$0xf0]  ;;  %v4590_v56 = vor.u32 %v5820_v52, %v4587_v31  ;;  %3968 = vmatpush.bf16.msra.mxu3 %v6095_v25 }
 0x26c   :  { %v3541_v3 = vpop.f32.mrf.mxu2 }
 0x26d   :  { %v3542_v24 = vadd.f32 %v3541_v3, %v3493_v62  ;;  %v4594_v62 = vor.u32 %v5833_v57, %v4593_v55 }
 0x26e   :  { %v3590_v23 = vpop.f32.mrf.mxu3  ;;  %v3495_v10 = vpop.f32.mrf.mxu1 }
 0x26f   :  { %v3591_v7 = vadd.f32 %v3590_v23, %v3542_v24  ;;  %v3496_v58 = vadd.f32 %v3495_v10, %v7578_v21  ;;  %v6080_v24 = vld [vmem:[%s8336_s1 + $0x548] sm:$0xff]  ;;  %v4685_v10 = vld [vmem:[%s8338_s0 + $0x430] sm:$0xf] }
 0x270   :  { %v3642_v34 = vpop.f32.mrf.mxu0  ;;  %v6104_v23 = vld [vmem:[%s8336_s1 + $0x608] sm:$0xff]  ;;  %3869 = vmatpush.bf16.msra.mxu1 %v6080_v24 }
 0x271   :  { %3690 = vmatmul.bf16.gmra.mxu1 %v4482_v27  ;;  %3739 = vmatmul.bf16.gmra.mxu2 %v4486_v6  ;;  %v7893_v35 = vadd.f32 %v3639_v49, %v3591_v7  ;;  %v5844_v27 = vld [vmem:[%s8338_s0 + $0x42c] sm:$0xf]  ;;  %v4679_v6 = vld [vmem:[%s8338_s0 + $0x48c] sm:$0xf0]  ;;  %v4687_v7 = vld [vmem:[%s8338_s0 + $0x494] sm:$0xf0] }
 0x272   :  { %4016 = vmatpush.bf16.msra.mxu0 %v6104_v23 }
 0x273   :  { %3788 = vmatmul.bf16.gmra.mxu3 %v4490_v30  ;;  %3837 = vmatmul.bf16.gmra.mxu0 %v4494_v18  ;;  %v5857_v30 = vld [vmem:[%s8338_s0 + $0x490] sm:$0xf0] }
 0x274   :  { %v3544_v37 = vpop.f32.mrf.mxu2  ;;  %v5845_v18 = vld [vmem:[%s8338_s0 + $0x434] sm:$0xf] }
 0x275   :  { %v3545_v38 = vadd.f32 %v3544_v37, %v3496_v58  ;;  %v4693_v58 = vld [vmem:[%s8338_s0 + $0x438] sm:$0xf] }
 0x276   :  { %v3593_v21 = vpop.f32.mrf.mxu3  ;;  %v3497_v14 = vpop.f32.mrf.mxu1 }
 0x277   :  { %v3594_v42 = vadd.f32 %v3593_v21, %v3545_v38  ;;  %v3498_v44 = vadd.f32 %v3497_v14, %v7599_v13  ;;  %v4682_v38 = vor.u32 %v5844_v27, %v4679_v6  ;;  %v4686_v21 = vor.u32 %v5857_v30, %v4685_v10 }
 0x278   :  { %v3644_v29 = vpop.f32.mrf.mxu0 }
 0x279   :  { %v7914_v13 = vadd.f32 %v3642_v34, %v3594_v42  ;;  %v5858_v34 = vld [vmem:[%s8338_s0 + $0x498] sm:$0xf0]  ;;  %v4690_v42 = vor.u32 %v5845_v18, %v4687_v7 }
 0x27c   :  { %v3546_v41 = vpop.f32.mrf.mxu2 }
 0x27d   :  { %v3547_v4 = vadd.f32 %v3546_v41, %v3498_v44  ;;  %v4694_v44 = vor.u32 %v5858_v34, %v4693_v58 }
 0x27e   :  { %v3595_v0 = vpop.f32.mrf.mxu3  ;;  %v3500_v39 = vpop.f32.mrf.mxu1 }
 0x27f   :  { %v3596_v49 = vadd.f32 %v3595_v0, %v3547_v4  ;;  %v3501_v22 = vadd.f32 %v3500_v39, %v7620_v63  ;;  %v6079_v4 = vld [vmem:[%s8336_s1 + $0x540] sm:$0xff]  ;;  %v4785_v39 = vld [vmem:[%s8338_s0 + $0x4f8] sm:$0xf] }
 0x280   :  { %v3647_v50 = vpop.f32.mrf.mxu0  ;;  %v6103_v0 = vld [vmem:[%s8336_s1 + $0x600] sm:$0xff]  ;;  %3870 = vmatpush.bf16.msra.mxu1 %v6079_v4 }
 0x281   :  { %3695 = vmatmul.bf16.gmra.mxu1 %v4582_v1  ;;  %3744 = vmatmul.bf16.gmra.mxu2 %v4586_v26  ;;  %v7935_v8 = vadd.f32 %v3644_v29, %v3596_v49  ;;  %v5869_v1 = vld [vmem:[%s8338_s0 + $0x4f4] sm:$0xf]  ;;  %v4779_v26 = vld [vmem:[%s8338_s0 + $0x554] sm:$0xf0]  ;;  %v4787_v49 = vld [vmem:[%s8338_s0 + $0x55c] sm:$0xf0] }
 0x282   :  { %4017 = vmatpush.bf16.msra.mxu0 %v6103_v0 }
 0x283   :  { %3793 = vmatmul.bf16.gmra.mxu3 %v4590_v56  ;;  %3842 = vmatmul.bf16.gmra.mxu0 %v4594_v62  ;;  %v5882_v56 = vld [vmem:[%s8338_s0 + $0x558] sm:$0xf0] }
 0x284   :  { %v3549_v11 = vpop.f32.mrf.mxu2  ;;  %v5870_v62 = vld [vmem:[%s8338_s0 + $0x4fc] sm:$0xf] }
 0x285   :  { %v3550_v12 = vadd.f32 %v3549_v11, %v3501_v22  ;;  %v4793_v22 = vld [vmem:[%s8338_s0 + $0x500] sm:$0xf] }
 0x286   :  { %v3598_v63 = vpop.f32.mrf.mxu3  ;;  %v3502_v43 = vpop.f32.mrf.mxu1 }
 0x287   :  { %v3599_v17 = vadd.f32 %v3598_v63, %v3550_v12  ;;  %v3503_v19 = vadd.f32 %v3502_v43, %v7641_v53  ;;  %v4782_v12 = vor.u32 %v5869_v1, %v4779_v26  ;;  %v4786_v63 = vor.u32 %v5882_v56, %v4785_v39 }
 0x288   :  { %v3649_v3 = vpop.f32.mrf.mxu0 }
 0x289   :  { %v7956_v53 = vadd.f32 %v3647_v50, %v3599_v17  ;;  %v5883_v50 = vld [vmem:[%s8338_s0 + $0x560] sm:$0xf0]  ;;  %v4790_v17 = vor.u32 %v5870_v62, %v4787_v49  ;;  %v5721_v62 = vld [vmem:[%s8338_s0 + $0x54] sm:$0xf] }
 0x28c   :  { %v3551_v16 = vpop.f32.mrf.mxu2 }
 0x28d   :  { %v3552_v46 = vadd.f32 %v3551_v16, %v3503_v19  ;;  %v4794_v19 = vor.u32 %v5883_v50, %v4793_v22  ;;  %v5894_v16 = vld [vmem:[%s8338_s0 + $0x5bc] sm:$0xf]  ;;  %v4201_v22 = vld [vmem:[%s8338_s0 + $0x58] sm:$0xf] }
 0x28e   :  { %v3600_v37 = vpop.f32.mrf.mxu3  ;;  %v3505_v14 = vpop.f32.mrf.mxu1  ;;  %v5734_v50 = vld [vmem:[%s8338_s0 + $0xb8] sm:$0xf0] }
 0x28f   :  { %v3601_v29 = vadd.f32 %v3600_v37, %v3552_v46  ;;  %v3506_v60 = vadd.f32 %v3505_v14, %v7662_v36  ;;  %v4885_v37 = vld [vmem:[%s8338_s0 + $0x5c0] sm:$0xf]  ;;  %v4893_v14 = vld [vmem:[%s8338_s0 + $0x5c8] sm:$0xf] }
 0x290   :  { %v3652_v47 = vpop.f32.mrf.mxu0 }
 0x291   :  { %3700 = vmatmul.bf16.gmra.mxu1 %v4682_v38  ;;  %3749 = vmatmul.bf16.gmra.mxu2 %v4686_v21  ;;  %v7977_v48 = vadd.f32 %v3649_v3, %v3601_v29  ;;  %v5907_v38 = vld [vmem:[%s8338_s0 + $0x620] sm:$0xf0]  ;;  %v4887_v21 = vld [vmem:[%s8338_s0 + $0x624] sm:$0xf0] }
 0x292   :  { %v4886_v33 = vor.u32 %v5907_v38, %v4885_v37 }
 0x293   :  { %3798 = vmatmul.bf16.gmra.mxu3 %v4690_v42  ;;  %3847 = vmatmul.bf16.gmra.mxu0 %v4694_v44  ;;  %v5908_v42 = vld [vmem:[%s8338_s0 + $0x628] sm:$0xf0] }
 0x294   :  { %v3554_v51 = vpop.f32.mrf.mxu2 }
 0x295   :  { %v3555_v52 = vadd.f32 %v3554_v51, %v3506_v60 }
 0x296   :  { %v3603_v36 = vpop.f32.mrf.mxu3  ;;  %v3507_v31 = vpop.f32.mrf.mxu1 }
 0x297   :  { %v3604_v55 = vadd.f32 %v3603_v36, %v3555_v52  ;;  %v3508_v57 = vadd.f32 %v3507_v31, %v7683_v32  ;;  %v4894_v52 = vor.u32 %v5908_v42, %v4893_v14  ;;  %v4301_v14 = vld [vmem:[%s8338_s0 + $0x120] sm:$0xf]  ;;  %v5759_v42 = vld [vmem:[%s8338_s0 + $0x180] sm:$0xf0] }
 0x298   :  { %v3654_v41 = vpop.f32.mrf.mxu0 }
 0x299   :  { %v7998_v32 = vadd.f32 %v3652_v47, %v3604_v55 }
 0x29c   :  { %v3556_v54 = vpop.f32.mrf.mxu2 }
 0x29d   :  { %v3557_v28 = vadd.f32 %v3556_v54, %v3508_v57  ;;  %v4203_v54 = vld [vmem:[%s8338_s0 + $0xbc] sm:$0xf0] }
 0x29e   :  { %v3605_v11 = vpop.f32.mrf.mxu3  ;;  %v3510_v43 = vpop.f32.mrf.mxu1 }
 0x29f   :  { %v3606_v3 = vadd.f32 %v3605_v11, %v3557_v28  ;;  %v3511_v24 = vadd.f32 %v3510_v43, %v7704_v9  ;;  %v4879_v9 = vld [vmem:[%s8338_s0 + $0x61c] sm:$0xf0]  ;;  %v5735_v11 = vld [vmem:[%s8338_s0 + $0xc0] sm:$0xf0] }
 0x2a0   :  { %v3657_v23 = vpop.f32.mrf.mxu0  ;;  %v4882_v47 = vor.u32 %v5894_v16, %v4879_v9  ;;  %v4209_v28 = vld [vmem:[%s8338_s0 + $0x60] sm:$0xf] }
 0x2a1   :  { %3705 = vmatmul.bf16.gmra.mxu1 %v4782_v12  ;;  %3754 = vmatmul.bf16.gmra.mxu2 %v4786_v63  ;;  %v8019_v27 = vadd.f32 %v3654_v41, %v3606_v3 }
 0x2a3   :  { %3803 = vmatmul.bf16.gmra.mxu3 %v4790_v17  ;;  %3852 = vmatmul.bf16.gmra.mxu0 %v4794_v19  ;;  %v4202_v19 = vor.u32 %v5734_v50, %v4201_v22 }
 0x2a4   :  { %v3559_v6 = vpop.f32.mrf.mxu2 }
 0x2a5   :  { %v3560_v10 = vadd.f32 %v3559_v6, %v3511_v24 }
 0x2a6   :  { %v3608_v30 = vpop.f32.mrf.mxu3  ;;  %v3512_v18 = vpop.f32.mrf.mxu1 }
 0x2a7   :  { %v3609_v7 = vadd.f32 %v3608_v30, %v3560_v10  ;;  %v3513_v58 = vadd.f32 %v3512_v18, %v7725_v5  ;;  %v5895_v5 = vld [vmem:[%s8338_s0 + $0x5c4] sm:$0xf] }
 0x2a8   :  { %v3659_v34 = vpop.f32.mrf.mxu0  ;;  %v4890_v51 = vor.u32 %v5895_v5, %v4887_v21  ;;  %v5746_v5 = vld [vmem:[%s8338_s0 + $0x11c] sm:$0xf] }
 0x2a9   :  { %v8028_v46 = vadd.f32 %v3657_v23, %v3609_v7  ;;  %v4210_v23 = vor.u32 %v5735_v11, %v4209_v28  ;;  %v4401_v28 = vld [vmem:[%s8338_s0 + $0x1e8] sm:$0xf]  ;;  %v5784_v11 = vld [vmem:[%s8338_s0 + $0x248] sm:$0xf0] }
 0x2ac   :  { %v3561_v44 = vpop.f32.mrf.mxu2 }
 0x2ad   :  { %v3562_v29 = vadd.f32 %v3561_v44, %v3513_v58  ;;  %v4303_v44 = vld [vmem:[%s8338_s0 + $0x184] sm:$0xf0] }
 0x2ae   :  { %v3610_v60 = vpop.f32.mrf.mxu3  ;;  %v3515_v25 = vpop.f32.mrf.mxu1 }
 0x2af   :  { %v3611_v36 = vadd.f32 %v3610_v60, %v3562_v29  ;;  %v3516_v31 = vadd.f32 %v3515_v25, %v7746_v15  ;;  %v4195_v15 = vld [vmem:[%s8338_s0 + $0xb4] sm:$0xf0]  ;;  %v4309_v29 = vld [vmem:[%s8338_s0 + $0x128] sm:$0xf]  ;;  %v5760_v60 = vld [vmem:[%s8338_s0 + $0x188] sm:$0xf0] }
 0x2b0   :  { %v3662_v55 = vpop.f32.mrf.mxu0  ;;  %v4198_v17 = vor.u32 %v5721_v62, %v4195_v15 }
 0x2b1   :  { %3710 = vmatmul.bf16.gmra.mxu1 %v4882_v47  ;;  %3759 = vmatmul.bf16.gmra.mxu2 %v4886_v33  ;;  %v8049_v57 = vadd.f32 %v3659_v34, %v3611_v36 }
 0x2b3   :  { %3808 = vmatmul.bf16.gmra.mxu3 %v4890_v51  ;;  %3857 = vmatmul.bf16.gmra.mxu0 %v4894_v52  ;;  %v4302_v52 = vor.u32 %v5759_v42, %v4301_v14 }
 0x2b4   :  { %v3564_v41 = vpop.f32.mrf.mxu2 }
 0x2b5   :  { %v3565_v4 = vadd.f32 %v3564_v41, %v3516_v31 }
 0x2b6   :  { %v3613_v0 = vpop.f32.mrf.mxu3  ;;  %v3517_v1 = vpop.f32.mrf.mxu1 }
 0x2b7   :  { %v3614_v26 = vadd.f32 %v3613_v0, %v3565_v4  ;;  %v3518_v39 = vadd.f32 %v3517_v1, %v7767_v45  ;;  %v5722_v45 = vld [vmem:[%s8338_s0 + $0x5c] sm:$0xf] }
 0x2b8   :  { %v3664_v56 = vpop.f32.mrf.mxu0  ;;  %v4206_v24 = vor.u32 %v5722_v45, %v4203_v54  ;;  %v5771_v45 = vld [vmem:[%s8338_s0 + $0x1e4] sm:$0xf] }
 0x2b9   :  { %v8058_v49 = vadd.f32 %v3662_v55, %v3614_v26  ;;  %v4310_v55 = vor.u32 %v5760_v60, %v4309_v29  ;;  %v4501_v29 = vld [vmem:[%s8338_s0 + $0x2b0] sm:$0xf]  ;;  %v5809_v60 = vld [vmem:[%s8338_s0 + $0x310] sm:$0xf0] }
 0x2bc   :  { %v3566_v12 = vpop.f32.mrf.mxu2 }
 0x2bd   :  { %v3567_v63 = vadd.f32 %v3566_v12, %v3518_v39  ;;  %v4403_v12 = vld [vmem:[%s8338_s0 + $0x24c] sm:$0xf0] }
 0x2be   :  { %v3615_v43 = vpop.f32.mrf.mxu3  ;;  %v3676_v3 = vpop.f32.mrf.mxu1 }
 0x2bf   :  { %v3616_v6 = vadd.f32 %v3615_v43, %v3567_v63  ;;  %v3677_v10 = vadd.f32 %v3676_v3, %v7788_v61  ;;  %v4295_v61 = vld [vmem:[%s8338_s0 + $0x17c] sm:$0xf0]  ;;  %v4409_v63 = vld [vmem:[%s8338_s0 + $0x1f0] sm:$0xf]  ;;  %v5785_v43 = vld [vmem:[%s8338_s0 + $0x250] sm:$0xf0] }
 0x2c0   :  { %v3823_v30 = vpop.f32.mrf.mxu0  ;;  %v4298_v51 = vor.u32 %v5746_v5, %v4295_v61 }
 0x2c1   :  { %3871 = vmatmul.bf16.vlgmr.msra.gmra.mxu1 %v4198_v17  ;;  %3920 = vmatmul.bf16.vlgmr.msra.gmra.mxu2 %v4202_v19  ;;  %v8079_v18 = vadd.f32 %v3664_v56, %v3616_v6 }
 0x2c3   :  { %3969 = vmatmul.bf16.vlgmr.msra.gmra.mxu3 %v4206_v24  ;;  %4018 = vmatmul.bf16.vlgmr.msra.gmra.mxu0 %v4210_v23  ;;  %v4402_v23 = vor.u32 %v5784_v11, %v4401_v28 }
 0x2c4   :  { %v3725_v7 = vpop.f32.mrf.mxu2 }
 0x2c5   :  { %v3726_v58 = vadd.f32 %v3725_v7, %v3677_v10 }
 0x2c6   :  { %v3774_v34 = vpop.f32.mrf.mxu3  ;;  %v3678_v16 = vpop.f32.mrf.mxu1 }
 0x2c7   :  { %v3775_v9 = vadd.f32 %v3774_v34, %v3726_v58  ;;  %v3679_v37 = vadd.f32 %v3678_v16, %v7809_v20  ;;  %v5747_v20 = vld [vmem:[%s8338_s0 + $0x124] sm:$0xf] }
 0x2c8   :  { %v3825_v38 = vpop.f32.mrf.mxu0  ;;  %v4306_v31 = vor.u32 %v5747_v20, %v4303_v44  ;;  %v5796_v20 = vld [vmem:[%s8338_s0 + $0x2ac] sm:$0xf] }
 0x2c9   :  { %v8088_v21 = vadd.f32 %v3823_v30, %v3775_v9  ;;  %v4410_v30 = vor.u32 %v5785_v43, %v4409_v63  ;;  %v4601_v63 = vld [vmem:[%s8338_s0 + $0x378] sm:$0xf]  ;;  %v5834_v43 = vld [vmem:[%s8338_s0 + $0x3d8] sm:$0xf0] }
 0x2cc   :  { %v3727_v47 = vpop.f32.mrf.mxu2 }
 0x2cd   :  { %v3728_v33 = vadd.f32 %v3727_v47, %v3679_v37  ;;  %v4503_v47 = vld [vmem:[%s8338_s0 + $0x314] sm:$0xf0] }
 0x2ce   :  { %v3776_v25 = vpop.f32.mrf.mxu3  ;;  %v3681_v36 = vpop.f32.mrf.mxu1 }
 0x2cf   :  { %v3777_v41 = vadd.f32 %v3776_v25, %v3728_v33  ;;  %v3682_v4 = vadd.f32 %v3681_v36, %v7830_v2  ;;  %v4395_v2 = vld [vmem:[%s8338_s0 + $0x244] sm:$0xf0]  ;;  %v4509_v33 = vld [vmem:[%s8338_s0 + $0x2b8] sm:$0xf]  ;;  %v5810_v25 = vld [vmem:[%s8338_s0 + $0x318] sm:$0xf0] }
 0x2d0   :  { %v3828_v0 = vpop.f32.mrf.mxu0  ;;  %v4398_v24 = vor.u32 %v5771_v45, %v4395_v2 }
 0x2d1   :  { %3876 = vmatmul.bf16.gmra.mxu1 %v4298_v51  ;;  %3925 = vmatmul.bf16.gmra.mxu2 %v4302_v52  ;;  %v8109_v1 = vadd.f32 %v3825_v38, %v3777_v41 }
 0x2d3   :  { %3974 = vmatmul.bf16.gmra.mxu3 %v4306_v31  ;;  %4023 = vmatmul.bf16.gmra.mxu0 %v4310_v55  ;;  %v4502_v55 = vor.u32 %v5809_v60, %v4501_v29 }
 0x2d4   :  { %v3730_v26 = vpop.f32.mrf.mxu2 }
 0x2d5   :  { %v3731_v39 = vadd.f32 %v3730_v26, %v3682_v4 }
 0x2d6   :  { %v3779_v56 = vpop.f32.mrf.mxu3  ;;  %v3683_v62 = vpop.f32.mrf.mxu1 }
 0x2d7   :  { %v3780_v15 = vadd.f32 %v3779_v56, %v3731_v39  ;;  %v3684_v22 = vadd.f32 %v3683_v62, %v7851_v59  ;;  %v5772_v59 = vld [vmem:[%s8338_s0 + $0x1ec] sm:$0xf] }
 0x2d8   :  { %v3830_v50 = vpop.f32.mrf.mxu0  ;;  %v4406_v10 = vor.u32 %v5772_v59, %v4403_v12  ;;  %v5821_v59 = vld [vmem:[%s8338_s0 + $0x374] sm:$0xf] }
 0x2d9   :  { %v8118_v54 = vadd.f32 %v3828_v0, %v3780_v15  ;;  %v4510_v0 = vor.u32 %v5810_v25, %v4509_v33  ;;  %v4701_v33 = vld [vmem:[%s8338_s0 + $0x440] sm:$0xf]  ;;  %v5859_v25 = vld [vmem:[%s8338_s0 + $0x4a0] sm:$0xf0] }
 0x2dc   :  { %v3732_v17 = vpop.f32.mrf.mxu2 }
 0x2dd   :  { %v3733_v19 = vadd.f32 %v3732_v17, %v3684_v22  ;;  %v4603_v17 = vld [vmem:[%s8338_s0 + $0x3dc] sm:$0xf0] }
 0x2de   :  { %v3781_v3 = vpop.f32.mrf.mxu3  ;;  %v3686_v6 = vpop.f32.mrf.mxu1 }
 0x2df   :  { %v3782_v7 = vadd.f32 %v3781_v3, %v3733_v19  ;;  %v3687_v58 = vadd.f32 %v3686_v6, %v7872_v40  ;;  %v4495_v40 = vld [vmem:[%s8338_s0 + $0x30c] sm:$0xf0]  ;;  %v4609_v19 = vld [vmem:[%s8338_s0 + $0x380] sm:$0xf]  ;;  %v5835_v3 = vld [vmem:[%s8338_s0 + $0x3e0] sm:$0xf0] }
 0x2e0   :  { %v3833_v34 = vpop.f32.mrf.mxu0  ;;  %v4498_v31 = vor.u32 %v5796_v20, %v4495_v40 }
 0x2e1   :  { %3881 = vmatmul.bf16.gmra.mxu1 %v4398_v24  ;;  %3930 = vmatmul.bf16.gmra.mxu2 %v4402_v23  ;;  %v8139_v16 = vadd.f32 %v3830_v50, %v3782_v7 }
 0x2e3   :  { %3979 = vmatmul.bf16.gmra.mxu3 %v4406_v10  ;;  %4028 = vmatmul.bf16.gmra.mxu0 %v4410_v30  ;;  %v4602_v30 = vor.u32 %v5834_v43, %v4601_v63 }
 0x2e4   :  { %v3735_v9 = vpop.f32.mrf.mxu2 }
 0x2e5   :  { %v3736_v37 = vadd.f32 %v3735_v9, %v3687_v58 }
 0x2e6   :  { %v3784_v38 = vpop.f32.mrf.mxu3  ;;  %v3688_v5 = vpop.f32.mrf.mxu1 }
 0x2e7   :  { %v3785_v61 = vadd.f32 %v3784_v38, %v3736_v37  ;;  %v3689_v14 = vadd.f32 %v3688_v5, %v7893_v35  ;;  %v5797_v35 = vld [vmem:[%s8338_s0 + $0x2b4] sm:$0xf] }
 0x2e8   :  { %v3835_v42 = vpop.f32.mrf.mxu0  ;;  %v4506_v4 = vor.u32 %v5797_v35, %v4503_v47  ;;  %v5846_v35 = vld [vmem:[%s8338_s0 + $0x43c] sm:$0xf] }
 0x2e9   :  { %v8148_v44 = vadd.f32 %v3833_v34, %v3785_v61  ;;  %v4610_v34 = vor.u32 %v5835_v3, %v4609_v19  ;;  %v4801_v19 = vld [vmem:[%s8338_s0 + $0x508] sm:$0xf]  ;;  %v5884_v3 = vld [vmem:[%s8338_s0 + $0x568] sm:$0xf0] }
 0x2ec   :  { %v3737_v51 = vpop.f32.mrf.mxu2 }
 0x2ed   :  { %v3738_v52 = vadd.f32 %v3737_v51, %v3689_v14  ;;  %v4703_v51 = vld [vmem:[%s8338_s0 + $0x4a4] sm:$0xf0] }
 0x2ee   :  { %v3786_v36 = vpop.f32.mrf.mxu3  ;;  %v3691_v41 = vpop.f32.mrf.mxu1 }
 0x2ef   :  { %v3787_v26 = vadd.f32 %v3786_v36, %v3738_v52  ;;  %v3692_v39 = vadd.f32 %v3691_v41, %v7914_v13  ;;  %v4595_v13 = vld [vmem:[%s8338_s0 + $0x3d4] sm:$0xf0]  ;;  %v4709_v52 = vld [vmem:[%s8338_s0 + $0x448] sm:$0xf]  ;;  %v5860_v36 = vld [vmem:[%s8338_s0 + $0x4a8] sm:$0xf0] }
 0x2f0   :  { %v3838_v56 = vpop.f32.mrf.mxu0  ;;  %v4598_v10 = vor.u32 %v5821_v59, %v4595_v13 }
 0x2f1   :  { %3886 = vmatmul.bf16.gmra.mxu1 %v4498_v31  ;;  %3935 = vmatmul.bf16.gmra.mxu2 %v4502_v55  ;;  %v8169_v62 = vadd.f32 %v3835_v42, %v3787_v26 }
 0x2f3   :  { %3984 = vmatmul.bf16.gmra.mxu3 %v4506_v4  ;;  %4033 = vmatmul.bf16.gmra.mxu0 %v4510_v0  ;;  %v4702_v0 = vor.u32 %v5859_v25, %v4701_v33 }
 0x2f4   :  { %v3740_v15 = vpop.f32.mrf.mxu2 }
 0x2f5   :  { %v3741_v22 = vadd.f32 %v3740_v15, %v3692_v39 }
 0x2f6   :  { %v3789_v50 = vpop.f32.mrf.mxu3  ;;  %v3693_v45 = vpop.f32.mrf.mxu1 }
 0x2f7   :  { %v3790_v2 = vadd.f32 %v3789_v50, %v3741_v22  ;;  %v3694_v28 = vadd.f32 %v3693_v45, %v7935_v8  ;;  %v5822_v8 = vld [vmem:[%s8338_s0 + $0x37c] sm:$0xf] }
 0x2f8   :  { %v3840_v11 = vpop.f32.mrf.mxu0  ;;  %v4606_v58 = vor.u32 %v5822_v8, %v4603_v17  ;;  %v5871_v8 = vld [vmem:[%s8338_s0 + $0x504] sm:$0xf] }
 0x2f9   :  { %v8178_v12 = vadd.f32 %v3838_v56, %v3790_v2  ;;  %v4710_v56 = vor.u32 %v5860_v36, %v4709_v52  ;;  %v4901_v52 = vld [vmem:[%s8338_s0 + $0x5d0] sm:$0xf]  ;;  %v5909_v36 = vld [vmem:[%s8338_s0 + $0x630] sm:$0xf0] }
 0x2fc   :  { %v3742_v24 = vpop.f32.mrf.mxu2 }
 0x2fd   :  { %v3743_v23 = vadd.f32 %v3742_v24, %v3694_v28  ;;  %v4803_v24 = vld [vmem:[%s8338_s0 + $0x56c] sm:$0xf0] }
 0x2fe   :  { %v3791_v6 = vpop.f32.mrf.mxu3  ;;  %v3696_v7 = vpop.f32.mrf.mxu1 }
 0x2ff   :  { %v3792_v9 = vadd.f32 %v3791_v6, %v3743_v23  ;;  %v3697_v37 = vadd.f32 %v3696_v7, %v7956_v53  ;;  %v4695_v53 = vld [vmem:[%s8338_s0 + $0x49c] sm:$0xf0]  ;;  %v4809_v23 = vld [vmem:[%s8338_s0 + $0x510] sm:$0xf]  ;;  %v5885_v6 = vld [vmem:[%s8338_s0 + $0x570] sm:$0xf0] }
 0x300   :  { %v3843_v38 = vpop.f32.mrf.mxu0  ;;  %v4698_v4 = vor.u32 %v5846_v35, %v4695_v53 }
 0x301   :  { %3891 = vmatmul.bf16.gmra.mxu1 %v4598_v10  ;;  %3940 = vmatmul.bf16.gmra.mxu2 %v4602_v30  ;;  %v8199_v5 = vadd.f32 %v3840_v11, %v3792_v9 }
 0x303   :  { %3989 = vmatmul.bf16.gmra.mxu3 %v4606_v58  ;;  %4038 = vmatmul.bf16.gmra.mxu0 %v4610_v34  ;;  %v4802_v34 = vor.u32 %v5884_v3, %v4801_v19 }
 0x304   :  { %v3745_v61 = vpop.f32.mrf.mxu2 }
 0x305   :  { %v3746_v14 = vadd.f32 %v3745_v61, %v3697_v37 }
 0x306   :  { %v3794_v42 = vpop.f32.mrf.mxu3  ;;  %v3698_v20 = vpop.f32.mrf.mxu1 }
 0x307   :  { %v3795_v40 = vadd.f32 %v3794_v42, %v3746_v14  ;;  %v3699_v29 = vadd.f32 %v3698_v20, %v7977_v48  ;;  %v5847_v48 = vld [vmem:[%s8338_s0 + $0x444] sm:$0xf] }
 0x308   :  { %v3845_v60 = vpop.f32.mrf.mxu0  ;;  %v4706_v39 = vor.u32 %v5847_v48, %v4703_v51  ;;  %v5896_v48 = vld [vmem:[%s8338_s0 + $0x5cc] sm:$0xf] }
 0x309   :  { %v8208_v47 = vadd.f32 %v3843_v38, %v3795_v40  ;;  %v4810_v38 = vor.u32 %v5885_v6, %v4809_v23 }
 0x30c   :  { %v3747_v31 = vpop.f32.mrf.mxu2 }
 0x30d   :  { %v3748_v55 = vadd.f32 %v3747_v31, %v3699_v29  ;;  %v4903_v31 = vld [vmem:[%s8338_s0 + $0x634] sm:$0xf0] }
 0x30e   :  { %v3796_v41 = vpop.f32.mrf.mxu3  ;;  %v3701_v26 = vpop.f32.mrf.mxu1 }
 0x30f   :  { %v3797_v15 = vadd.f32 %v3796_v41, %v3748_v55  ;;  %v3702_v22 = vadd.f32 %v3701_v26, %v7998_v32  ;;  %v4795_v32 = vld [vmem:[%s8338_s0 + $0x564] sm:$0xf0]  ;;  %v4909_v55 = vld [vmem:[%s8338_s0 + $0x5d8] sm:$0xf]  ;;  %v5910_v41 = vld [vmem:[%s8338_s0 + $0x638] sm:$0xf0] }
 0x310   :  { %v3848_v50 = vpop.f32.mrf.mxu0  ;;  %v4798_v58 = vor.u32 %v5871_v8, %v4795_v32 }
 0x311   :  { %3896 = vmatmul.bf16.gmra.mxu1 %v4698_v4  ;;  %3945 = vmatmul.bf16.gmra.mxu2 %v4702_v0  ;;  %v8229_v45 = vadd.f32 %v3845_v60, %v3797_v15 }
 0x313   :  { %3994 = vmatmul.bf16.gmra.mxu3 %v4706_v39  ;;  %4043 = vmatmul.bf16.gmra.mxu0 %v4710_v56  ;;  %v4902_v56 = vor.u32 %v5909_v36, %v4901_v52 }
 0x314   :  { %v3750_v2 = vpop.f32.mrf.mxu2 }
 0x315   :  { %v3751_v28 = vadd.f32 %v3750_v2, %v3702_v22 }
 0x316   :  { %v3799_v11 = vpop.f32.mrf.mxu3  ;;  %v3703_v59 = vpop.f32.mrf.mxu1 }
 0x317   :  { %v3800_v13 = vadd.f32 %v3799_v11, %v3751_v28  ;;  %v3704_v63 = vadd.f32 %v3703_v59, %v8019_v27  ;;  %v5872_v27 = vld [vmem:[%s8338_s0 + $0x50c] sm:$0xf] }
 0x318   :  { %v3850_v43 = vpop.f32.mrf.mxu0  ;;  %v4806_v37 = vor.u32 %v5872_v27, %v4803_v24 }
 0x319   :  { %v8238_v17 = vadd.f32 %v3848_v50, %v3800_v13  ;;  %v4910_v50 = vor.u32 %v5910_v41, %v4909_v55 }
 0x31c   :  { %v3752_v10 = vpop.f32.mrf.mxu2 }
 0x31d   :  { %v3753_v30 = vadd.f32 %v3752_v10, %v3704_v63 }
 0x31e   :  { %v3801_v7 = vpop.f32.mrf.mxu3  ;;  %v3706_v9 = vpop.f32.mrf.mxu1 }
 0x31f   :  { %v3802_v61 = vadd.f32 %v3801_v7, %v3753_v30  ;;  %v3707_v14 = vadd.f32 %v3706_v9, %v8028_v46  ;;  %v4895_v46 = vld [vmem:[%s8338_s0 + $0x62c] sm:$0xf0] }
 0x320   :  { %v3853_v42 = vpop.f32.mrf.mxu0  ;;  %v4898_v39 = vor.u32 %v5896_v48, %v4895_v46 }
 0x321   :  { %3901 = vmatmul.bf16.gmra.mxu1 %v4798_v58  ;;  %3950 = vmatmul.bf16.gmra.mxu2 %v4802_v34  ;;  %v8259_v20 = vadd.f32 %v3850_v43, %v3802_v61 }
 0x323   :  { %3999 = vmatmul.bf16.gmra.mxu3 %v4806_v37  ;;  %4048 = vmatmul.bf16.gmra.mxu0 %v4810_v38 }
 0x324   :  { %v3755_v40 = vpop.f32.mrf.mxu2 }
 0x325   :  { %v3756_v29 = vadd.f32 %v3755_v40, %v3707_v14 }
 0x326   :  { %v3804_v60 = vpop.f32.mrf.mxu3  ;;  %v3708_v35 = vpop.f32.mrf.mxu1 }
 0x327   :  { %v3805_v53 = vadd.f32 %v3804_v60, %v3756_v29  ;;  %v3709_v33 = vadd.f32 %v3708_v35, %v8049_v57  ;;  %v5897_v57 = vld [vmem:[%s8338_s0 + $0x5d4] sm:$0xf] }
 0x328   :  { %v3855_v25 = vpop.f32.mrf.mxu0  ;;  %v4906_v22 = vor.u32 %v5897_v57, %v4903_v31 }
 0x329   :  { %v8268_v51 = vadd.f32 %v3853_v42, %v3805_v53 }
 0x32c   :  { %v3757_v4 = vpop.f32.mrf.mxu2 }
 0x32d   :  { %v3758_v0 = vadd.f32 %v3757_v4, %v3709_v33 }
 0x32e   :  { %v3806_v26 = vpop.f32.mrf.mxu3  ;;  %v3711_v15 = vpop.f32.mrf.mxu1 }
 0x32f   :  { %v3807_v2 = vadd.f32 %v3806_v26, %v3758_v0  ;;  %v3712_v28 = vadd.f32 %v3711_v15, %v8058_v49 }
 0x330   :  { %v3858_v11 = vpop.f32.mrf.mxu0 }
 0x331   :  { %3906 = vmatmul.bf16.gmra.mxu1 %v4898_v39  ;;  %3955 = vmatmul.bf16.gmra.mxu2 %v4902_v56  ;;  %v8289_v59 = vadd.f32 %v3855_v25, %v3807_v2 }
 0x333   :  { %4004 = vmatmul.bf16.gmra.mxu3 %v4906_v22  ;;  %4053 = vmatmul.bf16.gmra.mxu0 %v4910_v50 }
 0x334   :  { %v3760_v13 = vpop.f32.mrf.mxu2 }
 0x335   :  { %v3761_v63 = vadd.f32 %v3760_v13, %v3712_v28 }
 0x336   :  { %v3809_v43 = vpop.f32.mrf.mxu3  ;;  %v3713_v8 = vpop.f32.mrf.mxu1 }
 0x337   :  { %v3810_v32 = vadd.f32 %v3809_v43, %v3761_v63  ;;  %v3714_v19 = vadd.f32 %v3713_v8, %v8079_v18 }
 0x338   :  { %v3860_v3 = vpop.f32.mrf.mxu0 }
 0x339   :  { %v8292_v27 = vadd.f32 %v3858_v11, %v3810_v32 }
 0x33c   :  { %v3762_v24 = vpop.f32.mrf.mxu2 }
 0x33d   :  { %v3763_v23 = vadd.f32 %v3762_v24, %v3714_v19 }
 0x33e   :  { %v3811_v49 = vpop.f32.mrf.mxu3  ;;  %v3872_v6 = vpop.f32.mrf.mxu1 }
 0x33f   :  { %v3812_v10 = vadd.f32 %v3811_v49, %v3763_v23  ;;  %v3873_v34 = vadd.f32 %v3872_v6, %v8088_v21 }
 0x340   :  { %v4019_v30 = vpop.f32.mrf.mxu0 }
 0x341   :  { %v8294_v7 = vadd.f32 %v3860_v3, %v3812_v10 }
 0x344   :  { %v3921_v58 = vpop.f32.mrf.mxu2 }
 0x345   :  { %v3922_v38 = vadd.f32 %v3921_v58, %v3873_v34 }
 0x346   :  { %v3970_v9 = vpop.f32.mrf.mxu3  ;;  %v3874_v37 = vpop.f32.mrf.mxu1 }
 0x347   :  { %v3971_v14 = vadd.f32 %v3970_v9, %v3922_v38  ;;  %v3875_v18 = vadd.f32 %v3874_v37, %v8109_v1 }
 0x348   :  { %v4021_v61 = vpop.f32.mrf.mxu0 }
 0x349   :  { %v4020_v35 = vadd.f32 %v4019_v30, %v3971_v14 }
 0x34b   :  { %v4059_v48 = vmax.f32 %v4020_v35, 0.0 }
 0x34c   :  { %v3923_v42 = vpop.f32.mrf.mxu2 }
 0x34d   :  { %v3924_v40 = vadd.f32 %v3923_v42, %v3875_v18 }
 0x34e   :  { %v3972_v29 = vpop.f32.mrf.mxu3  ;;  %v3877_v60 = vpop.f32.mrf.mxu1 }
 0x34f   :  { %v3973_v53 = vadd.f32 %v3972_v29, %v3924_v40  ;;  %v3878_v21 = vadd.f32 %v3877_v60, %v8118_v54 }
 0x350   :  { %v4024_v33 = vpop.f32.mrf.mxu0 }
 0x351   :  { %v4022_v25 = vadd.f32 %v4021_v61, %v3973_v53 }
 0x353   :  { %v4060_v46 = vmax.f32 %v4022_v25, 0.0 }
 0x354   :  { %v3926_v52 = vpop.f32.mrf.mxu2 }
 0x355   :  { %v6114_v36 = vpack.c.bf16 %v4060_v46, %v4059_v48  ;;  %v3927_v1 = vadd.f32 %v3926_v52, %v3878_v21 }
 0x356   :  { %v3975_v57 = vpop.f32.mrf.mxu3  ;;  %v3879_v31 = vpop.f32.mrf.mxu1 }
 0x357   :  { %6115 = vst [vmem:[%s8339_s3] sm:$0xff] %v6114_v36   ;;  %v3976_v41 = vadd.f32 %v3975_v57, %v3927_v1  ;;  %v3880_v4 = vadd.f32 %v3879_v31, %v8139_v16 }
 0x358   :  { %v4026_v55 = vpop.f32.mrf.mxu0 }
 0x359   :  { %v4025_v15 = vadd.f32 %v4024_v33, %v3976_v41 }
 0x35b   :  { %v4061_v54 = vmax.f32 %v4025_v15, 0.0 }
 0x35c   :  { %v3928_v0 = vpop.f32.mrf.mxu2 }
 0x35d   :  { %v3929_v26 = vadd.f32 %v3928_v0, %v3880_v4 }
 0x35e   :  { %v3977_v39 = vpop.f32.mrf.mxu3  ;;  %v3882_v56 = vpop.f32.mrf.mxu1 }
 0x35f   :  { %v3978_v22 = vadd.f32 %v3977_v39, %v3929_v26  ;;  %v3883_v63 = vadd.f32 %v3882_v56, %v8148_v44 }
 0x360   :  { %v4029_v50 = vpop.f32.mrf.mxu0 }
 0x361   :  { %v4027_v2 = vadd.f32 %v4026_v55, %v3978_v22 }
 0x363   :  { %v4062_v28 = vmax.f32 %v4027_v2, 0.0 }
 0x364   :  { %v3931_v11 = vpop.f32.mrf.mxu2 }
 0x365   :  { %v6119_v13 = vpack.c.bf16 %v4062_v28, %v4061_v54  ;;  %v3932_v16 = vadd.f32 %v3931_v11, %v3883_v63 }
 0x366   :  { %v3980_v43 = vpop.f32.mrf.mxu3  ;;  %v3884_v8 = vpop.f32.mrf.mxu1 }
 0x367   :  { %6151 = vst [vmem:[%s8339_s3 + $0x8] sm:$0xff] %v6119_v13   ;;  %v3981_v19 = vadd.f32 %v3980_v43, %v3932_v16  ;;  %v3885_v3 = vadd.f32 %v3884_v8, %v8169_v62 }
 0x368   :  { %v4031_v32 = vpop.f32.mrf.mxu0 }
 0x369   :  { %v4030_v10 = vadd.f32 %v4029_v50, %v3981_v19 }
 0x36b   :  { %v4063_v44 = vmax.f32 %v4030_v10, 0.0 }
 0x36c   :  { %v3933_v24 = vpop.f32.mrf.mxu2 }
 0x36d   :  { %v3934_v23 = vadd.f32 %v3933_v24, %v3885_v3 }
 0x36e   :  { %v3982_v49 = vpop.f32.mrf.mxu3  ;;  %v3887_v6 = vpop.f32.mrf.mxu1 }
 0x36f   :  { %v3983_v30 = vadd.f32 %v3982_v49, %v3934_v23  ;;  %v3888_v61 = vadd.f32 %v3887_v6, %v8178_v12 }
 0x370   :  { %v4034_v58 = vpop.f32.mrf.mxu0 }
 0x371   :  { %v4032_v34 = vadd.f32 %v4031_v32, %v3983_v30 }
 0x373   :  { %v4064_v9 = vmax.f32 %v4032_v34, 0.0 }
 0x374   :  { %v3936_v37 = vpop.f32.mrf.mxu2 }
 0x375   :  { %v6124_v38 = vpack.c.bf16 %v4064_v9, %v4063_v44  ;;  %v3937_v62 = vadd.f32 %v3936_v37, %v3888_v61 }
 0x376   :  { %v3985_v14 = vpop.f32.mrf.mxu3  ;;  %v3889_v18 = vpop.f32.mrf.mxu1 }
 0x377   :  { %6152 = vst [vmem:[%s8339_s3 + $0x10] sm:$0xff] %v6124_v38   ;;  %v3986_v40 = vadd.f32 %v3985_v14, %v3937_v62  ;;  %v3890_v29 = vadd.f32 %v3889_v18, %v8199_v5 }
 0x378   :  { %v4036_v42 = vpop.f32.mrf.mxu0 }
 0x379   :  { %v4035_v25 = vadd.f32 %v4034_v58, %v3986_v40 }
 0x37b   :  { %v4065_v12 = vmax.f32 %v4035_v25, 0.0 }
 0x37c   :  { %v3938_v60 = vpop.f32.mrf.mxu2 }
 0x37d   :  { %v3939_v35 = vadd.f32 %v3938_v60, %v3890_v29 }
 0x37e   :  { %v3987_v53 = vpop.f32.mrf.mxu3  ;;  %v3892_v33 = vpop.f32.mrf.mxu1 }
 0x37f   :  { %v3988_v48 = vadd.f32 %v3987_v53, %v3939_v35  ;;  %v3893_v31 = vadd.f32 %v3892_v33, %v8208_v47 }
 0x380   :  { %v4039_v46 = vpop.f32.mrf.mxu0 }
 0x381   :  { %v4037_v52 = vadd.f32 %v4036_v42, %v3988_v48 }
 0x383   :  { %v4066_v36 = vmax.f32 %v4037_v52, 0.0 }
 0x384   :  { %v3941_v21 = vpop.f32.mrf.mxu2 }
 0x385   :  { %v6129_v57 = vpack.c.bf16 %v4066_v36, %v4065_v12  ;;  %v3942_v5 = vadd.f32 %v3941_v21, %v3893_v31 }
 0x386   :  { %v3990_v1 = vpop.f32.mrf.mxu3  ;;  %v3894_v55 = vpop.f32.mrf.mxu1 }
 0x387   :  { %6153 = vst [vmem:[%s8339_s3 + $0x18] sm:$0xff] %v6129_v57   ;;  %v3991_v4 = vadd.f32 %v3990_v1, %v3942_v5  ;;  %v3895_v0 = vadd.f32 %v3894_v55, %v8229_v45 }
 0x388   :  { %v4041_v41 = vpop.f32.mrf.mxu0 }
 0x389   :  { %v4040_v22 = vadd.f32 %v4039_v46, %v3991_v4 }
 0x38b   :  { %v4067_v47 = vmax.f32 %v4040_v22, 0.0 }
 0x38c   :  { %v3943_v26 = vpop.f32.mrf.mxu2 }
 0x38d   :  { %v3944_v39 = vadd.f32 %v3943_v26, %v3895_v0 }
 0x38e   :  { %v3992_v56 = vpop.f32.mrf.mxu3  ;;  %v3897_v15 = vpop.f32.mrf.mxu1 }
 0x38f   :  { %v3993_v50 = vadd.f32 %v3992_v56, %v3944_v39  ;;  %v3898_v63 = vadd.f32 %v3897_v15, %v8238_v17 }
 0x390   :  { %v4044_v2 = vpop.f32.mrf.mxu0 }
 0x391   :  { %v4042_v54 = vadd.f32 %v4041_v41, %v3993_v50 }
 0x393   :  { %v4068_v28 = vmax.f32 %v4042_v54, 0.0 }
 0x394   :  { %v3946_v11 = vpop.f32.mrf.mxu2 }
 0x395   :  { %v6134_v13 = vpack.c.bf16 %v4068_v28, %v4067_v47  ;;  %v3947_v45 = vadd.f32 %v3946_v11, %v3898_v63 }
 0x396   :  { %v3995_v43 = vpop.f32.mrf.mxu3  ;;  %v3899_v8 = vpop.f32.mrf.mxu1 }
 0x397   :  { %6154 = vst [vmem:[%s8339_s3 + $0x20] sm:$0xff] %v6134_v13   ;;  %v3996_v32 = vadd.f32 %v3995_v43, %v3947_v45  ;;  %v3900_v19 = vadd.f32 %v3899_v8, %v8259_v20 }
 0x398   :  { %v4046_v16 = vpop.f32.mrf.mxu0 }
 0x399   :  { %v4045_v6 = vadd.f32 %v4044_v2, %v3996_v32 }
 0x39b   :  { %v4069_v17 = vmax.f32 %v4045_v6, 0.0 }
 0x39c   :  { %v3948_v3 = vpop.f32.mrf.mxu2 }
 0x39d   :  { %v3949_v24 = vadd.f32 %v3948_v3, %v3900_v19 }
 0x39e   :  { %v3997_v23 = vpop.f32.mrf.mxu3  ;;  %v3902_v49 = vpop.f32.mrf.mxu1 }
 0x39f   :  { %v3998_v10 = vadd.f32 %v3997_v23, %v3949_v24  ;;  %v3903_v37 = vadd.f32 %v3902_v49, %v8268_v51 }
 0x3a0   :  { %v4049_v58 = vpop.f32.mrf.mxu0 }
 0x3a1   :  { %v4047_v30 = vadd.f32 %v4046_v16, %v3998_v10 }
 0x3a3   :  { %v4070_v34 = vmax.f32 %v4047_v30, 0.0 }
 0x3a4   :  { %v3951_v44 = vpop.f32.mrf.mxu2 }
 0x3a5   :  { %v6139_v9 = vpack.c.bf16 %v4070_v34, %v4069_v17  ;;  %v3952_v20 = vadd.f32 %v3951_v44, %v3903_v37 }
 0x3a6   :  { %v4000_v38 = vpop.f32.mrf.mxu3  ;;  %v3904_v61 = vpop.f32.mrf.mxu1 }
 0x3a7   :  { %6155 = vst [vmem:[%s8339_s3 + $0x28] sm:$0xff] %v6139_v9   ;;  %v4001_v14 = vadd.f32 %v4000_v38, %v3952_v20  ;;  %v3905_v18 = vadd.f32 %v3904_v61, %v8289_v59 }
 0x3a8   :  { %v4051_v62 = vpop.f32.mrf.mxu0 }
 0x3a9   :  { %v4050_v35 = vadd.f32 %v4049_v58, %v4001_v14 }
 0x3ab   :  { %v4071_v25 = vmax.f32 %v4050_v35, 0.0 }
 0x3ac   :  { %v3953_v42 = vpop.f32.mrf.mxu2 }
 0x3ad   :  { %v3954_v40 = vadd.f32 %v3953_v42, %v3905_v18 }
 0x3ae   :  { %v4002_v29 = vpop.f32.mrf.mxu3  ;;  %v3907_v60 = vpop.f32.mrf.mxu1 }
 0x3af   :  { %v4003_v53 = vadd.f32 %v4002_v29, %v3954_v40  ;;  %v3908_v52 = vadd.f32 %v3907_v60, %v8292_v27 }
 0x3b0   :  { %v4054_v36 = vpop.f32.mrf.mxu0 }
 0x3b1   :  { %v4052_v33 = vadd.f32 %v4051_v62, %v4003_v53 }
 0x3b3   :  { %v4072_v51 = vmax.f32 %v4052_v33, 0.0 }
 0x3b4   :  { %v3956_v48 = vpop.f32.mrf.mxu2 }
 0x3b5   :  { %v6144_v46 = vpack.c.bf16 %v4072_v51, %v4071_v25  ;;  %v3957_v59 = vadd.f32 %v3956_v48, %v3908_v52 }
 0x3b6   :  { %v4005_v12 = vpop.f32.mrf.mxu3  ;;  %v3909_v21 = vpop.f32.mrf.mxu1 }
 0x3b7   :  { %6156 = vst [vmem:[%s8339_s3 + $0x30] sm:$0xff] %v6144_v46   ;;  %v4006_v57 = vadd.f32 %v4005_v12, %v3957_v59  ;;  %v3910_v31 = vadd.f32 %v3909_v21, %v8294_v7 }
 0x3b8   :  { %v4056_v0 = vpop.f32.mrf.mxu0 }
 0x3b9   :  { %v4055_v41 = vadd.f32 %v4054_v36, %v4006_v57 }
 0x3bb   :  { %v4073_v39 = vmax.f32 %v4055_v41, 0.0 }
 0x3bc   :  { %v3958_v1 = vpop.f32.mrf.mxu2 }
 0x3bd   :  { %v3959_v55 = vadd.f32 %v3958_v1, %v3910_v31 }
 0x3be   :  { %v4007_v5 = vpop.f32.mrf.mxu3 }
 0x3bf   :  { %v4008_v4 = vadd.f32 %v4007_v5, %v3959_v55 }
 0x3c1   :  { %v4057_v26 = vadd.f32 %v4056_v0, %v4008_v4 }
 0x3c3   :  { %v4074_v27 = vmax.f32 %v4057_v26, 0.0 }
 0x3c5   :  { %v6149_v56 = vpack.c.bf16 %v4074_v27, %v4073_v39 }
 0x3c7   :  { %6157 = vst [vmem:[%s8339_s3 + $0x38] sm:$0xff] %v6149_v56  }

// kernel: mnist_net_forward.15
= control target key start
LH: loop header
LB: loop body
LE: loop exit
PB: predicated region body
PF: predicated region fallthrough
CT: control target
= control target key end

     0   :  { %v342_v46 = vlaneseq  ;;  %s654_s1 = inlined_call_operand.vmem [shape: bf16[512,128], index: 1, kind: input, shape index: {}]   ;;  %s655_s2 = inlined_call_operand.vmem [shape: f32[1,128], index: 2, kind: input, shape index: {}]   ;;  %s656_s0 = inlined_call_operand.vmem [shape: bf16[8,512], index: 0, kind: input, shape index: {}]   ;;  %s657_s3 = inlined_call_operand.vmem [shape: f32[8,128], index: 3, kind: output, shape index: {}]  }
   0x1   :  { %v496_v0 = vld [vmem:[%s654_s1 + $0x38] sm:$0xff]  ;;  %v495_v4 = vld [vmem:[%s654_s1 + $0x30] sm:$0xff]  ;;  %v494_v8 = vld [vmem:[%s654_s1 + $0x28] sm:$0xff] }
   0x2   :  { %v504_v1 = vld [vmem:[%s654_s1 + $0x78] sm:$0xff]  ;;  %290 = vmatpush.bf16.msra.mxu0 %v496_v0  ;;  %v503_v5 = vld [vmem:[%s654_s1 + $0x70] sm:$0xff]  ;;  %v502_v9 = vld [vmem:[%s654_s1 + $0x68] sm:$0xff]  ;;  %v343_v48 = vand.u32 127, %v342_v46 }
   0x3   :  { %v512_v2 = vld [vmem:[%s654_s1 + $0xb8] sm:$0xff]  ;;  %303 = vmatpush.bf16.msra.mxu1 %v504_v1  ;;  %v511_v6 = vld [vmem:[%s654_s1 + $0xb0] sm:$0xff]  ;;  %v510_v10 = vld [vmem:[%s654_s1 + $0xa8] sm:$0xff] }
   0x4   :  { %v520_v3 = vld [vmem:[%s654_s1 + $0xf8] sm:$0xff]  ;;  %316 = vmatpush.bf16.msra.mxu2 %v512_v2  ;;  %v519_v7 = vld [vmem:[%s654_s1 + $0xf0] sm:$0xff]  ;;  %v518_v11 = vld [vmem:[%s654_s1 + $0xe8] sm:$0xff]  ;;  %vm344_vm0 = vcmp.lt.s32.totalorder %v343_v48, 10 }
   0x5   :  { %329 = vmatpush.bf16.msra.mxu3 %v520_v3  ;;  %v493_v12 = vld [vmem:[%s654_s1 + $0x20] sm:$0xff]  ;;  %v492_v16 = vld [vmem:[%s654_s1 + $0x18] sm:$0xff]  ;;  %v491_v20 = vld [vmem:[%s654_s1 + $0x10] sm:$0xff] }
   0x6   :  { %291 = vmatpush.bf16.msra.mxu0 %v495_v4  ;;  %v501_v13 = vld [vmem:[%s654_s1 + $0x60] sm:$0xff]  ;;  %v500_v17 = vld [vmem:[%s654_s1 + $0x58] sm:$0xff]  ;;  %v499_v21 = vld [vmem:[%s654_s1 + $0x50] sm:$0xff] }
   0x7   :  { %304 = vmatpush.bf16.msra.mxu1 %v503_v5  ;;  %v509_v14 = vld [vmem:[%s654_s1 + $0xa0] sm:$0xff]  ;;  %v508_v18 = vld [vmem:[%s654_s1 + $0x98] sm:$0xff]  ;;  %v507_v22 = vld [vmem:[%s654_s1 + $0x90] sm:$0xff] }
   0x8   :  { %317 = vmatpush.bf16.msra.mxu2 %v511_v6  ;;  %v517_v15 = vld [vmem:[%s654_s1 + $0xe0] sm:$0xff]  ;;  %v516_v19 = vld [vmem:[%s654_s1 + $0xd8] sm:$0xff]  ;;  %v515_v23 = vld [vmem:[%s654_s1 + $0xd0] sm:$0xff] }
   0x9   :  { %330 = vmatpush.bf16.msra.mxu3 %v519_v7  ;;  %v490_v24 = vld [vmem:[%s654_s1 + $0x8] sm:$0xff]  ;;  %v14_v26 = vld [vmem:[%s656_s0] sm:$0xff] }
   0xa   :  { %292 = vmatpush.bf16.msra.mxu0 %v494_v8  ;;  %v498_v25 = vld [vmem:[%s654_s1 + $0x48] sm:$0xff]  ;;  %v86_v30 = vunpack.c.l.b16 %v14_v26  ;;  %v87_v31 = vunpack.c.h.b16 %v14_v26  ;;  %v489_v32 = vld [vmem:[%s654_s1] sm:$0xff] }
   0xb   :  { %305 = vmatpush.bf16.msra.mxu1 %v502_v9  ;;  %v506_v27 = vld [vmem:[%s654_s1 + $0x88] sm:$0xff]  ;;  %v497_v33 = vld [vmem:[%s654_s1 + $0x40] sm:$0xff] }
   0xc   :  { %318 = vmatpush.bf16.msra.mxu2 %v510_v10  ;;  %v514_v28 = vld [vmem:[%s654_s1 + $0xc8] sm:$0xff]  ;;  %v505_v36 = vld [vmem:[%s654_s1 + $0x80] sm:$0xff]  ;;  %v90_v38 = vpack.c.b16 %v86_v30, %v86_v30  ;;  %v91_v39 = vpack.c.b16 %v87_v31, %v87_v31 }
   0xd   :  { %331 = vmatpush.bf16.msra.mxu3 %v518_v11  ;;  %v15_v29 = vld [vmem:[%s656_s0 + $0x8] sm:$0xff]  ;;  %v513_v37 = vld [vmem:[%s654_s1 + $0xc0] sm:$0xff] }
   0xe   :  { %293 = vmatpush.bf16.msra.mxu0 %v493_v12  ;;  %v88_v34 = vunpack.c.l.b16 %v15_v29  ;;  %v89_v35 = vunpack.c.h.b16 %v15_v29  ;;  %v521_v42 = vld [vmem:[%s655_s2] ss:$0 sm:$0xff] }
   0xf   :  { %306 = vmatpush.bf16.msra.mxu1 %v501_v13 }
  0x10   :  { %319 = vmatpush.bf16.msra.mxu2 %v509_v14  ;;  %v92_v40 = vpack.c.b16 %v88_v34, %v88_v34  ;;  %v93_v41 = vpack.c.b16 %v89_v35, %v89_v35 }
  0x11   :  { %332 = vmatpush.bf16.msra.mxu3 %v517_v15 }
  0x12   :  { %294 = vmatpush.bf16.msra.mxu0 %v492_v16 }
  0x13   :  { %307 = vmatpush.bf16.msra.mxu1 %v500_v17 }
  0x14   :  { %320 = vmatpush.bf16.msra.mxu2 %v508_v18 }
  0x15   :  { %333 = vmatpush.bf16.msra.mxu3 %v516_v19 }
  0x16   :  { %295 = vmatpush.bf16.msra.mxu0 %v491_v20 }
  0x17   :  { %308 = vmatpush.bf16.msra.mxu1 %v499_v21 }
  0x18   :  { %321 = vmatpush.bf16.msra.mxu2 %v507_v22 }
  0x19   :  { %334 = vmatpush.bf16.msra.mxu3 %v515_v23 }
  0x1a   :  { %296 = vmatpush.bf16.msra.mxu0 %v490_v24 }
  0x1b   :  { %309 = vmatpush.bf16.msra.mxu1 %v498_v25 }
  0x1c   :  { %322 = vmatpush.bf16.msra.mxu2 %v506_v27 }
  0x1d   :  { %335 = vmatpush.bf16.msra.mxu3 %v514_v28 }
  0x1e   :  { %297 = vmatpush.bf16.msra.mxu0 %v489_v32 }
  0x1f   :  { %310 = vmatpush.bf16.msra.mxu1 %v497_v33 }
  0x20   :  { %323 = vmatpush.bf16.msra.mxu2 %v505_v36 }
  0x21   :  { %336 = vmatpush.bf16.msra.mxu3 %v513_v37  ;;  %298 = vmatmul.bf16.vlgmr.msra.gmra.mxu0 %v90_v38 }
  0x22   :  { %311 = vmatmul.bf16.vlgmr.msra.gmra.mxu1 %v91_v39 }
  0x23   :  { %324 = vmatmul.bf16.vlgmr.msra.gmra.mxu2 %v92_v40 }
  0x24   :  { %337 = vmatmul.bf16.vlgmr.msra.gmra.mxu3 %v93_v41 }
  0x9e   :  { %v299_v43 = vpop.f32.mrf.mxu0 }
  0x9f   :  { %v312_v44 = vpop.f32.mrf.mxu1  ;;  %v300_v45 = vadd.f32 %v521_v42, %v299_v43 }
  0xa1   :  { %v313_v47 = vadd.f32 %v312_v44, %v300_v45 }
  0xa6   :  { %v325_v49 = vpop.f32.mrf.mxu2  ;;  %v301_v52 = vpop.f32.mrf.mxu0 }
  0xa7   :  { %v338_v50 = vpop.f32.mrf.mxu3  ;;  %v326_v51 = vadd.f32 %v325_v49, %v313_v47  ;;  %v314_v53 = vpop.f32.mrf.mxu1 }
  0xa9   :  { %v339_v54 = vadd.f32 %v338_v50, %v326_v51 }
  0xab   :  { %v345_v55 = vsel %vm344_vm0, %v339_v54, -inf }
  0xac   :  { %346 = vmax.xlane.f32.xlu0 %v345_v55 }
  0xae   :  { %v327_v56 = vpop.f32.mrf.mxu2 }
  0xaf   :  { %v340_v57 = vpop.f32.mrf.mxu3 }
 0x11f   :  { %v347_v58 = vpop.xlane.xlu0 %346 }
 0x120   :  { %v348_v59 = vsub.f32 %v345_v55, %v347_v58 }
 0x122   :  { %v349_v60 = vmul.f32 1.442695, %v348_v59 }
 0x124   :  { %522 = vpow2.f32 %v349_v60 }
 0x12a   :  { %v523_v61 = vpop.eup %522 }
 0x12b   :  { %351 = vadd.xlane.f32.xlu0 %v523_v61 }
 0x19e   :  { %v352_v62 = vpop.xlane.xlu0 %351 }
 0x19f   :  { %524 = vlog2.f32 %v352_v62 }
 0x1a5   :  { %v525_v63 = vpop.eup %524 }
 0x1a6   :  { %v354_v0 = vmul.f32 0.6931472, %v525_v63 }
 0x1a8   :  { %v355_v1 = vsub.f32 %v348_v59, %v354_v0 }
 0x1aa   :  { %356 = vst [vmem:[%s657_s3] sm:$0xff] %v355_v1 }

// kernel: mnist_net_forward.14
= control target key start
LH: loop header
LB: loop body
LE: loop exit
PB: predicated region body
PF: predicated region fallthrough
CT: control target
= control target key end

     0   :  { %s9842_s1 = inlined_call_operand.vmem [shape: bf16[2048,512], index: 1, kind: input, shape index: {}]   ;;  %s9843_s0 = inlined_call_operand.vmem [shape: bf16[8,2048], index: 0, kind: input, shape index: {}]   ;;  %s9844_s2 = inlined_call_operand.vmem [shape: f32[1,512], index: 2, kind: input, shape index: {}]   ;;  %s9845_s3 = inlined_call_operand.vmem [shape: bf16[8,512], index: 3, kind: output, shape index: {}]  }
   0x1   :  { %v4118_v0 = vld [vmem:[%s9842_s1 + $0xe0] sm:$0xf]  ;;  %v6082_v1 = vld [vmem:[%s9842_s1 + $0xec] sm:$0xf0] }
   0x2   :  { %v4246_v2 = vld [vmem:[%s9842_s1 + $0x1e0] sm:$0xf]  ;;  %v4119_v3 = vor.u32 %v6082_v1, %v4118_v0  ;;  %v6114_v4 = vld [vmem:[%s9842_s1 + $0x1ec] sm:$0xf0] }
   0x3   :  { %v4374_v5 = vld [vmem:[%s9842_s1 + $0x2e0] sm:$0xf]  ;;  %v6146_v6 = vld [vmem:[%s9842_s1 + $0x2ec] sm:$0xf0]  ;;  %v4247_v7 = vor.u32 %v6114_v4, %v4246_v2 }
   0x4   :  { %v4375_v8 = vor.u32 %v6146_v6, %v4374_v5  ;;  %v4502_v9 = vld [vmem:[%s9842_s1 + $0x3e0] sm:$0xf]  ;;  %v6178_v10 = vld [vmem:[%s9842_s1 + $0x3ec] sm:$0xf0]  ;;  %3160 = vmatpush.bf16.msra.mxu0 %v4119_v3 }
   0x5   :  { %v4102_v11 = vld [vmem:[%s9842_s1 + $0xc0] sm:$0xf]  ;;  %v4503_v12 = vor.u32 %v6178_v10, %v4502_v9  ;;  %v6078_v13 = vld [vmem:[%s9842_s1 + $0xcc] sm:$0xf0]  ;;  %3173 = vmatpush.bf16.msra.mxu1 %v4247_v7 }
   0x6   :  { %v4230_v14 = vld [vmem:[%s9842_s1 + $0x1c0] sm:$0xf]  ;;  %v6110_v15 = vld [vmem:[%s9842_s1 + $0x1cc] sm:$0xf0]  ;;  %3186 = vmatpush.bf16.msra.mxu2 %v4375_v8  ;;  %v4103_v16 = vor.u32 %v6078_v13, %v4102_v11 }
   0x7   :  { %v4231_v17 = vor.u32 %v6110_v15, %v4230_v14  ;;  %v4358_v18 = vld [vmem:[%s9842_s1 + $0x2c0] sm:$0xf]  ;;  %v6142_v19 = vld [vmem:[%s9842_s1 + $0x2cc] sm:$0xf0]  ;;  %3199 = vmatpush.bf16.msra.mxu3 %v4503_v12 }
   0x8   :  { %v4486_v20 = vld [vmem:[%s9842_s1 + $0x3c0] sm:$0xf]  ;;  %v4359_v21 = vor.u32 %v6142_v19, %v4358_v18  ;;  %v6174_v22 = vld [vmem:[%s9842_s1 + $0x3cc] sm:$0xf0]  ;;  %3161 = vmatpush.bf16.msra.mxu0 %v4103_v16 }
   0x9   :  { %v4086_v23 = vld [vmem:[%s9842_s1 + $0xa0] sm:$0xf]  ;;  %v6074_v24 = vld [vmem:[%s9842_s1 + $0xac] sm:$0xf0]  ;;  %v4487_v25 = vor.u32 %v6174_v22, %v4486_v20  ;;  %3174 = vmatpush.bf16.msra.mxu1 %v4231_v17 }
   0xa   :  { %v4214_v26 = vld [vmem:[%s9842_s1 + $0x1a0] sm:$0xf]  ;;  %v6106_v27 = vld [vmem:[%s9842_s1 + $0x1ac] sm:$0xf0]  ;;  %v4087_v29 = vor.u32 %v6074_v24, %v4086_v23  ;;  %3187 = vmatpush.bf16.msra.mxu2 %v4359_v21 }
   0xb   :  { %v4342_v28 = vld [vmem:[%s9842_s1 + $0x2a0] sm:$0xf]  ;;  %v6138_v30 = vld [vmem:[%s9842_s1 + $0x2ac] sm:$0xf0]  ;;  %v4215_v33 = vor.u32 %v6106_v27, %v4214_v26  ;;  %3200 = vmatpush.bf16.msra.mxu3 %v4487_v25 }
   0xc   :  { %v4470_v31 = vld [vmem:[%s9842_s1 + $0x3a0] sm:$0xf]  ;;  %v6170_v32 = vld [vmem:[%s9842_s1 + $0x3ac] sm:$0xf0]  ;;  %v4343_v34 = vor.u32 %v6138_v30, %v4342_v28  ;;  %3162 = vmatpush.bf16.msra.mxu0 %v4087_v29 }
   0xd   :  { %v4070_v35 = vld [vmem:[%s9842_s1 + $0x80] sm:$0xf]  ;;  %v6070_v36 = vld [vmem:[%s9842_s1 + $0x8c] sm:$0xf0]  ;;  %v4471_v38 = vor.u32 %v6170_v32, %v4470_v31  ;;  %3175 = vmatpush.bf16.msra.mxu1 %v4215_v33 }
   0xe   :  { %v4198_v37 = vld [vmem:[%s9842_s1 + $0x180] sm:$0xf]  ;;  %v6102_v39 = vld [vmem:[%s9842_s1 + $0x18c] sm:$0xf0]  ;;  %v4071_v44 = vor.u32 %v6070_v36, %v4070_v35  ;;  %3188 = vmatpush.bf16.msra.mxu2 %v4343_v34 }
   0xf   :  { %v4326_v40 = vld [vmem:[%s9842_s1 + $0x280] sm:$0xf]  ;;  %v6134_v41 = vld [vmem:[%s9842_s1 + $0x28c] sm:$0xf0]  ;;  %v4199_v45 = vor.u32 %v6102_v39, %v4198_v37  ;;  %3201 = vmatpush.bf16.msra.mxu3 %v4471_v38 }
  0x10   :  { %v4454_v42 = vld [vmem:[%s9842_s1 + $0x380] sm:$0xf]  ;;  %v6166_v43 = vld [vmem:[%s9842_s1 + $0x38c] sm:$0xf0]  ;;  %v4327_v46 = vor.u32 %v6134_v41, %v4326_v40  ;;  %3163 = vmatpush.bf16.msra.mxu0 %v4071_v44 }
  0x11   :  { %v4054_v47 = vld [vmem:[%s9842_s1 + $0x60] sm:$0xf]  ;;  %v6066_v48 = vld [vmem:[%s9842_s1 + $0x6c] sm:$0xf0]  ;;  %v4455_v50 = vor.u32 %v6166_v43, %v4454_v42  ;;  %3176 = vmatpush.bf16.msra.mxu1 %v4199_v45 }
  0x12   :  { %v4182_v49 = vld [vmem:[%s9842_s1 + $0x160] sm:$0xf]  ;;  %v6098_v51 = vld [vmem:[%s9842_s1 + $0x16c] sm:$0xf0]  ;;  %v4055_v56 = vor.u32 %v6066_v48, %v4054_v47  ;;  %3189 = vmatpush.bf16.msra.mxu2 %v4327_v46 }
  0x13   :  { %v4310_v52 = vld [vmem:[%s9842_s1 + $0x260] sm:$0xf]  ;;  %v6130_v53 = vld [vmem:[%s9842_s1 + $0x26c] sm:$0xf0]  ;;  %v4183_v57 = vor.u32 %v6098_v51, %v4182_v49  ;;  %3202 = vmatpush.bf16.msra.mxu3 %v4455_v50 }
  0x14   :  { %v4438_v54 = vld [vmem:[%s9842_s1 + $0x360] sm:$0xf]  ;;  %v6162_v55 = vld [vmem:[%s9842_s1 + $0x36c] sm:$0xf0]  ;;  %v4311_v58 = vor.u32 %v6130_v53, %v4310_v52  ;;  %3164 = vmatpush.bf16.msra.mxu0 %v4055_v56 }
  0x15   :  { %v4038_v59 = vld [vmem:[%s9842_s1 + $0x40] sm:$0xf]  ;;  %v6062_v60 = vld [vmem:[%s9842_s1 + $0x4c] sm:$0xf0]  ;;  %v4439_v62 = vor.u32 %v6162_v55, %v4438_v54  ;;  %3177 = vmatpush.bf16.msra.mxu1 %v4183_v57 }
  0x16   :  { %v4166_v61 = vld [vmem:[%s9842_s1 + $0x140] sm:$0xf]  ;;  %v6094_v63 = vld [vmem:[%s9842_s1 + $0x14c] sm:$0xf0]  ;;  %v4039_v4 = vor.u32 %v6062_v60, %v4038_v59  ;;  %3190 = vmatpush.bf16.msra.mxu2 %v4311_v58  ;;  %v15_v58 = vld [vmem:[%s9843_s0 + $0x8] sm:$0xff] }
  0x17   :  { %v4294_v0 = vld [vmem:[%s9842_s1 + $0x240] sm:$0xf]  ;;  %v6126_v1 = vld [vmem:[%s9842_s1 + $0x24c] sm:$0xf0]  ;;  %v4167_v5 = vor.u32 %v6094_v63, %v4166_v61  ;;  %3203 = vmatpush.bf16.msra.mxu3 %v4439_v62  ;;  %v554_v63 = vunpack.c.l.b16 %v15_v58 }
  0x18   :  { %v4422_v2 = vld [vmem:[%s9842_s1 + $0x340] sm:$0xf]  ;;  %v6158_v3 = vld [vmem:[%s9842_s1 + $0x34c] sm:$0xf0]  ;;  %v4295_v6 = vor.u32 %v6126_v1, %v4294_v0  ;;  %3165 = vmatpush.bf16.msra.mxu0 %v4039_v4  ;;  %v555_v0 = vunpack.c.h.b16 %v15_v58 }
  0x19   :  { %v4022_v7 = vld [vmem:[%s9842_s1 + $0x20] sm:$0xf]  ;;  %v6058_v8 = vld [vmem:[%s9842_s1 + $0x2c] sm:$0xf0]  ;;  %v4423_v10 = vor.u32 %v6158_v3, %v4422_v2  ;;  %3178 = vmatpush.bf16.msra.mxu1 %v4167_v5  ;;  %v6853_v4 = vpack.c.b16 %v554_v63, %v554_v63 }
  0x1a   :  { %v4150_v9 = vld [vmem:[%s9842_s1 + $0x120] sm:$0xf]  ;;  %v6090_v11 = vld [vmem:[%s9842_s1 + $0x12c] sm:$0xf0]  ;;  %v4023_v16 = vor.u32 %v6058_v8, %v4022_v7  ;;  %3191 = vmatpush.bf16.msra.mxu2 %v4295_v6  ;;  %v6858_v6 = vpack.c.b16 %v555_v0, %v555_v0 }
  0x1b   :  { %v4278_v12 = vld [vmem:[%s9842_s1 + $0x220] sm:$0xf]  ;;  %v6122_v13 = vld [vmem:[%s9842_s1 + $0x22c] sm:$0xf0]  ;;  %v4151_v19 = vor.u32 %v6090_v11, %v4150_v9  ;;  %3204 = vmatpush.bf16.msra.mxu3 %v4423_v10 }
  0x1c   :  { %v4406_v14 = vld [vmem:[%s9842_s1 + $0x320] sm:$0xf]  ;;  %v6154_v15 = vld [vmem:[%s9842_s1 + $0x32c] sm:$0xf0]  ;;  %v4279_v20 = vor.u32 %v6122_v13, %v4278_v12  ;;  %3166 = vmatpush.bf16.msra.mxu0 %v4023_v16 }
  0x1d   :  { %v4006_v17 = vld [vmem:[%s9842_s1] sm:$0xf]  ;;  %v6054_v18 = vld [vmem:[%s9842_s1 + $0xc] sm:$0xf0]  ;;  %v4407_v24 = vor.u32 %v6154_v15, %v4406_v14  ;;  %3179 = vmatpush.bf16.msra.mxu1 %v4151_v19 }
  0x1e   :  { %v4134_v21 = vld [vmem:[%s9842_s1 + $0x100] sm:$0xf]  ;;  %v6086_v22 = vld [vmem:[%s9842_s1 + $0x10c] sm:$0xf0]  ;;  %v4007_v31 = vor.u32 %v6054_v18, %v4006_v17  ;;  %3192 = vmatpush.bf16.msra.mxu2 %v4279_v20 }
  0x1f   :  { %v4262_v23 = vld [vmem:[%s9842_s1 + $0x200] sm:$0xf]  ;;  %v6118_v25 = vld [vmem:[%s9842_s1 + $0x20c] sm:$0xf0]  ;;  %v4135_v35 = vor.u32 %v6086_v22, %v4134_v21  ;;  %3205 = vmatpush.bf16.msra.mxu3 %v4407_v24 }
  0x20   :  { %v4390_v26 = vld [vmem:[%s9842_s1 + $0x300] sm:$0xf]  ;;  %v6150_v27 = vld [vmem:[%s9842_s1 + $0x30c] sm:$0xf0]  ;;  %v4263_v36 = vor.u32 %v6118_v25, %v4262_v23  ;;  %3167 = vmatpush.bf16.msra.mxu0 %v4007_v31 }
  0x21   :  { %v4630_v28 = vld [vmem:[%s9842_s1 + $0x4e0] sm:$0xf]  ;;  %v6210_v29 = vld [vmem:[%s9842_s1 + $0x4ec] sm:$0xf0]  ;;  %v4391_v39 = vor.u32 %v6150_v27, %v4390_v26  ;;  %3180 = vmatpush.bf16.msra.mxu1 %v4135_v35 }
  0x22   :  { %v4758_v30 = vld [vmem:[%s9842_s1 + $0x5e0] sm:$0xf]  ;;  %v6242_v32 = vld [vmem:[%s9842_s1 + $0x5ec] sm:$0xf0]  ;;  %v4631_v40 = vor.u32 %v6210_v29, %v4630_v28  ;;  %3193 = vmatpush.bf16.msra.mxu2 %v4263_v36 }
  0x23   :  { %v4886_v33 = vld [vmem:[%s9842_s1 + $0x6e0] sm:$0xf]  ;;  %v6274_v34 = vld [vmem:[%s9842_s1 + $0x6ec] sm:$0xf0]  ;;  %v4759_v41 = vor.u32 %v6242_v32, %v4758_v30  ;;  %3206 = vmatpush.bf16.msra.mxu3 %v4391_v39 }
  0x24   :  { %v5014_v37 = vld [vmem:[%s9842_s1 + $0x7e0] sm:$0xf]  ;;  %v6306_v38 = vld [vmem:[%s9842_s1 + $0x7ec] sm:$0xf0]  ;;  %v4887_v42 = vor.u32 %v6274_v34, %v4886_v33  ;;  %3212 = vmatpush.bf16.msrb.mxu0 %v4631_v40 }
  0x25   :  { %v4614_v43 = vld [vmem:[%s9842_s1 + $0x4c0] sm:$0xf]  ;;  %v6206_v44 = vld [vmem:[%s9842_s1 + $0x4cc] sm:$0xf0]  ;;  %v5015_v46 = vor.u32 %v6306_v38, %v5014_v37  ;;  %3225 = vmatpush.bf16.msrb.mxu1 %v4759_v41  ;;  %3194 = vmatmul.bf16.vlgmr.msra.gmra.mxu2 %v6853_v4 }
  0x26   :  { %v4742_v45 = vld [vmem:[%s9842_s1 + $0x5c0] sm:$0xf]  ;;  %v6238_v47 = vld [vmem:[%s9842_s1 + $0x5cc] sm:$0xf0]  ;;  %v4615_v52 = vor.u32 %v6206_v44, %v4614_v43  ;;  %3238 = vmatpush.bf16.msrb.mxu2 %v4887_v42  ;;  %3207 = vmatmul.bf16.vlgmr.msra.gmra.mxu3 %v6858_v6 }
  0x27   :  { %v4870_v48 = vld [vmem:[%s9842_s1 + $0x6c0] sm:$0xf]  ;;  %v6270_v49 = vld [vmem:[%s9842_s1 + $0x6cc] sm:$0xf0]  ;;  %v4743_v54 = vor.u32 %v6238_v47, %v4742_v45  ;;  %3251 = vmatpush.bf16.msrb.mxu3 %v5015_v46 }
  0x28   :  { %v4998_v50 = vld [vmem:[%s9842_s1 + $0x7c0] sm:$0xf]  ;;  %v6302_v51 = vld [vmem:[%s9842_s1 + $0x7cc] sm:$0xf0]  ;;  %v4871_v55 = vor.u32 %v6270_v49, %v4870_v48  ;;  %3213 = vmatpush.bf16.msrb.mxu0 %v4615_v52 }
  0x29   :  { %v4598_v53 = vld [vmem:[%s9842_s1 + $0x4a0] sm:$0xf]  ;;  %v6202_v56 = vld [vmem:[%s9842_s1 + $0x4ac] sm:$0xf0]  ;;  %v4999_v59 = vor.u32 %v6302_v51, %v4998_v50  ;;  %3226 = vmatpush.bf16.msrb.mxu1 %v4743_v54 }
  0x2a   :  { %v4726_v57 = vld [vmem:[%s9842_s1 + $0x5a0] sm:$0xf]  ;;  %v6234_v60 = vld [vmem:[%s9842_s1 + $0x5ac] sm:$0xf0]  ;;  %v4599_v3 = vor.u32 %v6202_v56, %v4598_v53  ;;  %3239 = vmatpush.bf16.msrb.mxu2 %v4871_v55 }
  0x2b   :  { %v4854_v61 = vld [vmem:[%s9842_s1 + $0x6a0] sm:$0xf]  ;;  %v6266_v62 = vld [vmem:[%s9842_s1 + $0x6ac] sm:$0xf0]  ;;  %v4727_v7 = vor.u32 %v6234_v60, %v4726_v57  ;;  %3252 = vmatpush.bf16.msrb.mxu3 %v4999_v59 }
  0x2c   :  { %v4982_v1 = vld [vmem:[%s9842_s1 + $0x7a0] sm:$0xf]  ;;  %v6298_v2 = vld [vmem:[%s9842_s1 + $0x7ac] sm:$0xf0]  ;;  %v4855_v8 = vor.u32 %v6266_v62, %v4854_v61  ;;  %3214 = vmatpush.bf16.msrb.mxu0 %v4599_v3  ;;  %v17_v3 = vld [vmem:[%s9843_s0 + $0x18] sm:$0xff] }
  0x2d   :  { %v14_v5 = vld [vmem:[%s9843_s0] sm:$0xff]  ;;  %v6198_v10 = vld [vmem:[%s9842_s1 + $0x48c] sm:$0xf0]  ;;  %v4983_v14 = vor.u32 %v6298_v2, %v4982_v1  ;;  %3227 = vmatpush.bf16.msrb.mxu1 %v4727_v7 }
  0x2e   :  { %v4582_v9 = vld [vmem:[%s9842_s1 + $0x480] sm:$0xf]  ;;  %v552_v12 = vunpack.c.l.b16 %v14_v5  ;;  %v553_v13 = vunpack.c.h.b16 %v14_v5  ;;  %v6230_v15 = vld [vmem:[%s9842_s1 + $0x58c] sm:$0xf0]  ;;  %3240 = vmatpush.bf16.msrb.mxu2 %v4855_v8 }
  0x2f   :  { %v4710_v11 = vld [vmem:[%s9842_s1 + $0x580] sm:$0xf]  ;;  %v6262_v17 = vld [vmem:[%s9842_s1 + $0x68c] sm:$0xf0]  ;;  %v4583_v22 = vor.u32 %v6198_v10, %v4582_v9  ;;  %3253 = vmatpush.bf16.msrb.mxu3 %v4983_v14 }
  0x30   :  { %v4838_v16 = vld [vmem:[%s9842_s1 + $0x680] sm:$0xf]  ;;  %v6294_v19 = vld [vmem:[%s9842_s1 + $0x78c] sm:$0xf0]  ;;  %v6885_v20 = vpack.c.b16 %v552_v12, %v552_v12  ;;  %v6888_v21 = vpack.c.b16 %v553_v13, %v553_v13  ;;  %v4711_v23 = vor.u32 %v6230_v15, %v4710_v11 }
  0x31   :  { %v4966_v18 = vld [vmem:[%s9842_s1 + $0x780] sm:$0xf]  ;;  %v4839_v24 = vor.u32 %v6262_v17, %v4838_v16  ;;  %v6194_v26 = vld [vmem:[%s9842_s1 + $0x46c] sm:$0xf0]  ;;  %3215 = vmatpush.bf16.msrb.mxu0 %v4583_v22  ;;  %v558_v17 = vunpack.c.l.b16 %v17_v3 }
  0x32   :  { %v4566_v25 = vld [vmem:[%s9842_s1 + $0x460] sm:$0xf]  ;;  %v4967_v28 = vor.u32 %v6294_v19, %v4966_v18  ;;  %v6226_v29 = vld [vmem:[%s9842_s1 + $0x56c] sm:$0xf0]  ;;  %3168 = vmatmul.bf16.vlgmr.msra.gmra.mxu0 %v6885_v20  ;;  %3181 = vmatmul.bf16.vlgmr.msra.gmra.mxu1 %v6888_v21 }
  0x33   :  { %v4694_v27 = vld [vmem:[%s9842_s1 + $0x560] sm:$0xf]  ;;  %v6258_v31 = vld [vmem:[%s9842_s1 + $0x66c] sm:$0xf0]  ;;  %v4567_v34 = vor.u32 %v6194_v26, %v4566_v25  ;;  %3228 = vmatpush.bf16.msrb.mxu1 %v4711_v23  ;;  %3241 = vmatpush.bf16.msrb.mxu2 %v4839_v24  ;;  %v559_v25 = vunpack.c.h.b16 %v17_v3 }
  0x34   :  { %v4822_v30 = vld [vmem:[%s9842_s1 + $0x660] sm:$0xf]  ;;  %v6290_v33 = vld [vmem:[%s9842_s1 + $0x76c] sm:$0xf0]  ;;  %v4695_v35 = vor.u32 %v6226_v29, %v4694_v27  ;;  %3254 = vmatpush.bf16.msrb.mxu3 %v4967_v28 }
  0x35   :  { %v4950_v32 = vld [vmem:[%s9842_s1 + $0x760] sm:$0xf]  ;;  %v4823_v36 = vor.u32 %v6258_v31, %v4822_v30  ;;  %v6190_v38 = vld [vmem:[%s9842_s1 + $0x44c] sm:$0xf0]  ;;  %3216 = vmatpush.bf16.msrb.mxu0 %v4567_v34 }
  0x36   :  { %v4550_v37 = vld [vmem:[%s9842_s1 + $0x440] sm:$0xf]  ;;  %v4951_v40 = vor.u32 %v6290_v33, %v4950_v32  ;;  %v6222_v41 = vld [vmem:[%s9842_s1 + $0x54c] sm:$0xf0] }
  0x37   :  { %v4678_v39 = vld [vmem:[%s9842_s1 + $0x540] sm:$0xf]  ;;  %v6254_v43 = vld [vmem:[%s9842_s1 + $0x64c] sm:$0xf0]  ;;  %v4551_v46 = vor.u32 %v6190_v38, %v4550_v37  ;;  %3229 = vmatpush.bf16.msrb.mxu1 %v4695_v35  ;;  %3242 = vmatpush.bf16.msrb.mxu2 %v4823_v36  ;;  %v7036_v38 = vpack.c.b16 %v558_v17, %v558_v17 }
  0x38   :  { %v4806_v42 = vld [vmem:[%s9842_s1 + $0x640] sm:$0xf]  ;;  %v6286_v45 = vld [vmem:[%s9842_s1 + $0x74c] sm:$0xf0]  ;;  %v4679_v47 = vor.u32 %v6222_v41, %v4678_v39  ;;  %3255 = vmatpush.bf16.msrb.mxu3 %v4951_v40 }
  0x39   :  { %v4934_v44 = vld [vmem:[%s9842_s1 + $0x740] sm:$0xf]  ;;  %v4807_v48 = vor.u32 %v6254_v43, %v4806_v42  ;;  %v6186_v50 = vld [vmem:[%s9842_s1 + $0x42c] sm:$0xf0]  ;;  %3217 = vmatpush.bf16.msrb.mxu0 %v4551_v46  ;;  %v7046_v42 = vpack.c.b16 %v559_v25, %v559_v25 }
  0x3a   :  { %v4534_v49 = vld [vmem:[%s9842_s1 + $0x420] sm:$0xf]  ;;  %v4935_v52 = vor.u32 %v6286_v45, %v4934_v44  ;;  %v6218_v53 = vld [vmem:[%s9842_s1 + $0x52c] sm:$0xf0] }
  0x3b   :  { %v4662_v51 = vld [vmem:[%s9842_s1 + $0x520] sm:$0xf]  ;;  %v6250_v55 = vld [vmem:[%s9842_s1 + $0x62c] sm:$0xf0]  ;;  %v4535_v59 = vor.u32 %v6186_v50, %v4534_v49  ;;  %3230 = vmatpush.bf16.msrb.mxu1 %v4679_v47  ;;  %3243 = vmatpush.bf16.msrb.mxu2 %v4807_v48 }
  0x3c   :  { %v4790_v54 = vld [vmem:[%s9842_s1 + $0x620] sm:$0xf]  ;;  %v6282_v57 = vld [vmem:[%s9842_s1 + $0x72c] sm:$0xf0]  ;;  %v4663_v63 = vor.u32 %v6218_v53, %v4662_v51  ;;  %3256 = vmatpush.bf16.msrb.mxu3 %v4935_v52 }
  0x3d   :  { %v4918_v56 = vld [vmem:[%s9842_s1 + $0x720] sm:$0xf]  ;;  %v6182_v60 = vld [vmem:[%s9842_s1 + $0x40c] sm:$0xf0]  ;;  %v4791_v0 = vor.u32 %v6250_v55, %v4790_v54  ;;  %3218 = vmatpush.bf16.msrb.mxu0 %v4535_v59 }
  0x3e   :  { %v4518_v58 = vld [vmem:[%s9842_s1 + $0x400] sm:$0xf]  ;;  %v6214_v62 = vld [vmem:[%s9842_s1 + $0x50c] sm:$0xf0]  ;;  %v4919_v5 = vor.u32 %v6282_v57, %v4918_v56 }
  0x3f   :  { %v4646_v61 = vld [vmem:[%s9842_s1 + $0x500] sm:$0xf]  ;;  %v6246_v2 = vld [vmem:[%s9842_s1 + $0x60c] sm:$0xf0]  ;;  %v4519_v13 = vor.u32 %v6182_v60, %v4518_v58  ;;  %3231 = vmatpush.bf16.msrb.mxu1 %v4663_v63  ;;  %3244 = vmatpush.bf16.msrb.mxu2 %v4791_v0 }
  0x40   :  { %v4774_v1 = vld [vmem:[%s9842_s1 + $0x600] sm:$0xf]  ;;  %v6278_v8 = vld [vmem:[%s9842_s1 + $0x70c] sm:$0xf0]  ;;  %v4647_v18 = vor.u32 %v6214_v62, %v4646_v61  ;;  %3257 = vmatpush.bf16.msrb.mxu3 %v4919_v5 }
  0x41   :  { %v4902_v7 = vld [vmem:[%s9842_s1 + $0x700] sm:$0xf]  ;;  %v16_v9 = vld [vmem:[%s9843_s0 + $0x10] sm:$0xff]  ;;  %v4775_v19 = vor.u32 %v6246_v2, %v4774_v1  ;;  %3219 = vmatpush.bf16.msrb.mxu0 %v4519_v13 }
  0x42   :  { %v5142_v10 = vld [vmem:[%s9842_s1 + $0x8e0] sm:$0xf]  ;;  %v6338_v11 = vld [vmem:[%s9842_s1 + $0x8ec] sm:$0xf0]  ;;  %v556_v24 = vunpack.c.l.b16 %v16_v9  ;;  %v4903_v26 = vor.u32 %v6278_v8, %v4902_v7  ;;  %v557_v28 = vunpack.c.h.b16 %v16_v9 }
  0x43   :  { %v5270_v12 = vld [vmem:[%s9842_s1 + $0x9e0] sm:$0xf]  ;;  %v6370_v14 = vld [vmem:[%s9842_s1 + $0x9ec] sm:$0xf0]  ;;  %v5143_v27 = vor.u32 %v6338_v11, %v5142_v10  ;;  %3232 = vmatpush.bf16.msrb.mxu1 %v4647_v18  ;;  %3245 = vmatpush.bf16.msrb.mxu2 %v4775_v19 }
  0x44   :  { %v5398_v15 = vld [vmem:[%s9842_s1 + $0xae0] sm:$0xf]  ;;  %v6402_v16 = vld [vmem:[%s9842_s1 + $0xaec] sm:$0xf0]  ;;  %v5271_v29 = vor.u32 %v6370_v14, %v5270_v12  ;;  %v7044_v41 = vpack.c.b16 %v556_v24, %v556_v24  ;;  %3258 = vmatpush.bf16.msrb.mxu3 %v4903_v26  ;;  %v7048_v44 = vpack.c.b16 %v557_v28, %v557_v28 }
  0x45   :  { %v5526_v22 = vld [vmem:[%s9842_s1 + $0xbe0] sm:$0xf]  ;;  %v6434_v23 = vld [vmem:[%s9842_s1 + $0xbec] sm:$0xf0]  ;;  %v5399_v30 = vor.u32 %v6402_v16, %v5398_v15  ;;  %3264 = vmatpush.bf16.msra.mxu0 %v5143_v27 }
  0x46   :  { %v5126_v31 = vld [vmem:[%s9842_s1 + $0x8c0] sm:$0xf]  ;;  %v6334_v32 = vld [vmem:[%s9842_s1 + $0x8cc] sm:$0xf0]  ;;  %v5527_v34 = vor.u32 %v6434_v23, %v5526_v22  ;;  %3246 = vmatmul.bf16.vlgmr.msrb.gmra.mxu2 %v7036_v38  ;;  %3220 = vmatmul.bf16.vlgmr.msrb.gmra.mxu0 %v7044_v41 }
  0x47   :  { %v5254_v33 = vld [vmem:[%s9842_s1 + $0x9c0] sm:$0xf]  ;;  %v6366_v35 = vld [vmem:[%s9842_s1 + $0x9cc] sm:$0xf0]  ;;  %v5127_v43 = vor.u32 %v6334_v32, %v5126_v31  ;;  %3277 = vmatpush.bf16.msra.mxu1 %v5271_v29  ;;  %3290 = vmatpush.bf16.msra.mxu2 %v5399_v30 }
  0x48   :  { %v5382_v36 = vld [vmem:[%s9842_s1 + $0xac0] sm:$0xf]  ;;  %v6398_v37 = vld [vmem:[%s9842_s1 + $0xacc] sm:$0xf0]  ;;  %v5255_v45 = vor.u32 %v6366_v35, %v5254_v33  ;;  %3303 = vmatpush.bf16.msra.mxu3 %v5527_v34  ;;  %3233 = vmatmul.bf16.vlgmr.msrb.gmra.mxu1 %v7048_v44 }
  0x49   :  { %v5510_v39 = vld [vmem:[%s9842_s1 + $0xbc0] sm:$0xf]  ;;  %v6430_v40 = vld [vmem:[%s9842_s1 + $0xbcc] sm:$0xf0]  ;;  %v5383_v46 = vor.u32 %v6398_v37, %v5382_v36  ;;  %3259 = vmatmul.bf16.vlgmr.msrb.gmra.mxu3 %v7046_v42  ;;  %3265 = vmatpush.bf16.msra.mxu0 %v5127_v43 }
  0x4a   :  { %v5110_v47 = vld [vmem:[%s9842_s1 + $0x8a0] sm:$0xf]  ;;  %v6330_v48 = vld [vmem:[%s9842_s1 + $0x8ac] sm:$0xf0]  ;;  %v5511_v50 = vor.u32 %v6430_v40, %v5510_v39 }
  0x4b   :  { %v5238_v49 = vld [vmem:[%s9842_s1 + $0x9a0] sm:$0xf]  ;;  %v6362_v51 = vld [vmem:[%s9842_s1 + $0x9ac] sm:$0xf0]  ;;  %v5111_v56 = vor.u32 %v6330_v48, %v5110_v47  ;;  %3278 = vmatpush.bf16.msra.mxu1 %v5255_v45  ;;  %3291 = vmatpush.bf16.msra.mxu2 %v5383_v46 }
  0x4c   :  { %v5366_v52 = vld [vmem:[%s9842_s1 + $0xaa0] sm:$0xf]  ;;  %v6394_v53 = vld [vmem:[%s9842_s1 + $0xaac] sm:$0xf0]  ;;  %v5239_v57 = vor.u32 %v6362_v51, %v5238_v49  ;;  %3304 = vmatpush.bf16.msra.mxu3 %v5511_v50 }
  0x4d   :  { %v5494_v54 = vld [vmem:[%s9842_s1 + $0xba0] sm:$0xf]  ;;  %v6426_v55 = vld [vmem:[%s9842_s1 + $0xbac] sm:$0xf0]  ;;  %v5367_v58 = vor.u32 %v6394_v53, %v5366_v52  ;;  %3266 = vmatpush.bf16.msra.mxu0 %v5111_v56 }
  0x4e   :  { %v5094_v59 = vld [vmem:[%s9842_s1 + $0x880] sm:$0xf]  ;;  %v6326_v60 = vld [vmem:[%s9842_s1 + $0x88c] sm:$0xf0]  ;;  %v5495_v62 = vor.u32 %v6426_v55, %v5494_v54 }
  0x4f   :  { %v5222_v61 = vld [vmem:[%s9842_s1 + $0x980] sm:$0xf]  ;;  %v6358_v63 = vld [vmem:[%s9842_s1 + $0x98c] sm:$0xf0]  ;;  %v5095_v5 = vor.u32 %v6326_v60, %v5094_v59  ;;  %3279 = vmatpush.bf16.msra.mxu1 %v5239_v57  ;;  %3292 = vmatpush.bf16.msra.mxu2 %v5367_v58 }
  0x50   :  { %v5350_v0 = vld [vmem:[%s9842_s1 + $0xa80] sm:$0xf]  ;;  %v6390_v1 = vld [vmem:[%s9842_s1 + $0xa8c] sm:$0xf0]  ;;  %v5223_v7 = vor.u32 %v6358_v63, %v5222_v61  ;;  %3305 = vmatpush.bf16.msra.mxu3 %v5495_v62  ;;  %v19_v61 = vld [vmem:[%s9843_s0 + $0x28] sm:$0xff] }
  0x51   :  { %v5478_v2 = vld [vmem:[%s9842_s1 + $0xb80] sm:$0xf]  ;;  %v6422_v3 = vld [vmem:[%s9842_s1 + $0xb8c] sm:$0xf0]  ;;  %v5351_v8 = vor.u32 %v6390_v1, %v5350_v0  ;;  %3267 = vmatpush.bf16.msra.mxu0 %v5095_v5 }
  0x52   :  { %v5078_v9 = vld [vmem:[%s9842_s1 + $0x860] sm:$0xf]  ;;  %v6322_v10 = vld [vmem:[%s9842_s1 + $0x86c] sm:$0xf0]  ;;  %v5479_v12 = vor.u32 %v6422_v3, %v5478_v2 }
  0x53   :  { %v5206_v11 = vld [vmem:[%s9842_s1 + $0x960] sm:$0xf]  ;;  %v6354_v13 = vld [vmem:[%s9842_s1 + $0x96c] sm:$0xf0]  ;;  %v5079_v18 = vor.u32 %v6322_v10, %v5078_v9  ;;  %3280 = vmatpush.bf16.msra.mxu1 %v5223_v7  ;;  %3293 = vmatpush.bf16.msra.mxu2 %v5351_v8 }
  0x54   :  { %v5334_v14 = vld [vmem:[%s9842_s1 + $0xa60] sm:$0xf]  ;;  %v6386_v15 = vld [vmem:[%s9842_s1 + $0xa6c] sm:$0xf0]  ;;  %v5207_v19 = vor.u32 %v6354_v13, %v5206_v11  ;;  %3306 = vmatpush.bf16.msra.mxu3 %v5479_v12  ;;  %v562_v12 = vunpack.c.l.b16 %v19_v61 }
  0x55   :  { %v5462_v16 = vld [vmem:[%s9842_s1 + $0xb60] sm:$0xf]  ;;  %v6418_v17 = vld [vmem:[%s9842_s1 + $0xb6c] sm:$0xf0]  ;;  %v5335_v22 = vor.u32 %v6386_v15, %v5334_v14  ;;  %3268 = vmatpush.bf16.msra.mxu0 %v5079_v18 }
  0x56   :  { %v5062_v23 = vld [vmem:[%s9842_s1 + $0x840] sm:$0xf]  ;;  %v6318_v24 = vld [vmem:[%s9842_s1 + $0x84c] sm:$0xf0]  ;;  %v5463_v26 = vor.u32 %v6418_v17, %v5462_v16  ;;  %v563_v16 = vunpack.c.h.b16 %v19_v61 }
  0x57   :  { %v5190_v25 = vld [vmem:[%s9842_s1 + $0x940] sm:$0xf]  ;;  %v6350_v27 = vld [vmem:[%s9842_s1 + $0x94c] sm:$0xf0]  ;;  %v5063_v32 = vor.u32 %v6318_v24, %v5062_v23  ;;  %3281 = vmatpush.bf16.msra.mxu1 %v5207_v19  ;;  %3294 = vmatpush.bf16.msra.mxu2 %v5335_v22 }
  0x58   :  { %v5318_v28 = vld [vmem:[%s9842_s1 + $0xa40] sm:$0xf]  ;;  %v6382_v29 = vld [vmem:[%s9842_s1 + $0xa4c] sm:$0xf0]  ;;  %v5191_v33 = vor.u32 %v6350_v27, %v5190_v25  ;;  %3307 = vmatpush.bf16.msra.mxu3 %v5463_v26 }
  0x59   :  { %v5446_v30 = vld [vmem:[%s9842_s1 + $0xb40] sm:$0xf]  ;;  %v6414_v31 = vld [vmem:[%s9842_s1 + $0xb4c] sm:$0xf0]  ;;  %v5319_v34 = vor.u32 %v6382_v29, %v5318_v28  ;;  %3269 = vmatpush.bf16.msra.mxu0 %v5063_v32  ;;  %v7248_v29 = vpack.c.b16 %v562_v12, %v562_v12 }
  0x5a   :  { %v5046_v35 = vld [vmem:[%s9842_s1 + $0x820] sm:$0xf]  ;;  %v6314_v36 = vld [vmem:[%s9842_s1 + $0x82c] sm:$0xf0]  ;;  %v5447_v39 = vor.u32 %v6414_v31, %v5446_v30 }
  0x5b   :  { %v5174_v37 = vld [vmem:[%s9842_s1 + $0x920] sm:$0xf]  ;;  %v6346_v40 = vld [vmem:[%s9842_s1 + $0x92c] sm:$0xf0]  ;;  %v5047_v49 = vor.u32 %v6314_v36, %v5046_v35  ;;  %3282 = vmatpush.bf16.msra.mxu1 %v5191_v33  ;;  %3295 = vmatpush.bf16.msra.mxu2 %v5319_v34  ;;  %v7258_v33 = vpack.c.b16 %v563_v16, %v563_v16 }
  0x5c   :  { %v5302_v43 = vld [vmem:[%s9842_s1 + $0xa20] sm:$0xf]  ;;  %v6378_v45 = vld [vmem:[%s9842_s1 + $0xa2c] sm:$0xf0]  ;;  %v5175_v53 = vor.u32 %v6346_v40, %v5174_v37  ;;  %3308 = vmatpush.bf16.msra.mxu3 %v5447_v39 }
  0x5d   :  { %v5430_v46 = vld [vmem:[%s9842_s1 + $0xb20] sm:$0xf]  ;;  %v6410_v47 = vld [vmem:[%s9842_s1 + $0xb2c] sm:$0xf0]  ;;  %v5303_v54 = vor.u32 %v6378_v45, %v5302_v43  ;;  %3270 = vmatpush.bf16.msra.mxu0 %v5047_v49 }
  0x5e   :  { %v5030_v48 = vld [vmem:[%s9842_s1 + $0x800] sm:$0xf]  ;;  %v6310_v50 = vld [vmem:[%s9842_s1 + $0x80c] sm:$0xf0]  ;;  %v5431_v58 = vor.u32 %v6410_v47, %v5430_v46 }
  0x5f   :  { %v5158_v51 = vld [vmem:[%s9842_s1 + $0x900] sm:$0xf]  ;;  %v6342_v52 = vld [vmem:[%s9842_s1 + $0x90c] sm:$0xf0]  ;;  %v5031_v1 = vor.u32 %v6310_v50, %v5030_v48  ;;  %3283 = vmatpush.bf16.msra.mxu1 %v5175_v53  ;;  %3296 = vmatpush.bf16.msra.mxu2 %v5303_v54 }
  0x60   :  { %v5286_v55 = vld [vmem:[%s9842_s1 + $0xa00] sm:$0xf]  ;;  %v6374_v56 = vld [vmem:[%s9842_s1 + $0xa0c] sm:$0xf0]  ;;  %v5159_v8 = vor.u32 %v6342_v52, %v5158_v51  ;;  %3309 = vmatpush.bf16.msra.mxu3 %v5431_v58 }
  0x61   :  { %v18_v57 = vld [vmem:[%s9843_s0 + $0x20] sm:$0xff]  ;;  %v6406_v60 = vld [vmem:[%s9842_s1 + $0xb0c] sm:$0xf0]  ;;  %v5287_v9 = vor.u32 %v6374_v56, %v5286_v55  ;;  %3271 = vmatpush.bf16.msra.mxu0 %v5031_v1 }
  0x62   :  { %v5414_v59 = vld [vmem:[%s9842_s1 + $0xb00] sm:$0xf]  ;;  %v6466_v63 = vld [vmem:[%s9842_s1 + $0xcec] sm:$0xf0]  ;;  %v560_v7 = vunpack.c.l.b16 %v18_v57  ;;  %v561_v13 = vunpack.c.h.b16 %v18_v57 }
  0x63   :  { %v5654_v62 = vld [vmem:[%s9842_s1 + $0xce0] sm:$0xf]  ;;  %v6498_v2 = vld [vmem:[%s9842_s1 + $0xdec] sm:$0xf0]  ;;  %v5415_v14 = vor.u32 %v6406_v60, %v5414_v59  ;;  %3284 = vmatpush.bf16.msra.mxu1 %v5159_v8  ;;  %3297 = vmatpush.bf16.msra.mxu2 %v5287_v9 }
  0x64   :  { %v5782_v0 = vld [vmem:[%s9842_s1 + $0xde0] sm:$0xf]  ;;  %v6530_v5 = vld [vmem:[%s9842_s1 + $0xeec] sm:$0xf0]  ;;  %v5655_v15 = vor.u32 %v6466_v63, %v5654_v62  ;;  %v7237_v25 = vpack.c.b16 %v560_v7, %v560_v7  ;;  %v7250_v30 = vpack.c.b16 %v561_v13, %v561_v13 }
  0x65   :  { %v5910_v3 = vld [vmem:[%s9842_s1 + $0xee0] sm:$0xf]  ;;  %v6562_v11 = vld [vmem:[%s9842_s1 + $0xfec] sm:$0xf0]  ;;  %v5783_v17 = vor.u32 %v6498_v2, %v5782_v0  ;;  %3310 = vmatpush.bf16.msra.mxu3 %v5415_v14 }
  0x66   :  { %v6038_v10 = vld [vmem:[%s9842_s1 + $0xfe0] sm:$0xf]  ;;  %v5911_v18 = vor.u32 %v6530_v5, %v5910_v3  ;;  %v6462_v22 = vld [vmem:[%s9842_s1 + $0xccc] sm:$0xf0]  ;;  %3316 = vmatpush.bf16.msrb.mxu0 %v5655_v15  ;;  %3298 = vmatmul.bf16.vlgmr.msra.gmra.mxu2 %v7248_v29 }
  0x67   :  { %v5638_v19 = vld [vmem:[%s9842_s1 + $0xcc0] sm:$0xf]  ;;  %v6039_v24 = vor.u32 %v6562_v11, %v6038_v10  ;;  %v6494_v26 = vld [vmem:[%s9842_s1 + $0xdcc] sm:$0xf0]  ;;  %3329 = vmatpush.bf16.msrb.mxu1 %v5783_v17  ;;  %3272 = vmatmul.bf16.vlgmr.msra.gmra.mxu0 %v7237_v25 }
  0x68   :  { %v5766_v23 = vld [vmem:[%s9842_s1 + $0xdc0] sm:$0xf]  ;;  %v6526_v28 = vld [vmem:[%s9842_s1 + $0xecc] sm:$0xf0]  ;;  %v5639_v34 = vor.u32 %v6462_v22, %v5638_v19  ;;  %3342 = vmatpush.bf16.msrb.mxu2 %v5911_v18  ;;  %3285 = vmatmul.bf16.vlgmr.msra.gmra.mxu1 %v7250_v30 }
  0x69   :  { %v5894_v27 = vld [vmem:[%s9842_s1 + $0xec0] sm:$0xf]  ;;  %v6558_v32 = vld [vmem:[%s9842_s1 + $0xfcc] sm:$0xf0]  ;;  %v5767_v35 = vor.u32 %v6494_v26, %v5766_v23  ;;  %3355 = vmatpush.bf16.msrb.mxu3 %v6039_v24 }
  0x6a   :  { %v6022_v31 = vld [vmem:[%s9842_s1 + $0xfc0] sm:$0xf]  ;;  %v5895_v36 = vor.u32 %v6526_v28, %v5894_v27  ;;  %v6458_v39 = vld [vmem:[%s9842_s1 + $0xcac] sm:$0xf0]  ;;  %3311 = vmatmul.bf16.vlgmr.msra.gmra.mxu3 %v7258_v33  ;;  %3317 = vmatpush.bf16.msrb.mxu0 %v5639_v34 }
  0x6b   :  { %v5622_v37 = vld [vmem:[%s9842_s1 + $0xca0] sm:$0xf]  ;;  %v6023_v43 = vor.u32 %v6558_v32, %v6022_v31  ;;  %v6490_v45 = vld [vmem:[%s9842_s1 + $0xdac] sm:$0xf0]  ;;  %3330 = vmatpush.bf16.msrb.mxu1 %v5767_v35 }
  0x6c   :  { %v5750_v40 = vld [vmem:[%s9842_s1 + $0xda0] sm:$0xf]  ;;  %v6522_v47 = vld [vmem:[%s9842_s1 + $0xeac] sm:$0xf0]  ;;  %v5623_v50 = vor.u32 %v6458_v39, %v5622_v37  ;;  %3343 = vmatpush.bf16.msrb.mxu2 %v5895_v36 }
  0x6d   :  { %v5878_v46 = vld [vmem:[%s9842_s1 + $0xea0] sm:$0xf]  ;;  %v6554_v49 = vld [vmem:[%s9842_s1 + $0xfac] sm:$0xf0]  ;;  %v5751_v51 = vor.u32 %v6490_v45, %v5750_v40  ;;  %3356 = vmatpush.bf16.msrb.mxu3 %v6023_v43 }
  0x6e   :  { %v6006_v48 = vld [vmem:[%s9842_s1 + $0xfa0] sm:$0xf]  ;;  %v5879_v52 = vor.u32 %v6522_v47, %v5878_v46  ;;  %v6454_v54 = vld [vmem:[%s9842_s1 + $0xc8c] sm:$0xf0]  ;;  %3318 = vmatpush.bf16.msrb.mxu0 %v5623_v50 }
  0x6f   :  { %v5606_v53 = vld [vmem:[%s9842_s1 + $0xc80] sm:$0xf]  ;;  %v6007_v56 = vor.u32 %v6554_v49, %v6006_v48  ;;  %v6486_v57 = vld [vmem:[%s9842_s1 + $0xd8c] sm:$0xf0]  ;;  %3331 = vmatpush.bf16.msrb.mxu1 %v5751_v51 }
  0x70   :  { %v5734_v55 = vld [vmem:[%s9842_s1 + $0xd80] sm:$0xf]  ;;  %v6518_v59 = vld [vmem:[%s9842_s1 + $0xe8c] sm:$0xf0]  ;;  %v5607_v62 = vor.u32 %v6454_v54, %v5606_v53  ;;  %3344 = vmatpush.bf16.msrb.mxu2 %v5879_v52 }
  0x71   :  { %v5862_v58 = vld [vmem:[%s9842_s1 + $0xe80] sm:$0xf]  ;;  %v6550_v61 = vld [vmem:[%s9842_s1 + $0xf8c] sm:$0xf0]  ;;  %v5735_v63 = vor.u32 %v6486_v57, %v5734_v55  ;;  %3357 = vmatpush.bf16.msrb.mxu3 %v6007_v56 }
  0x72   :  { %v5990_v60 = vld [vmem:[%s9842_s1 + $0xf80] sm:$0xf]  ;;  %v5863_v0 = vor.u32 %v6518_v59, %v5862_v58  ;;  %v6450_v2 = vld [vmem:[%s9842_s1 + $0xc6c] sm:$0xf0]  ;;  %3319 = vmatpush.bf16.msrb.mxu0 %v5607_v62  ;;  %v21_v59 = vld [vmem:[%s9843_s0 + $0x38] sm:$0xff] }
  0x73   :  { %v5590_v1 = vld [vmem:[%s9842_s1 + $0xc60] sm:$0xf]  ;;  %v5991_v5 = vor.u32 %v6550_v61, %v5990_v60  ;;  %v6482_v7 = vld [vmem:[%s9842_s1 + $0xd6c] sm:$0xf0]  ;;  %3332 = vmatpush.bf16.msrb.mxu1 %v5735_v63  ;;  %v6080_v60 = vld [vmem:[%s9842_s1 + $0xe4] sm:$0xf] }
  0x74   :  { %v5718_v3 = vld [vmem:[%s9842_s1 + $0xd60] sm:$0xf]  ;;  %v6514_v9 = vld [vmem:[%s9842_s1 + $0xe6c] sm:$0xf0]  ;;  %v5591_v12 = vor.u32 %v6450_v2, %v5590_v1  ;;  %3345 = vmatpush.bf16.msrb.mxu2 %v5863_v0  ;;  %v4120_v61 = vld [vmem:[%s9842_s1 + $0xf0] sm:$0xf0] }
  0x75   :  { %v5846_v8 = vld [vmem:[%s9842_s1 + $0xe60] sm:$0xf]  ;;  %v6546_v11 = vld [vmem:[%s9842_s1 + $0xf6c] sm:$0xf0]  ;;  %v5719_v13 = vor.u32 %v6482_v7, %v5718_v3  ;;  %3358 = vmatpush.bf16.msrb.mxu3 %v5991_v5  ;;  %v6112_v62 = vld [vmem:[%s9842_s1 + $0x1e4] sm:$0xf] }
  0x76   :  { %v5974_v10 = vld [vmem:[%s9842_s1 + $0xf60] sm:$0xf]  ;;  %v5847_v14 = vor.u32 %v6514_v9, %v5846_v8  ;;  %v6446_v16 = vld [vmem:[%s9842_s1 + $0xc4c] sm:$0xf0]  ;;  %3320 = vmatpush.bf16.msrb.mxu0 %v5591_v12  ;;  %v4248_v0 = vld [vmem:[%s9842_s1 + $0x1f0] sm:$0xf0] }
  0x77   :  { %v5574_v15 = vld [vmem:[%s9842_s1 + $0xc40] sm:$0xf]  ;;  %v5975_v18 = vor.u32 %v6546_v11, %v5974_v10  ;;  %v6478_v19 = vld [vmem:[%s9842_s1 + $0xd4c] sm:$0xf0]  ;;  %3333 = vmatpush.bf16.msrb.mxu1 %v5719_v13  ;;  %v6144_v1 = vld [vmem:[%s9842_s1 + $0x2e4] sm:$0xf]  ;;  %v566_v10 = vunpack.c.l.b16 %v21_v59  ;;  %v4123_v13 = vor.u32 %v6080_v60, %v4120_v61 }
  0x78   :  { %v5702_v17 = vld [vmem:[%s9842_s1 + $0xd40] sm:$0xf]  ;;  %v6510_v23 = vld [vmem:[%s9842_s1 + $0xe4c] sm:$0xf0]  ;;  %v5575_v27 = vor.u32 %v6446_v16, %v5574_v15  ;;  %3346 = vmatpush.bf16.msrb.mxu2 %v5847_v14  ;;  %v4376_v2 = vld [vmem:[%s9842_s1 + $0x2f0] sm:$0xf0]  ;;  %v567_v14 = vunpack.c.h.b16 %v21_v59  ;;  %v4251_v15 = vor.u32 %v6112_v62, %v4248_v0 }
  0x79   :  { %v5830_v22 = vld [vmem:[%s9842_s1 + $0xe40] sm:$0xf]  ;;  %v6542_v26 = vld [vmem:[%s9842_s1 + $0xf4c] sm:$0xf0]  ;;  %v5703_v28 = vor.u32 %v6478_v19, %v5702_v17  ;;  %3359 = vmatpush.bf16.msrb.mxu3 %v5975_v18  ;;  %v6176_v8 = vld [vmem:[%s9842_s1 + $0x3e4] sm:$0xf]  ;;  %v4379_v16 = vor.u32 %v6144_v1, %v4376_v2 }
  0x7a   :  { %v5958_v24 = vld [vmem:[%s9842_s1 + $0xf40] sm:$0xf]  ;;  %v5831_v31 = vor.u32 %v6510_v23, %v5830_v22  ;;  %v6442_v34 = vld [vmem:[%s9842_s1 + $0xc2c] sm:$0xf0]  ;;  %3321 = vmatpush.bf16.msrb.mxu0 %v5575_v27  ;;  %v4504_v9 = vld [vmem:[%s9842_s1 + $0x3f0] sm:$0xf0] }
  0x7b   :  { %v5558_v32 = vld [vmem:[%s9842_s1 + $0xc20] sm:$0xf]  ;;  %v5959_v36 = vor.u32 %v6542_v26, %v5958_v24  ;;  %v6474_v37 = vld [vmem:[%s9842_s1 + $0xd2c] sm:$0xf0]  ;;  %3334 = vmatpush.bf16.msrb.mxu1 %v5703_v28  ;;  %v6076_v17 = vld [vmem:[%s9842_s1 + $0xc4] sm:$0xf]  ;;  %v4507_v22 = vor.u32 %v6176_v8, %v4504_v9  ;;  %v7458_v28 = vpack.c.b16 %v566_v10, %v566_v10 }
  0x7c   :  { %v5686_v35 = vld [vmem:[%s9842_s1 + $0xd20] sm:$0xf]  ;;  %v6506_v40 = vld [vmem:[%s9842_s1 + $0xe2c] sm:$0xf0]  ;;  %v5559_v47 = vor.u32 %v6442_v34, %v5558_v32  ;;  %3347 = vmatpush.bf16.msrb.mxu2 %v5831_v31  ;;  %v4104_v18 = vld [vmem:[%s9842_s1 + $0xd0] sm:$0xf0] }
  0x7d   :  { %v5814_v39 = vld [vmem:[%s9842_s1 + $0xe20] sm:$0xf]  ;;  %v6538_v45 = vld [vmem:[%s9842_s1 + $0xf2c] sm:$0xf0]  ;;  %v5687_v51 = vor.u32 %v6474_v37, %v5686_v35  ;;  %3360 = vmatpush.bf16.msrb.mxu3 %v5959_v36  ;;  %v6108_v19 = vld [vmem:[%s9842_s1 + $0x1c4] sm:$0xf]  ;;  %v7468_v35 = vpack.c.b16 %v567_v14, %v567_v14  ;;  %v4107_v36 = vor.u32 %v6076_v17, %v4104_v18 }
  0x7e   :  { %v5942_v43 = vld [vmem:[%s9842_s1 + $0xf20] sm:$0xf]  ;;  %v6438_v48 = vld [vmem:[%s9842_s1 + $0xc0c] sm:$0xf0]  ;;  %v5815_v52 = vor.u32 %v6506_v40, %v5814_v39  ;;  %3322 = vmatpush.bf16.msrb.mxu0 %v5559_v47  ;;  %v4232_v24 = vld [vmem:[%s9842_s1 + $0x1d0] sm:$0xf0] }
  0x7f   :  { %v5542_v46 = vld [vmem:[%s9842_s1 + $0xc00] sm:$0xf]  ;;  %v6470_v50 = vld [vmem:[%s9842_s1 + $0xd0c] sm:$0xf0]  ;;  %v5943_v56 = vor.u32 %v6538_v45, %v5942_v43  ;;  %3335 = vmatpush.bf16.msrb.mxu1 %v5687_v51  ;;  %v6140_v26 = vld [vmem:[%s9842_s1 + $0x2c4] sm:$0xf]  ;;  %v4235_v37 = vor.u32 %v6108_v19, %v4232_v24 }
  0x80   :  { %v5670_v49 = vld [vmem:[%s9842_s1 + $0xd00] sm:$0xf]  ;;  %v6502_v54 = vld [vmem:[%s9842_s1 + $0xe0c] sm:$0xf0]  ;;  %v5543_v63 = vor.u32 %v6438_v48, %v5542_v46  ;;  %3348 = vmatpush.bf16.msrb.mxu2 %v5815_v52  ;;  %v4360_v27 = vld [vmem:[%s9842_s1 + $0x2d0] sm:$0xf0] }
  0x81   :  { %v5798_v53 = vld [vmem:[%s9842_s1 + $0xe00] sm:$0xf]  ;;  %v20_v55 = vld [vmem:[%s9843_s0 + $0x30] sm:$0xff]  ;;  %v5671_v5 = vor.u32 %v6470_v50, %v5670_v49  ;;  %3361 = vmatpush.bf16.msrb.mxu3 %v5943_v56  ;;  %v6172_v32 = vld [vmem:[%s9842_s1 + $0x3c4] sm:$0xf]  ;;  %v4363_v39 = vor.u32 %v6140_v26, %v4360_v27 }
  0x82   :  { %v5926_v57 = vld [vmem:[%s9842_s1 + $0xf00] sm:$0xf]  ;;  %v6534_v58 = vld [vmem:[%s9842_s1 + $0xf0c] sm:$0xf0]  ;;  %v564_v3 = vunpack.c.l.b16 %v20_v55  ;;  %v5799_v7 = vor.u32 %v6502_v54, %v5798_v53  ;;  %v565_v11 = vunpack.c.h.b16 %v20_v55  ;;  %3323 = vmatpush.bf16.msrb.mxu0 %v5543_v63  ;;  %v4488_v34 = vld [vmem:[%s9842_s1 + $0x3d0] sm:$0xf0] }
  0x83   :  { %v5927_v12 = vor.u32 %v6534_v58, %v5926_v57  ;;  %3336 = vmatpush.bf16.msrb.mxu1 %v5671_v5  ;;  %v6072_v40 = vld [vmem:[%s9842_s1 + $0xa4] sm:$0xf]  ;;  %v4088_v43 = vld [vmem:[%s9842_s1 + $0xb0] sm:$0xf0]  ;;  %v4491_v46 = vor.u32 %v6172_v32, %v4488_v34 }
  0x84   :  { %v7447_v23 = vpack.c.b16 %v564_v3, %v564_v3  ;;  %3349 = vmatpush.bf16.msrb.mxu2 %v5799_v7  ;;  %v7460_v31 = vpack.c.b16 %v565_v11, %v565_v11  ;;  %v6104_v45 = vld [vmem:[%s9842_s1 + $0x1a4] sm:$0xf]  ;;  %v4216_v47 = vld [vmem:[%s9842_s1 + $0x1b0] sm:$0xf0]  ;;  %v4091_v52 = vor.u32 %v6072_v40, %v4088_v43 }
  0x85   :  { %3362 = vmatpush.bf16.msrb.mxu3 %v5927_v12  ;;  %v6136_v48 = vld [vmem:[%s9842_s1 + $0x2a4] sm:$0xf]  ;;  %v4344_v49 = vld [vmem:[%s9842_s1 + $0x2b0] sm:$0xf0]  ;;  %v4219_v53 = vor.u32 %v6104_v45, %v4216_v47 }
  0x86   :  { %3368 = vmatpush.bf16.msra.mxu0 %v4123_v13  ;;  %3337 = vmatmul.bf16.vlgmr.msrb.gmra.mxu1 %v7460_v31  ;;  %v6168_v50 = vld [vmem:[%s9842_s1 + $0x3a4] sm:$0xf]  ;;  %v4472_v51 = vld [vmem:[%s9842_s1 + $0x3b0] sm:$0xf0]  ;;  %v4347_v54 = vor.u32 %v6136_v48, %v4344_v49 }
  0x87   :  { %3381 = vmatpush.bf16.msra.mxu1 %v4251_v15  ;;  %3324 = vmatmul.bf16.vlgmr.msrb.gmra.mxu0 %v7447_v23  ;;  %v6068_v55 = vld [vmem:[%s9842_s1 + $0x84] sm:$0xf]  ;;  %v4072_v56 = vld [vmem:[%s9842_s1 + $0x90] sm:$0xf0]  ;;  %v4475_v58 = vor.u32 %v6168_v50, %v4472_v51 }
  0x88   :  { %3394 = vmatpush.bf16.msra.mxu2 %v4379_v16  ;;  %3363 = vmatmul.bf16.vlgmr.msrb.gmra.mxu3 %v7468_v35  ;;  %v6100_v57 = vld [vmem:[%s9842_s1 + $0x184] sm:$0xf]  ;;  %v4200_v59 = vld [vmem:[%s9842_s1 + $0x190] sm:$0xf0]  ;;  %v4075_v0 = vor.u32 %v6068_v55, %v4072_v56 }
  0x89   :  { %3407 = vmatpush.bf16.msra.mxu3 %v4507_v22  ;;  %3350 = vmatmul.bf16.vlgmr.msrb.gmra.mxu2 %v7458_v28  ;;  %v6132_v60 = vld [vmem:[%s9842_s1 + $0x284] sm:$0xf]  ;;  %v4328_v61 = vld [vmem:[%s9842_s1 + $0x290] sm:$0xf0]  ;;  %v4203_v1 = vor.u32 %v6100_v57, %v4200_v59 }
  0x8a   :  { %3369 = vmatpush.bf16.msra.mxu0 %v4107_v36  ;;  %v6164_v62 = vld [vmem:[%s9842_s1 + $0x384] sm:$0xf]  ;;  %v4456_v63 = vld [vmem:[%s9842_s1 + $0x390] sm:$0xf0]  ;;  %v4331_v2 = vor.u32 %v6132_v60, %v4328_v61 }
  0x8b   :  { %3382 = vmatpush.bf16.msra.mxu1 %v4235_v37  ;;  %v6064_v3 = vld [vmem:[%s9842_s1 + $0x64] sm:$0xf]  ;;  %v4056_v5 = vld [vmem:[%s9842_s1 + $0x70] sm:$0xf0]  ;;  %v4459_v8 = vor.u32 %v6164_v62, %v4456_v63 }
  0x8c   :  { %3395 = vmatpush.bf16.msra.mxu2 %v4363_v39  ;;  %v6096_v7 = vld [vmem:[%s9842_s1 + $0x164] sm:$0xf]  ;;  %v4184_v9 = vld [vmem:[%s9842_s1 + $0x170] sm:$0xf0]  ;;  %v4059_v14 = vor.u32 %v6064_v3, %v4056_v5 }
  0x8d   :  { %3408 = vmatpush.bf16.msra.mxu3 %v4491_v46  ;;  %v6128_v10 = vld [vmem:[%s9842_s1 + $0x264] sm:$0xf]  ;;  %v4312_v11 = vld [vmem:[%s9842_s1 + $0x270] sm:$0xf0]  ;;  %v4187_v15 = vor.u32 %v6096_v7, %v4184_v9 }
  0x8e   :  { %3370 = vmatpush.bf16.msra.mxu0 %v4091_v52  ;;  %v6160_v12 = vld [vmem:[%s9842_s1 + $0x364] sm:$0xf]  ;;  %v4440_v13 = vld [vmem:[%s9842_s1 + $0x370] sm:$0xf0]  ;;  %v4315_v16 = vor.u32 %v6128_v10, %v4312_v11 }
  0x8f   :  { %3383 = vmatpush.bf16.msra.mxu1 %v4219_v53  ;;  %v6060_v17 = vld [vmem:[%s9842_s1 + $0x44] sm:$0xf]  ;;  %v4040_v18 = vld [vmem:[%s9842_s1 + $0x50] sm:$0xf0]  ;;  %v4443_v22 = vor.u32 %v6160_v12, %v4440_v13 }
  0x90   :  { %3396 = vmatpush.bf16.msra.mxu2 %v4347_v54  ;;  %v6092_v19 = vld [vmem:[%s9842_s1 + $0x144] sm:$0xf]  ;;  %v4168_v24 = vld [vmem:[%s9842_s1 + $0x150] sm:$0xf0]  ;;  %v4043_v36 = vor.u32 %v6060_v17, %v4040_v18 }
  0x91   :  { %3409 = vmatpush.bf16.msra.mxu3 %v4475_v58  ;;  %v6124_v26 = vld [vmem:[%s9842_s1 + $0x244] sm:$0xf]  ;;  %v4296_v27 = vld [vmem:[%s9842_s1 + $0x250] sm:$0xf0]  ;;  %v4171_v37 = vor.u32 %v6092_v19, %v4168_v24 }
  0x92   :  { %3371 = vmatpush.bf16.msra.mxu0 %v4075_v0  ;;  %v6156_v32 = vld [vmem:[%s9842_s1 + $0x344] sm:$0xf]  ;;  %v4424_v34 = vld [vmem:[%s9842_s1 + $0x350] sm:$0xf0]  ;;  %v4299_v39 = vor.u32 %v6124_v26, %v4296_v27 }
  0x93   :  { %3384 = vmatpush.bf16.msra.mxu1 %v4203_v1  ;;  %v6056_v40 = vld [vmem:[%s9842_s1 + $0x24] sm:$0xf]  ;;  %v4024_v43 = vld [vmem:[%s9842_s1 + $0x30] sm:$0xf0]  ;;  %v4427_v46 = vor.u32 %v6156_v32, %v4424_v34 }
  0x94   :  { %3397 = vmatpush.bf16.msra.mxu2 %v4331_v2  ;;  %v6088_v45 = vld [vmem:[%s9842_s1 + $0x124] sm:$0xf]  ;;  %v4152_v47 = vld [vmem:[%s9842_s1 + $0x130] sm:$0xf0]  ;;  %v4027_v52 = vor.u32 %v6056_v40, %v4024_v43 }
  0x95   :  { %3410 = vmatpush.bf16.msra.mxu3 %v4459_v8  ;;  %v6120_v48 = vld [vmem:[%s9842_s1 + $0x224] sm:$0xf]  ;;  %v4280_v49 = vld [vmem:[%s9842_s1 + $0x230] sm:$0xf0]  ;;  %v4155_v55 = vor.u32 %v6088_v45, %v4152_v47 }
  0x96   :  { %3372 = vmatpush.bf16.msra.mxu0 %v4059_v14  ;;  %v6152_v50 = vld [vmem:[%s9842_s1 + $0x324] sm:$0xf]  ;;  %v4408_v51 = vld [vmem:[%s9842_s1 + $0x330] sm:$0xf0]  ;;  %v4283_v56 = vor.u32 %v6120_v48, %v4280_v49 }
  0x97   :  { %3385 = vmatpush.bf16.msra.mxu1 %v4187_v15  ;;  %v6052_v53 = vld [vmem:[%s9842_s1 + $0x4] sm:$0xf]  ;;  %v4008_v54 = vld [vmem:[%s9842_s1 + $0x10] sm:$0xf0]  ;;  %v4411_v60 = vor.u32 %v6152_v50, %v4408_v51 }
  0x98   :  { %3398 = vmatpush.bf16.msra.mxu2 %v4315_v16  ;;  %v6084_v57 = vld [vmem:[%s9842_s1 + $0x104] sm:$0xf]  ;;  %v4136_v58 = vld [vmem:[%s9842_s1 + $0x110] sm:$0xf0]  ;;  %v4011_v3 = vor.u32 %v6052_v53, %v4008_v54 }
  0x99   :  { %3411 = vmatpush.bf16.msra.mxu3 %v4443_v22  ;;  %v6116_v59 = vld [vmem:[%s9842_s1 + $0x204] sm:$0xf]  ;;  %v4264_v61 = vld [vmem:[%s9842_s1 + $0x210] sm:$0xf0]  ;;  %v4139_v9 = vor.u32 %v6084_v57, %v4136_v58 }
  0x9a   :  { %3373 = vmatpush.bf16.msra.mxu0 %v4043_v36  ;;  %v6148_v62 = vld [vmem:[%s9842_s1 + $0x304] sm:$0xf]  ;;  %v4392_v63 = vld [vmem:[%s9842_s1 + $0x310] sm:$0xf0]  ;;  %v4267_v10 = vor.u32 %v6116_v59, %v4264_v61 }
  0x9b   :  { %3386 = vmatpush.bf16.msra.mxu1 %v4171_v37  ;;  %v6208_v0 = vld [vmem:[%s9842_s1 + $0x4e4] sm:$0xf]  ;;  %v4632_v1 = vld [vmem:[%s9842_s1 + $0x4f0] sm:$0xf0]  ;;  %v4395_v13 = vor.u32 %v6148_v62, %v4392_v63 }
  0x9c   :  { %3399 = vmatpush.bf16.msra.mxu2 %v4299_v39  ;;  %v6240_v2 = vld [vmem:[%s9842_s1 + $0x5e4] sm:$0xf]  ;;  %v4760_v5 = vld [vmem:[%s9842_s1 + $0x5f0] sm:$0xf0]  ;;  %v4635_v14 = vor.u32 %v6208_v0, %v4632_v1 }
  0x9d   :  { %3412 = vmatpush.bf16.msra.mxu3 %v4427_v46  ;;  %v6272_v7 = vld [vmem:[%s9842_s1 + $0x6e4] sm:$0xf]  ;;  %v4888_v8 = vld [vmem:[%s9842_s1 + $0x6f0] sm:$0xf0]  ;;  %v4763_v15 = vor.u32 %v6240_v2, %v4760_v5 }
  0x9e   :  { %3374 = vmatpush.bf16.msra.mxu0 %v4027_v52  ;;  %v6304_v11 = vld [vmem:[%s9842_s1 + $0x7e4] sm:$0xf]  ;;  %v5016_v12 = vld [vmem:[%s9842_s1 + $0x7f0] sm:$0xf0]  ;;  %v4891_v16 = vor.u32 %v6272_v7, %v4888_v8  ;;  %v534_v8 = vld [vmem:[%s9844_s2] sm:$0xf] }
  0x9f   :  { %3387 = vmatpush.bf16.msra.mxu1 %v4155_v55  ;;  %v6204_v17 = vld [vmem:[%s9842_s1 + $0x4c4] sm:$0xf]  ;;  %v4616_v18 = vld [vmem:[%s9842_s1 + $0x4d0] sm:$0xf0]  ;;  %v5019_v22 = vor.u32 %v6304_v11, %v5016_v12 }
  0xa0   :  { %3400 = vmatpush.bf16.msra.mxu2 %v4283_v56  ;;  %v6236_v19 = vld [vmem:[%s9842_s1 + $0x5c4] sm:$0xf]  ;;  %v4744_v24 = vld [vmem:[%s9842_s1 + $0x5d0] sm:$0xf0]  ;;  %v4619_v36 = vor.u32 %v6204_v17, %v4616_v18 }
  0xa1   :  { %3413 = vmatpush.bf16.msra.mxu3 %v4411_v60  ;;  %v6268_v26 = vld [vmem:[%s9842_s1 + $0x6c4] sm:$0xf]  ;;  %v4872_v27 = vld [vmem:[%s9842_s1 + $0x6d0] sm:$0xf0]  ;;  %v4747_v37 = vor.u32 %v6236_v19, %v4744_v24 }
  0xa2   :  { %3375 = vmatpush.bf16.msra.mxu0 %v4011_v3  ;;  %v6300_v32 = vld [vmem:[%s9842_s1 + $0x7c4] sm:$0xf]  ;;  %v5000_v34 = vld [vmem:[%s9842_s1 + $0x7d0] sm:$0xf0]  ;;  %v4875_v39 = vor.u32 %v6268_v26, %v4872_v27 }
  0xa3   :  { %3388 = vmatpush.bf16.msra.mxu1 %v4139_v9  ;;  %v6200_v40 = vld [vmem:[%s9842_s1 + $0x4a4] sm:$0xf]  ;;  %v4600_v43 = vld [vmem:[%s9842_s1 + $0x4b0] sm:$0xf0]  ;;  %v5003_v46 = vor.u32 %v6300_v32, %v5000_v34 }
  0xa4   :  { %3401 = vmatpush.bf16.msra.mxu2 %v4267_v10  ;;  %v6232_v45 = vld [vmem:[%s9842_s1 + $0x5a4] sm:$0xf]  ;;  %v4728_v47 = vld [vmem:[%s9842_s1 + $0x5b0] sm:$0xf0]  ;;  %v4603_v52 = vor.u32 %v6200_v40, %v4600_v43 }
  0xa5   :  { %3414 = vmatpush.bf16.msra.mxu3 %v4395_v13  ;;  %v6264_v48 = vld [vmem:[%s9842_s1 + $0x6a4] sm:$0xf]  ;;  %v4856_v49 = vld [vmem:[%s9842_s1 + $0x6b0] sm:$0xf0]  ;;  %3376 = vmatmul.bf16.vlgmr.msra.gmra.mxu0 %v6885_v20  ;;  %v4731_v53 = vor.u32 %v6232_v45, %v4728_v47 }
  0xa6   :  { %3420 = vmatpush.bf16.msrb.mxu0 %v4635_v14  ;;  %v6296_v50 = vld [vmem:[%s9842_s1 + $0x7a4] sm:$0xf]  ;;  %v4984_v51 = vld [vmem:[%s9842_s1 + $0x7b0] sm:$0xf0]  ;;  %3389 = vmatmul.bf16.vlgmr.msra.gmra.mxu1 %v6888_v21  ;;  %v4859_v54 = vor.u32 %v6264_v48, %v4856_v49 }
  0xa7   :  { %3433 = vmatpush.bf16.msrb.mxu1 %v4763_v15  ;;  %3402 = vmatmul.bf16.vlgmr.msra.gmra.mxu2 %v6853_v4  ;;  %v6196_v55 = vld [vmem:[%s9842_s1 + $0x484] sm:$0xf]  ;;  %v4584_v56 = vld [vmem:[%s9842_s1 + $0x490] sm:$0xf0]  ;;  %v4987_v58 = vor.u32 %v6296_v50, %v4984_v51 }
  0xa8   :  { %3446 = vmatpush.bf16.msrb.mxu2 %v4891_v16  ;;  %3415 = vmatmul.bf16.vlgmr.msra.gmra.mxu3 %v6858_v6  ;;  %v6228_v57 = vld [vmem:[%s9842_s1 + $0x584] sm:$0xf]  ;;  %v4712_v59 = vld [vmem:[%s9842_s1 + $0x590] sm:$0xf0]  ;;  %v4587_v0 = vor.u32 %v6196_v55, %v4584_v56  ;;  %v536_v16 = vperm.slane %v534_v8, 0  ;;  %v3195_v51 = vpop.f32.mrf.mxu2 }
  0xa9   :  { %3459 = vmatpush.bf16.msrb.mxu3 %v5019_v22  ;;  %v6260_v60 = vld [vmem:[%s9842_s1 + $0x684] sm:$0xf]  ;;  %v4840_v61 = vld [vmem:[%s9842_s1 + $0x690] sm:$0xf0]  ;;  %v4715_v2 = vor.u32 %v6228_v57, %v4712_v59  ;;  %v3208_v57 = vpop.f32.mrf.mxu3 }
  0xaa   :  { %3421 = vmatpush.bf16.msrb.mxu0 %v4619_v36  ;;  %v6292_v62 = vld [vmem:[%s9842_s1 + $0x784] sm:$0xf]  ;;  %v4968_v63 = vld [vmem:[%s9842_s1 + $0x790] sm:$0xf0]  ;;  %v4843_v3 = vor.u32 %v6260_v60, %v4840_v61 }
  0xab   :  { %3434 = vmatpush.bf16.msrb.mxu1 %v4747_v37  ;;  %v6192_v1 = vld [vmem:[%s9842_s1 + $0x464] sm:$0xf]  ;;  %v4568_v5 = vld [vmem:[%s9842_s1 + $0x470] sm:$0xf0]  ;;  %v4971_v9 = vor.u32 %v6292_v62, %v4968_v63 }
  0xac   :  { %3447 = vmatpush.bf16.msrb.mxu2 %v4875_v39  ;;  %v6224_v7 = vld [vmem:[%s9842_s1 + $0x564] sm:$0xf]  ;;  %v4696_v10 = vld [vmem:[%s9842_s1 + $0x570] sm:$0xf0]  ;;  %v4571_v15 = vor.u32 %v6192_v1, %v4568_v5 }
  0xad   :  { %3460 = vmatpush.bf16.msrb.mxu3 %v5003_v46  ;;  %v6256_v11 = vld [vmem:[%s9842_s1 + $0x664] sm:$0xf]  ;;  %v4824_v12 = vld [vmem:[%s9842_s1 + $0x670] sm:$0xf0]  ;;  %v4699_v17 = vor.u32 %v6224_v7, %v4696_v10 }
  0xae   :  { %3422 = vmatpush.bf16.msrb.mxu0 %v4603_v52  ;;  %v6288_v13 = vld [vmem:[%s9842_s1 + $0x764] sm:$0xf]  ;;  %v4952_v14 = vld [vmem:[%s9842_s1 + $0x770] sm:$0xf0]  ;;  %v4827_v18 = vor.u32 %v6256_v11, %v4824_v12 }
  0xaf   :  { %3435 = vmatpush.bf16.msrb.mxu1 %v4731_v53  ;;  %v6188_v19 = vld [vmem:[%s9842_s1 + $0x444] sm:$0xf]  ;;  %v4552_v22 = vld [vmem:[%s9842_s1 + $0x450] sm:$0xf0]  ;;  %v4955_v26 = vor.u32 %v6288_v13, %v4952_v14  ;;  %v3169_v39 = vpop.f32.mrf.mxu0  ;;  %v3182_v45 = vpop.f32.mrf.mxu1 }
  0xb0   :  { %3448 = vmatpush.bf16.msrb.mxu2 %v4859_v54  ;;  %v6220_v24 = vld [vmem:[%s9842_s1 + $0x544] sm:$0xf]  ;;  %v4680_v27 = vld [vmem:[%s9842_s1 + $0x550] sm:$0xf0]  ;;  %v4555_v40 = vor.u32 %v6188_v19, %v4552_v22  ;;  %v3170_v43 = vadd.f32 %v3169_v39, %v536_v16 }
  0xb1   :  { %3461 = vmatpush.bf16.msrb.mxu3 %v4987_v58  ;;  %v6252_v32 = vld [vmem:[%s9842_s1 + $0x644] sm:$0xf]  ;;  %v4808_v34 = vld [vmem:[%s9842_s1 + $0x650] sm:$0xf0]  ;;  %v4683_v46 = vor.u32 %v6220_v24, %v4680_v27  ;;  %v3210_v39 = vpop.f32.mrf.mxu3 }
  0xb2   :  { %3423 = vmatpush.bf16.msrb.mxu0 %v4587_v0  ;;  %v6284_v36 = vld [vmem:[%s9842_s1 + $0x744] sm:$0xf]  ;;  %v4936_v37 = vld [vmem:[%s9842_s1 + $0x750] sm:$0xf0]  ;;  %v4811_v47 = vor.u32 %v6252_v32, %v4808_v34  ;;  %v3183_v56 = vadd.f32 %v3182_v45, %v3170_v43  ;;  %v3197_v34 = vpop.f32.mrf.mxu2 }
  0xb3   :  { %3436 = vmatpush.bf16.msrb.mxu1 %v4715_v2  ;;  %v6184_v48 = vld [vmem:[%s9842_s1 + $0x424] sm:$0xf]  ;;  %v4536_v49 = vld [vmem:[%s9842_s1 + $0x430] sm:$0xf0]  ;;  %v4939_v52 = vor.u32 %v6284_v36, %v4936_v37 }
  0xb4   :  { %3449 = vmatpush.bf16.msrb.mxu2 %v4843_v3  ;;  %v6216_v50 = vld [vmem:[%s9842_s1 + $0x524] sm:$0xf]  ;;  %v4664_v53 = vld [vmem:[%s9842_s1 + $0x530] sm:$0xf0]  ;;  %v4539_v60 = vor.u32 %v6184_v48, %v4536_v49  ;;  %v3196_v63 = vadd.f32 %v3195_v51, %v3183_v56 }
  0xb5   :  { %3462 = vmatpush.bf16.msrb.mxu3 %v4971_v9  ;;  %v6248_v54 = vld [vmem:[%s9842_s1 + $0x624] sm:$0xf]  ;;  %v4792_v55 = vld [vmem:[%s9842_s1 + $0x630] sm:$0xf0]  ;;  %v4667_v0 = vor.u32 %v6216_v50, %v4664_v53 }
  0xb6   :  { %3424 = vmatpush.bf16.msrb.mxu0 %v4571_v15  ;;  %v6280_v58 = vld [vmem:[%s9842_s1 + $0x724] sm:$0xf]  ;;  %v4920_v59 = vld [vmem:[%s9842_s1 + $0x730] sm:$0xf0]  ;;  %v4795_v1 = vor.u32 %v6248_v54, %v4792_v55  ;;  %v7817_v11 = vadd.f32 %v3208_v57, %v3196_v63 }
  0xb7   :  { %3437 = vmatpush.bf16.msrb.mxu1 %v4699_v17  ;;  %v6180_v61 = vld [vmem:[%s9842_s1 + $0x404] sm:$0xf]  ;;  %v4520_v62 = vld [vmem:[%s9842_s1 + $0x410] sm:$0xf0]  ;;  %v4923_v7 = vor.u32 %v6280_v58, %v4920_v59  ;;  %v3171_v15 = vpop.f32.mrf.mxu0  ;;  %v3184_v22 = vpop.f32.mrf.mxu1 }
  0xb8   :  { %3450 = vmatpush.bf16.msrb.mxu2 %v4827_v18  ;;  %v6212_v2 = vld [vmem:[%s9842_s1 + $0x504] sm:$0xf]  ;;  %v4648_v3 = vld [vmem:[%s9842_s1 + $0x510] sm:$0xf0]  ;;  %v4523_v16 = vor.u32 %v6180_v61, %v4520_v62 }
  0xb9   :  { %3463 = vmatpush.bf16.msrb.mxu3 %v4955_v26  ;;  %v6244_v5 = vld [vmem:[%s9842_s1 + $0x604] sm:$0xf]  ;;  %v4776_v8 = vld [vmem:[%s9842_s1 + $0x610] sm:$0xf0]  ;;  %v4651_v24 = vor.u32 %v6212_v2, %v4648_v3 }
  0xba   :  { %3425 = vmatpush.bf16.msrb.mxu0 %v4555_v40  ;;  %v6276_v9 = vld [vmem:[%s9842_s1 + $0x704] sm:$0xf]  ;;  %v4904_v10 = vld [vmem:[%s9842_s1 + $0x710] sm:$0xf0]  ;;  %v4779_v26 = vor.u32 %v6244_v5, %v4776_v8 }
  0xbb   :  { %3438 = vmatpush.bf16.msrb.mxu1 %v4683_v46  ;;  %v6336_v12 = vld [vmem:[%s9842_s1 + $0x8e4] sm:$0xf]  ;;  %v5144_v13 = vld [vmem:[%s9842_s1 + $0x8f0] sm:$0xf0]  ;;  %v4907_v36 = vor.u32 %v6276_v9, %v4904_v10 }
  0xbc   :  { %3451 = vmatpush.bf16.msrb.mxu2 %v4811_v47  ;;  %v6368_v14 = vld [vmem:[%s9842_s1 + $0x9e4] sm:$0xf]  ;;  %v5272_v17 = vld [vmem:[%s9842_s1 + $0x9f0] sm:$0xf0]  ;;  %v5147_v37 = vor.u32 %v6336_v12, %v5144_v13 }
  0xbd   :  { %3464 = vmatpush.bf16.msrb.mxu3 %v4939_v52  ;;  %v6400_v18 = vld [vmem:[%s9842_s1 + $0xae4] sm:$0xf]  ;;  %v5400_v19 = vld [vmem:[%s9842_s1 + $0xaf0] sm:$0xf0]  ;;  %v5275_v40 = vor.u32 %v6368_v14, %v5272_v17 }
  0xbe   :  { %3426 = vmatpush.bf16.msrb.mxu0 %v4539_v60  ;;  %v6432_v27 = vld [vmem:[%s9842_s1 + $0xbe4] sm:$0xf]  ;;  %v5528_v32 = vld [vmem:[%s9842_s1 + $0xbf0] sm:$0xf0]  ;;  %v5403_v43 = vor.u32 %v6400_v18, %v5400_v19 }
  0xbf   :  { %3439 = vmatpush.bf16.msrb.mxu1 %v4667_v0  ;;  %v6332_v45 = vld [vmem:[%s9842_s1 + $0x8c4] sm:$0xf]  ;;  %v5128_v46 = vld [vmem:[%s9842_s1 + $0x8d0] sm:$0xf0]  ;;  %v5531_v48 = vor.u32 %v6432_v27, %v5528_v32 }
  0xc0   :  { %3452 = vmatpush.bf16.msrb.mxu2 %v4795_v1  ;;  %v6364_v47 = vld [vmem:[%s9842_s1 + $0x9c4] sm:$0xf]  ;;  %v5256_v49 = vld [vmem:[%s9842_s1 + $0x9d0] sm:$0xf0]  ;;  %v5131_v54 = vor.u32 %v6332_v45, %v5128_v46 }
  0xc1   :  { %3465 = vmatpush.bf16.msrb.mxu3 %v4923_v7  ;;  %v6396_v50 = vld [vmem:[%s9842_s1 + $0xac4] sm:$0xf]  ;;  %v5384_v51 = vld [vmem:[%s9842_s1 + $0xad0] sm:$0xf0]  ;;  %v5259_v55 = vor.u32 %v6364_v47, %v5256_v49 }
  0xc2   :  { %3427 = vmatpush.bf16.msrb.mxu0 %v4523_v16  ;;  %v6428_v52 = vld [vmem:[%s9842_s1 + $0xbc4] sm:$0xf]  ;;  %v5512_v53 = vld [vmem:[%s9842_s1 + $0xbd0] sm:$0xf0]  ;;  %v5387_v56 = vor.u32 %v6396_v50, %v5384_v51 }
  0xc3   :  { %3440 = vmatpush.bf16.msrb.mxu1 %v4651_v24  ;;  %v6328_v57 = vld [vmem:[%s9842_s1 + $0x8a4] sm:$0xf]  ;;  %v5112_v58 = vld [vmem:[%s9842_s1 + $0x8b0] sm:$0xf0]  ;;  %v5515_v60 = vor.u32 %v6428_v52, %v5512_v53  ;;  %v3221_v18 = vpop.f32.mrf.mxu0 }
  0xc4   :  { %3453 = vmatpush.bf16.msrb.mxu2 %v4779_v26  ;;  %v6360_v59 = vld [vmem:[%s9842_s1 + $0x9a4] sm:$0xf]  ;;  %v5240_v61 = vld [vmem:[%s9842_s1 + $0x9b0] sm:$0xf0]  ;;  %v5115_v2 = vor.u32 %v6328_v57, %v5112_v58  ;;  %v3222_v32 = vadd.f32 %v3221_v18, %v7817_v11 }
  0xc5   :  { %3466 = vmatpush.bf16.msrb.mxu3 %v4907_v36  ;;  %v6392_v62 = vld [vmem:[%s9842_s1 + $0xaa4] sm:$0xf]  ;;  %v5368_v63 = vld [vmem:[%s9842_s1 + $0xab0] sm:$0xf0]  ;;  %3428 = vmatmul.bf16.vlgmr.msrb.gmra.mxu0 %v7044_v41  ;;  %v5243_v3 = vor.u32 %v6360_v59, %v5240_v61  ;;  %v3234_v34 = vpop.f32.mrf.mxu1 }
  0xc6   :  { %3472 = vmatpush.bf16.msra.mxu0 %v5147_v37  ;;  %v6424_v0 = vld [vmem:[%s9842_s1 + $0xba4] sm:$0xf]  ;;  %v5496_v1 = vld [vmem:[%s9842_s1 + $0xbb0] sm:$0xf0]  ;;  %3441 = vmatmul.bf16.vlgmr.msrb.gmra.mxu1 %v7048_v44  ;;  %v5371_v5 = vor.u32 %v6392_v62, %v5368_v63  ;;  %v3235_v45 = vadd.f32 %v3234_v34, %v3222_v32 }
  0xc7   :  { %3485 = vmatpush.bf16.msra.mxu1 %v5275_v40  ;;  %3454 = vmatmul.bf16.vlgmr.msrb.gmra.mxu2 %v7036_v38  ;;  %v6324_v7 = vld [vmem:[%s9842_s1 + $0x884] sm:$0xf]  ;;  %v5096_v8 = vld [vmem:[%s9842_s1 + $0x890] sm:$0xf0]  ;;  %v5499_v10 = vor.u32 %v6424_v0, %v5496_v1 }
  0xc8   :  { %3498 = vmatpush.bf16.msra.mxu2 %v5403_v43  ;;  %3467 = vmatmul.bf16.vlgmr.msrb.gmra.mxu3 %v7046_v42  ;;  %v6356_v9 = vld [vmem:[%s9842_s1 + $0x984] sm:$0xf]  ;;  %v5224_v12 = vld [vmem:[%s9842_s1 + $0x990] sm:$0xf0]  ;;  %v5099_v17 = vor.u32 %v6324_v7, %v5096_v8 }
  0xc9   :  { %3511 = vmatpush.bf16.msra.mxu3 %v5531_v48  ;;  %v6388_v13 = vld [vmem:[%s9842_s1 + $0xa84] sm:$0xf]  ;;  %v5352_v14 = vld [vmem:[%s9842_s1 + $0xa90] sm:$0xf0]  ;;  %v5227_v19 = vor.u32 %v6356_v9, %v5224_v12  ;;  %v3247_v52 = vpop.f32.mrf.mxu2 }
  0xca   :  { %3473 = vmatpush.bf16.msra.mxu0 %v5131_v54  ;;  %v6420_v15 = vld [vmem:[%s9842_s1 + $0xb84] sm:$0xf]  ;;  %v5480_v16 = vld [vmem:[%s9842_s1 + $0xb90] sm:$0xf0]  ;;  %v5355_v22 = vor.u32 %v6388_v13, %v5352_v14  ;;  %v3248_v57 = vadd.f32 %v3247_v52, %v3235_v45 }
  0xcb   :  { %3486 = vmatpush.bf16.msra.mxu1 %v5259_v55  ;;  %v6320_v24 = vld [vmem:[%s9842_s1 + $0x864] sm:$0xf]  ;;  %v5080_v26 = vld [vmem:[%s9842_s1 + $0x870] sm:$0xf0]  ;;  %v5483_v36 = vor.u32 %v6420_v15, %v5480_v16  ;;  %v3223_v63 = vpop.f32.mrf.mxu0 }
  0xcc   :  { %3499 = vmatpush.bf16.msra.mxu2 %v5387_v56  ;;  %v6352_v27 = vld [vmem:[%s9842_s1 + $0x964] sm:$0xf]  ;;  %v5208_v37 = vld [vmem:[%s9842_s1 + $0x970] sm:$0xf0]  ;;  %v5083_v46 = vor.u32 %v6320_v24, %v5080_v26  ;;  %v3260_v58 = vpop.f32.mrf.mxu3 }
  0xcd   :  { %3512 = vmatpush.bf16.msra.mxu3 %v5515_v60  ;;  %v6384_v39 = vld [vmem:[%s9842_s1 + $0xa64] sm:$0xf]  ;;  %v5336_v40 = vld [vmem:[%s9842_s1 + $0xa70] sm:$0xf0]  ;;  %v5211_v47 = vor.u32 %v6352_v27, %v5208_v37  ;;  %v7968_v62 = vadd.f32 %v3260_v58, %v3248_v57  ;;  %v3236_v7 = vpop.f32.mrf.mxu1 }
  0xce   :  { %3474 = vmatpush.bf16.msra.mxu0 %v5115_v2  ;;  %v6416_v43 = vld [vmem:[%s9842_s1 + $0xb64] sm:$0xf]  ;;  %v5464_v11 = vld [vmem:[%s9842_s1 + $0xb70] sm:$0xf0]  ;;  %v5339_v48 = vor.u32 %v6384_v39, %v5336_v40 }
  0xcf   :  { %3487 = vmatpush.bf16.msra.mxu1 %v5243_v3  ;;  %v6316_v49 = vld [vmem:[%s9842_s1 + $0x844] sm:$0xf]  ;;  %v5064_v50 = vld [vmem:[%s9842_s1 + $0x850] sm:$0xf0]  ;;  %v5467_v53 = vor.u32 %v6416_v43, %v5464_v11 }
  0xd0   :  { %3500 = vmatpush.bf16.msra.mxu2 %v5371_v5  ;;  %v6348_v51 = vld [vmem:[%s9842_s1 + $0x944] sm:$0xf]  ;;  %v5192_v54 = vld [vmem:[%s9842_s1 + $0x950] sm:$0xf0]  ;;  %v5067_v61 = vor.u32 %v6316_v49, %v5064_v50 }
  0xd1   :  { %3513 = vmatpush.bf16.msra.mxu3 %v5499_v10  ;;  %v6380_v55 = vld [vmem:[%s9842_s1 + $0xa44] sm:$0xf]  ;;  %v5320_v56 = vld [vmem:[%s9842_s1 + $0xa50] sm:$0xf0]  ;;  %v5195_v0 = vor.u32 %v6348_v51, %v5192_v54  ;;  %v3249_v27 = vpop.f32.mrf.mxu2 }
  0xd2   :  { %3475 = vmatpush.bf16.msra.mxu0 %v5099_v17  ;;  %v6412_v59 = vld [vmem:[%s9842_s1 + $0xb44] sm:$0xf]  ;;  %v5448_v60 = vld [vmem:[%s9842_s1 + $0xb50] sm:$0xf0]  ;;  %v5323_v1 = vor.u32 %v6380_v55, %v5320_v56 }
  0xd3   :  { %3488 = vmatpush.bf16.msra.mxu1 %v5227_v19  ;;  %v6312_v2 = vld [vmem:[%s9842_s1 + $0x824] sm:$0xf]  ;;  %v5048_v3 = vld [vmem:[%s9842_s1 + $0x830] sm:$0xf0]  ;;  %v5451_v8 = vor.u32 %v6412_v59, %v5448_v60 }
  0xd4   :  { %3501 = vmatpush.bf16.msra.mxu2 %v5355_v22  ;;  %v6344_v5 = vld [vmem:[%s9842_s1 + $0x924] sm:$0xf]  ;;  %v5176_v9 = vld [vmem:[%s9842_s1 + $0x930] sm:$0xf0]  ;;  %v5051_v15 = vor.u32 %v6312_v2, %v5048_v3  ;;  %v3262_v39 = vpop.f32.mrf.mxu3 }
  0xd5   :  { %3514 = vmatpush.bf16.msra.mxu3 %v5483_v36  ;;  %v6376_v10 = vld [vmem:[%s9842_s1 + $0xa24] sm:$0xf]  ;;  %v5304_v12 = vld [vmem:[%s9842_s1 + $0xa30] sm:$0xf0]  ;;  %v5179_v18 = vor.u32 %v6344_v5, %v5176_v9 }
  0xd6   :  { %3476 = vmatpush.bf16.msra.mxu0 %v5083_v46  ;;  %v6408_v13 = vld [vmem:[%s9842_s1 + $0xb24] sm:$0xf]  ;;  %v5432_v14 = vld [vmem:[%s9842_s1 + $0xb30] sm:$0xf0]  ;;  %v5307_v19 = vor.u32 %v6376_v10, %v5304_v12 }
  0xd7   :  { %3489 = vmatpush.bf16.msra.mxu1 %v5211_v47  ;;  %v6308_v16 = vld [vmem:[%s9842_s1 + $0x804] sm:$0xf]  ;;  %v5032_v17 = vld [vmem:[%s9842_s1 + $0x810] sm:$0xf0]  ;;  %v5435_v32 = vor.u32 %v6408_v13, %v5432_v14 }
  0xd8   :  { %3502 = vmatpush.bf16.msra.mxu2 %v5339_v48  ;;  %v6340_v22 = vld [vmem:[%s9842_s1 + $0x904] sm:$0xf]  ;;  %v5160_v24 = vld [vmem:[%s9842_s1 + $0x910] sm:$0xf0]  ;;  %v5035_v45 = vor.u32 %v6308_v16, %v5032_v17 }
  0xd9   :  { %3515 = vmatpush.bf16.msra.mxu3 %v5467_v53  ;;  %v6372_v26 = vld [vmem:[%s9842_s1 + $0xa04] sm:$0xf]  ;;  %v5288_v34 = vld [vmem:[%s9842_s1 + $0xa10] sm:$0xf0]  ;;  %v5163_v49 = vor.u32 %v6340_v22, %v5160_v24 }
  0xda   :  { %3477 = vmatpush.bf16.msra.mxu0 %v5067_v61  ;;  %v6404_v36 = vld [vmem:[%s9842_s1 + $0xb04] sm:$0xf]  ;;  %v5416_v37 = vld [vmem:[%s9842_s1 + $0xb10] sm:$0xf0]  ;;  %v5291_v50 = vor.u32 %v6372_v26, %v5288_v34 }
  0xdb   :  { %3490 = vmatpush.bf16.msra.mxu1 %v5195_v0  ;;  %v6464_v40 = vld [vmem:[%s9842_s1 + $0xce4] sm:$0xf]  ;;  %v5656_v43 = vld [vmem:[%s9842_s1 + $0xcf0] sm:$0xf0]  ;;  %v5419_v53 = vor.u32 %v6404_v36, %v5416_v37 }
  0xdc   :  { %3503 = vmatpush.bf16.msra.mxu2 %v5323_v1  ;;  %v6496_v11 = vld [vmem:[%s9842_s1 + $0xde4] sm:$0xf]  ;;  %v5784_v46 = vld [vmem:[%s9842_s1 + $0xdf0] sm:$0xf0]  ;;  %v5659_v54 = vor.u32 %v6464_v40, %v5656_v43 }
  0xdd   :  { %3516 = vmatpush.bf16.msra.mxu3 %v5451_v8  ;;  %v6528_v47 = vld [vmem:[%s9842_s1 + $0xee4] sm:$0xf]  ;;  %v5912_v48 = vld [vmem:[%s9842_s1 + $0xef0] sm:$0xf0]  ;;  %v5787_v55 = vor.u32 %v6496_v11, %v5784_v46 }
  0xde   :  { %3478 = vmatpush.bf16.msra.mxu0 %v5051_v15  ;;  %v6560_v51 = vld [vmem:[%s9842_s1 + $0xfe4] sm:$0xf]  ;;  %v6040_v52 = vld [vmem:[%s9842_s1 + $0xff0] sm:$0xf0]  ;;  %v5915_v56 = vor.u32 %v6528_v47, %v5912_v48 }
  0xdf   :  { %3491 = vmatpush.bf16.msra.mxu1 %v5179_v18  ;;  %v6460_v57 = vld [vmem:[%s9842_s1 + $0xcc4] sm:$0xf]  ;;  %v5640_v58 = vld [vmem:[%s9842_s1 + $0xcd0] sm:$0xf0]  ;;  %v6043_v60 = vor.u32 %v6560_v51, %v6040_v52 }
  0xe0   :  { %3504 = vmatpush.bf16.msra.mxu2 %v5307_v19  ;;  %v6492_v59 = vld [vmem:[%s9842_s1 + $0xdc4] sm:$0xf]  ;;  %v5768_v61 = vld [vmem:[%s9842_s1 + $0xdd0] sm:$0xf0]  ;;  %v5643_v3 = vor.u32 %v6460_v57, %v5640_v58 }
  0xe1   :  { %3517 = vmatpush.bf16.msra.mxu3 %v5435_v32  ;;  %v6524_v63 = vld [vmem:[%s9842_s1 + $0xec4] sm:$0xf]  ;;  %v5896_v0 = vld [vmem:[%s9842_s1 + $0xed0] sm:$0xf0]  ;;  %v5771_v5 = vor.u32 %v6492_v59, %v5768_v61 }
  0xe2   :  { %3479 = vmatpush.bf16.msra.mxu0 %v5035_v45  ;;  %v6556_v1 = vld [vmem:[%s9842_s1 + $0xfc4] sm:$0xf]  ;;  %v6024_v2 = vld [vmem:[%s9842_s1 + $0xfd0] sm:$0xf0]  ;;  %v5899_v7 = vor.u32 %v6524_v63, %v5896_v0 }
  0xe3   :  { %3492 = vmatpush.bf16.msra.mxu1 %v5163_v49  ;;  %v6456_v8 = vld [vmem:[%s9842_s1 + $0xca4] sm:$0xf]  ;;  %v5624_v9 = vld [vmem:[%s9842_s1 + $0xcb0] sm:$0xf0]  ;;  %v6027_v12 = vor.u32 %v6556_v1, %v6024_v2 }
  0xe4   :  { %3505 = vmatpush.bf16.msra.mxu2 %v5291_v50  ;;  %v6488_v10 = vld [vmem:[%s9842_s1 + $0xda4] sm:$0xf]  ;;  %v5752_v13 = vld [vmem:[%s9842_s1 + $0xdb0] sm:$0xf0]  ;;  %v5627_v18 = vor.u32 %v6456_v8, %v5624_v9  ;;  %v3273_v39 = vpop.f32.mrf.mxu0 }
  0xe5   :  { %3518 = vmatpush.bf16.msra.mxu3 %v5419_v53  ;;  %3480 = vmatmul.bf16.vlgmr.msra.gmra.mxu0 %v7237_v25  ;;  %v6520_v14 = vld [vmem:[%s9842_s1 + $0xea4] sm:$0xf]  ;;  %v5880_v15 = vld [vmem:[%s9842_s1 + $0xeb0] sm:$0xf0]  ;;  %v5755_v19 = vor.u32 %v6488_v10, %v5752_v13  ;;  %v3274_v11 = vadd.f32 %v3273_v39, %v7968_v62  ;;  %v3286_v46 = vpop.f32.mrf.mxu1 }
  0xe6   :  { %3524 = vmatpush.bf16.msrb.mxu0 %v5659_v54  ;;  %3493 = vmatmul.bf16.vlgmr.msra.gmra.mxu1 %v7250_v30  ;;  %v6552_v16 = vld [vmem:[%s9842_s1 + $0xfa4] sm:$0xf]  ;;  %v6008_v17 = vld [vmem:[%s9842_s1 + $0xfb0] sm:$0xf0]  ;;  %v5883_v22 = vor.u32 %v6520_v14, %v5880_v15 }
  0xe7   :  { %3537 = vmatpush.bf16.msrb.mxu1 %v5787_v55  ;;  %3506 = vmatmul.bf16.vlgmr.msra.gmra.mxu2 %v7248_v29  ;;  %v6452_v24 = vld [vmem:[%s9842_s1 + $0xc84] sm:$0xf]  ;;  %v5608_v26 = vld [vmem:[%s9842_s1 + $0xc90] sm:$0xf0]  ;;  %v6011_v32 = vor.u32 %v6552_v16, %v6008_v17  ;;  %v3287_v52 = vadd.f32 %v3286_v46, %v3274_v11 }
  0xe8   :  { %3550 = vmatpush.bf16.msrb.mxu2 %v5915_v56  ;;  %3519 = vmatmul.bf16.vlgmr.msra.gmra.mxu3 %v7258_v33  ;;  %v6484_v27 = vld [vmem:[%s9842_s1 + $0xd84] sm:$0xf]  ;;  %v5736_v34 = vld [vmem:[%s9842_s1 + $0xd90] sm:$0xf0]  ;;  %v5611_v45 = vor.u32 %v6452_v24, %v5608_v26 }
  0xe9   :  { %3563 = vmatpush.bf16.msrb.mxu3 %v6043_v60  ;;  %v6516_v36 = vld [vmem:[%s9842_s1 + $0xe84] sm:$0xf]  ;;  %v5864_v37 = vld [vmem:[%s9842_s1 + $0xe90] sm:$0xf0]  ;;  %v5739_v47 = vor.u32 %v6484_v27, %v5736_v34  ;;  %v3299_v2 = vpop.f32.mrf.mxu2 }
  0xea   :  { %3525 = vmatpush.bf16.msrb.mxu0 %v5643_v3  ;;  %v6548_v40 = vld [vmem:[%s9842_s1 + $0xf84] sm:$0xf]  ;;  %v5992_v43 = vld [vmem:[%s9842_s1 + $0xf90] sm:$0xf0]  ;;  %v5867_v48 = vor.u32 %v6516_v36, %v5864_v37  ;;  %v3300_v8 = vadd.f32 %v3299_v2, %v3287_v52 }
  0xeb   :  { %3538 = vmatpush.bf16.msrb.mxu1 %v5771_v5  ;;  %v6448_v49 = vld [vmem:[%s9842_s1 + $0xc64] sm:$0xf]  ;;  %v5592_v50 = vld [vmem:[%s9842_s1 + $0xc70] sm:$0xf0]  ;;  %v5995_v62 = vor.u32 %v6548_v40, %v5992_v43 }
  0xec   :  { %3551 = vmatpush.bf16.msrb.mxu2 %v5899_v7  ;;  %v6480_v51 = vld [vmem:[%s9842_s1 + $0xd64] sm:$0xf]  ;;  %v5720_v53 = vld [vmem:[%s9842_s1 + $0xd70] sm:$0xf0]  ;;  %v5595_v58 = vor.u32 %v6448_v49, %v5592_v50  ;;  %v3275_v13 = vpop.f32.mrf.mxu0 }
  0xed   :  { %3564 = vmatpush.bf16.msrb.mxu3 %v6027_v12  ;;  %v6512_v54 = vld [vmem:[%s9842_s1 + $0xe64] sm:$0xf]  ;;  %v5848_v55 = vld [vmem:[%s9842_s1 + $0xe70] sm:$0xf0]  ;;  %v5723_v59 = vor.u32 %v6480_v51, %v5720_v53  ;;  %v3312_v9 = vpop.f32.mrf.mxu3  ;;  %v3288_v15 = vpop.f32.mrf.mxu1  ;;  %v4126_v53 = vld [vmem:[%s9842_s1 + $0xe8] sm:$0xf] }
  0xee   :  { %3526 = vmatpush.bf16.msrb.mxu0 %v5627_v18  ;;  %v6544_v56 = vld [vmem:[%s9842_s1 + $0xf64] sm:$0xf]  ;;  %v5976_v57 = vld [vmem:[%s9842_s1 + $0xf70] sm:$0xf0]  ;;  %v5851_v60 = vor.u32 %v6512_v54, %v5848_v55  ;;  %v8167_v16 = vadd.f32 %v3312_v9, %v3300_v8  ;;  %v6083_v54 = vld [vmem:[%s9842_s1 + $0xf4] sm:$0xf0] }
  0xef   :  { %3539 = vmatpush.bf16.msrb.mxu1 %v5755_v19  ;;  %v6444_v61 = vld [vmem:[%s9842_s1 + $0xc44] sm:$0xf]  ;;  %v5576_v63 = vld [vmem:[%s9842_s1 + $0xc50] sm:$0xf0]  ;;  %v5979_v1 = vor.u32 %v6544_v56, %v5976_v57  ;;  %v4254_v55 = vld [vmem:[%s9842_s1 + $0x1e8] sm:$0xf] }
  0xf0   :  { %3552 = vmatpush.bf16.msrb.mxu2 %v5883_v22  ;;  %v6476_v0 = vld [vmem:[%s9842_s1 + $0xd44] sm:$0xf]  ;;  %v5704_v3 = vld [vmem:[%s9842_s1 + $0xd50] sm:$0xf0]  ;;  %v5579_v14 = vor.u32 %v6444_v61, %v5576_v63  ;;  %v4110_v8 = vld [vmem:[%s9842_s1 + $0xc8] sm:$0xf] }
  0xf1   :  { %3565 = vmatpush.bf16.msrb.mxu3 %v6011_v32  ;;  %v6508_v5 = vld [vmem:[%s9842_s1 + $0xe44] sm:$0xf]  ;;  %v5832_v7 = vld [vmem:[%s9842_s1 + $0xe50] sm:$0xf0]  ;;  %v5707_v17 = vor.u32 %v6476_v0, %v5704_v3  ;;  %v3301_v52 = vpop.f32.mrf.mxu2  ;;  %v4510_v0 = vld [vmem:[%s9842_s1 + $0x3e8] sm:$0xf]  ;;  %v4127_v3 = vor.u32 %v6083_v54, %v4126_v53 }
  0xf2   :  { %3527 = vmatpush.bf16.msrb.mxu0 %v5611_v45  ;;  %v6540_v10 = vld [vmem:[%s9842_s1 + $0xf44] sm:$0xf]  ;;  %v5960_v12 = vld [vmem:[%s9842_s1 + $0xf50] sm:$0xf0]  ;;  %v5835_v18 = vor.u32 %v6508_v5, %v5832_v7  ;;  %v6079_v9 = vld [vmem:[%s9842_s1 + $0xd4] sm:$0xf0] }
  0xf3   :  { %3540 = vmatpush.bf16.msrb.mxu1 %v5739_v47  ;;  %v6440_v19 = vld [vmem:[%s9842_s1 + $0xc24] sm:$0xf]  ;;  %v5560_v22 = vld [vmem:[%s9842_s1 + $0xc30] sm:$0xf0]  ;;  %v5963_v26 = vor.u32 %v6540_v10, %v5960_v12  ;;  %v4238_v10 = vld [vmem:[%s9842_s1 + $0x1c8] sm:$0xf] }
  0xf4   :  { %3553 = vmatpush.bf16.msrb.mxu2 %v5867_v48  ;;  %v6472_v24 = vld [vmem:[%s9842_s1 + $0xd24] sm:$0xf]  ;;  %v5688_v27 = vld [vmem:[%s9842_s1 + $0xd30] sm:$0xf0]  ;;  %v5563_v39 = vor.u32 %v6440_v19, %v5560_v22  ;;  %v6111_v13 = vld [vmem:[%s9842_s1 + $0x1d4] sm:$0xf0]  ;;  %v4111_v19 = vor.u32 %v6079_v9, %v4110_v8 }
  0xf5   :  { %3566 = vmatpush.bf16.msrb.mxu3 %v5995_v62  ;;  %v6504_v32 = vld [vmem:[%s9842_s1 + $0xe24] sm:$0xf]  ;;  %v5816_v34 = vld [vmem:[%s9842_s1 + $0xe30] sm:$0xf0]  ;;  %v5691_v11 = vor.u32 %v6472_v24, %v5688_v27  ;;  %v3314_v56 = vpop.f32.mrf.mxu3  ;;  %v6143_v15 = vld [vmem:[%s9842_s1 + $0x2d4] sm:$0xf0]  ;;  %v4239_v22 = vor.u32 %v6111_v13, %v4238_v10 }
  0xf6   :  { %3528 = vmatpush.bf16.msrb.mxu0 %v5595_v58  ;;  %v6536_v36 = vld [vmem:[%s9842_s1 + $0xf24] sm:$0xf]  ;;  %v5944_v37 = vld [vmem:[%s9842_s1 + $0xf30] sm:$0xf0]  ;;  %v5819_v45 = vor.u32 %v6504_v32, %v5816_v34  ;;  %v6115_v58 = vld [vmem:[%s9842_s1 + $0x1f4] sm:$0xf0] }
  0xf7   :  { %3541 = vmatpush.bf16.msrb.mxu1 %v5723_v59  ;;  %v6436_v40 = vld [vmem:[%s9842_s1 + $0xc04] sm:$0xf]  ;;  %v5544_v43 = vld [vmem:[%s9842_s1 + $0xc10] sm:$0xf0]  ;;  %v5947_v49 = vor.u32 %v6536_v36, %v5944_v37  ;;  %v4382_v59 = vld [vmem:[%s9842_s1 + $0x2e8] sm:$0xf]  ;;  %v4255_v5 = vor.u32 %v6115_v58, %v4254_v55 }
  0xf8   :  { %3554 = vmatpush.bf16.msrb.mxu2 %v5851_v60  ;;  %v6468_v46 = vld [vmem:[%s9842_s1 + $0xd04] sm:$0xf]  ;;  %v5672_v47 = vld [vmem:[%s9842_s1 + $0xd10] sm:$0xf0]  ;;  %v5547_v57 = vor.u32 %v6436_v40, %v5544_v43  ;;  %v6147_v60 = vld [vmem:[%s9842_s1 + $0x2f4] sm:$0xf0] }
  0xf9   :  { %3567 = vmatpush.bf16.msrb.mxu3 %v5979_v1  ;;  %v6500_v48 = vld [vmem:[%s9842_s1 + $0xe04] sm:$0xf]  ;;  %v5800_v50 = vld [vmem:[%s9842_s1 + $0xe10] sm:$0xf0]  ;;  %v5675_v61 = vor.u32 %v6468_v46, %v5672_v47  ;;  %v6179_v1 = vld [vmem:[%s9842_s1 + $0x3f4] sm:$0xf0]  ;;  %v4383_v7 = vor.u32 %v6147_v60, %v4382_v59 }
  0xfa   :  { %3529 = vmatpush.bf16.msrb.mxu0 %v5579_v14  ;;  %v6532_v51 = vld [vmem:[%s9842_s1 + $0xf04] sm:$0xf]  ;;  %v5928_v62 = vld [vmem:[%s9842_s1 + $0xf10] sm:$0xf0]  ;;  %v5803_v63 = vor.u32 %v6500_v48, %v5800_v50  ;;  %v4511_v12 = vor.u32 %v6179_v1, %v4510_v0  ;;  %v4366_v14 = vld [vmem:[%s9842_s1 + $0x2c8] sm:$0xf] }
  0xfb   :  { %3542 = vmatpush.bf16.msrb.mxu1 %v5707_v17  ;;  %v5931_v2 = vor.u32 %v6532_v51, %v5928_v62  ;;  %v4494_v17 = vld [vmem:[%s9842_s1 + $0x3c8] sm:$0xf]  ;;  %v4367_v24 = vor.u32 %v6143_v15, %v4366_v14  ;;  %v6075_v27 = vld [vmem:[%s9842_s1 + $0xb4] sm:$0xf0] }
  0xfc   :  { %3555 = vmatpush.bf16.msrb.mxu2 %v5835_v18  ;;  %v6175_v18 = vld [vmem:[%s9842_s1 + $0x3d4] sm:$0xf0]  ;;  %v4222_v32 = vld [vmem:[%s9842_s1 + $0x1a8] sm:$0xf] }
  0xfd   :  { %3568 = vmatpush.bf16.msrb.mxu3 %v5963_v26  ;;  %v4094_v26 = vld [vmem:[%s9842_s1 + $0xa8] sm:$0xf]  ;;  %v4495_v34 = vor.u32 %v6175_v18, %v4494_v17  ;;  %v6107_v36 = vld [vmem:[%s9842_s1 + $0x1b4] sm:$0xf0] }
  0xfe   :  { %3530 = vmatpush.bf16.msrb.mxu0 %v5563_v39  ;;  %v4350_v37 = vld [vmem:[%s9842_s1 + $0x2a8] sm:$0xf]  ;;  %v6139_v39 = vld [vmem:[%s9842_s1 + $0x2b4] sm:$0xf0] }
  0xff   :  { %3543 = vmatpush.bf16.msrb.mxu1 %v5691_v11  ;;  %v4478_v40 = vld [vmem:[%s9842_s1 + $0x3a8] sm:$0xf]  ;;  %v6171_v43 = vld [vmem:[%s9842_s1 + $0x3b4] sm:$0xf0]  ;;  %v4095_v11 = vor.u32 %v6075_v27, %v4094_v26  ;;  %v4351_v46 = vor.u32 %v6139_v39, %v4350_v37 }
 0x100   :  { %3556 = vmatpush.bf16.msrb.mxu2 %v5819_v45  ;;  %v4223_v45 = vor.u32 %v6107_v36, %v4222_v32  ;;  %v4078_v47 = vld [vmem:[%s9842_s1 + $0x88] sm:$0xf]  ;;  %v6071_v48 = vld [vmem:[%s9842_s1 + $0x94] sm:$0xf0]  ;;  %v4479_v50 = vor.u32 %v6171_v43, %v4478_v40 }
 0x101   :  { %3569 = vmatpush.bf16.msrb.mxu3 %v5947_v49  ;;  %v4206_v49 = vld [vmem:[%s9842_s1 + $0x188] sm:$0xf]  ;;  %v6103_v51 = vld [vmem:[%s9842_s1 + $0x194] sm:$0xf0] }
 0x102   :  { %3531 = vmatpush.bf16.msrb.mxu0 %v5547_v57  ;;  %v4334_v62 = vld [vmem:[%s9842_s1 + $0x288] sm:$0xf]  ;;  %v6135_v52 = vld [vmem:[%s9842_s1 + $0x294] sm:$0xf0]  ;;  %v4079_v57 = vor.u32 %v6071_v48, %v4078_v47  ;;  %v4207_v59 = vor.u32 %v6103_v51, %v4206_v49 }
 0x103   :  { %3544 = vmatpush.bf16.msrb.mxu1 %v5675_v61  ;;  %v4462_v54 = vld [vmem:[%s9842_s1 + $0x388] sm:$0xf]  ;;  %v6167_v55 = vld [vmem:[%s9842_s1 + $0x394] sm:$0xf0]  ;;  %v3338_v58 = vpop.f32.mrf.mxu1  ;;  %v4335_v60 = vor.u32 %v6135_v52, %v4334_v62 }
 0x104   :  { %3557 = vmatpush.bf16.msrb.mxu2 %v5803_v63  ;;  %v3325_v53 = vpop.f32.mrf.mxu0  ;;  %v4062_v61 = vld [vmem:[%s9842_s1 + $0x68] sm:$0xf]  ;;  %v6067_v63 = vld [vmem:[%s9842_s1 + $0x74] sm:$0xf0] }
 0x105   :  { %3570 = vmatpush.bf16.msrb.mxu3 %v5931_v2  ;;  %3532 = vmatmul.bf16.vlgmr.msrb.gmra.mxu0 %v7447_v23  ;;  %v3326_v56 = vadd.f32 %v3325_v53, %v8167_v16  ;;  %v4190_v0 = vld [vmem:[%s9842_s1 + $0x168] sm:$0xf]  ;;  %v4463_v16 = vor.u32 %v6167_v55, %v4462_v54  ;;  %v6099_v2 = vld [vmem:[%s9842_s1 + $0x174] sm:$0xf0]  ;;  %v4063_v9 = vor.u32 %v6067_v63, %v4062_v61 }
 0x106   :  { %3576 = vmatpush.bf16.msra.mxu0 %v4127_v3  ;;  %3545 = vmatmul.bf16.vlgmr.msrb.gmra.mxu1 %v7460_v31  ;;  %v4318_v3 = vld [vmem:[%s9842_s1 + $0x268] sm:$0xf]  ;;  %v6163_v8 = vld [vmem:[%s9842_s1 + $0x374] sm:$0xf0]  ;;  %v4191_v10 = vor.u32 %v6099_v2, %v4190_v0 }
 0x107   :  { %3589 = vmatpush.bf16.msra.mxu1 %v4255_v5  ;;  %3558 = vmatmul.bf16.vlgmr.msrb.gmra.mxu2 %v7458_v28  ;;  %v3339_v1 = vadd.f32 %v3338_v58, %v3326_v56  ;;  %v6131_v5 = vld [vmem:[%s9842_s1 + $0x274] sm:$0xf0]  ;;  %v4046_v13 = vld [vmem:[%s9842_s1 + $0x48] sm:$0xf] }
 0x108   :  { %3602 = vmatpush.bf16.msra.mxu2 %v4383_v7  ;;  %3571 = vmatmul.bf16.vlgmr.msrb.gmra.mxu3 %v7468_v35  ;;  %v4446_v7 = vld [vmem:[%s9842_s1 + $0x368] sm:$0xf]  ;;  %v6063_v14 = vld [vmem:[%s9842_s1 + $0x54] sm:$0xf0] }
 0x109   :  { %3615 = vmatpush.bf16.msra.mxu3 %v4511_v12  ;;  %v4319_v12 = vor.u32 %v6131_v5, %v4318_v3  ;;  %v4174_v15 = vld [vmem:[%s9842_s1 + $0x148] sm:$0xf]  ;;  %v4447_v17 = vor.u32 %v6163_v8, %v4446_v7  ;;  %v4047_v37 = vor.u32 %v6063_v14, %v4046_v13  ;;  %v6091_v49 = vld [vmem:[%s9842_s1 + $0x134] sm:$0xf0] }
 0x10a   :  { %3577 = vmatpush.bf16.msra.mxu0 %v4111_v19  ;;  %v6095_v19 = vld [vmem:[%s9842_s1 + $0x154] sm:$0xf0]  ;;  %v4430_v32 = vld [vmem:[%s9842_s1 + $0x348] sm:$0xf] }
 0x10b   :  { %3590 = vmatpush.bf16.msra.mxu1 %v4239_v22  ;;  %v4302_v22 = vld [vmem:[%s9842_s1 + $0x248] sm:$0xf]  ;;  %v3364_v27 = vpop.f32.mrf.mxu3  ;;  %v3340_v39 = vpop.f32.mrf.mxu1  ;;  %v4175_v43 = vor.u32 %v6095_v19, %v4174_v15  ;;  %v6123_v51 = vld [vmem:[%s9842_s1 + $0x234] sm:$0xf0] }
 0x10c   :  { %3603 = vmatpush.bf16.msra.mxu2 %v4367_v24  ;;  %v3351_v18 = vpop.f32.mrf.mxu2  ;;  %v6127_v24 = vld [vmem:[%s9842_s1 + $0x254] sm:$0xf0]  ;;  %v3327_v36 = vpop.f32.mrf.mxu0  ;;  %v4158_v47 = vld [vmem:[%s9842_s1 + $0x128] sm:$0xf] }
 0x10d   :  { %3616 = vmatpush.bf16.msra.mxu3 %v4495_v34  ;;  %v3352_v26 = vadd.f32 %v3351_v18, %v3339_v1  ;;  %v6159_v34 = vld [vmem:[%s9842_s1 + $0x354] sm:$0xf0]  ;;  %v4414_v62 = vld [vmem:[%s9842_s1 + $0x328] sm:$0xf]  ;;  %v4159_v56 = vor.u32 %v6091_v49, %v4158_v47 }
 0x10e   :  { %3578 = vmatpush.bf16.msra.mxu0 %v4095_v11  ;;  %v4303_v11 = vor.u32 %v6127_v24, %v4302_v22  ;;  %v4431_v48 = vor.u32 %v6159_v34, %v4430_v32  ;;  %v6155_v52 = vld [vmem:[%s9842_s1 + $0x334] sm:$0xf0]  ;;  %v4014_v54 = vld [vmem:[%s9842_s1 + $0x8] sm:$0xf] }
 0x10f   :  { %3591 = vmatpush.bf16.msra.mxu1 %v4223_v45  ;;  %v8366_v40 = vadd.f32 %v3364_v27, %v3352_v26  ;;  %v4030_v45 = vld [vmem:[%s9842_s1 + $0x28] sm:$0xf]  ;;  %v6055_v55 = vld [vmem:[%s9842_s1 + $0x14] sm:$0xf0]  ;;  %v4415_v61 = vor.u32 %v6155_v52, %v4414_v62 }
 0x110   :  { %3604 = vmatpush.bf16.msra.mxu2 %v4351_v46  ;;  %v6059_v46 = vld [vmem:[%s9842_s1 + $0x34] sm:$0xf0]  ;;  %v4142_v58 = vld [vmem:[%s9842_s1 + $0x108] sm:$0xf]  ;;  %v4015_v8 = vor.u32 %v6055_v55, %v4014_v54 }
 0x111   :  { %3617 = vmatpush.bf16.msra.mxu3 %v4479_v50  ;;  %v4286_v50 = vld [vmem:[%s9842_s1 + $0x228] sm:$0xf]  ;;  %v4031_v53 = vor.u32 %v6059_v46, %v4030_v45  ;;  %v6119_v63 = vld [vmem:[%s9842_s1 + $0x214] sm:$0xf0] }
 0x112   :  { %3579 = vmatpush.bf16.msra.mxu0 %v4079_v57  ;;  %v4287_v57 = vor.u32 %v6123_v51, %v4286_v50  ;;  %v4398_v0 = vld [vmem:[%s9842_s1 + $0x308] sm:$0xf]  ;;  %v6211_v3 = vld [vmem:[%s9842_s1 + $0x4f4] sm:$0xf0] }
 0x113   :  { %3592 = vmatpush.bf16.msra.mxu1 %v4207_v59  ;;  %v6087_v59 = vld [vmem:[%s9842_s1 + $0x114] sm:$0xf0]  ;;  %v4638_v2 = vld [vmem:[%s9842_s1 + $0x4e8] sm:$0xf]  ;;  %v3366_v7 = vpop.f32.mrf.mxu3 }
 0x114   :  { %3605 = vmatpush.bf16.msra.mxu2 %v4335_v60  ;;  %v4270_v60 = vld [vmem:[%s9842_s1 + $0x208] sm:$0xf]  ;;  %v3353_v1 = vpop.f32.mrf.mxu2  ;;  %v4143_v13 = vor.u32 %v6087_v59, %v4142_v58  ;;  %v4639_v19 = vor.u32 %v6211_v3, %v4638_v2  ;;  %v6207_v27 = vld [vmem:[%s9842_s1 + $0x4d4] sm:$0xf0] }
 0x115   :  { %3618 = vmatpush.bf16.msra.mxu3 %v4463_v16  ;;  %v6151_v16 = vld [vmem:[%s9842_s1 + $0x314] sm:$0xf0]  ;;  %v4766_v5 = vld [vmem:[%s9842_s1 + $0x5e8] sm:$0xf]  ;;  %v4271_v14 = vor.u32 %v6119_v63, %v4270_v60  ;;  %v6564_v63 = vld [vmem:[%s9844_s2] sm:$0xf] }
 0x116   :  { %3580 = vmatpush.bf16.msra.mxu0 %v4063_v9  ;;  %v6243_v9 = vld [vmem:[%s9842_s1 + $0x5f4] sm:$0xf0]  ;;  %v5022_v15 = vld [vmem:[%s9842_s1 + $0x7e8] sm:$0xf]  ;;  %v4399_v18 = vor.u32 %v6151_v16, %v4398_v0  ;;  %v537_v0 = vperm.slane %v6564_v63, 1 }
 0x117   :  { %3593 = vmatpush.bf16.msra.mxu1 %v4191_v10  ;;  %v4894_v10 = vld [vmem:[%s9842_s1 + $0x6e8] sm:$0xf]  ;;  %v4767_v22 = vor.u32 %v6243_v9, %v4766_v5  ;;  %v6239_v36 = vld [vmem:[%s9842_s1 + $0x5d4] sm:$0xf0] }
 0x118   :  { %3606 = vmatpush.bf16.msra.mxu2 %v4319_v12  ;;  %v6275_v12 = vld [vmem:[%s9842_s1 + $0x6f4] sm:$0xf0]  ;;  %v4622_v26 = vld [vmem:[%s9842_s1 + $0x4c8] sm:$0xf] }
 0x119   :  { %3619 = vmatpush.bf16.msra.mxu3 %v4447_v17  ;;  %v6307_v17 = vld [vmem:[%s9842_s1 + $0x7f4] sm:$0xf0]  ;;  %v4895_v24 = vor.u32 %v6275_v12, %v4894_v10  ;;  %v4750_v32 = vld [vmem:[%s9842_s1 + $0x5c8] sm:$0xf]  ;;  %v4623_v45 = vor.u32 %v6207_v27, %v4622_v26 }
 0x11a   :  { %3581 = vmatpush.bf16.msra.mxu0 %v4047_v37  ;;  %v5023_v34 = vor.u32 %v6307_v17, %v5022_v15  ;;  %v4878_v37 = vld [vmem:[%s9842_s1 + $0x6c8] sm:$0xf]  ;;  %v6271_v39 = vld [vmem:[%s9842_s1 + $0x6d4] sm:$0xf0]  ;;  %v4751_v46 = vor.u32 %v6239_v36, %v4750_v32 }
 0x11b   :  { %3594 = vmatpush.bf16.msra.mxu1 %v4175_v43  ;;  %v5006_v43 = vld [vmem:[%s9842_s1 + $0x7c8] sm:$0xf]  ;;  %v4879_v47 = vor.u32 %v6271_v39, %v4878_v37  ;;  %v6203_v49 = vld [vmem:[%s9842_s1 + $0x4b4] sm:$0xf0] }
 0x11c   :  { %3607 = vmatpush.bf16.msra.mxu2 %v4303_v11  ;;  %v6303_v11 = vld [vmem:[%s9842_s1 + $0x7d4] sm:$0xf0]  ;;  %v4734_v50 = vld [vmem:[%s9842_s1 + $0x5a8] sm:$0xf] }
 0x11d   :  { %3620 = vmatpush.bf16.msra.mxu3 %v4431_v48  ;;  %v4606_v48 = vld [vmem:[%s9842_s1 + $0x4a8] sm:$0xf]  ;;  %v5007_v51 = vor.u32 %v6303_v11, %v5006_v43  ;;  %v6235_v62 = vld [vmem:[%s9842_s1 + $0x5b4] sm:$0xf0] }
 0x11e   :  { %3582 = vmatpush.bf16.msra.mxu0 %v4031_v53  ;;  %v4862_v52 = vld [vmem:[%s9842_s1 + $0x6a8] sm:$0xf]  ;;  %v6267_v53 = vld [vmem:[%s9842_s1 + $0x6b4] sm:$0xf0]  ;;  %v4735_v58 = vor.u32 %v6235_v62, %v4734_v50 }
 0x11f   :  { %3595 = vmatpush.bf16.msra.mxu1 %v4159_v56  ;;  %v4990_v54 = vld [vmem:[%s9842_s1 + $0x7a8] sm:$0xf]  ;;  %v6299_v55 = vld [vmem:[%s9842_s1 + $0x7b4] sm:$0xf0]  ;;  %v4607_v56 = vor.u32 %v6203_v49, %v4606_v48  ;;  %v4863_v59 = vor.u32 %v6267_v53, %v4862_v52 }
 0x120   :  { %3608 = vmatpush.bf16.msra.mxu2 %v4287_v57  ;;  %v4590_v57 = vld [vmem:[%s9842_s1 + $0x488] sm:$0xf]  ;;  %v6199_v60 = vld [vmem:[%s9842_s1 + $0x494] sm:$0xf0]  ;;  %v4991_v16 = vor.u32 %v6299_v55, %v4990_v54 }
 0x121   :  { %3621 = vmatpush.bf16.msra.mxu3 %v4415_v61  ;;  %v4718_v61 = vld [vmem:[%s9842_s1 + $0x588] sm:$0xf]  ;;  %v6231_v1 = vld [vmem:[%s9842_s1 + $0x594] sm:$0xf0] }
 0x122   :  { %3583 = vmatpush.bf16.msra.mxu0 %v4015_v8  ;;  %v4846_v2 = vld [vmem:[%s9842_s1 + $0x688] sm:$0xf]  ;;  %v6263_v3 = vld [vmem:[%s9842_s1 + $0x694] sm:$0xf0]  ;;  %v4591_v8 = vor.u32 %v6199_v60, %v4590_v57  ;;  %v3377_v9 = vpop.f32.mrf.mxu0  ;;  %v4719_v10 = vor.u32 %v6231_v1, %v4718_v61 }
 0x123   :  { %3596 = vmatpush.bf16.msra.mxu1 %v4143_v13  ;;  %v4974_v5 = vld [vmem:[%s9842_s1 + $0x788] sm:$0xf]  ;;  %v6295_v7 = vld [vmem:[%s9842_s1 + $0x794] sm:$0xf0]  ;;  %v4847_v12 = vor.u32 %v6263_v3, %v4846_v2  ;;  %v3378_v17 = vadd.f32 %v3377_v9, %v537_v0 }
 0x124   :  { %3609 = vmatpush.bf16.msra.mxu2 %v4271_v14  ;;  %v4574_v13 = vld [vmem:[%s9842_s1 + $0x468] sm:$0xf]  ;;  %v6195_v14 = vld [vmem:[%s9842_s1 + $0x474] sm:$0xf0] }
 0x125   :  { %3622 = vmatpush.bf16.msra.mxu3 %v4399_v18  ;;  %3584 = vmatmul.bf16.vlgmr.msra.gmra.mxu0 %v6885_v20  ;;  %v4702_v15 = vld [vmem:[%s9842_s1 + $0x568] sm:$0xf]  ;;  %v3390_v18 = vpop.f32.mrf.mxu1  ;;  %v6259_v26 = vld [vmem:[%s9842_s1 + $0x674] sm:$0xf0]  ;;  %v4575_v36 = vor.u32 %v6195_v14, %v4574_v13 }
 0x126   :  { %3628 = vmatpush.bf16.msrb.mxu0 %v4639_v19  ;;  %3597 = vmatmul.bf16.vlgmr.msra.gmra.mxu1 %v6888_v21  ;;  %v4975_v19 = vor.u32 %v6295_v7, %v4974_v5  ;;  %v4958_v27 = vld [vmem:[%s9842_s1 + $0x768] sm:$0xf]  ;;  %v6291_v32 = vld [vmem:[%s9842_s1 + $0x774] sm:$0xf0] }
 0x127   :  { %3641 = vmatpush.bf16.msrb.mxu1 %v4767_v22  ;;  %3610 = vmatmul.bf16.vlgmr.msra.gmra.mxu2 %v6853_v4  ;;  %v6227_v22 = vld [vmem:[%s9842_s1 + $0x574] sm:$0xf0]  ;;  %v4558_v43 = vld [vmem:[%s9842_s1 + $0x448] sm:$0xf] }
 0x128   :  { %3654 = vmatpush.bf16.msrb.mxu2 %v4895_v24  ;;  %3623 = vmatmul.bf16.vlgmr.msra.gmra.mxu3 %v6858_v6  ;;  %v4830_v24 = vld [vmem:[%s9842_s1 + $0x668] sm:$0xf]  ;;  %v4703_v37 = vor.u32 %v6227_v22, %v4702_v15  ;;  %v6191_v11 = vld [vmem:[%s9842_s1 + $0x454] sm:$0xf0] }
 0x129   :  { %3667 = vmatpush.bf16.msrb.mxu3 %v5023_v34  ;;  %v3391_v34 = vadd.f32 %v3390_v18, %v3378_v17  ;;  %v4831_v39 = vor.u32 %v6259_v26, %v4830_v24  ;;  %v6223_v48 = vld [vmem:[%s9842_s1 + $0x554] sm:$0xf0]  ;;  %v4814_v49 = vld [vmem:[%s9842_s1 + $0x648] sm:$0xf]  ;;  %v4559_v54 = vor.u32 %v6191_v11, %v4558_v43 }
 0x12a   :  { %3629 = vmatpush.bf16.msrb.mxu0 %v4623_v45  ;;  %v4686_v45 = vld [vmem:[%s9842_s1 + $0x548] sm:$0xf]  ;;  %v6255_v50 = vld [vmem:[%s9842_s1 + $0x654] sm:$0xf0] }
 0x12b   :  { %3642 = vmatpush.bf16.msrb.mxu1 %v4751_v46  ;;  %v3403_v46 = vpop.f32.mrf.mxu2  ;;  %v3416_v62 = vpop.f32.mrf.mxu3  ;;  %v4942_v52 = vld [vmem:[%s9842_s1 + $0x748] sm:$0xf]  ;;  %v6287_v53 = vld [vmem:[%s9842_s1 + $0x754] sm:$0xf0]  ;;  %v4687_v57 = vor.u32 %v6223_v48, %v4686_v45 }
 0x12c   :  { %3655 = vmatpush.bf16.msrb.mxu2 %v4879_v47  ;;  %v4959_v47 = vor.u32 %v6291_v32, %v4958_v27  ;;  %v6187_v60 = vld [vmem:[%s9842_s1 + $0x434] sm:$0xf0]  ;;  %v4670_v61 = vld [vmem:[%s9842_s1 + $0x528] sm:$0xf]  ;;  %v4943_v0 = vor.u32 %v6287_v53, %v4942_v52 }
 0x12d   :  { %3668 = vmatpush.bf16.msrb.mxu3 %v5007_v51  ;;  %v3404_v51 = vadd.f32 %v3403_v46, %v3391_v34  ;;  %v3392_v63 = vpop.f32.mrf.mxu1  ;;  %v4798_v1 = vld [vmem:[%s9842_s1 + $0x628] sm:$0xf]  ;;  %v6251_v2 = vld [vmem:[%s9842_s1 + $0x634] sm:$0xf0] }
 0x12e   :  { %3630 = vmatpush.bf16.msrb.mxu0 %v4607_v56  ;;  %v3379_v56 = vpop.f32.mrf.mxu0  ;;  %v4926_v3 = vld [vmem:[%s9842_s1 + $0x728] sm:$0xf]  ;;  %v6283_v5 = vld [vmem:[%s9842_s1 + $0x734] sm:$0xf0] }
 0x12f   :  { %3643 = vmatpush.bf16.msrb.mxu1 %v4735_v58  ;;  %v8567_v55 = vadd.f32 %v3416_v62, %v3404_v51  ;;  %v4815_v58 = vor.u32 %v6255_v50, %v4814_v49  ;;  %v6183_v9 = vld [vmem:[%s9842_s1 + $0x414] sm:$0xf0]  ;;  %v4654_v13 = vld [vmem:[%s9842_s1 + $0x508] sm:$0xf]  ;;  %v4927_v18 = vor.u32 %v6283_v5, %v4926_v3 }
 0x130   :  { %3656 = vmatpush.bf16.msrb.mxu2 %v4863_v59  ;;  %v4542_v59 = vld [vmem:[%s9842_s1 + $0x428] sm:$0xf]  ;;  %v6215_v14 = vld [vmem:[%s9842_s1 + $0x514] sm:$0xf0] }
 0x131   :  { %3669 = vmatpush.bf16.msrb.mxu3 %v4991_v16  ;;  %v6219_v16 = vld [vmem:[%s9842_s1 + $0x534] sm:$0xf0]  ;;  %v4543_v7 = vor.u32 %v6187_v60, %v4542_v59  ;;  %v4782_v15 = vld [vmem:[%s9842_s1 + $0x608] sm:$0xf]  ;;  %v4655_v11 = vor.u32 %v6215_v14, %v4654_v13 }
 0x132   :  { %3631 = vmatpush.bf16.msrb.mxu0 %v4591_v8  ;;  %v4526_v8 = vld [vmem:[%s9842_s1 + $0x408] sm:$0xf]  ;;  %v6279_v24 = vld [vmem:[%s9842_s1 + $0x714] sm:$0xf0] }
 0x133   :  { %3644 = vmatpush.bf16.msrb.mxu1 %v4719_v10  ;;  %v4671_v10 = vor.u32 %v6219_v16, %v4670_v61  ;;  %v3405_v17 = vpop.f32.mrf.mxu2  ;;  %v4910_v22 = vld [vmem:[%s9842_s1 + $0x708] sm:$0xf]  ;;  %v3418_v26 = vpop.f32.mrf.mxu3  ;;  %v6339_v32 = vld [vmem:[%s9842_s1 + $0x8f4] sm:$0xf0] }
 0x134   :  { %3657 = vmatpush.bf16.msrb.mxu2 %v4847_v12  ;;  %v4799_v12 = vor.u32 %v6251_v2, %v4798_v1  ;;  %v5150_v27 = vld [vmem:[%s9842_s1 + $0x8e8] sm:$0xf]  ;;  %v6403_v43 = vld [vmem:[%s9842_s1 + $0xaf4] sm:$0xf0]  ;;  %v4911_v48 = vor.u32 %v6279_v24, %v4910_v22 }
 0x135   :  { %3670 = vmatpush.bf16.msrb.mxu3 %v4975_v19  ;;  %v6247_v19 = vld [vmem:[%s9842_s1 + $0x614] sm:$0xf0]  ;;  %v5278_v34 = vld [vmem:[%s9842_s1 + $0x9e8] sm:$0xf]  ;;  %v5151_v49 = vor.u32 %v6339_v32, %v5150_v27 }
 0x136   :  { %3632 = vmatpush.bf16.msrb.mxu0 %v4575_v36  ;;  %v4527_v36 = vor.u32 %v6183_v9, %v4526_v8  ;;  %v4783_v45 = vor.u32 %v6247_v19, %v4782_v15  ;;  %v5534_v46 = vld [vmem:[%s9842_s1 + $0xbe8] sm:$0xf]  ;;  %v6335_v52 = vld [vmem:[%s9842_s1 + $0x8d4] sm:$0xf0] }
 0x137   :  { %3645 = vmatpush.bf16.msrb.mxu1 %v4703_v37  ;;  %v6371_v37 = vld [vmem:[%s9842_s1 + $0x9f4] sm:$0xf0]  ;;  %v5134_v62 = vld [vmem:[%s9842_s1 + $0x8c8] sm:$0xf] }
 0x138   :  { %3658 = vmatpush.bf16.msrb.mxu2 %v4831_v39  ;;  %v5406_v39 = vld [vmem:[%s9842_s1 + $0xae8] sm:$0xf]  ;;  %v5279_v50 = vor.u32 %v6371_v37, %v5278_v34  ;;  %v6367_v56 = vld [vmem:[%s9842_s1 + $0x9d4] sm:$0xf0]  ;;  %v5135_v61 = vor.u32 %v6335_v52, %v5134_v62 }
 0x139   :  { %3671 = vmatpush.bf16.msrb.mxu3 %v4959_v47  ;;  %v6435_v47 = vld [vmem:[%s9842_s1 + $0xbf4] sm:$0xf0]  ;;  %v5407_v51 = vor.u32 %v6403_v43, %v5406_v39  ;;  %v5262_v53 = vld [vmem:[%s9842_s1 + $0x9c8] sm:$0xf] }
 0x13a   :  { %3633 = vmatpush.bf16.msrb.mxu0 %v4559_v54  ;;  %v5535_v54 = vor.u32 %v6435_v47, %v5534_v46  ;;  %v5518_v59 = vld [vmem:[%s9842_s1 + $0xbc8] sm:$0xf]  ;;  %v6431_v60 = vld [vmem:[%s9842_s1 + $0xbd4] sm:$0xf0]  ;;  %v5263_v63 = vor.u32 %v6367_v56, %v5262_v53 }
 0x13b   :  { %3646 = vmatpush.bf16.msrb.mxu1 %v4687_v57  ;;  %v5390_v57 = vld [vmem:[%s9842_s1 + $0xac8] sm:$0xf]  ;;  %v6331_v1 = vld [vmem:[%s9842_s1 + $0x8b4] sm:$0xf0]  ;;  %v5519_v3 = vor.u32 %v6431_v60, %v5518_v59 }
 0x13c   :  { %3659 = vmatpush.bf16.msrb.mxu2 %v4815_v58  ;;  %v6399_v58 = vld [vmem:[%s9842_s1 + $0xad4] sm:$0xf0]  ;;  %v5118_v16 = vld [vmem:[%s9842_s1 + $0x8a8] sm:$0xf] }
 0x13d   :  { %3672 = vmatpush.bf16.msrb.mxu3 %v4943_v0  ;;  %v5391_v0 = vor.u32 %v6399_v58, %v5390_v57  ;;  %v5246_v2 = vld [vmem:[%s9842_s1 + $0x9a8] sm:$0xf]  ;;  %v6363_v5 = vld [vmem:[%s9842_s1 + $0x9b4] sm:$0xf0] }
 0x13e   :  { %3634 = vmatpush.bf16.msrb.mxu0 %v4543_v7  ;;  %v5374_v7 = vld [vmem:[%s9842_s1 + $0xaa8] sm:$0xf]  ;;  %v6395_v8 = vld [vmem:[%s9842_s1 + $0xab4] sm:$0xf0]  ;;  %v5247_v13 = vor.u32 %v6363_v5, %v5246_v2 }
 0x13f   :  { %3647 = vmatpush.bf16.msrb.mxu1 %v4671_v10  ;;  %v5502_v9 = vld [vmem:[%s9842_s1 + $0xba8] sm:$0xf]  ;;  %v6427_v10 = vld [vmem:[%s9842_s1 + $0xbb4] sm:$0xf0]  ;;  %v5375_v14 = vor.u32 %v6395_v8, %v5374_v7 }
 0x140   :  { %3660 = vmatpush.bf16.msrb.mxu2 %v4799_v12  ;;  %v5119_v12 = vor.u32 %v6331_v1, %v5118_v16  ;;  %v5102_v15 = vld [vmem:[%s9842_s1 + $0x888] sm:$0xf]  ;;  %v6327_v17 = vld [vmem:[%s9842_s1 + $0x894] sm:$0xf0]  ;;  %v5503_v19 = vor.u32 %v6427_v10, %v5502_v9 }
 0x141   :  { %3673 = vmatpush.bf16.msrb.mxu3 %v4927_v18  ;;  %v5230_v18 = vld [vmem:[%s9842_s1 + $0x988] sm:$0xf]  ;;  %v6359_v22 = vld [vmem:[%s9842_s1 + $0x994] sm:$0xf0]  ;;  %v5103_v34 = vor.u32 %v6327_v17, %v5102_v15 }
 0x142   :  { %3635 = vmatpush.bf16.msrb.mxu0 %v4527_v36  ;;  %v5358_v24 = vld [vmem:[%s9842_s1 + $0xa88] sm:$0xf]  ;;  %v6391_v26 = vld [vmem:[%s9842_s1 + $0xa94] sm:$0xf0]  ;;  %v8717_v36 = vpop.f32.mrf.mxu0  ;;  %v5231_v37 = vor.u32 %v6359_v22, %v5230_v18 }
 0x143   :  { %3648 = vmatpush.bf16.msrb.mxu1 %v4655_v11  ;;  %v5486_v27 = vld [vmem:[%s9842_s1 + $0xb88] sm:$0xf]  ;;  %v6423_v32 = vld [vmem:[%s9842_s1 + $0xb94] sm:$0xf0]  ;;  %v5359_v39 = vor.u32 %v6391_v26, %v5358_v24  ;;  %v8728_v46 = vpop.f32.mrf.mxu1 }
 0x144   :  { %3661 = vmatpush.bf16.msrb.mxu2 %v4783_v45  ;;  %v5086_v43 = vld [vmem:[%s9842_s1 + $0x868] sm:$0xf]  ;;  %v6323_v11 = vld [vmem:[%s9842_s1 + $0x874] sm:$0xf0]  ;;  %v5487_v47 = vor.u32 %v6423_v32, %v5486_v27 }
 0x145   :  { %3674 = vmatpush.bf16.msrb.mxu3 %v4911_v48  ;;  %3636 = vmatmul.bf16.vlgmr.msrb.gmra.mxu0 %v7044_v41  ;;  %v5214_v45 = vld [vmem:[%s9842_s1 + $0x968] sm:$0xf]  ;;  %v6355_v48 = vld [vmem:[%s9842_s1 + $0x974] sm:$0xf0]  ;;  %v5087_v52 = vor.u32 %v6323_v11, %v5086_v43 }
 0x146   :  { %3680 = vmatpush.bf16.msra.mxu0 %v5151_v49  ;;  %3649 = vmatmul.bf16.vlgmr.msrb.gmra.mxu1 %v7048_v44  ;;  %v5342_v49 = vld [vmem:[%s9842_s1 + $0xa68] sm:$0xf]  ;;  %v6419_v62 = vld [vmem:[%s9842_s1 + $0xb74] sm:$0xf0]  ;;  %v5215_v53 = vor.u32 %v6355_v48, %v5214_v45 }
 0x147   :  { %3693 = vmatpush.bf16.msra.mxu1 %v5279_v50  ;;  %3662 = vmatmul.bf16.vlgmr.msrb.gmra.mxu2 %v7036_v38  ;;  %v6387_v50 = vld [vmem:[%s9842_s1 + $0xa74] sm:$0xf0]  ;;  %v5070_v56 = vld [vmem:[%s9842_s1 + $0x848] sm:$0xf] }
 0x148   :  { %3706 = vmatpush.bf16.msra.mxu2 %v5407_v51  ;;  %3675 = vmatmul.bf16.vlgmr.msrb.gmra.mxu3 %v7046_v42  ;;  %v5470_v51 = vld [vmem:[%s9842_s1 + $0xb68] sm:$0xf]  ;;  %v6319_v57 = vld [vmem:[%s9842_s1 + $0x854] sm:$0xf0] }
 0x149   :  { %3719 = vmatpush.bf16.msra.mxu3 %v5535_v54  ;;  %v5343_v54 = vor.u32 %v6387_v50, %v5342_v49  ;;  %v5198_v58 = vld [vmem:[%s9842_s1 + $0x948] sm:$0xf]  ;;  %v5471_v60 = vor.u32 %v6419_v62, %v5470_v51  ;;  %v6415_v2 = vld [vmem:[%s9842_s1 + $0xb54] sm:$0xf0] }
 0x14a   :  { %3681 = vmatpush.bf16.msra.mxu0 %v5135_v61  ;;  %v8754_v59 = vpop.f32.mrf.mxu2  ;;  %v6351_v61 = vld [vmem:[%s9842_s1 + $0x954] sm:$0xf0]  ;;  %v5454_v1 = vld [vmem:[%s9842_s1 + $0xb48] sm:$0xf]  ;;  %v3431_v5 = vpop.f32.mrf.mxu0 }
 0x14b   :  { %3694 = vmatpush.bf16.msra.mxu1 %v5263_v63  ;;  %v5326_v63 = vld [vmem:[%s9842_s1 + $0xa48] sm:$0xf]  ;;  %v8765_v16 = vpop.f32.mrf.mxu3  ;;  %v5199_v7 = vor.u32 %v6351_v61, %v5198_v58  ;;  %v6315_v10 = vld [vmem:[%s9842_s1 + $0x834] sm:$0xf0] }
 0x14c   :  { %3707 = vmatpush.bf16.msra.mxu2 %v5391_v0  ;;  %v6383_v0 = vld [vmem:[%s9842_s1 + $0xa54] sm:$0xf0]  ;;  %v5054_v9 = vld [vmem:[%s9842_s1 + $0x828] sm:$0xf] }
 0x14d   :  { %3720 = vmatpush.bf16.msra.mxu3 %v5519_v3  ;;  %v5071_v3 = vor.u32 %v6319_v57, %v5070_v56  ;;  %v5327_v8 = vor.u32 %v6383_v0, %v5326_v63  ;;  %v6347_v15 = vld [vmem:[%s9842_s1 + $0x934] sm:$0xf0]  ;;  %v5310_v17 = vld [vmem:[%s9842_s1 + $0xa28] sm:$0xf]  ;;  %v5055_v24 = vor.u32 %v6315_v10, %v5054_v9 }
 0x14e   :  { %3682 = vmatpush.bf16.msra.mxu0 %v5119_v12  ;;  %v5182_v12 = vld [vmem:[%s9842_s1 + $0x928] sm:$0xf]  ;;  %v6379_v18 = vld [vmem:[%s9842_s1 + $0xa34] sm:$0xf0] }
 0x14f   :  { %3695 = vmatpush.bf16.msra.mxu1 %v5247_v13  ;;  %v3444_v13 = vpop.f32.mrf.mxu1  ;;  %v6411_v22 = vld [vmem:[%s9842_s1 + $0xb34] sm:$0xf0]  ;;  %v5038_v26 = vld [vmem:[%s9842_s1 + $0x808] sm:$0xf]  ;;  %v5183_v32 = vor.u32 %v6347_v15, %v5182_v12 }
 0x150   :  { %3708 = vmatpush.bf16.msra.mxu2 %v5375_v14  ;;  %v5455_v14 = vor.u32 %v6415_v2, %v5454_v1  ;;  %v6311_v27 = vld [vmem:[%s9842_s1 + $0x814] sm:$0xf0]  ;;  %v5294_v43 = vld [vmem:[%s9842_s1 + $0xa08] sm:$0xf] }
 0x151   :  { %3721 = vmatpush.bf16.msra.mxu3 %v5503_v19  ;;  %v5438_v19 = vld [vmem:[%s9842_s1 + $0xb28] sm:$0xf]  ;;  %v6407_v49 = vld [vmem:[%s9842_s1 + $0xb14] sm:$0xf0] }
 0x152   :  { %3683 = vmatpush.bf16.msra.mxu0 %v5103_v34  ;;  %v5311_v34 = vor.u32 %v6379_v18, %v5310_v17  ;;  %v3457_v11 = vpop.f32.mrf.mxu2  ;;  %v5439_v45 = vor.u32 %v6411_v22, %v5438_v19  ;;  %v5422_v48 = vld [vmem:[%s9842_s1 + $0xb08] sm:$0xf]  ;;  %v6467_v62 = vld [vmem:[%s9842_s1 + $0xcf4] sm:$0xf0] }
 0x153   :  { %3696 = vmatpush.bf16.msra.mxu1 %v5231_v37  ;;  %v5166_v37 = vld [vmem:[%s9842_s1 + $0x908] sm:$0xf]  ;;  %v3470_v50 = vpop.f32.mrf.mxu3  ;;  %v6531_v57 = vld [vmem:[%s9842_s1 + $0xef4] sm:$0xf0]  ;;  %v5423_v0 = vor.u32 %v6407_v49, %v5422_v48 }
 0x154   :  { %3709 = vmatpush.bf16.msra.mxu2 %v5359_v39  ;;  %v6343_v39 = vld [vmem:[%s9842_s1 + $0x914] sm:$0xf0]  ;;  %v5662_v51 = vld [vmem:[%s9842_s1 + $0xce8] sm:$0xf] }
 0x155   :  { %3722 = vmatpush.bf16.msra.mxu3 %v5487_v47  ;;  %v6375_v47 = vld [vmem:[%s9842_s1 + $0xa14] sm:$0xf0]  ;;  %v5918_v56 = vld [vmem:[%s9842_s1 + $0xee8] sm:$0xf]  ;;  %v5167_v58 = vor.u32 %v6343_v39, %v5166_v37  ;;  %v5663_v1 = vor.u32 %v6467_v62, %v5662_v51 }
 0x156   :  { %3684 = vmatpush.bf16.msra.mxu0 %v5087_v52  ;;  %v5790_v52 = vld [vmem:[%s9842_s1 + $0xde8] sm:$0xf]  ;;  %v6563_v63 = vld [vmem:[%s9842_s1 + $0xff4] sm:$0xf0] }
 0x157   :  { %3697 = vmatpush.bf16.msra.mxu1 %v5215_v53  ;;  %v5039_v53 = vor.u32 %v6311_v27, %v5038_v26  ;;  %v6046_v61 = vld [vmem:[%s9842_s1 + $0xfe8] sm:$0xf]  ;;  %v6495_v10 = vld [vmem:[%s9842_s1 + $0xdd4] sm:$0xf0] }
 0x158   :  { %3710 = vmatpush.bf16.msra.mxu2 %v5343_v54  ;;  %v6499_v54 = vld [vmem:[%s9842_s1 + $0xdf4] sm:$0xf0]  ;;  %v5646_v5 = vld [vmem:[%s9842_s1 + $0xcc8] sm:$0xf]  ;;  %v6047_v9 = vor.u32 %v6563_v63, %v6046_v61 }
 0x159   :  { %3723 = vmatpush.bf16.msra.mxu3 %v5471_v60  ;;  %v5295_v60 = vor.u32 %v6375_v47, %v5294_v43  ;;  %v5791_v2 = vor.u32 %v6499_v54, %v5790_v52  ;;  %v5902_v12 = vld [vmem:[%s9842_s1 + $0xec8] sm:$0xf]  ;;  %v6527_v13 = vld [vmem:[%s9842_s1 + $0xed4] sm:$0xf0] }
 0x15a   :  { %3685 = vmatpush.bf16.msra.mxu0 %v5071_v3  ;;  %v5919_v3 = vor.u32 %v6531_v57, %v5918_v56  ;;  %v6559_v15 = vld [vmem:[%s9842_s1 + $0xfd4] sm:$0xf0]  ;;  %v5903_v19 = vor.u32 %v6527_v13, %v5902_v12  ;;  %v5630_v22 = vld [vmem:[%s9842_s1 + $0xca8] sm:$0xf]  ;;  %v3430_v13 = vadd.f32 %v8717_v36, %v8567_v55 }
 0x15b   :  { %3698 = vmatpush.bf16.msra.mxu1 %v5199_v7  ;;  %v6463_v7 = vld [vmem:[%s9842_s1 + $0xcd4] sm:$0xf0]  ;;  %v5758_v26 = vld [vmem:[%s9842_s1 + $0xda8] sm:$0xf] }
 0x15c   :  { %3711 = vmatpush.bf16.msra.mxu2 %v5327_v8  ;;  %v5774_v8 = vld [vmem:[%s9842_s1 + $0xdc8] sm:$0xf]  ;;  %v5647_v17 = vor.u32 %v6463_v7, %v5646_v5  ;;  %v6523_v37 = vld [vmem:[%s9842_s1 + $0xeb4] sm:$0xf0] }
 0x15d   :  { %3724 = vmatpush.bf16.msra.mxu3 %v5455_v14  ;;  %v6030_v14 = vld [vmem:[%s9842_s1 + $0xfc8] sm:$0xf]  ;;  %v5775_v18 = vor.u32 %v6495_v10, %v5774_v8  ;;  %v6555_v43 = vld [vmem:[%s9842_s1 + $0xfb4] sm:$0xf0] }
 0x15e   :  { %3686 = vmatpush.bf16.msra.mxu0 %v5055_v24  ;;  %v6459_v24 = vld [vmem:[%s9842_s1 + $0xcb4] sm:$0xf0]  ;;  %v6031_v27 = vor.u32 %v6559_v15, %v6030_v14  ;;  %v6014_v39 = vld [vmem:[%s9842_s1 + $0xfa8] sm:$0xf] }
 0x15f   :  { %3699 = vmatpush.bf16.msra.mxu1 %v5183_v32  ;;  %v6491_v32 = vld [vmem:[%s9842_s1 + $0xdb4] sm:$0xf0]  ;;  %v5631_v11 = vor.u32 %v6459_v24, %v5630_v22  ;;  %v5614_v48 = vld [vmem:[%s9842_s1 + $0xc88] sm:$0xf]  ;;  %v6015_v51 = vor.u32 %v6555_v43, %v6014_v39 }
 0x160   :  { %3712 = vmatpush.bf16.msra.mxu2 %v5311_v34  ;;  %v5886_v34 = vld [vmem:[%s9842_s1 + $0xea8] sm:$0xf]  ;;  %v6455_v49 = vld [vmem:[%s9842_s1 + $0xc94] sm:$0xf0] }
 0x161   :  { %3725 = vmatpush.bf16.msra.mxu3 %v5439_v45  ;;  %v5759_v45 = vor.u32 %v6491_v32, %v5758_v26  ;;  %v5887_v47 = vor.u32 %v6523_v37, %v5886_v34  ;;  %v5742_v50 = vld [vmem:[%s9842_s1 + $0xd88] sm:$0xf]  ;;  %v6487_v62 = vld [vmem:[%s9842_s1 + $0xd94] sm:$0xf0] }
 0x162   :  { %3687 = vmatpush.bf16.msra.mxu0 %v5039_v53  ;;  %v5870_v52 = vld [vmem:[%s9842_s1 + $0xe88] sm:$0xf]  ;;  %v6519_v53 = vld [vmem:[%s9842_s1 + $0xe94] sm:$0xf0]  ;;  %v8915_v54 = vpop.f32.mrf.mxu0  ;;  %v5743_v61 = vor.u32 %v6487_v62, %v5742_v50 }
 0x163   :  { %3700 = vmatpush.bf16.msra.mxu1 %v5167_v58  ;;  %v5998_v56 = vld [vmem:[%s9842_s1 + $0xf88] sm:$0xf]  ;;  %v6551_v57 = vld [vmem:[%s9842_s1 + $0xf94] sm:$0xf0]  ;;  %v5615_v58 = vor.u32 %v6455_v49, %v5614_v48  ;;  %v5871_v63 = vor.u32 %v6519_v53, %v5870_v52 }
 0x164   :  { %3713 = vmatpush.bf16.msra.mxu2 %v5295_v60  ;;  %v8923_v60 = vpop.f32.mrf.mxu1  ;;  %v6483_v5 = vld [vmem:[%s9842_s1 + $0xd74] sm:$0xf0]  ;;  %v5854_v7 = vld [vmem:[%s9842_s1 + $0xe68] sm:$0xf] }
 0x165   :  { %3726 = vmatpush.bf16.msra.mxu3 %v5423_v0  ;;  %3688 = vmatmul.bf16.vlgmr.msra.gmra.mxu0 %v7237_v25  ;;  %v5598_v0 = vld [vmem:[%s9842_s1 + $0xc68] sm:$0xf]  ;;  %v6515_v8 = vld [vmem:[%s9842_s1 + $0xe74] sm:$0xf0] }
 0x166   :  { %3732 = vmatpush.bf16.msrb.mxu0 %v5663_v1  ;;  %3701 = vmatmul.bf16.vlgmr.msra.gmra.mxu1 %v7250_v30  ;;  %v6451_v1 = vld [vmem:[%s9842_s1 + $0xc74] sm:$0xf0]  ;;  %v5855_v15 = vor.u32 %v6515_v8, %v5854_v7  ;;  %v5838_v36 = vld [vmem:[%s9842_s1 + $0xe48] sm:$0xf] }
 0x167   :  { %3745 = vmatpush.bf16.msrb.mxu1 %v5791_v2  ;;  %3714 = vmatmul.bf16.vlgmr.msra.gmra.mxu2 %v7248_v29  ;;  %v5726_v2 = vld [vmem:[%s9842_s1 + $0xd68] sm:$0xf]  ;;  %v6547_v10 = vld [vmem:[%s9842_s1 + $0xf74] sm:$0xf0]  ;;  %v5599_v12 = vor.u32 %v6451_v1, %v5598_v0 }
 0x168   :  { %3758 = vmatpush.bf16.msrb.mxu2 %v5919_v3  ;;  %3727 = vmatmul.bf16.vlgmr.msra.gmra.mxu3 %v7258_v33  ;;  %v5999_v3 = vor.u32 %v6551_v57, %v5998_v56  ;;  %v5727_v14 = vor.u32 %v6483_v5, %v5726_v2  ;;  %v6479_v55 = vld [vmem:[%s9842_s1 + $0xd54] sm:$0xf0]  ;;  %v5966_v32 = vld [vmem:[%s9842_s1 + $0xf48] sm:$0xf] }
 0x169   :  { %3771 = vmatpush.bf16.msrb.mxu3 %v6047_v9  ;;  %v5982_v9 = vld [vmem:[%s9842_s1 + $0xf68] sm:$0xf]  ;;  %v6511_v26 = vld [vmem:[%s9842_s1 + $0xe54] sm:$0xf0] }
 0x16a   :  { %3733 = vmatpush.bf16.msrb.mxu0 %v5647_v17  ;;  %v5582_v17 = vld [vmem:[%s9842_s1 + $0xc48] sm:$0xf]  ;;  %v5983_v22 = vor.u32 %v6547_v10, %v5982_v9  ;;  %v8960_v24 = vpop.f32.mrf.mxu2  ;;  %v6543_v34 = vld [vmem:[%s9842_s1 + $0xf54] sm:$0xf0]  ;;  %v3483_v37 = vpop.f32.mrf.mxu0 }
 0x16b   :  { %3746 = vmatpush.bf16.msrb.mxu1 %v5775_v18  ;;  %v6447_v18 = vld [vmem:[%s9842_s1 + $0xc54] sm:$0xf0]  ;;  %v5566_v48 = vld [vmem:[%s9842_s1 + $0xc28] sm:$0xf] }
 0x16c   :  { %3759 = vmatpush.bf16.msrb.mxu2 %v5903_v19  ;;  %v5710_v19 = vld [vmem:[%s9842_s1 + $0xd48] sm:$0xf]  ;;  %v5583_v39 = vor.u32 %v6447_v18, %v5582_v17  ;;  %v3496_v43 = vpop.f32.mrf.mxu1  ;;  %v6443_v49 = vld [vmem:[%s9842_s1 + $0xc34] sm:$0xf0]  ;;  %v4256_v18 = vld [vmem:[%s9842_s1 + $0x1f8] sm:$0xf0] }
 0x16d   :  { %3772 = vmatpush.bf16.msrb.mxu3 %v6031_v27  ;;  %v8971_v27 = vpop.f32.mrf.mxu3  ;;  %v5694_v50 = vld [vmem:[%s9842_s1 + $0xd28] sm:$0xf]  ;;  %v6507_v52 = vld [vmem:[%s9842_s1 + $0xe34] sm:$0xf0]  ;;  %v5567_v57 = vor.u32 %v6443_v49, %v5566_v48  ;;  %v6109_v48 = vld [vmem:[%s9842_s1 + $0x1cc] sm:$0xf] }
 0x16e   :  { %3734 = vmatpush.bf16.msrb.mxu0 %v5631_v11  ;;  %v3443_v11 = vadd.f32 %v8728_v46, %v3430_v13  ;;  %v6475_v46 = vld [vmem:[%s9842_s1 + $0xd34] sm:$0xf0]  ;;  %v5822_v62 = vld [vmem:[%s9842_s1 + $0xe28] sm:$0xf]  ;;  %v4128_v13 = vld [vmem:[%s9842_s1 + $0xf8] sm:$0xf0] }
 0x16f   :  { %3747 = vmatpush.bf16.msrb.mxu1 %v5759_v45  ;;  %v5711_v45 = vor.u32 %v6479_v55, %v5710_v19  ;;  %v5950_v53 = vld [vmem:[%s9842_s1 + $0xf28] sm:$0xf]  ;;  %v6539_v56 = vld [vmem:[%s9842_s1 + $0xf34] sm:$0xf0]  ;;  %v5695_v0 = vor.u32 %v6475_v46, %v5694_v50  ;;  %v5823_v1 = vor.u32 %v6507_v52, %v5822_v62  ;;  %v6145_v19 = vld [vmem:[%s9842_s1 + $0x2ec] sm:$0xf] }
 0x170   :  { %3760 = vmatpush.bf16.msrb.mxu2 %v5887_v47  ;;  %v5839_v47 = vor.u32 %v6511_v26, %v5838_v36  ;;  %v5678_v2 = vld [vmem:[%s9842_s1 + $0xd08] sm:$0xf]  ;;  %v5951_v7 = vor.u32 %v6539_v56, %v5950_v53  ;;  %v6535_v9 = vld [vmem:[%s9842_s1 + $0xf14] sm:$0xf0]  ;;  %v6141_v50 = vld [vmem:[%s9842_s1 + $0x2cc] sm:$0xf] }
 0x171   :  { %3773 = vmatpush.bf16.msrb.mxu3 %v6015_v51  ;;  %v5967_v51 = vor.u32 %v6543_v34, %v5966_v32  ;;  %v5806_v5 = vld [vmem:[%s9842_s1 + $0xe08] sm:$0xf]  ;;  %v6177_v32 = vld [vmem:[%s9842_s1 + $0x3ec] sm:$0xf]  ;;  %v4512_v34 = vld [vmem:[%s9842_s1 + $0x3f8] sm:$0xf0] }
 0x172   :  { %3735 = vmatpush.bf16.msrb.mxu0 %v5615_v58  ;;  %v5550_v58 = vld [vmem:[%s9842_s1 + $0xc08] sm:$0xf]  ;;  %v3509_v10 = vpop.f32.mrf.mxu2  ;;  %v4515_v49 = vor.u32 %v6177_v32, %v4512_v34  ;;  %v6173_v46 = vld [vmem:[%s9842_s1 + $0x3cc] sm:$0xf]  ;;  %v4496_v62 = vld [vmem:[%s9842_s1 + $0x3d8] sm:$0xf0] }
 0x173   :  { %3748 = vmatpush.bf16.msrb.mxu1 %v5743_v61  ;;  %v6439_v61 = vld [vmem:[%s9842_s1 + $0xc14] sm:$0xf0]  ;;  %v5934_v8 = vld [vmem:[%s9842_s1 + $0xf08] sm:$0xf]  ;;  %v4080_v10 = vld [vmem:[%s9842_s1 + $0x98] sm:$0xf0] }
 0x174   :  { %3761 = vmatpush.bf16.msrb.mxu2 %v5871_v63  ;;  %v3456_v63 = vadd.f32 %v8754_v59, %v3443_v11  ;;  %v6503_v59 = vld [vmem:[%s9842_s1 + $0xe14] sm:$0xf0]  ;;  %v5551_v17 = vor.u32 %v6439_v61, %v5550_v58  ;;  %v5935_v37 = vor.u32 %v6535_v9, %v5934_v8  ;;  %v6073_v58 = vld [vmem:[%s9842_s1 + $0xac] sm:$0xf]  ;;  %v4096_v61 = vld [vmem:[%s9842_s1 + $0xb8] sm:$0xf0] }
 0x175   :  { %3774 = vmatpush.bf16.msrb.mxu3 %v5999_v3  ;;  %v6471_v3 = vld [vmem:[%s9842_s1 + $0xd14] sm:$0xf0]  ;;  %v5807_v26 = vor.u32 %v6503_v59, %v5806_v5  ;;  %v6169_v5 = vld [vmem:[%s9842_s1 + $0x3ac] sm:$0xf]  ;;  %v4099_v59 = vor.u32 %v6073_v58, %v4096_v61  ;;  %v4176_v58 = vld [vmem:[%s9842_s1 + $0x158] sm:$0xf0] }
 0x176   :  { %3736 = vmatpush.bf16.msrb.mxu0 %v5599_v12  ;;  %v6081_v12 = vld [vmem:[%s9842_s1 + $0xec] sm:$0xf]  ;;  %v3469_v55 = vadd.f32 %v8765_v16, %v3456_v63  ;;  %v5679_v36 = vor.u32 %v6471_v3, %v5678_v2  ;;  %v4352_v2 = vld [vmem:[%s9842_s1 + $0x2b8] sm:$0xf0] }
 0x177   :  { %3749 = vmatpush.bf16.msrb.mxu1 %v5727_v14  ;;  %v6113_v14 = vld [vmem:[%s9842_s1 + $0x1ec] sm:$0xf] }
 0x178   :  { %3762 = vmatpush.bf16.msrb.mxu2 %v5855_v15  ;;  %v3522_v15 = vpop.f32.mrf.mxu3  ;;  %v3482_v43 = vadd.f32 %v8915_v54, %v3469_v55  ;;  %v4259_v11 = vor.u32 %v6113_v14, %v4256_v18  ;;  %v6077_v16 = vld [vmem:[%s9842_s1 + $0xcc] sm:$0xf]  ;;  %v4240_v54 = vld [vmem:[%s9842_s1 + $0x1d8] sm:$0xf0] }
 0x179   :  { %3775 = vmatpush.bf16.msrb.mxu3 %v5983_v22  ;;  %v4384_v22 = vld [vmem:[%s9842_s1 + $0x2f8] sm:$0xf0]  ;;  %v4243_v56 = vor.u32 %v6109_v48, %v4240_v54  ;;  %v6105_v63 = vld [vmem:[%s9842_s1 + $0x1ac] sm:$0xf] }
 0x17a   :  { %3737 = vmatpush.bf16.msrb.mxu0 %v5583_v39  ;;  %v4131_v39 = vor.u32 %v6081_v12, %v4128_v13  ;;  %v3495_v53 = vadd.f32 %v8923_v60, %v3482_v43  ;;  %v4499_v60 = vor.u32 %v6173_v46, %v4496_v62  ;;  %v6069_v9 = vld [vmem:[%s9842_s1 + $0x8c] sm:$0xf]  ;;  %v4208_v14 = vld [vmem:[%s9842_s1 + $0x198] sm:$0xf0] }
 0x17b   :  { %3750 = vmatpush.bf16.msrb.mxu1 %v5711_v45  ;;  %v4387_v45 = vor.u32 %v6145_v19, %v4384_v22  ;;  %v6101_v12 = vld [vmem:[%s9842_s1 + $0x18c] sm:$0xf]  ;;  %v4464_v55 = vld [vmem:[%s9842_s1 + $0x398] sm:$0xf0] }
 0x17c   :  { %3763 = vmatpush.bf16.msrb.mxu2 %v5839_v47  ;;  %v4112_v47 = vld [vmem:[%s9842_s1 + $0xd8] sm:$0xf0]  ;;  %v3508_v3 = vadd.f32 %v8960_v24, %v3495_v53  ;;  %v6133_v15 = vld [vmem:[%s9842_s1 + $0x28c] sm:$0xf]  ;;  %v4211_v34 = vor.u32 %v6101_v12, %v4208_v14 }
 0x17d   :  { %3776 = vmatpush.bf16.msrb.mxu3 %v5967_v51  ;;  %v4368_v51 = vld [vmem:[%s9842_s1 + $0x2d8] sm:$0xf0]  ;;  %v4115_v52 = vor.u32 %v6077_v16, %v4112_v47  ;;  %v6165_v22 = vld [vmem:[%s9842_s1 + $0x38c] sm:$0xf] }
 0x17e   :  { %3738 = vmatpush.bf16.msrb.mxu0 %v5567_v57  ;;  %v4371_v57 = vor.u32 %v6141_v50, %v4368_v51  ;;  %v3521_v18 = vadd.f32 %v8971_v27, %v3508_v3  ;;  %v6065_v27 = vld [vmem:[%s9842_s1 + $0x6c] sm:$0xf]  ;;  %v4320_v47 = vld [vmem:[%s9842_s1 + $0x278] sm:$0xf0] }
 0x17f   :  { %3751 = vmatpush.bf16.msrb.mxu1 %v5695_v0  ;;  %v4224_v0 = vld [vmem:[%s9842_s1 + $0x1b8] sm:$0xf0]  ;;  %v6097_v43 = vld [vmem:[%s9842_s1 + $0x16c] sm:$0xf] }
 0x180   :  { %3764 = vmatpush.bf16.msrb.mxu2 %v5823_v1  ;;  %v6137_v1 = vld [vmem:[%s9842_s1 + $0x2ac] sm:$0xf]  ;;  %v4227_v8 = vor.u32 %v6105_v63, %v4224_v0  ;;  %v4304_v63 = vld [vmem:[%s9842_s1 + $0x258] sm:$0xf0] }
 0x181   :  { %3777 = vmatpush.bf16.msrb.mxu3 %v5951_v7  ;;  %v4480_v7 = vld [vmem:[%s9842_s1 + $0x3b8] sm:$0xf0]  ;;  %v4355_v24 = vor.u32 %v6137_v1, %v4352_v2  ;;  %v6129_v16 = vld [vmem:[%s9842_s1 + $0x26c] sm:$0xf] }
 0x182   :  { %3739 = vmatpush.bf16.msrb.mxu0 %v5551_v17  ;;  %v4483_v13 = vor.u32 %v6169_v5, %v4480_v7  ;;  %v4336_v17 = vld [vmem:[%s9842_s1 + $0x298] sm:$0xf0]  ;;  %v3533_v19 = vpop.f32.mrf.mxu0  ;;  %v6161_v48 = vld [vmem:[%s9842_s1 + $0x36c] sm:$0xf]  ;;  %v4323_v46 = vor.u32 %v6129_v16, %v4320_v47 }
 0x183   :  { %3752 = vmatpush.bf16.msrb.mxu1 %v5679_v36  ;;  %v4083_v36 = vor.u32 %v6069_v9, %v4080_v10  ;;  %v3534_v32 = vadd.f32 %v3533_v19, %v3521_v18  ;;  %v6061_v62 = vld [vmem:[%s9842_s1 + $0x4c] sm:$0xf]  ;;  %v4432_v2 = vld [vmem:[%s9842_s1 + $0x358] sm:$0xf0]  ;;  %v3992_v18 = vmax.f32 %v8366_v40, 0.0 }
 0x184   :  { %3765 = vmatpush.bf16.msrb.mxu2 %v5807_v26  ;;  %v3546_v26 = vpop.f32.mrf.mxu1  ;;  %v6093_v53 = vld [vmem:[%s9842_s1 + $0x14c] sm:$0xf]  ;;  %v4032_v10 = vld [vmem:[%s9842_s1 + $0x38] sm:$0xf0] }
 0x185   :  { %3778 = vmatpush.bf16.msrb.mxu3 %v5935_v37  ;;  %3740 = vmatmul.bf16.vlgmr.msrb.gmra.mxu0 %v7447_v23  ;;  %v4339_v37 = vor.u32 %v6133_v15, %v4336_v17  ;;  %v3547_v50 = vadd.f32 %v3546_v26, %v3534_v32  ;;  %v6125_v61 = vld [vmem:[%s9842_s1 + $0x24c] sm:$0xf]  ;;  %v4160_v14 = vld [vmem:[%s9842_s1 + $0x138] sm:$0xf0] }
 0x186   :  { %3784 = vmatpush.bf16.msra.mxu0 %v4131_v39  ;;  %3753 = vmatmul.bf16.vlgmr.msrb.gmra.mxu1 %v7460_v31  ;;  %v4064_v39 = vld [vmem:[%s9842_s1 + $0x78] sm:$0xf0]  ;;  %v6157_v1 = vld [vmem:[%s9842_s1 + $0x34c] sm:$0xf] }
 0x187   :  { %3797 = vmatpush.bf16.msra.mxu1 %v4259_v11  ;;  %3766 = vmatmul.bf16.vlgmr.msrb.gmra.mxu2 %v7458_v28  ;;  %v4467_v11 = vor.u32 %v6165_v22, %v4464_v55  ;;  %v4067_v54 = vor.u32 %v6065_v27, %v4064_v39  ;;  %v6057_v9 = vld [vmem:[%s9842_s1 + $0x2c] sm:$0xf]  ;;  %v4288_v17 = vld [vmem:[%s9842_s1 + $0x238] sm:$0xf0] }
 0x188   :  { %3810 = vmatpush.bf16.msra.mxu2 %v4387_v45  ;;  %3779 = vmatmul.bf16.vlgmr.msrb.gmra.mxu3 %v7468_v35  ;;  %v4192_v45 = vld [vmem:[%s9842_s1 + $0x178] sm:$0xf0]  ;;  %v6089_v12 = vld [vmem:[%s9842_s1 + $0x12c] sm:$0xf] }
 0x189   :  { %3823 = vmatpush.bf16.msra.mxu3 %v4515_v49  ;;  %v4448_v49 = vld [vmem:[%s9842_s1 + $0x378] sm:$0xf0]  ;;  %v4195_v51 = vor.u32 %v6097_v43, %v4192_v45  ;;  %v6121_v15 = vld [vmem:[%s9842_s1 + $0x22c] sm:$0xf] }
 0x18a   :  { %3785 = vmatpush.bf16.msra.mxu0 %v4115_v52  ;;  %v4048_v52 = vld [vmem:[%s9842_s1 + $0x58] sm:$0xf0]  ;;  %v3535_v3 = vpop.f32.mrf.mxu0  ;;  %v6153_v22 = vld [vmem:[%s9842_s1 + $0x32c] sm:$0xf] }
 0x18b   :  { %3798 = vmatpush.bf16.msra.mxu1 %v4243_v56  ;;  %v4451_v56 = vor.u32 %v6161_v48, %v4448_v49  ;;  %v3572_v0 = vpop.f32.mrf.mxu3  ;;  %v4051_v5 = vor.u32 %v6061_v62, %v4048_v52  ;;  %v4416_v55 = vld [vmem:[%s9842_s1 + $0x338] sm:$0xf0]  ;;  %v6053_v26 = vld [vmem:[%s9842_s1 + $0xc] sm:$0xf] }
 0x18c   :  { %3811 = vmatpush.bf16.msra.mxu2 %v4371_v57  ;;  %v3559_v57 = vpop.f32.mrf.mxu2  ;;  %v3548_v7 = vpop.f32.mrf.mxu1  ;;  %v4016_v32 = vld [vmem:[%s9842_s1 + $0x18] sm:$0xf0]  ;;  %v6085_v27 = vld [vmem:[%s9842_s1 + $0x10c] sm:$0xf] }
 0x18d   :  { %3824 = vmatpush.bf16.msra.mxu3 %v4499_v60  ;;  %v3560_v60 = vadd.f32 %v3559_v57, %v3547_v50  ;;  %v4144_v39 = vld [vmem:[%s9842_s1 + $0x118] sm:$0xf0]  ;;  %v6117_v43 = vld [vmem:[%s9842_s1 + $0x20c] sm:$0xf] }
 0x18e   :  { %3786 = vmatpush.bf16.msra.mxu0 %v4099_v59  ;;  %v4272_v45 = vld [vmem:[%s9842_s1 + $0x218] sm:$0xf0]  ;;  %v6149_v16 = vld [vmem:[%s9842_s1 + $0x30c] sm:$0xf] }
 0x18f   :  { %3799 = vmatpush.bf16.msra.mxu1 %v4227_v8  ;;  %v3573_v59 = vadd.f32 %v3572_v0, %v3560_v60  ;;  %v4179_v8 = vor.u32 %v6093_v53, %v4176_v58  ;;  %v4400_v47 = vld [vmem:[%s9842_s1 + $0x318] sm:$0xf0]  ;;  %v6209_v49 = vld [vmem:[%s9842_s1 + $0x4ec] sm:$0xf]  ;;  %v4275_v57 = vor.u32 %v6117_v43, %v4272_v45 }
 0x190   :  { %3812 = vmatpush.bf16.msra.mxu2 %v4355_v24  ;;  %v4307_v24 = vor.u32 %v6125_v61, %v4304_v63  ;;  %v6241_v50 = vld [vmem:[%s9842_s1 + $0x5ec] sm:$0xf]  ;;  %v4768_v62 = vld [vmem:[%s9842_s1 + $0x5f8] sm:$0xf0]  ;;  %v4403_v63 = vor.u32 %v6149_v16, %v4400_v47 }
 0x191   :  { %3825 = vmatpush.bf16.msra.mxu3 %v4483_v13  ;;  %v4435_v13 = vor.u32 %v6157_v1, %v4432_v2  ;;  %v3993_v19 = vmax.f32 %v3573_v59, 0.0  ;;  %v6273_v52 = vld [vmem:[%s9842_s1 + $0x6ec] sm:$0xf]  ;;  %v4896_v53 = vld [vmem:[%s9842_s1 + $0x6f8] sm:$0xf0]  ;;  %v4771_v0 = vor.u32 %v6241_v50, %v4768_v62 }
 0x192   :  { %3787 = vmatpush.bf16.msra.mxu0 %v4083_v36  ;;  %v4035_v36 = vor.u32 %v6057_v9, %v4032_v10  ;;  %v6305_v58 = vld [vmem:[%s9842_s1 + $0x7ec] sm:$0xf]  ;;  %v5024_v61 = vld [vmem:[%s9842_s1 + $0x7f8] sm:$0xf0]  ;;  %v4899_v1 = vor.u32 %v6273_v52, %v4896_v53 }
 0x193   :  { %3800 = vmatpush.bf16.msra.mxu1 %v4211_v34  ;;  %v3996_v40 = vpack.c.bf16 %v3993_v19, %v3992_v18  ;;  %v4163_v34 = vor.u32 %v6089_v12, %v4160_v14  ;;  %v6205_v2 = vld [vmem:[%s9842_s1 + $0x4cc] sm:$0xf]  ;;  %v4624_v3 = vld [vmem:[%s9842_s1 + $0x4d8] sm:$0xf0]  ;;  %v5027_v7 = vor.u32 %v6305_v58, %v5024_v61 }
 0x194   :  { %3813 = vmatpush.bf16.msra.mxu2 %v4339_v37  ;;  %v4291_v37 = vor.u32 %v6121_v15, %v4288_v17  ;;  %v3561_v48 = vpop.f32.mrf.mxu2  ;;  %v4752_v59 = vld [vmem:[%s9842_s1 + $0x5d8] sm:$0xf0]  ;;  %v6301_v9 = vld [vmem:[%s9842_s1 + $0x7cc] sm:$0xf]  ;;  %v4627_v12 = vor.u32 %v6205_v2, %v4624_v3 }
 0x195   :  { %3826 = vmatpush.bf16.msra.mxu3 %v4467_v11  ;;  %v4419_v11 = vor.u32 %v6153_v22, %v4416_v55  ;;  %3998 = vst [vmem:[%s9845_s3] sm:$0xff] %v3996_v40  ;;  %v5008_v10 = vld [vmem:[%s9842_s1 + $0x7d8] sm:$0xf0]  ;;  %v6201_v15 = vld [vmem:[%s9842_s1 + $0x4ac] sm:$0xf] }
 0x196   :  { %3788 = vmatpush.bf16.msra.mxu0 %v4067_v54  ;;  %v4640_v54 = vld [vmem:[%s9842_s1 + $0x4f8] sm:$0xf0]  ;;  %v6233_v18 = vld [vmem:[%s9842_s1 + $0x5ac] sm:$0xf]  ;;  %v5011_v19 = vor.u32 %v6301_v9, %v5008_v10 }
 0x197   :  { %3801 = vmatpush.bf16.msra.mxu1 %v4195_v51  ;;  %v3574_v51 = vpop.f32.mrf.mxu3  ;;  %v4643_v60 = vor.u32 %v6209_v49, %v4640_v54  ;;  %v4608_v17 = vld [vmem:[%s9842_s1 + $0x4b8] sm:$0xf0]  ;;  %v6265_v55 = vld [vmem:[%s9842_s1 + $0x6ac] sm:$0xf] }
 0x198   :  { %3814 = vmatpush.bf16.msra.mxu2 %v4323_v46  ;;  %v4019_v46 = vor.u32 %v6053_v26, %v4016_v32  ;;  %v4736_v22 = vld [vmem:[%s9842_s1 + $0x5b8] sm:$0xf0]  ;;  %v6297_v26 = vld [vmem:[%s9842_s1 + $0x7ac] sm:$0xf]  ;;  %v4611_v40 = vor.u32 %v6201_v15, %v4608_v17 }
 0x199   :  { %3827 = vmatpush.bf16.msra.mxu3 %v4451_v56  ;;  %v4147_v56 = vor.u32 %v6085_v27, %v4144_v39  ;;  %v4992_v32 = vld [vmem:[%s9842_s1 + $0x7b8] sm:$0xf0]  ;;  %v6293_v16 = vld [vmem:[%s9842_s1 + $0x78c] sm:$0xf] }
 0x19a   :  { %3789 = vmatpush.bf16.msra.mxu0 %v4051_v5  ;;  %v6237_v5 = vld [vmem:[%s9842_s1 + $0x5cc] sm:$0xf]  ;;  %v4592_v27 = vld [vmem:[%s9842_s1 + $0x498] sm:$0xf0] }
 0x19b   :  { %3802 = vmatpush.bf16.msra.mxu1 %v4179_v8  ;;  %v6269_v8 = vld [vmem:[%s9842_s1 + $0x6cc] sm:$0xf]  ;;  %v4720_v43 = vld [vmem:[%s9842_s1 + $0x598] sm:$0xf0] }
 0x19c   :  { %3815 = vmatpush.bf16.msra.mxu2 %v4307_v24  ;;  %v4880_v24 = vld [vmem:[%s9842_s1 + $0x6d8] sm:$0xf0]  ;;  %v6193_v51 = vld [vmem:[%s9842_s1 + $0x46c] sm:$0xf] }
 0x19d   :  { %3828 = vmatpush.bf16.msra.mxu3 %v4435_v13  ;;  %v4755_v13 = vor.u32 %v6237_v5, %v4752_v59  ;;  %v4883_v14 = vor.u32 %v6269_v8, %v4880_v24  ;;  %v4848_v45 = vld [vmem:[%s9842_s1 + $0x698] sm:$0xf0]  ;;  %v6225_v62 = vld [vmem:[%s9842_s1 + $0x56c] sm:$0xf] }
 0x19e   :  { %3790 = vmatpush.bf16.msra.mxu0 %v4035_v36  ;;  %v4864_v36 = vld [vmem:[%s9842_s1 + $0x6b8] sm:$0xf0]  ;;  %v6257_v58 = vld [vmem:[%s9842_s1 + $0x66c] sm:$0xf] }
 0x19f   :  { %3803 = vmatpush.bf16.msra.mxu1 %v4163_v34  ;;  %v6197_v34 = vld [vmem:[%s9842_s1 + $0x48c] sm:$0xf]  ;;  %v4976_v47 = vld [vmem:[%s9842_s1 + $0x798] sm:$0xf0] }
 0x1a0   :  { %3816 = vmatpush.bf16.msra.mxu2 %v4291_v37  ;;  %v4867_v37 = vor.u32 %v6265_v55, %v4864_v36  ;;  %v4595_v48 = vor.u32 %v6197_v34, %v4592_v27  ;;  %v4832_v61 = vld [vmem:[%s9842_s1 + $0x678] sm:$0xf0]  ;;  %v6189_v5 = vld [vmem:[%s9842_s1 + $0x44c] sm:$0xf] }
 0x1a1   :  { %3829 = vmatpush.bf16.msra.mxu3 %v4419_v11  ;;  %v6261_v11 = vld [vmem:[%s9842_s1 + $0x68c] sm:$0xf]  ;;  %v4835_v3 = vor.u32 %v6257_v58, %v4832_v61  ;;  %v4688_v9 = vld [vmem:[%s9842_s1 + $0x558] sm:$0xf0] }
 0x1a2   :  { %3791 = vmatpush.bf16.msra.mxu0 %v4019_v46  ;;  %v3585_v49 = vpop.f32.mrf.mxu0  ;;  %v4851_v50 = vor.u32 %v6261_v11, %v4848_v45  ;;  %v4576_v46 = vld [vmem:[%s9842_s1 + $0x478] sm:$0xf0]  ;;  %v6221_v59 = vld [vmem:[%s9842_s1 + $0x54c] sm:$0xf] }
 0x1a3   :  { %3804 = vmatpush.bf16.msra.mxu1 %v4147_v56  ;;  %v3598_v53 = vpop.f32.mrf.mxu1  ;;  %v4979_v56 = vor.u32 %v6293_v16, %v4976_v47  ;;  %v6253_v10 = vld [vmem:[%s9842_s1 + $0x64c] sm:$0xf]  ;;  %v4944_v17 = vld [vmem:[%s9842_s1 + $0x758] sm:$0xf0]  ;;  %v4691_v55 = vor.u32 %v6221_v59, %v4688_v9 }
 0x1a4   :  { %3817 = vmatpush.bf16.msra.mxu2 %v4275_v57  ;;  %v4704_v57 = vld [vmem:[%s9842_s1 + $0x578] sm:$0xf0]  ;;  %v6285_v15 = vld [vmem:[%s9842_s1 + $0x74c] sm:$0xf] }
 0x1a5   :  { %3830 = vmatpush.bf16.msra.mxu3 %v4403_v63  ;;  %3792 = vmatmul.bf16.vlgmr.msra.gmra.mxu0 %v6885_v20  ;;  %v9322_v20 = vld [vmem:[%s9844_s2] sm:$0xf]  ;;  %v6289_v63 = vld [vmem:[%s9842_s1 + $0x76c] sm:$0xf]  ;;  %v4707_v2 = vor.u32 %v6225_v62, %v4704_v57  ;;  %v4528_v45 = vld [vmem:[%s9842_s1 + $0x418] sm:$0xf0] }
 0x1a6   :  { %3836 = vmatpush.bf16.msrb.mxu0 %v4643_v60  ;;  %3805 = vmatmul.bf16.vlgmr.msra.gmra.mxu1 %v6888_v21  ;;  %v538_v39 = vperm.slane %v9322_v20, 2  ;;  %v4995_v21 = vor.u32 %v6297_v26, %v4992_v32  ;;  %v4960_v60 = vld [vmem:[%s9842_s1 + $0x778] sm:$0xf0]  ;;  %v6185_v26 = vld [vmem:[%s9842_s1 + $0x42c] sm:$0xf] }
 0x1a7   :  { %3849 = vmatpush.bf16.msrb.mxu1 %v4771_v0  ;;  %3818 = vmatmul.bf16.vlgmr.msra.gmra.mxu2 %v6853_v4  ;;  %v4739_v4 = vor.u32 %v6233_v18, %v4736_v22  ;;  %v4963_v24 = vor.u32 %v6289_v63, %v4960_v60  ;;  %v4544_v32 = vld [vmem:[%s9842_s1 + $0x438] sm:$0xf0]  ;;  %v6249_v27 = vld [vmem:[%s9842_s1 + $0x62c] sm:$0xf] }
 0x1a8   :  { %3862 = vmatpush.bf16.msrb.mxu2 %v4899_v1  ;;  %3831 = vmatmul.bf16.vlgmr.msra.gmra.mxu3 %v6858_v6  ;;  %v6229_v6 = vld [vmem:[%s9842_s1 + $0x58c] sm:$0xf]  ;;  %v3586_v52 = vadd.f32 %v3585_v49, %v538_v39  ;;  %v4579_v1 = vor.u32 %v6193_v51, %v4576_v46  ;;  %v4656_v49 = vld [vmem:[%s9842_s1 + $0x518] sm:$0xf0] }
 0x1a9   :  { %3875 = vmatpush.bf16.msrb.mxu3 %v5027_v7  ;;  %v4723_v54 = vor.u32 %v6229_v6, %v4720_v43  ;;  %v4560_v7 = vld [vmem:[%s9842_s1 + $0x458] sm:$0xf0]  ;;  %v6281_v39 = vld [vmem:[%s9842_s1 + $0x72c] sm:$0xf]  ;;  %v4547_v43 = vor.u32 %v6185_v26, %v4544_v32 }
 0x1aa   :  { %3837 = vmatpush.bf16.msrb.mxu0 %v4627_v12  ;;  %v3599_v0 = vadd.f32 %v3598_v53, %v3586_v52  ;;  %v3611_v8 = vpop.f32.mrf.mxu2  ;;  %v4816_v12 = vld [vmem:[%s9842_s1 + $0x658] sm:$0xf0]  ;;  %v4563_v18 = vor.u32 %v6189_v5, %v4560_v7  ;;  %v3587_v22 = vpop.f32.mrf.mxu0  ;;  %v6181_v11 = vld [vmem:[%s9842_s1 + $0x40c] sm:$0xf] }
 0x1ab   :  { %3850 = vmatpush.bf16.msrb.mxu1 %v4755_v13  ;;  %v4819_v36 = vor.u32 %v6253_v10, %v4816_v12  ;;  %v3600_v34 = vpop.f32.mrf.mxu1  ;;  %v4800_v6 = vld [vmem:[%s9842_s1 + $0x638] sm:$0xf0]  ;;  %v6277_v62 = vld [vmem:[%s9842_s1 + $0x70c] sm:$0xf]  ;;  %v4531_v61 = vor.u32 %v6181_v11, %v4528_v45 }
 0x1ac   :  { %3863 = vmatpush.bf16.msrb.mxu2 %v4883_v14  ;;  %v3612_v13 = vadd.f32 %v3611_v8, %v3599_v0  ;;  %v3624_v14 = vpop.f32.mrf.mxu3  ;;  %v4803_v47 = vor.u32 %v6249_v27, %v4800_v6  ;;  %v4784_v46 = vld [vmem:[%s9842_s1 + $0x618] sm:$0xf0]  ;;  %v6369_v58 = vld [vmem:[%s9842_s1 + $0x9ec] sm:$0xf] }
 0x1ad   :  { %3876 = vmatpush.bf16.msrb.mxu3 %v5011_v19  ;;  %v4912_v52 = vld [vmem:[%s9842_s1 + $0x718] sm:$0xf0]  ;;  %v6401_v60 = vld [vmem:[%s9842_s1 + $0xaec] sm:$0xf] }
 0x1ae   :  { %3838 = vmatpush.bf16.msrb.mxu0 %v4611_v40  ;;  %v9388_v19 = vadd.f32 %v3624_v14, %v3612_v13  ;;  %v6217_v40 = vld [vmem:[%s9842_s1 + $0x52c] sm:$0xf]  ;;  %v5152_v57 = vld [vmem:[%s9842_s1 + $0x8f8] sm:$0xf0]  ;;  %v4915_v7 = vor.u32 %v6277_v62, %v4912_v52 }
 0x1af   :  { %3851 = vmatpush.bf16.msrb.mxu1 %v4739_v4  ;;  %v4947_v4 = vor.u32 %v6285_v15, %v4944_v17  ;;  %v5280_v63 = vld [vmem:[%s9842_s1 + $0x9f8] sm:$0xf0]  ;;  %v6333_v9 = vld [vmem:[%s9842_s1 + $0x8cc] sm:$0xf] }
 0x1b0   :  { %3864 = vmatpush.bf16.msrb.mxu2 %v4867_v37  ;;  %v4672_v37 = vld [vmem:[%s9842_s1 + $0x538] sm:$0xf0]  ;;  %v5283_v8 = vor.u32 %v6369_v58, %v5280_v63  ;;  %v6365_v12 = vld [vmem:[%s9842_s1 + $0x9cc] sm:$0xf] }
 0x1b1   :  { %3877 = vmatpush.bf16.msrb.mxu3 %v4995_v21  ;;  %v4928_v21 = vld [vmem:[%s9842_s1 + $0x738] sm:$0xf0]  ;;  %v4675_v16 = vor.u32 %v6217_v40, %v4672_v37  ;;  %v6397_v15 = vld [vmem:[%s9842_s1 + $0xacc] sm:$0xf] }
 0x1b2   :  { %3839 = vmatpush.bf16.msrb.mxu0 %v4595_v48  ;;  %v6213_v48 = vld [vmem:[%s9842_s1 + $0x50c] sm:$0xf]  ;;  %v4931_v51 = vor.u32 %v6281_v39, %v4928_v21  ;;  %v5408_v0 = vld [vmem:[%s9842_s1 + $0xaf8] sm:$0xf0] }
 0x1b3   :  { %3852 = vmatpush.bf16.msrb.mxu1 %v4723_v54  ;;  %v6245_v54 = vld [vmem:[%s9842_s1 + $0x60c] sm:$0xf]  ;;  %v5536_v5 = vld [vmem:[%s9842_s1 + $0xbf8] sm:$0xf0] }
 0x1b4   :  { %3865 = vmatpush.bf16.msrb.mxu2 %v4851_v50  ;;  %v3613_v50 = vpop.f32.mrf.mxu2  ;;  %v3626_v53 = vpop.f32.mrf.mxu3  ;;  %v5136_v10 = vld [vmem:[%s9842_s1 + $0x8d8] sm:$0xf0]  ;;  %v6329_v32 = vld [vmem:[%s9842_s1 + $0x8ac] sm:$0xf] }
 0x1b5   :  { %3878 = vmatpush.bf16.msrb.mxu3 %v4979_v56  ;;  %v6337_v56 = vld [vmem:[%s9842_s1 + $0x8ec] sm:$0xf]  ;;  %v5264_v14 = vld [vmem:[%s9842_s1 + $0x9d8] sm:$0xf0] }
 0x1b6   :  { %3840 = vmatpush.bf16.msrb.mxu0 %v4579_v1  ;;  %v4659_v1 = vor.u32 %v6213_v48, %v4656_v49  ;;  %v5155_v59 = vor.u32 %v6337_v56, %v5152_v57  ;;  %v5392_v17 = vld [vmem:[%s9842_s1 + $0xad8] sm:$0xf0]  ;;  %v6361_v34 = vld [vmem:[%s9842_s1 + $0x9ac] sm:$0xf] }
 0x1b7   :  { %3853 = vmatpush.bf16.msrb.mxu1 %v4707_v2  ;;  %v4787_v2 = vor.u32 %v6245_v54, %v4784_v46  ;;  %v5520_v22 = vld [vmem:[%s9842_s1 + $0xbd8] sm:$0xf0]  ;;  %v5395_v26 = vor.u32 %v6397_v15, %v5392_v17  ;;  %v6393_v27 = vld [vmem:[%s9842_s1 + $0xaac] sm:$0xf] }
 0x1b8   :  { %3866 = vmatpush.bf16.msrb.mxu2 %v4835_v3  ;;  %v6433_v3 = vld [vmem:[%s9842_s1 + $0xbec] sm:$0xf]  ;;  %v5120_v40 = vld [vmem:[%s9842_s1 + $0x8b8] sm:$0xf0] }
 0x1b9   :  { %3879 = vmatpush.bf16.msrb.mxu3 %v4963_v24  ;;  %v5411_v24 = vor.u32 %v6401_v60, %v5408_v0  ;;  %v5539_v13 = vor.u32 %v6433_v3, %v5536_v5  ;;  %v5248_v37 = vld [vmem:[%s9842_s1 + $0x9b8] sm:$0xf0]  ;;  %v6425_v39 = vld [vmem:[%s9842_s1 + $0xbac] sm:$0xf]  ;;  %v5123_v21 = vor.u32 %v6329_v32, %v5120_v40 }
 0x1ba   :  { %3841 = vmatpush.bf16.msrb.mxu0 %v4563_v18  ;;  %v6429_v18 = vld [vmem:[%s9842_s1 + $0xbcc] sm:$0xf]  ;;  %v5376_v6 = vld [vmem:[%s9842_s1 + $0xab8] sm:$0xf0] }
 0x1bb   :  { %3854 = vmatpush.bf16.msrb.mxu1 %v4691_v55  ;;  %v5139_v55 = vor.u32 %v6333_v9, %v5136_v10  ;;  %v5379_v11 = vor.u32 %v6393_v27, %v5376_v6  ;;  %v6325_v45 = vld [vmem:[%s9842_s1 + $0x88c] sm:$0xf]  ;;  %v5360_v48 = vld [vmem:[%s9842_s1 + $0xa98] sm:$0xf0] }
 0x1bc   :  { %3867 = vmatpush.bf16.msrb.mxu2 %v4819_v36  ;;  %v5267_v36 = vor.u32 %v6365_v12, %v5264_v14  ;;  %v6421_v49 = vld [vmem:[%s9842_s1 + $0xb8c] sm:$0xf]  ;;  %v5488_v54 = vld [vmem:[%s9842_s1 + $0xb98] sm:$0xf0] }
 0x1bd   :  { %3880 = vmatpush.bf16.msrb.mxu3 %v4947_v4  ;;  %v5523_v4 = vor.u32 %v6429_v18, %v5520_v22  ;;  %v6321_v52 = vld [vmem:[%s9842_s1 + $0x86c] sm:$0xf]  ;;  %v5088_v53 = vld [vmem:[%s9842_s1 + $0x878] sm:$0xf0] }
 0x1be   :  { %3842 = vmatpush.bf16.msrb.mxu0 %v4547_v43  ;;  %v5251_v43 = vor.u32 %v6361_v34, %v5248_v37  ;;  %v6353_v56 = vld [vmem:[%s9842_s1 + $0x96c] sm:$0xf]  ;;  %v5216_v63 = vld [vmem:[%s9842_s1 + $0x978] sm:$0xf0]  ;;  %v5091_v3 = vor.u32 %v6321_v52, %v5088_v53 }
 0x1bf   :  { %3855 = vmatpush.bf16.msrb.mxu1 %v4675_v16  ;;  %v5104_v16 = vld [vmem:[%s9842_s1 + $0x898] sm:$0xf0]  ;;  %v6385_v60 = vld [vmem:[%s9842_s1 + $0xa6c] sm:$0xf]  ;;  %v5219_v5 = vor.u32 %v6353_v56, %v5216_v63 }
 0x1c0   :  { %3868 = vmatpush.bf16.msrb.mxu2 %v4803_v47  ;;  %v6389_v47 = vld [vmem:[%s9842_s1 + $0xa8c] sm:$0xf]  ;;  %v5107_v50 = vor.u32 %v6325_v45, %v5104_v16  ;;  %v5344_v0 = vld [vmem:[%s9842_s1 + $0xa78] sm:$0xf0] }
 0x1c1   :  { %3881 = vmatpush.bf16.msrb.mxu3 %v4931_v51  ;;  %v5363_v62 = vor.u32 %v6389_v47, %v5360_v48  ;;  %v5200_v12 = vld [vmem:[%s9842_s1 + $0x958] sm:$0xf0]  ;;  %v6413_v18 = vld [vmem:[%s9842_s1 + $0xb4c] sm:$0xf] }
 0x1c2   :  { %3843 = vmatpush.bf16.msrb.mxu0 %v4531_v61  ;;  %v3637_v51 = vpop.f32.mrf.mxu0  ;;  %v5491_v61 = vor.u32 %v6421_v49, %v5488_v54  ;;  %v5328_v14 = vld [vmem:[%s9842_s1 + $0xa58] sm:$0xf0]  ;;  %v6313_v34 = vld [vmem:[%s9842_s1 + $0x82c] sm:$0xf] }
 0x1c3   :  { %3856 = vmatpush.bf16.msrb.mxu1 %v4659_v1  ;;  %v3638_v57 = vadd.f32 %v3637_v51, %v9388_v19  ;;  %v3650_v58 = vpop.f32.mrf.mxu1  ;;  %v6417_v1 = vld [vmem:[%s9842_s1 + $0xb6c] sm:$0xf]  ;;  %v5472_v19 = vld [vmem:[%s9842_s1 + $0xb78] sm:$0xf0] }
 0x1c4   :  { %3869 = vmatpush.bf16.msrb.mxu2 %v4787_v2  ;;  %v5475_v10 = vor.u32 %v6417_v1, %v5472_v19  ;;  %v5456_v22 = vld [vmem:[%s9842_s1 + $0xb58] sm:$0xf0]  ;;  %v6345_v37 = vld [vmem:[%s9842_s1 + $0x92c] sm:$0xf] }
 0x1c5   :  { %3882 = vmatpush.bf16.msrb.mxu3 %v4915_v7  ;;  %3844 = vmatmul.bf16.vlgmr.msrb.gmra.mxu0 %v7044_v41  ;;  %v6357_v41 = vld [vmem:[%s9842_s1 + $0x98c] sm:$0xf]  ;;  %v3651_v2 = vadd.f32 %v3650_v58, %v3638_v57  ;;  %v5347_v7 = vor.u32 %v6385_v60, %v5344_v0  ;;  %v5459_v6 = vor.u32 %v6413_v18, %v5456_v22  ;;  %v5168_v48 = vld [vmem:[%s9842_s1 + $0x918] sm:$0xf0] }
 0x1c6   :  { %3888 = vmatpush.bf16.msra.mxu0 %v5155_v59  ;;  %3857 = vmatmul.bf16.vlgmr.msrb.gmra.mxu1 %v7048_v44  ;;  %v5232_v44 = vld [vmem:[%s9842_s1 + $0x998] sm:$0xf0]  ;;  %v6317_v59 = vld [vmem:[%s9842_s1 + $0x84c] sm:$0xf] }
 0x1c7   :  { %3901 = vmatpush.bf16.msra.mxu1 %v5283_v8  ;;  %3870 = vmatmul.bf16.vlgmr.msrb.gmra.mxu2 %v7036_v38  ;;  %v5504_v38 = vld [vmem:[%s9842_s1 + $0xbb8] sm:$0xf0]  ;;  %v5235_v46 = vor.u32 %v6357_v41, %v5232_v44  ;;  %v6309_v16 = vld [vmem:[%s9842_s1 + $0x80c] sm:$0xf] }
 0x1c8   :  { %3914 = vmatpush.bf16.msra.mxu2 %v5411_v24  ;;  %3883 = vmatmul.bf16.vlgmr.msrb.gmra.mxu3 %v7046_v42  ;;  %v5507_v42 = vor.u32 %v6425_v39, %v5504_v38  ;;  %v5072_v8 = vld [vmem:[%s9842_s1 + $0x858] sm:$0xf0]  ;;  %v6349_v24 = vld [vmem:[%s9842_s1 + $0x94c] sm:$0xf] }
 0x1c9   :  { %3927 = vmatpush.bf16.msra.mxu3 %v5539_v13  ;;  %v6381_v13 = vld [vmem:[%s9842_s1 + $0xa4c] sm:$0xf]  ;;  %v5203_v32 = vor.u32 %v6349_v24, %v5200_v12  ;;  %v5184_v39 = vld [vmem:[%s9842_s1 + $0x938] sm:$0xf0] }
 0x1ca   :  { %3889 = vmatpush.bf16.msra.mxu0 %v5139_v55  ;;  %v3663_v9 = vpop.f32.mrf.mxu2  ;;  %v5075_v55 = vor.u32 %v6317_v59, %v5072_v8  ;;  %v5331_v40 = vor.u32 %v6381_v13, %v5328_v14  ;;  %v6377_v38 = vld [vmem:[%s9842_s1 + $0xa2c] sm:$0xf]  ;;  %v5040_v41 = vld [vmem:[%s9842_s1 + $0x818] sm:$0xf0] }
 0x1cb   :  { %3902 = vmatpush.bf16.msra.mxu1 %v5267_v36  ;;  %v3664_v15 = vadd.f32 %v3663_v9, %v3651_v2  ;;  %v3676_v17 = vpop.f32.mrf.mxu3  ;;  %v3652_v27 = vpop.f32.mrf.mxu1  ;;  %v6341_v47 = vld [vmem:[%s9842_s1 + $0x90c] sm:$0xf]  ;;  %v5296_v51 = vld [vmem:[%s9842_s1 + $0xa18] sm:$0xf0]  ;;  %v5043_v58 = vor.u32 %v6309_v16, %v5040_v41 }
 0x1cc   :  { %3915 = vmatpush.bf16.msra.mxu2 %v5395_v26  ;;  %v3639_v26 = vpop.f32.mrf.mxu0  ;;  %v6373_v49 = vld [vmem:[%s9842_s1 + $0xa0c] sm:$0xf]  ;;  %v5664_v56 = vld [vmem:[%s9842_s1 + $0xcf8] sm:$0xf0]  ;;  %v5171_v0 = vor.u32 %v6341_v47, %v5168_v48 }
 0x1cd   :  { %3928 = vmatpush.bf16.msra.mxu3 %v5523_v4  ;;  %v9587_v36 = vadd.f32 %v3676_v17, %v3664_v15  ;;  %v5056_v4 = vld [vmem:[%s9842_s1 + $0x838] sm:$0xf0]  ;;  %v6465_v53 = vld [vmem:[%s9842_s1 + $0xcec] sm:$0xf]  ;;  %v5299_v1 = vor.u32 %v6373_v49, %v5296_v51 }
 0x1ce   :  { %3890 = vmatpush.bf16.msra.mxu0 %v5123_v21  ;;  %v5312_v21 = vld [vmem:[%s9842_s1 + $0xa38] sm:$0xf0]  ;;  %v5059_v45 = vor.u32 %v6313_v34, %v5056_v4  ;;  %v6497_v57 = vld [vmem:[%s9842_s1 + $0xdec] sm:$0xf] }
 0x1cf   :  { %3903 = vmatpush.bf16.msra.mxu1 %v5251_v43  ;;  %v6409_v43 = vld [vmem:[%s9842_s1 + $0xb2c] sm:$0xf]  ;;  %v5315_v44 = vor.u32 %v6377_v38, %v5312_v21  ;;  %v5920_v60 = vld [vmem:[%s9842_s1 + $0xef8] sm:$0xf0] }
 0x1d0   :  { %3916 = vmatpush.bf16.msra.mxu2 %v5379_v11  ;;  %v5440_v11 = vld [vmem:[%s9842_s1 + $0xb38] sm:$0xf0]  ;;  %v6529_v63 = vld [vmem:[%s9842_s1 + $0xeec] sm:$0xf] }
 0x1d1   :  { %3929 = vmatpush.bf16.msra.mxu3 %v5507_v42  ;;  %v5187_v42 = vor.u32 %v6345_v37, %v5184_v39  ;;  %v6561_v19 = vld [vmem:[%s9842_s1 + $0xfec] sm:$0xf]  ;;  %v6048_v2 = vld [vmem:[%s9842_s1 + $0xff8] sm:$0xf0]  ;;  %v5923_v59 = vor.u32 %v6529_v63, %v5920_v60 }
 0x1d2   :  { %3891 = vmatpush.bf16.msra.mxu0 %v5107_v50  ;;  %v3665_v54 = vpop.f32.mrf.mxu2  ;;  %v5443_v50 = vor.u32 %v6409_v43, %v5440_v11  ;;  %v6461_v8 = vld [vmem:[%s9842_s1 + $0xccc] sm:$0xf]  ;;  %v5648_v24 = vld [vmem:[%s9842_s1 + $0xcd8] sm:$0xf0] }
 0x1d3   :  { %3904 = vmatpush.bf16.msra.mxu1 %v5235_v46  ;;  %v6405_v46 = vld [vmem:[%s9842_s1 + $0xb0c] sm:$0xf]  ;;  %v3678_v52 = vpop.f32.mrf.mxu3  ;;  %v5776_v12 = vld [vmem:[%s9842_s1 + $0xdd8] sm:$0xf0]  ;;  %v5651_v18 = vor.u32 %v6461_v8, %v5648_v24 }
 0x1d4   :  { %3917 = vmatpush.bf16.msra.mxu2 %v5363_v62  ;;  %v5424_v62 = vld [vmem:[%s9842_s1 + $0xb18] sm:$0xf0]  ;;  %v6493_v9 = vld [vmem:[%s9842_s1 + $0xdcc] sm:$0xf] }
 0x1d5   :  { %3930 = vmatpush.bf16.msra.mxu3 %v5491_v61  ;;  %v5792_v61 = vld [vmem:[%s9842_s1 + $0xdf8] sm:$0xf0]  ;;  %v6525_v13 = vld [vmem:[%s9842_s1 + $0xecc] sm:$0xf]  ;;  %v5779_v22 = vor.u32 %v6493_v9, %v5776_v12 }
 0x1d6   :  { %3892 = vmatpush.bf16.msra.mxu0 %v5091_v3  ;;  %v5427_v3 = vor.u32 %v6405_v46, %v5424_v62  ;;  %v5904_v14 = vld [vmem:[%s9842_s1 + $0xed8] sm:$0xf0]  ;;  %v6557_v15 = vld [vmem:[%s9842_s1 + $0xfcc] sm:$0xf] }
 0x1d7   :  { %3905 = vmatpush.bf16.msra.mxu1 %v5219_v5  ;;  %v5667_v5 = vor.u32 %v6465_v53, %v5664_v56  ;;  %v6032_v17 = vld [vmem:[%s9842_s1 + $0xfd8] sm:$0xf0]  ;;  %v6457_v26 = vld [vmem:[%s9842_s1 + $0xcac] sm:$0xf] }
 0x1d8   :  { %3918 = vmatpush.bf16.msra.mxu2 %v5347_v7  ;;  %v5795_v7 = vor.u32 %v6497_v57, %v5792_v61  ;;  %v6035_v34 = vor.u32 %v6557_v15, %v6032_v17  ;;  %v5760_v4 = vld [vmem:[%s9842_s1 + $0xdb8] sm:$0xf0]  ;;  %v6521_v37 = vld [vmem:[%s9842_s1 + $0xeac] sm:$0xf] }
 0x1d9   :  { %3931 = vmatpush.bf16.msra.mxu3 %v5475_v10  ;;  %v6051_v10 = vor.u32 %v6561_v19, %v6048_v2  ;;  %v5888_v27 = vld [vmem:[%s9842_s1 + $0xeb8] sm:$0xf0]  ;;  %v6485_v43 = vld [vmem:[%s9842_s1 + $0xd8c] sm:$0xf] }
 0x1da   :  { %3893 = vmatpush.bf16.msra.mxu0 %v5075_v55  ;;  %v5907_v55 = vor.u32 %v6525_v13, %v5904_v14  ;;  %v5891_v21 = vor.u32 %v6521_v37, %v5888_v27  ;;  %v5744_v11 = vld [vmem:[%s9842_s1 + $0xd98] sm:$0xf0]  ;;  %v6449_v51 = vld [vmem:[%s9842_s1 + $0xc6c] sm:$0xf] }
 0x1db   :  { %3906 = vmatpush.bf16.msra.mxu1 %v5203_v32  ;;  %v5632_v32 = vld [vmem:[%s9842_s1 + $0xcb8] sm:$0xf0]  ;;  %v5747_v54 = vor.u32 %v6485_v43, %v5744_v11  ;;  %v6481_v62 = vld [vmem:[%s9842_s1 + $0xd6c] sm:$0xf] }
 0x1dc   :  { %3919 = vmatpush.bf16.msra.mxu2 %v5331_v40  ;;  %v6489_v40 = vld [vmem:[%s9842_s1 + $0xdac] sm:$0xf]  ;;  %v5635_v39 = vor.u32 %v6457_v26, %v5632_v32  ;;  %v5872_v16 = vld [vmem:[%s9842_s1 + $0xe98] sm:$0xf0] }
 0x1dd   :  { %3932 = vmatpush.bf16.msra.mxu3 %v5459_v6  ;;  %v6016_v6 = vld [vmem:[%s9842_s1 + $0xfb8] sm:$0xf0]  ;;  %v5763_v38 = vor.u32 %v6489_v40, %v5760_v4  ;;  %v6513_v56 = vld [vmem:[%s9842_s1 + $0xe6c] sm:$0xf] }
 0x1de   :  { %3894 = vmatpush.bf16.msra.mxu0 %v5059_v45  ;;  %v6517_v45 = vld [vmem:[%s9842_s1 + $0xe8c] sm:$0xf]  ;;  %v5600_v46 = vld [vmem:[%s9842_s1 + $0xc78] sm:$0xf0] }
 0x1df   :  { %3907 = vmatpush.bf16.msra.mxu1 %v5187_v42  ;;  %v6549_v42 = vld [vmem:[%s9842_s1 + $0xf8c] sm:$0xf]  ;;  %v5728_v53 = vld [vmem:[%s9842_s1 + $0xd78] sm:$0xf0]  ;;  %v5603_v63 = vor.u32 %v6449_v51, %v5600_v46 }
 0x1e0   :  { %3920 = vmatpush.bf16.msra.mxu2 %v5315_v44  ;;  %v6000_v44 = vld [vmem:[%s9842_s1 + $0xf98] sm:$0xf0]  ;;  %v5731_v60 = vor.u32 %v6481_v62, %v5728_v53  ;;  %v6477_v2 = vld [vmem:[%s9842_s1 + $0xd4c] sm:$0xf] }
 0x1e1   :  { %3933 = vmatpush.bf16.msra.mxu3 %v5443_v50  ;;  %v5875_v50 = vor.u32 %v6517_v45, %v5872_v16  ;;  %v5856_v57 = vld [vmem:[%s9842_s1 + $0xe78] sm:$0xf0]  ;;  %v6473_v32 = vld [vmem:[%s9842_s1 + $0xd2c] sm:$0xf] }
 0x1e2   :  { %3895 = vmatpush.bf16.msra.mxu0 %v5043_v58  ;;  %v3689_v41 = vpop.f32.mrf.mxu0  ;;  %v6545_v58 = vld [vmem:[%s9842_s1 + $0xf6c] sm:$0xf]  ;;  %v5984_v61 = vld [vmem:[%s9842_s1 + $0xf78] sm:$0xf0] }
 0x1e3   :  { %3908 = vmatpush.bf16.msra.mxu1 %v5171_v0  ;;  %v3690_v47 = vadd.f32 %v3689_v41, %v9587_v36  ;;  %v3702_v49 = vpop.f32.mrf.mxu1  ;;  %v6003_v36 = vor.u32 %v6549_v42, %v6000_v44  ;;  %v5859_v0 = vor.u32 %v6513_v56, %v5856_v57  ;;  %v5584_v19 = vld [vmem:[%s9842_s1 + $0xc58] sm:$0xf0]  ;;  %v6505_v4 = vld [vmem:[%s9842_s1 + $0xe2c] sm:$0xf] }
 0x1e4   :  { %3921 = vmatpush.bf16.msra.mxu2 %v5299_v1  ;;  %v6445_v1 = vld [vmem:[%s9842_s1 + $0xc4c] sm:$0xf]  ;;  %v5840_v8 = vld [vmem:[%s9842_s1 + $0xe58] sm:$0xf0] }
 0x1e5   :  { %3934 = vmatpush.bf16.msra.mxu3 %v5427_v3  ;;  %3896 = vmatmul.bf16.vlgmr.msra.gmra.mxu0 %v7237_v25  ;;  %v6553_v25 = vld [vmem:[%s9842_s1 + $0xfac] sm:$0xf]  ;;  %v3703_v52 = vadd.f32 %v3702_v49, %v3690_v47  ;;  %v5987_v3 = vor.u32 %v6545_v58, %v5984_v61  ;;  %v5968_v12 = vld [vmem:[%s9842_s1 + $0xf58] sm:$0xf0]  ;;  %v5587_v14 = vor.u32 %v6445_v1, %v5584_v19 }
 0x1e6   :  { %3940 = vmatpush.bf16.msrb.mxu0 %v5667_v5  ;;  %3909 = vmatmul.bf16.vlgmr.msra.gmra.mxu1 %v7250_v30  ;;  %v5616_v30 = vld [vmem:[%s9842_s1 + $0xc98] sm:$0xf0]  ;;  %v6537_v27 = vld [vmem:[%s9842_s1 + $0xf2c] sm:$0xf] }
 0x1e7   :  { %3953 = vmatpush.bf16.msrb.mxu1 %v5795_v7  ;;  %3922 = vmatmul.bf16.vlgmr.msra.gmra.mxu2 %v7248_v29  ;;  %v6453_v29 = vld [vmem:[%s9842_s1 + $0xc8c] sm:$0xf]  ;;  %v5712_v7 = vld [vmem:[%s9842_s1 + $0xd58] sm:$0xf0] }
 0x1e8   :  { %3966 = vmatpush.bf16.msrb.mxu2 %v5923_v59  ;;  %3935 = vmatmul.bf16.vlgmr.msra.gmra.mxu3 %v7258_v33  ;;  %v6019_v33 = vor.u32 %v6553_v25, %v6016_v6  ;;  %v5619_v48 = vor.u32 %v6453_v29, %v5616_v30  ;;  %v6509_v59 = vld [vmem:[%s9842_s1 + $0xe4c] sm:$0xf]  ;;  %v5568_v26 = vld [vmem:[%s9842_s1 + $0xc38] sm:$0xf0] }
 0x1e9   :  { %3979 = vmatpush.bf16.msrb.mxu3 %v6051_v10  ;;  %v6541_v10 = vld [vmem:[%s9842_s1 + $0xf4c] sm:$0xf]  ;;  %v5824_v37 = vld [vmem:[%s9842_s1 + $0xe38] sm:$0xf0] }
 0x1ea   :  { %3941 = vmatpush.bf16.msrb.mxu0 %v5651_v18  ;;  %v3715_v5 = vpop.f32.mrf.mxu2  ;;  %v3691_v13 = vpop.f32.mrf.mxu0  ;;  %v5715_v18 = vor.u32 %v6477_v2, %v5712_v7  ;;  %v5971_v40 = vor.u32 %v6541_v10, %v5968_v12  ;;  %v5952_v25 = vld [vmem:[%s9842_s1 + $0xf38] sm:$0xf0]  ;;  %v6469_v30 = vld [vmem:[%s9842_s1 + $0xd0c] sm:$0xf] }
 0x1eb   :  { %3954 = vmatpush.bf16.msrb.mxu1 %v5779_v22  ;;  %v3716_v24 = vadd.f32 %v3715_v5, %v3703_v52  ;;  %v3728_v9 = vpop.f32.mrf.mxu3  ;;  %v3704_v15 = vpop.f32.mrf.mxu1  ;;  %v5843_v22 = vor.u32 %v6509_v59, %v5840_v8  ;;  %v5552_v29 = vld [vmem:[%s9842_s1 + $0xc18] sm:$0xf0]  ;;  %v5955_v43 = vor.u32 %v6537_v27, %v5952_v25  ;;  %v6501_v11 = vld [vmem:[%s9842_s1 + $0xe0c] sm:$0xf] }
 0x1ec   :  { %3967 = vmatpush.bf16.msrb.mxu2 %v5907_v55  ;;  %v6441_v55 = vld [vmem:[%s9842_s1 + $0xc2c] sm:$0xf]  ;;  %v5808_v45 = vld [vmem:[%s9842_s1 + $0xe18] sm:$0xf0] }
 0x1ed   :  { %3980 = vmatpush.bf16.msrb.mxu3 %v6035_v34  ;;  %v3729_v17 = vadd.f32 %v3728_v9, %v3716_v24  ;;  %v5696_v34 = vld [vmem:[%s9842_s1 + $0xd38] sm:$0xf0]  ;;  %v5571_v6 = vor.u32 %v6441_v55, %v5568_v26  ;;  %v6533_v41 = vld [vmem:[%s9842_s1 + $0xf0c] sm:$0xf]  ;;  %v5811_v49 = vor.u32 %v6501_v11, %v5808_v45 }
 0x1ee   :  { %3942 = vmatpush.bf16.msrb.mxu0 %v5635_v39  ;;  %v5699_v39 = vor.u32 %v6473_v32, %v5696_v34  ;;  %v5936_v42 = vld [vmem:[%s9842_s1 + $0xf18] sm:$0xf0] }
 0x1ef   :  { %3955 = vmatpush.bf16.msrb.mxu1 %v5763_v38  ;;  %v5827_v38 = vor.u32 %v6505_v4, %v5824_v37 }
 0x1f0   :  { %3968 = vmatpush.bf16.msrb.mxu2 %v5891_v21  ;;  %v6437_v21 = vld [vmem:[%s9842_s1 + $0xc0c] sm:$0xf] }
 0x1f1   :  { %3981 = vmatpush.bf16.msrb.mxu3 %v6019_v33  ;;  %v5680_v33 = vld [vmem:[%s9842_s1 + $0xd18] sm:$0xf0]  ;;  %v5555_v47 = vor.u32 %v6437_v21, %v5552_v29 }
 0x1f2   :  { %3943 = vmatpush.bf16.msrb.mxu0 %v5619_v48  ;;  %v3717_v16 = vpop.f32.mrf.mxu2  ;;  %v5683_v48 = vor.u32 %v6469_v30, %v5680_v33 }
 0x1f3   :  { %3956 = vmatpush.bf16.msrb.mxu1 %v5747_v54  ;;  %v3730_v44 = vpop.f32.mrf.mxu3  ;;  %v5939_v54 = vor.u32 %v6533_v41, %v5936_v42 }
 0x1f4   :  { %3969 = vmatpush.bf16.msrb.mxu2 %v5875_v50 }
 0x1f5   :  { %3982 = vmatpush.bf16.msrb.mxu3 %v6003_v36 }
 0x1f6   :  { %3944 = vmatpush.bf16.msrb.mxu0 %v5603_v63 }
 0x1f7   :  { %3957 = vmatpush.bf16.msrb.mxu1 %v5731_v60 }
 0x1f8   :  { %3970 = vmatpush.bf16.msrb.mxu2 %v5859_v0 }
 0x1f9   :  { %3983 = vmatpush.bf16.msrb.mxu3 %v5987_v3 }
 0x1fa   :  { %3945 = vmatpush.bf16.msrb.mxu0 %v5587_v14 }
 0x1fb   :  { %3958 = vmatpush.bf16.msrb.mxu1 %v5715_v18 }
 0x1fc   :  { %3971 = vmatpush.bf16.msrb.mxu2 %v5843_v22 }
 0x1fd   :  { %3984 = vmatpush.bf16.msrb.mxu3 %v5971_v40 }
 0x1fe   :  { %3946 = vmatpush.bf16.msrb.mxu0 %v5571_v6 }
 0x1ff   :  { %3959 = vmatpush.bf16.msrb.mxu1 %v5699_v39 }
 0x200   :  { %3972 = vmatpush.bf16.msrb.mxu2 %v5827_v38 }
 0x201   :  { %3985 = vmatpush.bf16.msrb.mxu3 %v5955_v43 }
 0x202   :  { %3947 = vmatpush.bf16.msrb.mxu0 %v5555_v47  ;;  %v3741_v50 = vpop.f32.mrf.mxu0 }
 0x203   :  { %3960 = vmatpush.bf16.msrb.mxu1 %v5683_v48  ;;  %v3742_v51 = vadd.f32 %v3741_v50, %v3729_v17  ;;  %v3754_v46 = vpop.f32.mrf.mxu1 }
 0x204   :  { %3973 = vmatpush.bf16.msrb.mxu2 %v5811_v49 }
 0x205   :  { %3986 = vmatpush.bf16.msrb.mxu3 %v5939_v54  ;;  %3948 = vmatmul.bf16.vlgmr.msrb.gmra.mxu0 %v7447_v23  ;;  %v3755_v62 = vadd.f32 %v3754_v46, %v3742_v51  ;;  %v539_v23 = vperm.slane %v9322_v20, 3 }
 0x206   :  { %3961 = vmatmul.bf16.vlgmr.msrb.gmra.mxu1 %v7460_v31 }
 0x207   :  { %3974 = vmatmul.bf16.vlgmr.msrb.gmra.mxu2 %v7458_v28 }
 0x208   :  { %3987 = vmatmul.bf16.vlgmr.msrb.gmra.mxu3 %v7468_v35 }
 0x20a   :  { %v3767_v36 = vpop.f32.mrf.mxu2  ;;  %v3743_v56 = vpop.f32.mrf.mxu0 }
 0x20b   :  { %v3768_v52 = vadd.f32 %v3767_v36, %v3755_v62  ;;  %v3780_v53 = vpop.f32.mrf.mxu3  ;;  %v3756_v57 = vpop.f32.mrf.mxu1 }
 0x20d   :  { %v3781_v58 = vadd.f32 %v3780_v53, %v3768_v52 }
 0x20f   :  { %v3994_v44 = vmax.f32 %v3781_v58, 0.0 }
 0x212   :  { %v3769_v61 = vpop.f32.mrf.mxu2 }
 0x213   :  { %v3782_v63 = vpop.f32.mrf.mxu3 }
 0x222   :  { %v3793_v60 = vpop.f32.mrf.mxu0 }
 0x223   :  { %v3794_v31 = vadd.f32 %v3793_v60, %v539_v23  ;;  %v3806_v0 = vpop.f32.mrf.mxu1 }
 0x225   :  { %v3807_v28 = vadd.f32 %v3806_v0, %v3794_v31 }
 0x22a   :  { %v3819_v1 = vpop.f32.mrf.mxu2  ;;  %v3795_v3 = vpop.f32.mrf.mxu0 }
 0x22b   :  { %v3820_v35 = vadd.f32 %v3819_v1, %v3807_v28  ;;  %v3832_v19 = vpop.f32.mrf.mxu3  ;;  %v3808_v5 = vpop.f32.mrf.mxu1 }
 0x22d   :  { %v3833_v2 = vadd.f32 %v3832_v19, %v3820_v35 }
 0x232   :  { %v3821_v7 = vpop.f32.mrf.mxu2 }
 0x233   :  { %v3834_v59 = vpop.f32.mrf.mxu3 }
 0x242   :  { %v3845_v8 = vpop.f32.mrf.mxu0 }
 0x243   :  { %v3858_v24 = vpop.f32.mrf.mxu1  ;;  %v3846_v18 = vadd.f32 %v3845_v8, %v3833_v2 }
 0x245   :  { %v3859_v32 = vadd.f32 %v3858_v24, %v3846_v18 }
 0x24a   :  { %v3871_v9 = vpop.f32.mrf.mxu2  ;;  %v3847_v12 = vpop.f32.mrf.mxu0 }
 0x24b   :  { %v3884_v10 = vpop.f32.mrf.mxu3  ;;  %v3860_v13 = vpop.f32.mrf.mxu1  ;;  %v3872_v34 = vadd.f32 %v3871_v9, %v3859_v32 }
 0x24d   :  { %v3885_v27 = vadd.f32 %v3884_v10, %v3872_v34 }
 0x252   :  { %v3873_v14 = vpop.f32.mrf.mxu2 }
 0x253   :  { %v3886_v20 = vpop.f32.mrf.mxu3 }
 0x262   :  { %v3897_v15 = vpop.f32.mrf.mxu0 }
 0x263   :  { %v3910_v17 = vpop.f32.mrf.mxu1  ;;  %v3898_v25 = vadd.f32 %v3897_v15, %v3885_v27 }
 0x265   :  { %v3911_v6 = vadd.f32 %v3910_v17, %v3898_v25 }
 0x26a   :  { %v3923_v22 = vpop.f32.mrf.mxu2  ;;  %v3899_v26 = vpop.f32.mrf.mxu0 }
 0x26b   :  { %v3936_v55 = vpop.f32.mrf.mxu3  ;;  %v3912_v40 = vpop.f32.mrf.mxu1  ;;  %v3924_v39 = vadd.f32 %v3923_v22, %v3911_v6 }
 0x26d   :  { %v3937_v38 = vadd.f32 %v3936_v55, %v3924_v39 }
 0x272   :  { %v3925_v4 = vpop.f32.mrf.mxu2 }
 0x273   :  { %v3938_v37 = vpop.f32.mrf.mxu3 }
 0x282   :  { %v3949_v21 = vpop.f32.mrf.mxu0 }
 0x283   :  { %v3962_v29 = vpop.f32.mrf.mxu1  ;;  %v3950_v30 = vadd.f32 %v3949_v21, %v3937_v38 }
 0x285   :  { %v3963_v43 = vadd.f32 %v3962_v29, %v3950_v30 }
 0x28a   :  { %v3975_v33 = vpop.f32.mrf.mxu2  ;;  %v3951_v16 = vpop.f32.mrf.mxu0 }
 0x28b   :  { %v3976_v11 = vadd.f32 %v3975_v33, %v3963_v43  ;;  %v3988_v45 = vpop.f32.mrf.mxu3  ;;  %v3964_v41 = vpop.f32.mrf.mxu1 }
 0x28d   :  { %v3989_v42 = vadd.f32 %v3988_v45, %v3976_v11 }
 0x28f   :  { %v3995_v47 = vmax.f32 %v3989_v42, 0.0 }
 0x291   :  { %v3997_v48 = vpack.c.bf16 %v3995_v47, %v3994_v44 }
 0x292   :  { %v3977_v49 = vpop.f32.mrf.mxu2 }
 0x293   :  { %3999 = vst [vmem:[%s9845_s3 + $0x8] sm:$0xff] %v3997_v48  ;;  %v3990_v54 = vpop.f32.mrf.mxu3 }

</bundles_post_ra>
